<compile_context>
chip_gen: v5e
topology: v5e:2x2
jax: 0.10.0
libtpu: 0.0.40
codegen_flags: <defaults>
</compile_context>

<pallas_src>
import functools

import numpy as np
import jax
import jax.numpy as jnp
from jax import lax
from jax.experimental import pallas as pl
from jax.experimental.pallas import tpu as pltpu

# Memory-space enum (small compat shim for older pltpu namespaces).
_VMEM = getattr(pltpu, "MemorySpace", getattr(pltpu, "TPUMemorySpace", pltpu)).VMEM


# ----------------------------------------------------------------------------
# The single fused kernel: conv1 -> ReLU -> conv2 -> ReLU -> conv3 -> ReLU
# ----------------------------------------------------------------------------
def _cnn_head_kernel(pat_ref, g_ref, w1_ref, b1_ref, w2_ref, b2_ref,
                     w3_ref, b3_ref, out_ref, *,
                     n_k2, m2_pad, w2_grid, batch, out_pos, k3):
    # conv1 + ReLU on the raster im2col patches: (B*H1*W1, 256) @ (256, 32).
    a1r = jnp.dot(pat_ref[...], w1_ref[...], preferred_element_type=jnp.float32)
    a1r = jnp.maximum(a1r + b1_ref[...], 0.0)

    # conv2 im2col, fully in VMEM:
    #  * one 0/1 matmul duplicates / zero-pads conv1 rows into
    #    (kernel-pixel p, conv2-output-position m2) order (handles the
    #    spatial padding of conv2 as all-zero rows),
    #  * a lane-dim concat of the 64 aligned row blocks forms the
    #    (m2_pad, 64*32) patch matrix,
    #  * one matmul + bias + ReLU gives the conv2 output
    #    (rows ordered (ho2, wo2, b)).
    a1 = jnp.dot(g_ref[...], a1r, preferred_element_type=jnp.float32)
    p2 = jnp.concatenate(
        [a1[p * m2_pad:(p + 1) * m2_pad, :] for p in range(n_k2)], axis=1)
    o2 = jnp.dot(p2, w2_ref[...], preferred_element_type=jnp.float32)
    o2 = jnp.maximum(o2 + b2_ref[...], 0.0)

    # conv3 im2col: each output position is a full 3x3 window of conv2 rows,
    # gathered with static row slices and concatenated along lanes in
    # (dh, dw, c) order to match the packed conv3 weight.
    blocks = []
    for (h3, w3) in out_pos:
        pieces = []
        for dh in range(k3):
            for dw in range(k3):
                r0 = ((2 * h3 + dh) * w2_grid + (2 * w3 + dw)) * batch
                pieces.append(o2[r0:r0 + batch, :])
        blocks.append(jnp.concatenate(pieces, axis=1))
    p3 = blocks[0] if len(blocks) == 1 else jnp.concatenate(blocks, axis=0)

    o3 = jnp.dot(p3, w3_ref[...], preferred_element_type=jnp.float32)
    out_ref[...] = jnp.maximum(o3 + b3_ref[...], 0.0)   # lane-dense (rows, 128)


# ----------------------------------------------------------------------------
# XLA-side helpers (cheap, shape-static)
# ----------------------------------------------------------------------------
def _conv1_patches(xb, H1, W1):
    """im2col for conv1 via space-to-depth (no per-pixel Python loop).

    xb: (B, H, W) single channel.  Returns (B*H1*W1, 256) with rows in
    (b, h1, w1) raster order and columns in (kh, kw) order (C=1).
    """
    B = xb.shape[0]
    xp = jnp.pad(xb, ((0, 0), (4, 4), (4, 4)))
    # std[b, gh, gw, r, c] = xp[b, 8*gh + r, 8*gw + c]
    std = xp.reshape(B, H1 + 1, 8, W1 + 1, 8).transpose(0, 1, 3, 2, 4)
    t = jnp.concatenate([std[:, :H1], std[:, 1:H1 + 1]], axis=3)      # (B,H1,W1+1,16,8)
    pat = jnp.concatenate([t[:, :, :W1], t[:, :, 1:W1 + 1]], axis=4)  # (B,H1,W1,16,16)
    return pat.reshape(B * H1 * W1, 16 * 16)


def _dup_matrix(B, H1, W1, H2, W2, m2_pad):
    """0/1 matrix mapping conv1 output rows (raster) to conv2 im2col rows.

    Row (p, m2), p = di*8 + dj (conv2 kernel pixel), m2 = (ho2*W2 + wo2)*B + b,
    selects conv1 output pixel (4*ho2 - 2 + di, 4*wo2 - 2 + dj) of batch b;
    out-of-range pixels (conv2 zero padding) and alignment slots stay all-zero.
    """
    g = np.zeros((64 * m2_pad, B * H1 * W1), dtype=np.float32)
    for di in range(8):
        for dj in range(8):
            p = di * 8 + dj
            for ho2 in range(H2):
                h1 = 4 * ho2 - 2 + di
                if not 0 <= h1 < H1:
                    continue
                for wo2 in range(W2):
                    w1 = 4 * wo2 - 2 + dj
                    if not 0 <= w1 < W1:
                        continue
                    for b in range(B):
                        m2 = (ho2 * W2 + wo2) * B + b
                        g[p * m2_pad + m2, (b * H1 + h1) * W1 + w1] = 1.0
    return g


# ----------------------------------------------------------------------------
# Parameters
# ----------------------------------------------------------------------------
def init_params(key):
    """Deterministic torch-style (fan-in uniform) parameters, torch layouts."""
    keys = jax.random.split(key, 6)

    def u(k, shape, fan_in):
        bound = 1.0 / (fan_in ** 0.5)
        return jax.random.uniform(k, shape, jnp.float32, -bound, bound)

    return {
        "c1_w": u(keys[0], (32, 1, 16, 16), 1 * 16 * 16),
        "c1_b": u(keys[1], (32,), 1 * 16 * 16),
        "c2_w": u(keys[2], (64, 32, 8, 8), 32 * 8 * 8),
        "c2_b": u(keys[3], (64,), 32 * 8 * 8),
        "c3_w": u(keys[4], (128, 64, 3, 3), 64 * 3 * 3),
        "c3_b": u(keys[5], (128,), 64 * 3 * 3),
    }


def prepare_params(p):
    """Re-pack torch-layout weights once into matmul-ready kernel layouts."""
    w1 = jnp.transpose(p["c1_w"], (2, 3, 1, 0)).reshape(16 * 16 * 1, 32)
    w2 = jnp.transpose(p["c2_w"], (2, 3, 1, 0)).reshape(8 * 8 * 32, 64)
    w3 = jnp.transpose(p["c3_w"], (2, 3, 1, 0)).reshape(3 * 3 * 64, 128)
    return {
        "w1": w1, "b1": p["c1_b"].reshape(1, 32),
        "w2": w2, "b2": p["c2_b"].reshape(1, 64),
        "w3": w3, "b3": p["c3_b"].reshape(1, 128),
    }


# ----------------------------------------------------------------------------
# CnnHead forward (single fused pallas_call)
# ----------------------------------------------------------------------------
@jax.jit
def cnn_head_forward(x, kp):
    """x: (..., H, W, 1) -> (..., 128*H3*W3), matching CnnHead.forward."""
    shape = x.shape
    H, W, C = shape[-3:]
    assert C == 1, "CnnHead's first conv expects a single input channel"
    assert H % 8 == 0 and W % 8 == 0, "spatial size must be a multiple of 8"
    B = int(np.prod(shape[:-3], dtype=np.int64)) if len(shape) > 3 else 1

    # Conv arithmetic (identical to the torch module).
    H1, W1 = (H - 8) // 8 + 1, (W - 8) // 8 + 1          # conv1: k16 s8 p4
    H2, W2 = (H1 - 4) // 4 + 1, (W1 - 4) // 4 + 1        # conv2: k8  s4 p2
    H3, W3 = (H2 - 3) // 2 + 1, (W2 - 3) // 2 + 1        # conv3: k3  s2 p0
    assert H1 >= 4 and W1 >= 4 and H2 >= 3 and W2 >= 3, "input too small"

    xb = x.reshape(B, H, W, C)[..., 0]
    pat = _conv1_patches(xb, H1, W1)                     # (B*H1*W1, 256)

    m2 = H2 * W2 * B
    m2_pad = ((m2 + 7) // 8) * 8                         # 8-aligned row blocks
    g = jnp.asarray(_dup_matrix(B, H1, W1, H2, W2, m2_pad))
    out_pos = tuple((h3, w3) for h3 in range(H3) for w3 in range(W3))
    n_out_rows = H3 * W3 * B

    kernel = functools.partial(
        _cnn_head_kernel, n_k2=64, m2_pad=m2_pad, w2_grid=W2, batch=B,
        out_pos=out_pos, k3=3)

    o3 = pl.pallas_call(
        kernel,
        out_shape=jax.ShapeDtypeStruct((n_out_rows, 128), jnp.float32),
        in_specs=[pl.BlockSpec(memory_space=_VMEM)] * 8,
        out_specs=pl.BlockSpec(memory_space=_VMEM),
    )(pat, g, kp["w1"], kp["b1"], kp["w2"], kp["b2"], kp["w3"], kp["b3"])

    # nn.Flatten acts on NCHW, so the flatten order is (C, H3, W3).  o3 rows
    # are ordered (h3, w3, b); this permutation touches <= a few KiB.
    S = H3 * W3
    y = o3.reshape(S, B, 128).transpose(1, 2, 0).reshape(B, 128 * S)
    return y.reshape(*shape[:-3], 128 * S)


# ----------------------------------------------------------------------------
# Pure-JAX reference (mirrors the torch module exactly)
# ----------------------------------------------------------------------------
def cnn_head_reference(x, p):
    shape = x.shape
    v = x.reshape(-1, *shape[-3:])
    v = jnp.transpose(v, (0, 3, 1, 2))                   # NHWC -> NCHW

    def conv(v, w, b, stride, pad):
        out = lax.conv_general_dilated(
            v, w, (stride, stride), ((pad, pad), (pad, pad)),
            dimension_numbers=("NCHW", "OIHW", "NCHW"),
            precision=lax.Precision.HIGHEST)
        return jax.nn.relu(out + b.reshape(1, -1, 1, 1))

    v = conv(v, p["c1_w"], p["c1_b"], 8, 4)
    v = conv(v, p["c2_w"], p["c2_b"], 4, 2)
    v = conv(v, p["c3_w"], p["c3_b"], 2, 0)
    v = v.reshape(v.shape[0], -1)                        # NCHW flatten
    return v.reshape(*shape[:-3], -1)


if __name__ == "__main__":
    key = jax.random.PRNGKey(0)
    pkey, xkey = jax.random.split(key)
    params = init_params(pkey)
    kparams = prepare_params(params)     # one-time weight repack (not per call)

    # Smallest non-degenerate spatial size for this conv stack:
    # 96x96x1 -> conv1 12x12x32 -> conv2 3x3x64 -> conv3 1x1x128 -> 128 feats.
    x = jax.random.normal(xkey, (2, 96, 96, 1), jnp.float32)

    out = jax.block_until_ready(cnn_head_forward(x, kparams))
    assert out.shape == (2, 128), out.shape
    assert bool(jnp.all(jnp.isfinite(out)))

    ref = jax.block_until_ready(cnn_head_reference(x, params))
    assert bool(jnp.allclose(out, ref, atol=2e-3, rtol=2e-2)), (
        "max abs diff = %g" % float(jnp.max(jnp.abs(out - ref))))

    print("KERNEL_OK")
</pallas_src>

<mosaic_0001>
module attributes {stable_mosaic.version = 11 : i64} {
  func.func @_cnn_head_kernel(%arg0: memref<288x256xf32, #tpu.memory_space<vmem>>, %arg1: memref<1536x288xf32, #tpu.memory_space<vmem>>, %arg2: memref<256x32xf32, #tpu.memory_space<vmem>>, %arg3: memref<1x32xf32, #tpu.memory_space<vmem>>, %arg4: memref<2048x64xf32, #tpu.memory_space<vmem>>, %arg5: memref<1x64xf32, #tpu.memory_space<vmem>>, %arg6: memref<576x128xf32, #tpu.memory_space<vmem>>, %arg7: memref<1x128xf32, #tpu.memory_space<vmem>>, %arg8: memref<2x128xf32, #tpu.memory_space<vmem>>) attributes {dimension_semantics = [], scalar_prefetch = 0 : i64, scratch_operands = 0 : i64, tpu.core_type = #tpu.core_type<tc>} {
    %c0 = arith.constant 0 : index
    %c0_0 = arith.constant 0 : index
    %0 = vector.load %arg0[%c0, %c0_0] : memref<288x256xf32, #tpu.memory_space<vmem>>, vector<288x256xf32>
    %c0_1 = arith.constant 0 : index
    %c0_2 = arith.constant 0 : index
    %1 = vector.load %arg2[%c0_1, %c0_2] : memref<256x32xf32, #tpu.memory_space<vmem>>, vector<256x32xf32>
    %cst = arith.constant dense<0.000000e+00> : vector<288x32xf32>
    %2 = tpu.matmul %0, %1, %cst {dimension_numbers = #tpu.dot_dimension_numbers<[1], [0], [0], [1], [0, 0, 1, 1], [], []>} : vector<288x256xf32>, vector<256x32xf32>, vector<288x32xf32> -> vector<288x32xf32>
    %c0_3 = arith.constant 0 : index
    %c0_4 = arith.constant 0 : index
    %3 = vector.load %arg3[%c0_3, %c0_4] : memref<1x32xf32, #tpu.memory_space<vmem>>, vector<1x32xf32>
    %4 = vector.broadcast %3 : vector<1x32xf32> to vector<288x32xf32>
    %5 = arith.addf %2, %4 : vector<288x32xf32>
    %cst_5 = arith.constant 0.000000e+00 : f32
    %6 = vector.broadcast %cst_5 : f32 to vector<288x32xf32>
    %7 = arith.maximumf %5, %6 : vector<288x32xf32>
    %c0_6 = arith.constant 0 : index
    %c0_7 = arith.constant 0 : index
    %8 = vector.load %arg1[%c0_6, %c0_7] : memref<1536x288xf32, #tpu.memory_space<vmem>>, vector<1536x288xf32>
    %cst_8 = arith.constant dense<0.000000e+00> : vector<1536x32xf32>
    %9 = tpu.matmul %8, %7, %cst_8 {dimension_numbers = #tpu.dot_dimension_numbers<[1], [0], [0], [1], [0, 0, 1, 1], [], []>} : vector<1536x288xf32>, vector<288x32xf32>, vector<1536x32xf32> -> vector<1536x32xf32>
    %10 = vector.extract_strided_slice %9 {offsets = [0, 0], sizes = [24, 32], strides = [1, 1]} : vector<1536x32xf32> to vector<24x32xf32>
    %11 = vector.extract_strided_slice %9 {offsets = [24, 0], sizes = [24, 32], strides = [1, 1]} : vector<1536x32xf32> to vector<24x32xf32>
    %12 = vector.extract_strided_slice %9 {offsets = [48, 0], sizes = [24, 32], strides = [1, 1]} : vector<1536x32xf32> to vector<24x32xf32>
    %13 = vector.extract_strided_slice %9 {offsets = [72, 0], sizes = [24, 32], strides = [1, 1]} : vector<1536x32xf32> to vector<24x32xf32>
    %14 = vector.extract_strided_slice %9 {offsets = [96, 0], sizes = [24, 32], strides = [1, 1]} : vector<1536x32xf32> to vector<24x32xf32>
    %15 = vector.extract_strided_slice %9 {offsets = [120, 0], sizes = [24, 32], strides = [1, 1]} : vector<1536x32xf32> to vector<24x32xf32>
    %16 = vector.extract_strided_slice %9 {offsets = [144, 0], sizes = [24, 32], strides = [1, 1]} : vector<1536x32xf32> to vector<24x32xf32>
    %17 = vector.extract_strided_slice %9 {offsets = [168, 0], sizes = [24, 32], strides = [1, 1]} : vector<1536x32xf32> to vector<24x32xf32>
    %18 = vector.extract_strided_slice %9 {offsets = [192, 0], sizes = [24, 32], strides = [1, 1]} : vector<1536x32xf32> to vector<24x32xf32>
    %19 = vector.extract_strided_slice %9 {offsets = [216, 0], sizes = [24, 32], strides = [1, 1]} : vector<1536x32xf32> to vector<24x32xf32>
    %20 = vector.extract_strided_slice %9 {offsets = [240, 0], sizes = [24, 32], strides = [1, 1]} : vector<1536x32xf32> to vector<24x32xf32>
    %21 = vector.extract_strided_slice %9 {offsets = [264, 0], sizes = [24, 32], strides = [1, 1]} : vector<1536x32xf32> to vector<24x32xf32>
    %22 = vector.extract_strided_slice %9 {offsets = [288, 0], sizes = [24, 32], strides = [1, 1]} : vector<1536x32xf32> to vector<24x32xf32>
    %23 = vector.extract_strided_slice %9 {offsets = [312, 0], sizes = [24, 32], strides = [1, 1]} : vector<1536x32xf32> to vector<24x32xf32>
    %24 = vector.extract_strided_slice %9 {offsets = [336, 0], sizes = [24, 32], strides = [1, 1]} : vector<1536x32xf32> to vector<24x32xf32>
    %25 = vector.extract_strided_slice %9 {offsets = [360, 0], sizes = [24, 32], strides = [1, 1]} : vector<1536x32xf32> to vector<24x32xf32>
    %26 = vector.extract_strided_slice %9 {offsets = [384, 0], sizes = [24, 32], strides = [1, 1]} : vector<1536x32xf32> to vector<24x32xf32>
    %27 = vector.extract_strided_slice %9 {offsets = [408, 0], sizes = [24, 32], strides = [1, 1]} : vector<1536x32xf32> to vector<24x32xf32>
    %28 = vector.extract_strided_slice %9 {offsets = [432, 0], sizes = [24, 32], strides = [1, 1]} : vector<1536x32xf32> to vector<24x32xf32>
    %29 = vector.extract_strided_slice %9 {offsets = [456, 0], sizes = [24, 32], strides = [1, 1]} : vector<1536x32xf32> to vector<24x32xf32>
    %30 = vector.extract_strided_slice %9 {offsets = [480, 0], sizes = [24, 32], strides = [1, 1]} : vector<1536x32xf32> to vector<24x32xf32>
    %31 = vector.extract_strided_slice %9 {offsets = [504, 0], sizes = [24, 32], strides = [1, 1]} : vector<1536x32xf32> to vector<24x32xf32>
    %32 = vector.extract_strided_slice %9 {offsets = [528, 0], sizes = [24, 32], strides = [1, 1]} : vector<1536x32xf32> to vector<24x32xf32>
    %33 = vector.extract_strided_slice %9 {offsets = [552, 0], sizes = [24, 32], strides = [1, 1]} : vector<1536x32xf32> to vector<24x32xf32>
    %34 = vector.extract_strided_slice %9 {offsets = [576, 0], sizes = [24, 32], strides = [1, 1]} : vector<1536x32xf32> to vector<24x32xf32>
    %35 = vector.extract_strided_slice %9 {offsets = [600, 0], sizes = [24, 32], strides = [1, 1]} : vector<1536x32xf32> to vector<24x32xf32>
    %36 = vector.extract_strided_slice %9 {offsets = [624, 0], sizes = [24, 32], strides = [1, 1]} : vector<1536x32xf32> to vector<24x32xf32>
    %37 = vector.extract_strided_slice %9 {offsets = [648, 0], sizes = [24, 32], strides = [1, 1]} : vector<1536x32xf32> to vector<24x32xf32>
    %38 = vector.extract_strided_slice %9 {offsets = [672, 0], sizes = [24, 32], strides = [1, 1]} : vector<1536x32xf32> to vector<24x32xf32>
    %39 = vector.extract_strided_slice %9 {offsets = [696, 0], sizes = [24, 32], strides = [1, 1]} : vector<1536x32xf32> to vector<24x32xf32>
    %40 = vector.extract_strided_slice %9 {offsets = [720, 0], sizes = [24, 32], strides = [1, 1]} : vector<1536x32xf32> to vector<24x32xf32>
    %41 = vector.extract_strided_slice %9 {offsets = [744, 0], sizes = [24, 32], strides = [1, 1]} : vector<1536x32xf32> to vector<24x32xf32>
    %42 = vector.extract_strided_slice %9 {offsets = [768, 0], sizes = [24, 32], strides = [1, 1]} : vector<1536x32xf32> to vector<24x32xf32>
    %43 = vector.extract_strided_slice %9 {offsets = [792, 0], sizes = [24, 32], strides = [1, 1]} : vector<1536x32xf32> to vector<24x32xf32>
    %44 = vector.extract_strided_slice %9 {offsets = [816, 0], sizes = [24, 32], strides = [1, 1]} : vector<1536x32xf32> to vector<24x32xf32>
    %45 = vector.extract_strided_slice %9 {offsets = [840, 0], sizes = [24, 32], strides = [1, 1]} : vector<1536x32xf32> to vector<24x32xf32>
    %46 = vector.extract_strided_slice %9 {offsets = [864, 0], sizes = [24, 32], strides = [1, 1]} : vector<1536x32xf32> to vector<24x32xf32>
    %47 = vector.extract_strided_slice %9 {offsets = [888, 0], sizes = [24, 32], strides = [1, 1]} : vector<1536x32xf32> to vector<24x32xf32>
    %48 = vector.extract_strided_slice %9 {offsets = [912, 0], sizes = [24, 32], strides = [1, 1]} : vector<1536x32xf32> to vector<24x32xf32>
    %49 = vector.extract_strided_slice %9 {offsets = [936, 0], sizes = [24, 32], strides = [1, 1]} : vector<1536x32xf32> to vector<24x32xf32>
    %50 = vector.extract_strided_slice %9 {offsets = [960, 0], sizes = [24, 32], strides = [1, 1]} : vector<1536x32xf32> to vector<24x32xf32>
    %51 = vector.extract_strided_slice %9 {offsets = [984, 0], sizes = [24, 32], strides = [1, 1]} : vector<1536x32xf32> to vector<24x32xf32>
    %52 = vector.extract_strided_slice %9 {offsets = [1008, 0], sizes = [24, 32], strides = [1, 1]} : vector<1536x32xf32> to vector<24x32xf32>
    %53 = vector.extract_strided_slice %9 {offsets = [1032, 0], sizes = [24, 32], strides = [1, 1]} : vector<1536x32xf32> to vector<24x32xf32>
    %54 = vector.extract_strided_slice %9 {offsets = [1056, 0], sizes = [24, 32], strides = [1, 1]} : vector<1536x32xf32> to vector<24x32xf32>
    %55 = vector.extract_strided_slice %9 {offsets = [1080, 0], sizes = [24, 32], strides = [1, 1]} : vector<1536x32xf32> to vector<24x32xf32>
    %56 = vector.extract_strided_slice %9 {offsets = [1104, 0], sizes = [24, 32], strides = [1, 1]} : vector<1536x32xf32> to vector<24x32xf32>
    %57 = vector.extract_strided_slice %9 {offsets = [1128, 0], sizes = [24, 32], strides = [1, 1]} : vector<1536x32xf32> to vector<24x32xf32>
    %58 = vector.extract_strided_slice %9 {offsets = [1152, 0], sizes = [24, 32], strides = [1, 1]} : vector<1536x32xf32> to vector<24x32xf32>
    %59 = vector.extract_strided_slice %9 {offsets = [1176, 0], sizes = [24, 32], strides = [1, 1]} : vector<1536x32xf32> to vector<24x32xf32>
    %60 = vector.extract_strided_slice %9 {offsets = [1200, 0], sizes = [24, 32], strides = [1, 1]} : vector<1536x32xf32> to vector<24x32xf32>
    %61 = vector.extract_strided_slice %9 {offsets = [1224, 0], sizes = [24, 32], strides = [1, 1]} : vector<1536x32xf32> to vector<24x32xf32>
    %62 = vector.extract_strided_slice %9 {offsets = [1248, 0], sizes = [24, 32], strides = [1, 1]} : vector<1536x32xf32> to vector<24x32xf32>
    %63 = vector.extract_strided_slice %9 {offsets = [1272, 0], sizes = [24, 32], strides = [1, 1]} : vector<1536x32xf32> to vector<24x32xf32>
    %64 = vector.extract_strided_slice %9 {offsets = [1296, 0], sizes = [24, 32], strides = [1, 1]} : vector<1536x32xf32> to vector<24x32xf32>
    %65 = vector.extract_strided_slice %9 {offsets = [1320, 0], sizes = [24, 32], strides = [1, 1]} : vector<1536x32xf32> to vector<24x32xf32>
    %66 = vector.extract_strided_slice %9 {offsets = [1344, 0], sizes = [24, 32], strides = [1, 1]} : vector<1536x32xf32> to vector<24x32xf32>
    %67 = vector.extract_strided_slice %9 {offsets = [1368, 0], sizes = [24, 32], strides = [1, 1]} : vector<1536x32xf32> to vector<24x32xf32>
    %68 = vector.extract_strided_slice %9 {offsets = [1392, 0], sizes = [24, 32], strides = [1, 1]} : vector<1536x32xf32> to vector<24x32xf32>
    %69 = vector.extract_strided_slice %9 {offsets = [1416, 0], sizes = [24, 32], strides = [1, 1]} : vector<1536x32xf32> to vector<24x32xf32>
    %70 = vector.extract_strided_slice %9 {offsets = [1440, 0], sizes = [24, 32], strides = [1, 1]} : vector<1536x32xf32> to vector<24x32xf32>
    %71 = vector.extract_strided_slice %9 {offsets = [1464, 0], sizes = [24, 32], strides = [1, 1]} : vector<1536x32xf32> to vector<24x32xf32>
    %72 = vector.extract_strided_slice %9 {offsets = [1488, 0], sizes = [24, 32], strides = [1, 1]} : vector<1536x32xf32> to vector<24x32xf32>
    %73 = vector.extract_strided_slice %9 {offsets = [1512, 0], sizes = [24, 32], strides = [1, 1]} : vector<1536x32xf32> to vector<24x32xf32>
    %74 = tpu.concatenate %10, %11, %12, %13, %14, %15, %16, %17, %18, %19, %20, %21, %22, %23, %24, %25 in 1 : vector<24x32xf32>, vector<24x32xf32>, vector<24x32xf32>, vector<24x32xf32>, vector<24x32xf32>, vector<24x32xf32>, vector<24x32xf32>, vector<24x32xf32>, vector<24x32xf32>, vector<24x32xf32>, vector<24x32xf32>, vector<24x32xf32>, vector<24x32xf32>, vector<24x32xf32>, vector<24x32xf32>, vector<24x32xf32> -> vector<24x512xf32>
    %75 = tpu.concatenate %26, %27, %28, %29, %30, %31, %32, %33, %34, %35, %36, %37, %38, %39, %40, %41 in 1 : vector<24x32xf32>, vector<24x32xf32>, vector<24x32xf32>, vector<24x32xf32>, vector<24x32xf32>, vector<24x32xf32>, vector<24x32xf32>, vector<24x32xf32>, vector<24x32xf32>, vector<24x32xf32>, vector<24x32xf32>, vector<24x32xf32>, vector<24x32xf32>, vector<24x32xf32>, vector<24x32xf32>, vector<24x32xf32> -> vector<24x512xf32>
    %76 = tpu.concatenate %42, %43, %44, %45, %46, %47, %48, %49, %50, %51, %52, %53, %54, %55, %56, %57 in 1 : vector<24x32xf32>, vector<24x32xf32>, vector<24x32xf32>, vector<24x32xf32>, vector<24x32xf32>, vector<24x32xf32>, vector<24x32xf32>, vector<24x32xf32>, vector<24x32xf32>, vector<24x32xf32>, vector<24x32xf32>, vector<24x32xf32>, vector<24x32xf32>, vector<24x32xf32>, vector<24x32xf32>, vector<24x32xf32> -> vector<24x512xf32>
    %77 = tpu.concatenate %58, %59, %60, %61, %62, %63, %64, %65, %66, %67, %68, %69, %70, %71, %72, %73 in 1 : vector<24x32xf32>, vector<24x32xf32>, vector<24x32xf32>, vector<24x32xf32>, vector<24x32xf32>, vector<24x32xf32>, vector<24x32xf32>, vector<24x32xf32>, vector<24x32xf32>, vector<24x32xf32>, vector<24x32xf32>, vector<24x32xf32>, vector<24x32xf32>, vector<24x32xf32>, vector<24x32xf32>, vector<24x32xf32> -> vector<24x512xf32>
    %78 = tpu.concatenate %74, %75, %76, %77 in 1 : vector<24x512xf32>, vector<24x512xf32>, vector<24x512xf32>, vector<24x512xf32> -> vector<24x2048xf32>
    %c0_9 = arith.constant 0 : index
    %c0_10 = arith.constant 0 : index
    %79 = vector.load %arg4[%c0_9, %c0_10] : memref<2048x64xf32, #tpu.memory_space<vmem>>, vector<2048x64xf32>
    %cst_11 = arith.constant dense<0.000000e+00> : vector<24x64xf32>
    %80 = tpu.matmul %78, %79, %cst_11 {dimension_numbers = #tpu.dot_dimension_numbers<[1], [0], [0], [1], [0, 0, 1, 1], [], []>} : vector<24x2048xf32>, vector<2048x64xf32>, vector<24x64xf32> -> vector<24x64xf32>
    %c0_12 = arith.constant 0 : index
    %c0_13 = arith.constant 0 : index
    %81 = vector.load %arg5[%c0_12, %c0_13] : memref<1x64xf32, #tpu.memory_space<vmem>>, vector<1x64xf32>
    %82 = vector.broadcast %81 : vector<1x64xf32> to vector<24x64xf32>
    %83 = arith.addf %80, %82 : vector<24x64xf32>
    %cst_14 = arith.constant 0.000000e+00 : f32
    %84 = vector.broadcast %cst_14 : f32 to vector<24x64xf32>
    %85 = arith.maximumf %83, %84 : vector<24x64xf32>
    %86 = vector.extract_strided_slice %85 {offsets = [0, 0], sizes = [2, 64], strides = [1, 1]} : vector<24x64xf32> to vector<2x64xf32>
    %87 = vector.extract_strided_slice %85 {offsets = [2, 0], sizes = [2, 64], strides = [1, 1]} : vector<24x64xf32> to vector<2x64xf32>
    %88 = vector.extract_strided_slice %85 {offsets = [4, 0], sizes = [2, 64], strides = [1, 1]} : vector<24x64xf32> to vector<2x64xf32>
    %89 = vector.extract_strided_slice %85 {offsets = [6, 0], sizes = [2, 64], strides = [1, 1]} : vector<24x64xf32> to vector<2x64xf32>
    %90 = vector.extract_strided_slice %85 {offsets = [8, 0], sizes = [2, 64], strides = [1, 1]} : vector<24x64xf32> to vector<2x64xf32>
    %91 = vector.extract_strided_slice %85 {offsets = [10, 0], sizes = [2, 64], strides = [1, 1]} : vector<24x64xf32> to vector<2x64xf32>
    %92 = vector.extract_strided_slice %85 {offsets = [12, 0], sizes = [2, 64], strides = [1, 1]} : vector<24x64xf32> to vector<2x64xf32>
    %93 = vector.extract_strided_slice %85 {offsets = [14, 0], sizes = [2, 64], strides = [1, 1]} : vector<24x64xf32> to vector<2x64xf32>
    %94 = vector.extract_strided_slice %85 {offsets = [16, 0], sizes = [2, 64], strides = [1, 1]} : vector<24x64xf32> to vector<2x64xf32>
    %95 = tpu.concatenate %86, %87, %88, %89, %90, %91, %92, %93, %94 in 1 : vector<2x64xf32>, vector<2x64xf32>, vector<2x64xf32>, vector<2x64xf32>, vector<2x64xf32>, vector<2x64xf32>, vector<2x64xf32>, vector<2x64xf32>, vector<2x64xf32> -> vector<2x576xf32>
    %c0_15 = arith.constant 0 : index
    %c0_16 = arith.constant 0 : index
    %96 = vector.load %arg6[%c0_15, %c0_16] : memref<576x128xf32, #tpu.memory_space<vmem>>, vector<576x128xf32>
    %cst_17 = arith.constant dense<0.000000e+00> : vector<2x128xf32>
    %97 = tpu.matmul %95, %96, %cst_17 {dimension_numbers = #tpu.dot_dimension_numbers<[1], [0], [0], [1], [0, 0, 1, 1], [], []>} : vector<2x576xf32>, vector<576x128xf32>, vector<2x128xf32> -> vector<2x128xf32>
    %c0_18 = arith.constant 0 : index
    %c0_19 = arith.constant 0 : index
    %98 = vector.load %arg7[%c0_18, %c0_19] : memref<1x128xf32, #tpu.memory_space<vmem>>, vector<1x128xf32>
    %99 = vector.broadcast %98 : vector<1x128xf32> to vector<2x128xf32>
    %100 = arith.addf %97, %99 : vector<2x128xf32>
    %cst_20 = arith.constant 0.000000e+00 : f32
    %101 = vector.broadcast %cst_20 : f32 to vector<2x128xf32>
    %102 = arith.maximumf %100, %101 : vector<2x128xf32>
    %c0_21 = arith.constant 0 : index
    %c0_22 = arith.constant 0 : index
    %103 = vector.load %arg8[%c0_21, %c0_22] : memref<2x128xf32, #tpu.memory_space<vmem>>, vector<2x128xf32>
    tpu.vector_store %arg8[%c0_21, %c0_22], %102 {strides = array<i32>} : memref<2x128xf32, #tpu.memory_space<vmem>>, vector<2x128xf32>,
    return
  }
}

</mosaic_0001>

<bundles_post_ra>
// kernel: cnn_head_forward.1
= control target key start
LH: loop header
LB: loop body
LE: loop exit
PB: predicated region body
PF: predicated region fallthrough
CT: control target
= control target key end

     0   :  { %s10346_s0 = inlined_call_operand.vmem [shape: f32[288,256], index: 0, kind: input, shape index: {}]   ;;  %s10347_s1 = inlined_call_operand.vmem [shape: f32[1536,288], index: 1, kind: input, shape index: {}]   ;;  %s10348_s2 = inlined_call_operand.vmem [shape: f32[256,32], index: 2, kind: input, shape index: {}]   ;;  %s10349_s3 = inlined_call_operand.vmem [shape: f32[1,32], index: 3, kind: input, shape index: {}]   ;;  %s10350_s4 = inlined_call_operand.vmem [shape: f32[2048,64], index: 4, kind: input, shape index: {}]   ;;  %s10351_s5 = inlined_call_operand.vmem [shape: f32[1,64], index: 5, kind: input, shape index: {}]   ;;  %s10352_s6 = inlined_call_operand.vmem [shape: f32[576,128], index: 6, kind: input, shape index: {}]   ;;  %s10353_s7 = inlined_call_operand.vmem [shape: f32[1,128], index: 7, kind: input, shape index: {}]   ;;  %s10354_s8 = inlined_call_operand.hbm [shape: f32[2,128], index: 8, kind: output, shape index: {}]  }
   0x1   :  { %v117_v0 = vld [vmem:[%s10348_s2 + $0x78] sm:$0xff]  ;;  %v116_v1 = vld [vmem:[%s10348_s2 + $0x70] sm:$0xff]  ;;  %v115_v4 = vld [vmem:[%s10348_s2 + $0x68] sm:$0xff] }
   0x2   :  { %v133_v2 = vld [vmem:[%s10348_s2 + $0xf8] sm:$0xff]  ;;  %138 = vmatpush.msra.mxu0 %v117_v0  ;;  %v132_v3 = vld [vmem:[%s10348_s2 + $0xf0] sm:$0xff]  ;;  %v131_v5 = vld [vmem:[%s10348_s2 + $0xe8] sm:$0xff] }
   0x3   :  { %263 = vmatpush.msra.mxu1 %v133_v2  ;;  %v114_v6 = vld [vmem:[%s10348_s2 + $0x60] sm:$0xff]  ;;  %v113_v8 = vld [vmem:[%s10348_s2 + $0x58] sm:$0xff]  ;;  %v112_v10 = vld [vmem:[%s10348_s2 + $0x50] sm:$0xff] }
   0x4   :  { %139 = vmatpush.msra.mxu0 %v116_v1  ;;  %v130_v7 = vld [vmem:[%s10348_s2 + $0xe0] sm:$0xff]  ;;  %v129_v9 = vld [vmem:[%s10348_s2 + $0xd8] sm:$0xff]  ;;  %v128_v11 = vld [vmem:[%s10348_s2 + $0xd0] sm:$0xff] }
   0x5   :  { %264 = vmatpush.msra.mxu1 %v132_v3  ;;  %v111_v12 = vld [vmem:[%s10348_s2 + $0x48] sm:$0xff]  ;;  %v110_v14 = vld [vmem:[%s10348_s2 + $0x40] sm:$0xff] }
   0x6   :  { %140 = vmatpush.msra.mxu0 %v115_v4  ;;  %v127_v13 = vld [vmem:[%s10348_s2 + $0xc8] sm:$0xff]  ;;  %v126_v15 = vld [vmem:[%s10348_s2 + $0xc0] sm:$0xff] }
   0x7   :  { %265 = vmatpush.msra.mxu1 %v131_v5 }
   0x8   :  { %141 = vmatpush.msra.mxu0 %v114_v6 }
   0x9   :  { %266 = vmatpush.msra.mxu1 %v130_v7 }
   0xa   :  { %142 = vmatpush.msra.mxu0 %v113_v8 }
   0xb   :  { %267 = vmatpush.msra.mxu1 %v129_v9 }
   0xc   :  { %143 = vmatpush.msra.mxu0 %v112_v10 }
   0xd   :  { %268 = vmatpush.msra.mxu1 %v128_v11 }
   0xe   :  { %144 = vmatpush.msra.mxu0 %v111_v12 }
   0xf   :  { %269 = vmatpush.msra.mxu1 %v127_v13 }
  0x10   :  { %13 = vsyncpa [#allocation3], 0  ;;  %v109_v16 = vld [vmem:[%s10348_s2 + $0x38] sm:$0xff]  ;;  %145 = vmatpush.msra.mxu0 %v110_v14  ;;  %v108_v18 = vld [vmem:[%s10348_s2 + $0x30] sm:$0xff]  ;;  %vm1000_vm0 = vcmask 261120   ;;  %s5557_s16 = smov 32  }
  0x11   :  { %v125_v17 = vld [vmem:[%s10348_s2 + $0xb8] sm:$0xff]  ;;  %270 = vmatpush.msra.mxu1 %v126_v15  ;;  %v124_v19 = vld [vmem:[%s10348_s2 + $0xb0] sm:$0xff]  ;;  %v107_v20 = vld [vmem:[%s10348_s2 + $0x28] sm:$0xff]  ;;  %s5559_s11 = smov 96   ;;  %vm3503_vm1 = vcmask 523264   ;;  %vm3507_vm2 = vcmask 785408  }
  0x12   :  { %146 = vmatpush.msra.mxu0 %v109_v16  ;;  %v123_v21 = vld [vmem:[%s10348_s2 + $0xa8] sm:$0xff]  ;;  %v106_v22 = vld [vmem:[%s10348_s2 + $0x20] sm:$0xff]  ;;  %v105_v24 = vld [vmem:[%s10348_s2 + $0x18] sm:$0xff]  ;;  %s4971_s18 = sshll.u32 %s10354_s8, 4  ;;  %s4972_s18 = int_to_ptr.hbm [resolvable:$true] %s4971_s18 }
  0x13   :  { %271 = vmatpush.msra.mxu1 %v125_v17  ;;  %v122_v23 = vld [vmem:[%s10348_s2 + $0xa0] sm:$0xff]  ;;  %v121_v25 = vld [vmem:[%s10348_s2 + $0x98] sm:$0xff]  ;;  %v104_v26 = vld [vmem:[%s10348_s2 + $0x10] sm:$0xff] }
  0x14   :  { %147 = vmatpush.msra.mxu0 %v108_v18  ;;  %v120_v27 = vld [vmem:[%s10348_s2 + $0x90] sm:$0xff]  ;;  %v103_v28 = vld [vmem:[%s10348_s2 + $0x8] sm:$0xff]  ;;  %v102_v30 = vld [vmem:[%s10348_s2] sm:$0xff] }
  0x15   :  { %272 = vmatpush.msra.mxu1 %v124_v19  ;;  %v119_v29 = vld [vmem:[%s10348_s2 + $0x88] sm:$0xff]  ;;  %v118_v31 = vld [vmem:[%s10348_s2 + $0x80] sm:$0xff]  ;;  %v32_v34 = vld [vmem:[%s10346_s0 + $0x10] sm:$0xff] }
  0x16   :  { %148 = vmatpush.msra.mxu0 %v107_v20  ;;  %v30_v32 = vld [vmem:[%s10346_s0] sm:$0xff]  ;;  %v31_v33 = vld [vmem:[%s10346_s0 + $0x8] sm:$0xff]  ;;  %v33_v35 = vld [vmem:[%s10346_s0 + $0x18] sm:$0xff] }
  0x17   :  { %273 = vmatpush.msra.mxu1 %v123_v21  ;;  %v34_v36 = vld [vmem:[%s10346_s0 + $0x20] sm:$0xff]  ;;  %v35_v37 = vld [vmem:[%s10346_s0 + $0x28] sm:$0xff]  ;;  %v36_v38 = vld [vmem:[%s10346_s0 + $0x30] sm:$0xff] }
  0x18   :  { %149 = vmatpush.msra.mxu0 %v106_v22  ;;  %v37_v39 = vld [vmem:[%s10346_s0 + $0x38] sm:$0xff]  ;;  %v38_v40 = vld [vmem:[%s10346_s0 + $0x40] sm:$0xff]  ;;  %v39_v41 = vld [vmem:[%s10346_s0 + $0x48] sm:$0xff] }
  0x19   :  { %274 = vmatpush.msra.mxu1 %v122_v23  ;;  %v40_v42 = vld [vmem:[%s10346_s0 + $0x50] sm:$0xff]  ;;  %v41_v43 = vld [vmem:[%s10346_s0 + $0x58] sm:$0xff]  ;;  %v42_v44 = vld [vmem:[%s10346_s0 + $0x60] sm:$0xff] }
  0x1a   :  { %150 = vmatpush.msra.mxu0 %v105_v24  ;;  %v43_v45 = vld [vmem:[%s10346_s0 + $0x68] sm:$0xff]  ;;  %v44_v46 = vld [vmem:[%s10346_s0 + $0x70] sm:$0xff]  ;;  %v45_v47 = vld [vmem:[%s10346_s0 + $0x78] sm:$0xff] }
  0x1b   :  { %275 = vmatpush.msra.mxu1 %v121_v25  ;;  %v46_v48 = vld [vmem:[%s10346_s0 + $0x80] sm:$0xff]  ;;  %v47_v49 = vld [vmem:[%s10346_s0 + $0x88] sm:$0xff]  ;;  %v48_v50 = vld [vmem:[%s10346_s0 + $0x90] sm:$0xff] }
  0x1c   :  { %151 = vmatpush.msra.mxu0 %v104_v26  ;;  %v49_v51 = vld [vmem:[%s10346_s0 + $0x98] sm:$0xff]  ;;  %v50_v52 = vld [vmem:[%s10346_s0 + $0xa0] sm:$0xff]  ;;  %v51_v53 = vld [vmem:[%s10346_s0 + $0xa8] sm:$0xff] }
  0x1d   :  { %276 = vmatpush.msra.mxu1 %v120_v27  ;;  %v52_v54 = vld [vmem:[%s10346_s0 + $0xb0] sm:$0xff]  ;;  %v53_v55 = vld [vmem:[%s10346_s0 + $0xb8] sm:$0xff]  ;;  %v54_v56 = vld [vmem:[%s10346_s0 + $0xc0] sm:$0xff] }
  0x1e   :  { %152 = vmatpush.msra.mxu0 %v103_v28  ;;  %v55_v57 = vld [vmem:[%s10346_s0 + $0xc8] sm:$0xff]  ;;  %v56_v58 = vld [vmem:[%s10346_s0 + $0xd0] sm:$0xff]  ;;  %v57_v59 = vld [vmem:[%s10346_s0 + $0xd8] sm:$0xff] }
  0x1f   :  { %277 = vmatpush.msra.mxu1 %v119_v29  ;;  %v58_v60 = vld [vmem:[%s10346_s0 + $0xe0] sm:$0xff]  ;;  %v59_v61 = vld [vmem:[%s10346_s0 + $0xe8] sm:$0xff]  ;;  %v60_v62 = vld [vmem:[%s10346_s0 + $0xf0] sm:$0xff] }
  0x20   :  { %153 = vmatpush.msra.mxu0 %v102_v30  ;;  %v61_v63 = vld [vmem:[%s10346_s0 + $0xf8] sm:$0xff]  ;;  %v62_v2 = vld [vmem:[%s10346_s0 + $0x100] sm:$0xff]  ;;  %v63_v3 = vld [vmem:[%s10346_s0 + $0x108] sm:$0xff] }
  0x21   :  { %278 = vmatpush.msra.mxu1 %v118_v31  ;;  %154 = vmatmul.f32.vlgmr.msra.gmra.mxu0 %v30_v32  ;;  %v64_v6 = vld [vmem:[%s10346_s0 + $0x110] sm:$0xff]  ;;  %v65_v7 = vld [vmem:[%s10346_s0 + $0x118] sm:$0xff]  ;;  %v66_v10 = vld [vmem:[%s10346_s0 + $0x120] sm:$0xff] }
  0x22   :  { %279 = vmatmul.f32.vlgmr.msra.gmra.mxu1 %v31_v33  ;;  %v67_v11 = vld [vmem:[%s10346_s0 + $0x128] sm:$0xff]  ;;  %v68_v14 = vld [vmem:[%s10346_s0 + $0x130] sm:$0xff]  ;;  %v69_v15 = vld [vmem:[%s10346_s0 + $0x138] sm:$0xff] }
  0x23   :  { %v70_v18 = vld [vmem:[%s10346_s0 + $0x140] sm:$0xff]  ;;  %v71_v19 = vld [vmem:[%s10346_s0 + $0x148] sm:$0xff]  ;;  %v72_v22 = vld [vmem:[%s10346_s0 + $0x150] sm:$0xff] }
  0x24   :  { %v73_v23 = vld [vmem:[%s10346_s0 + $0x158] sm:$0xff]  ;;  %v74_v26 = vld [vmem:[%s10346_s0 + $0x160] sm:$0xff]  ;;  %v75_v27 = vld [vmem:[%s10346_s0 + $0x168] sm:$0xff] }
  0x25   :  { %v76_v30 = vld [vmem:[%s10346_s0 + $0x170] sm:$0xff]  ;;  %v77_v31 = vld [vmem:[%s10346_s0 + $0x178] sm:$0xff]  ;;  %v5881_v32 = vld [vmem:[%s10349_s3] ss:$0 sm:$0xff] }
  0x29   :  { %157 = vmatmul.f32.gmra.mxu0 %v32_v34 }
  0x2a   :  { %282 = vmatmul.f32.gmra.mxu1 %v33_v35  ;;  %v78_v35 = vld [vmem:[%s10346_s0 + $0x180] sm:$0xff] }
  0x31   :  { %160 = vmatmul.f32.gmra.mxu0 %v34_v36  ;;  %v79_v36 = vld [vmem:[%s10346_s0 + $0x188] sm:$0xff] }
  0x32   :  { %285 = vmatmul.f32.gmra.mxu1 %v35_v37 }
  0x39   :  { %163 = vmatmul.f32.gmra.mxu0 %v36_v38 }
  0x3a   :  { %288 = vmatmul.f32.gmra.mxu1 %v37_v39 }
  0x41   :  { %166 = vmatmul.f32.gmra.mxu0 %v38_v40 }
  0x42   :  { %291 = vmatmul.f32.gmra.mxu1 %v39_v41  ;;  %v80_v41 = vld [vmem:[%s10346_s0 + $0x190] sm:$0xff] }
  0x49   :  { %169 = vmatmul.f32.gmra.mxu0 %v40_v42  ;;  %v81_v42 = vld [vmem:[%s10346_s0 + $0x198] sm:$0xff] }
  0x4a   :  { %294 = vmatmul.f32.gmra.mxu1 %v41_v43 }
  0x51   :  { %172 = vmatmul.f32.gmra.mxu0 %v42_v44 }
  0x52   :  { %297 = vmatmul.f32.gmra.mxu1 %v43_v45  ;;  %v82_v45 = vld [vmem:[%s10346_s0 + $0x1a0] sm:$0xff] }
  0x59   :  { %175 = vmatmul.f32.gmra.mxu0 %v44_v46  ;;  %v83_v46 = vld [vmem:[%s10346_s0 + $0x1a8] sm:$0xff] }
  0x5a   :  { %300 = vmatmul.f32.gmra.mxu1 %v45_v47 }
  0x61   :  { %178 = vmatmul.f32.gmra.mxu0 %v46_v48 }
  0x62   :  { %303 = vmatmul.f32.gmra.mxu1 %v47_v49  ;;  %v84_v49 = vld [vmem:[%s10346_s0 + $0x1b0] sm:$0xff] }
  0x69   :  { %181 = vmatmul.f32.gmra.mxu0 %v48_v50  ;;  %v85_v50 = vld [vmem:[%s10346_s0 + $0x1b8] sm:$0xff] }
  0x6a   :  { %306 = vmatmul.f32.gmra.mxu1 %v49_v51 }
  0x71   :  { %184 = vmatmul.f32.gmra.mxu0 %v50_v52 }
  0x72   :  { %309 = vmatmul.f32.gmra.mxu1 %v51_v53  ;;  %v86_v53 = vld [vmem:[%s10346_s0 + $0x1c0] sm:$0xff] }
  0x79   :  { %187 = vmatmul.f32.gmra.mxu0 %v52_v54  ;;  %v87_v54 = vld [vmem:[%s10346_s0 + $0x1c8] sm:$0xff] }
  0x7a   :  { %312 = vmatmul.f32.gmra.mxu1 %v53_v55 }
  0x81   :  { %190 = vmatmul.f32.gmra.mxu0 %v54_v56 }
  0x82   :  { %315 = vmatmul.f32.gmra.mxu1 %v55_v57  ;;  %v88_v57 = vld [vmem:[%s10346_s0 + $0x1d0] sm:$0xff] }
  0x89   :  { %193 = vmatmul.f32.gmra.mxu0 %v56_v58  ;;  %v89_v58 = vld [vmem:[%s10346_s0 + $0x1d8] sm:$0xff] }
  0x8a   :  { %318 = vmatmul.f32.gmra.mxu1 %v57_v59 }
  0x91   :  { %196 = vmatmul.f32.gmra.mxu0 %v58_v60 }
  0x92   :  { %321 = vmatmul.f32.gmra.mxu1 %v59_v61  ;;  %v90_v61 = vld [vmem:[%s10346_s0 + $0x1e0] sm:$0xff] }
  0x99   :  { %199 = vmatmul.f32.gmra.mxu0 %v60_v62  ;;  %v91_v62 = vld [vmem:[%s10346_s0 + $0x1e8] sm:$0xff] }
  0x9a   :  { %324 = vmatmul.f32.gmra.mxu1 %v61_v63 }
  0x9e   :  { %v5798_v0 = vpop.f32.mrf.mxu0 }
  0x9f   :  { %v5800_v1 = vpop.f32.mrf.mxu1 }
  0xa1   :  { %202 = vmatmul.f32.gmra.mxu0 %v62_v2 }
  0xa2   :  { %327 = vmatmul.f32.gmra.mxu1 %v63_v3 }
  0xa6   :  { %v5808_v4 = vpop.f32.mrf.mxu0 }
  0xa7   :  { %v5810_v5 = vpop.f32.mrf.mxu1 }
  0xa9   :  { %205 = vmatmul.f32.gmra.mxu0 %v64_v6  ;;  %v92_v6 = vld [vmem:[%s10346_s0 + $0x1f0] sm:$0xff] }
  0xaa   :  { %330 = vmatmul.f32.gmra.mxu1 %v65_v7  ;;  %v93_v7 = vld [vmem:[%s10346_s0 + $0x1f8] sm:$0xff] }
  0xae   :  { %v5818_v8 = vpop.f32.mrf.mxu0 }
  0xaf   :  { %v5820_v9 = vpop.f32.mrf.mxu1 }
  0xb1   :  { %208 = vmatmul.f32.gmra.mxu0 %v66_v10 }
  0xb2   :  { %333 = vmatmul.f32.gmra.mxu1 %v67_v11 }
  0xb6   :  { %v5828_v12 = vpop.f32.mrf.mxu0 }
  0xb7   :  { %v5830_v13 = vpop.f32.mrf.mxu1 }
  0xb9   :  { %211 = vmatmul.f32.gmra.mxu0 %v68_v14 }
  0xba   :  { %336 = vmatmul.f32.gmra.mxu1 %v69_v15 }
  0xbe   :  { %v5838_v16 = vpop.f32.mrf.mxu0 }
  0xbf   :  { %v5840_v17 = vpop.f32.mrf.mxu1 }
  0xc1   :  { %214 = vmatmul.f32.gmra.mxu0 %v70_v18 }
  0xc2   :  { %339 = vmatmul.f32.gmra.mxu1 %v71_v19 }
  0xc6   :  { %v5848_v20 = vpop.f32.mrf.mxu0 }
  0xc7   :  { %v5850_v21 = vpop.f32.mrf.mxu1 }
  0xc9   :  { %217 = vmatmul.f32.gmra.mxu0 %v72_v22 }
  0xca   :  { %342 = vmatmul.f32.gmra.mxu1 %v73_v23 }
  0xce   :  { %v5858_v24 = vpop.f32.mrf.mxu0 }
  0xcf   :  { %v5860_v25 = vpop.f32.mrf.mxu1 }
  0xd1   :  { %220 = vmatmul.f32.gmra.mxu0 %v74_v26 }
  0xd2   :  { %345 = vmatmul.f32.gmra.mxu1 %v75_v27 }
  0xd6   :  { %v5868_v28 = vpop.f32.mrf.mxu0 }
  0xd7   :  { %v5870_v29 = vpop.f32.mrf.mxu1 }
  0xd9   :  { %223 = vmatmul.f32.gmra.mxu0 %v76_v30 }
  0xda   :  { %348 = vmatmul.f32.gmra.mxu1 %v77_v31 }
  0xde   :  { %v179_v33 = vpop.f32.mrf.mxu0 }
  0xdf   :  { %v304_v34 = vpop.f32.mrf.mxu1  ;;  %v180_v37 = vadd.f32 %v5881_v32, %v179_v33 }
  0xe1   :  { %v5890_v38 = vadd.f32 %v304_v34, %v180_v37  ;;  %226 = vmatmul.f32.gmra.mxu0 %v78_v35  ;;  %v94_v34 = vld [vmem:[%s10346_s0 + $0x200] sm:$0xff] }
  0xe2   :  { %351 = vmatmul.f32.gmra.mxu1 %v79_v36 }
  0xe6   :  { %v182_v39 = vpop.f32.mrf.mxu0 }
  0xe7   :  { %v5892_v40 = vpop.f32.mrf.mxu1  ;;  %v183_v35 = vadd.f32 %v5881_v32, %v182_v39 }
  0xe9   :  { %229 = vmatmul.f32.gmra.mxu0 %v80_v41  ;;  %v95_v41 = vld [vmem:[%s10346_s0 + $0x208] sm:$0xff] }
  0xea   :  { %354 = vmatmul.f32.gmra.mxu1 %v81_v42 }
  0xee   :  { %v185_v43 = vpop.f32.mrf.mxu0 }
  0xef   :  { %v310_v44 = vpop.f32.mrf.mxu1  ;;  %v186_v26 = vadd.f32 %v5881_v32, %v185_v43 }
  0xf1   :  { %232 = vmatmul.f32.gmra.mxu0 %v82_v45  ;;  %v311_v42 = vadd.f32 %v310_v44, %v186_v26  ;;  %v177_v45 = vadd.f32 %v5881_v32, %v5868_v28  ;;  %v171_v28 = vadd.f32 %v5881_v32, %v5848_v20  ;;  %v165_v20 = vadd.f32 %v5881_v32, %v5828_v12  ;;  %v98_v12 = vld [vmem:[%s10346_s0 + $0x220] sm:$0xff]  ;;  %v430_v26 = vld [vmem:[%s10347_s1 + $0x30] sm:$0xff] }
  0xf2   :  { %357 = vmatmul.f32.gmra.mxu1 %v83_v46  ;;  %v308_v46 = vadd.f32 %v5892_v40, %v183_v35 }
  0xf3   :  { %v302_v40 = vadd.f32 %v5870_v29, %v177_v45  ;;  %v296_v29 = vadd.f32 %v5850_v21, %v171_v28  ;;  %v159_v21 = vadd.f32 %v5881_v32, %v5808_v4 }
  0xf5   :  { %v284_v4 = vadd.f32 %v5810_v5, %v159_v21  ;;  %v101_v5 = vld [vmem:[%s10346_s0 + $0x238] sm:$0xff] }
  0xf6   :  { %v188_v47 = vpop.f32.mrf.mxu0 }
  0xf7   :  { %v313_v48 = vpop.f32.mrf.mxu1  ;;  %v189_v19 = vadd.f32 %v5881_v32, %v188_v47  ;;  %v174_v47 = vadd.f32 %v5881_v32, %v5858_v24  ;;  %v97_v24 = vld [vmem:[%s10346_s0 + $0x218] sm:$0xff] }
  0xf9   :  { %235 = vmatmul.f32.gmra.mxu0 %v84_v49  ;;  %v314_v36 = vadd.f32 %v313_v48, %v189_v19  ;;  %v398_v48 = vmax.f32 %v311_v42, 0.0  ;;  %v427_v19 = vld [vmem:[%s10347_s1 + $0x18] sm:$0xff] }
  0xfa   :  { %360 = vmatmul.f32.gmra.mxu1 %v85_v50  ;;  %v96_v50 = vld [vmem:[%s10346_s0 + $0x210] sm:$0xff] }
  0xfb   :  { %v399_v39 = vmax.f32 %v314_v36, 0.0 }
  0xfe   :  { %v191_v51 = vpop.f32.mrf.mxu0 }
  0xff   :  { %v316_v52 = vpop.f32.mrf.mxu1  ;;  %v192_v14 = vadd.f32 %v5881_v32, %v191_v51  ;;  %v397_v51 = vmax.f32 %v308_v46, 0.0 }
 0x101   :  { %238 = vmatmul.f32.gmra.mxu0 %v86_v53  ;;  %v317_v27 = vadd.f32 %v316_v52, %v192_v14  ;;  %v168_v52 = vadd.f32 %v5881_v32, %v5838_v16  ;;  %v299_v53 = vadd.f32 %v5860_v25, %v174_v47  ;;  %v424_v14 = vld [vmem:[%s10347_s1] sm:$0xff] }
 0x102   :  { %363 = vmatmul.f32.gmra.mxu1 %v87_v54  ;;  %v396_v54 = vmax.f32 %v5890_v38, 0.0 }
 0x103   :  { %v400_v43 = vmax.f32 %v317_v27, 0.0  ;;  %v293_v16 = vadd.f32 %v5840_v17, %v168_v52  ;;  %v394_v25 = vmax.f32 %v299_v53, 0.0  ;;  %v99_v17 = vld [vmem:[%s10346_s0 + $0x228] sm:$0xff]  ;;  %v451_v53 = vld [vmem:[%s10347_s1 + $0xd8] sm:$0xff] }
 0x106   :  { %v194_v55 = vpop.f32.mrf.mxu0 }
 0x107   :  { %v319_v56 = vpop.f32.mrf.mxu1  ;;  %v195_v10 = vadd.f32 %v5881_v32, %v194_v55  ;;  %v395_v55 = vmax.f32 %v302_v40, 0.0 }
 0x109   :  { %241 = vmatmul.f32.gmra.mxu0 %v88_v57  ;;  %v320_v22 = vadd.f32 %v319_v56, %v195_v10  ;;  %v162_v56 = vadd.f32 %v5881_v32, %v5818_v8  ;;  %v393_v8 = vmax.f32 %v296_v29, 0.0 }
 0x10a   :  { %366 = vmatmul.f32.gmra.mxu1 %v89_v58  ;;  %v290_v58 = vadd.f32 %v5830_v13, %v165_v20 }
 0x10b   :  { %v401_v37 = vmax.f32 %v320_v22, 0.0 }
 0x10c   :  { %v391_v13 = vmax.f32 %v290_v58, 0.0 }
 0x10e   :  { %v197_v59 = vpop.f32.mrf.mxu0 }
 0x10f   :  { %v322_v60 = vpop.f32.mrf.mxu1  ;;  %v198_v63 = vadd.f32 %v5881_v32, %v197_v59  ;;  %v156_v59 = vadd.f32 %v5881_v32, %v5798_v0 }
 0x111   :  { %244 = vmatmul.f32.gmra.mxu0 %v90_v61  ;;  %v323_v15 = vadd.f32 %v322_v60, %v198_v63  ;;  %v287_v60 = vadd.f32 %v5820_v9, %v162_v56  ;;  %v392_v61 = vmax.f32 %v293_v16, 0.0  ;;  %v100_v9 = vld [vmem:[%s10346_s0 + $0x230] sm:$0xff]  ;;  %s5558_s0 = smov 64  }
 0x112   :  { %369 = vmatmul.f32.gmra.mxu1 %v91_v62  ;;  %v281_v62 = vadd.f32 %v5800_v1, %v156_v59 }
 0x113   :  { %v402_v30 = vmax.f32 %v323_v15, 0.0  ;;  %v390_v63 = vmax.f32 %v287_v60, 0.0 }
 0x114   :  { %v388_v1 = vmax.f32 %v281_v62, 0.0 }
 0x116   :  { %v200_v2 = vpop.f32.mrf.mxu0 }
 0x117   :  { %v325_v3 = vpop.f32.mrf.mxu1  ;;  %v201_v11 = vadd.f32 %v5881_v32, %v200_v2 }
 0x119   :  { %v326_v18 = vadd.f32 %v325_v3, %v201_v11  ;;  %247 = vmatmul.f32.gmra.mxu0 %v92_v6  ;;  %v389_v3 = vmax.f32 %v284_v4, 0.0 }
 0x11a   :  { %372 = vmatmul.f32.gmra.mxu1 %v93_v7 }
 0x11b   :  { %v403_v23 = vmax.f32 %v326_v18, 0.0 }
 0x11d   :  { %1577 = vmatpush.msrb.mxu1 %v403_v23  ;;  %5173 = vmatpush.msra.mxu2 %v403_v23 }
 0x11e   :  { %v5942_v31 = vpop.f32.mrf.mxu0 }
 0x11f   :  { %v5944_v33 = vpop.f32.mrf.mxu1  ;;  %1578 = vmatpush.msrb.mxu1 %v402_v30  ;;  %5174 = vmatpush.msra.mxu2 %v402_v30 }
 0x121   :  { %250 = vmatmul.f32.gmra.mxu0 %v94_v34  ;;  %1579 = vmatpush.msrb.mxu1 %v401_v37  ;;  %v433_v34 = vld [vmem:[%s10347_s1 + $0x48] sm:$0xff] }
 0x122   :  { %5175 = vmatpush.msra.mxu2 %v401_v37  ;;  %375 = vmatmul.f32.gmra.mxu1 %v95_v41  ;;  %v436_v37 = vld [vmem:[%s10347_s1 + $0x60] sm:$0xff] }
 0x123   :  { %1580 = vmatpush.msrb.mxu1 %v400_v43 }
 0x124   :  { %5176 = vmatpush.msra.mxu2 %v400_v43  ;;  %v439_v43 = vld [vmem:[%s10347_s1 + $0x78] sm:$0xff] }
 0x125   :  { %1581 = vmatpush.msrb.mxu1 %v399_v39 }
 0x126   :  { %5177 = vmatpush.msra.mxu2 %v399_v39  ;;  %v5958_v44 = vpop.f32.mrf.mxu0  ;;  %v442_v39 = vld [vmem:[%s10347_s1 + $0x90] sm:$0xff] }
 0x127   :  { %v5960_v49 = vpop.f32.mrf.mxu1  ;;  %1582 = vmatpush.msrb.mxu1 %v398_v48 }
 0x128   :  { %5178 = vmatpush.msra.mxu2 %v398_v48 }
 0x129   :  { %253 = vmatmul.f32.gmra.mxu0 %v96_v50  ;;  %1583 = vmatpush.msrb.mxu1 %v397_v51  ;;  %v445_v50 = vld [vmem:[%s10347_s1 + $0xa8] sm:$0xff] }
 0x12a   :  { %5179 = vmatpush.msra.mxu2 %v397_v51  ;;  %378 = vmatmul.f32.gmra.mxu1 %v97_v24  ;;  %v448_v51 = vld [vmem:[%s10347_s1 + $0xc0] sm:$0xff] }
 0x12b   :  { %1584 = vmatpush.msrb.mxu1 %v396_v54 }
 0x12c   :  { %5180 = vmatpush.msra.mxu2 %v396_v54 }
 0x12d   :  { %1585 = vmatpush.msrb.mxu1 %v395_v55 }
 0x12e   :  { %5181 = vmatpush.msra.mxu2 %v395_v55  ;;  %v5981_v57 = vpop.f32.mrf.mxu0 }
 0x12f   :  { %v5983_v38 = vpop.f32.mrf.mxu1  ;;  %1586 = vmatpush.msrb.mxu1 %v394_v25 }
 0x130   :  { %5182 = vmatpush.msra.mxu2 %v394_v25 }
 0x131   :  { %256 = vmatmul.f32.gmra.mxu0 %v98_v12  ;;  %1587 = vmatpush.msrb.mxu1 %v393_v8 }
 0x132   :  { %5183 = vmatpush.msra.mxu2 %v393_v8  ;;  %381 = vmatmul.f32.gmra.mxu1 %v99_v17  ;;  %v454_v17 = vld [vmem:[%s10347_s1 + $0xf0] sm:$0xff] }
 0x133   :  { %1588 = vmatpush.msrb.mxu1 %v392_v61 }
 0x134   :  { %5184 = vmatpush.msra.mxu2 %v392_v61 }
 0x135   :  { %1589 = vmatpush.msrb.mxu1 %v391_v13 }
 0x136   :  { %5185 = vmatpush.msra.mxu2 %v391_v13  ;;  %v5999_v2 = vpop.f32.mrf.mxu0 }
 0x137   :  { %v6001_v0 = vpop.f32.mrf.mxu1  ;;  %1590 = vmatpush.msrb.mxu1 %v390_v63 }
 0x138   :  { %5186 = vmatpush.msra.mxu2 %v390_v63 }
 0x139   :  { %259 = vmatmul.f32.gmra.mxu0 %v100_v9  ;;  %1591 = vmatpush.msrb.mxu1 %v389_v3 }
 0x13a   :  { %5187 = vmatpush.msra.mxu2 %v389_v3  ;;  %384 = vmatmul.f32.gmra.mxu1 %v101_v5 }
 0x13b   :  { %1592 = vmatpush.msrb.mxu1 %v388_v1 }
 0x13c   :  { %5188 = vmatpush.msra.mxu2 %v388_v1 }
 0x13d   :  { %1623 = vmatmul.f32.vlgmr.msra.gmra.mxu2 %v454_v17 }
 0x13e   :  { %v6009_v6 = vpop.f32.mrf.mxu0 }
 0x13f   :  { %v6011_v7 = vpop.f32.mrf.mxu1 }
 0x142   :  { %1593 = vmatmul.f32.vlgmr.msrb.gmra.mxu1 %v424_v14 }
 0x146   :  { %v6013_v10 = vpop.f32.mrf.mxu0 }
 0x147   :  { %v6015_v11 = vpop.f32.mrf.mxu1 }
 0x14a   :  { %1596 = vmatmul.f32.gmra.mxu1 %v427_v19 }
 0x14e   :  { %v6020_v15 = vpop.f32.mrf.mxu0 }
 0x14f   :  { %v6022_v18 = vpop.f32.mrf.mxu1 }
 0x152   :  { %1599 = vmatmul.f32.gmra.mxu1 %v430_v26 }
 0x156   :  { %v224_v22 = vpop.f32.mrf.mxu0 }
 0x157   :  { %v6027_v23 = vpop.f32.mrf.mxu1  ;;  %v225_v14 = vadd.f32 %v5881_v32, %v224_v22  ;;  %v219_v22 = vadd.f32 %v5881_v32, %v6013_v10  ;;  %v213_v10 = vadd.f32 %v5881_v32, %v5999_v2 }
 0x159   :  { %v338_v2 = vadd.f32 %v6001_v0, %v213_v10  ;;  %v484_v10 = vld [vmem:[%s10347_s1 + $0x1e0] sm:$0xff] }
 0x15a   :  { %1602 = vmatmul.f32.gmra.mxu1 %v433_v34  ;;  %v457_v34 = vld [vmem:[%s10347_s1 + $0x108] sm:$0xff] }
 0x15b   :  { %1626 = vmatmul.f32.gmra.mxu2 %v457_v34  ;;  %v437_v34 = vld [vmem:[%s10347_s1 + $0x68] sm:$0xff] }
 0x15e   :  { %v227_v27 = vpop.f32.mrf.mxu0 }
 0x15f   :  { %v6032_v30 = vpop.f32.mrf.mxu1  ;;  %v228_v3 = vadd.f32 %v5881_v32, %v227_v27 }
 0x161   :  { %v353_v27 = vadd.f32 %v6032_v30, %v228_v3  ;;  %v460_v30 = vld [vmem:[%s10347_s1 + $0x120] sm:$0xff] }
 0x162   :  { %1605 = vmatmul.f32.gmra.mxu1 %v436_v37  ;;  %v472_v3 = vld [vmem:[%s10347_s1 + $0x180] sm:$0xff] }
 0x163   :  { %1629 = vmatmul.f32.gmra.mxu2 %v460_v30  ;;  %v441_v30 = vld [vmem:[%s10347_s1 + $0x88] sm:$0xff] }
 0x166   :  { %v230_v35 = vpop.f32.mrf.mxu0 }
 0x167   :  { %v355_v36 = vpop.f32.mrf.mxu1  ;;  %v231_v13 = vadd.f32 %v5881_v32, %v230_v35  ;;  %v222_v35 = vadd.f32 %v5881_v32, %v6020_v15 }
 0x169   :  { %v356_v19 = vadd.f32 %v355_v36, %v231_v13  ;;  %v350_v36 = vadd.f32 %v6027_v23, %v225_v14  ;;  %v347_v15 = vadd.f32 %v6022_v18, %v222_v35  ;;  %v344_v23 = vadd.f32 %v6015_v11, %v219_v22  ;;  %v469_v13 = vld [vmem:[%s10347_s1 + $0x168] sm:$0xff]  ;;  %v432_v14 = vld [vmem:[%s10347_s1 + $0x40] sm:$0xff]  ;;  %v467_v35 = vld [vmem:[%s10347_s1 + $0x158] sm:$0xff] }
 0x16a   :  { %1608 = vmatmul.f32.gmra.mxu1 %v439_v43  ;;  %v440_v22 = vld [vmem:[%s10347_s1 + $0x80] sm:$0xff] }
 0x16e   :  { %v233_v41 = vpop.f32.mrf.mxu0 }
 0x16f   :  { %v358_v42 = vpop.f32.mrf.mxu1  ;;  %v234_v59 = vadd.f32 %v5881_v32, %v233_v41 }
 0x171   :  { %v359_v5 = vadd.f32 %v358_v42, %v234_v59  ;;  %v413_v42 = vmax.f32 %v356_v19, 0.0  ;;  %v475_v19 = vld [vmem:[%s10347_s1 + $0x198] sm:$0xff] }
 0x172   :  { %1611 = vmatmul.f32.gmra.mxu1 %v442_v39  ;;  %v411_v39 = vmax.f32 %v350_v36, 0.0  ;;  %v470_v36 = vld [vmem:[%s10347_s1 + $0x170] sm:$0xff] }
 0x173   :  { %v414_v37 = vmax.f32 %v359_v5, 0.0  ;;  %v434_v5 = vld [vmem:[%s10347_s1 + $0x50] sm:$0xff] }
 0x176   :  { %v236_v45 = vpop.f32.mrf.mxu0 }
 0x177   :  { %v361_v46 = vpop.f32.mrf.mxu1  ;;  %v237_v21 = vadd.f32 %v5881_v32, %v236_v45  ;;  %v216_v45 = vadd.f32 %v5881_v32, %v6009_v6  ;;  %v210_v6 = vadd.f32 %v5881_v32, %v5981_v57 }
 0x179   :  { %v362_v62 = vadd.f32 %v361_v46, %v237_v21  ;;  %v412_v46 = vmax.f32 %v353_v27, 0.0  ;;  %v341_v18 = vadd.f32 %v6011_v7, %v216_v45  ;;  %v335_v57 = vadd.f32 %v5983_v38, %v210_v6  ;;  %v463_v7 = vld [vmem:[%s10347_s1 + $0x138] sm:$0xff]  ;;  %v444_v6 = vld [vmem:[%s10347_s1 + $0xa0] sm:$0xff] }
 0x17a   :  { %1614 = vmatmul.f32.gmra.mxu1 %v445_v50  ;;  %v207_v50 = vadd.f32 %v5881_v32, %v5958_v44  ;;  %1632 = vmatmul.f32.gmra.mxu2 %v463_v7  ;;  %v435_v27 = vld [vmem:[%s10347_s1 + $0x58] sm:$0xff]  ;;  %v493_v7 = vld [vmem:[%s10347_s1 + $0x228] sm:$0xff] }
 0x17b   :  { %v415_v26 = vmax.f32 %v362_v62, 0.0  ;;  %v431_v62 = vld [vmem:[%s10347_s1 + $0x38] sm:$0xff] }
 0x17c   :  { %v332_v44 = vadd.f32 %v5960_v49, %v207_v50  ;;  %v443_v45 = vld [vmem:[%s10347_s1 + $0x98] sm:$0xff] }
 0x17d   :  { %v479_v50 = vld [vmem:[%s10347_s1 + $0x1b8] sm:$0xff] }
 0x17e   :  { %v239_v47 = vpop.f32.mrf.mxu0 }
 0x17f   :  { %v364_v48 = vpop.f32.mrf.mxu1  ;;  %v240_v16 = vadd.f32 %v5881_v32, %v239_v47  ;;  %v410_v47 = vmax.f32 %v347_v15, 0.0  ;;  %v473_v15 = vld [vmem:[%s10347_s1 + $0x188] sm:$0xff] }
 0x181   :  { %v365_v60 = vadd.f32 %v364_v48, %v240_v16 }
 0x182   :  { %1617 = vmatmul.f32.gmra.mxu1 %v448_v51  ;;  %v408_v51 = vmax.f32 %v341_v18, 0.0 }
 0x183   :  { %v416_v1 = vmax.f32 %v365_v60, 0.0  ;;  %v428_v60 = vld [vmem:[%s10347_s1 + $0x20] sm:$0xff] }
 0x186   :  { %v242_v28 = vpop.f32.mrf.mxu0 }
 0x187   :  { %v367_v40 = vpop.f32.mrf.mxu1  ;;  %v243_v55 = vadd.f32 %v5881_v32, %v242_v28  ;;  %v409_v28 = vmax.f32 %v344_v23, 0.0  ;;  %v446_v23 = vld [vmem:[%s10347_s1 + $0xb0] sm:$0xff] }
 0x189   :  { %v368_v58 = vadd.f32 %v367_v40, %v243_v55  ;;  %v204_v40 = vadd.f32 %v5881_v32, %v5942_v31  ;;  %v406_v31 = vmax.f32 %v335_v57, 0.0  ;;  %v482_v57 = vld [vmem:[%s10347_s1 + $0x1d0] sm:$0xff] }
 0x18a   :  { %1620 = vmatmul.f32.gmra.mxu1 %v451_v53 }
 0x18b   :  { %v417_v63 = vmax.f32 %v368_v58, 0.0 }
 0x18e   :  { %v245_v24 = vpop.f32.mrf.mxu0 }
 0x18f   :  { %v370_v52 = vpop.f32.mrf.mxu1  ;;  %v246_v54 = vadd.f32 %v5881_v32, %v245_v24  ;;  %v407_v24 = vmax.f32 %v338_v2, 0.0  ;;  %v447_v2 = vld [vmem:[%s10347_s1 + $0xb8] sm:$0xff] }
 0x191   :  { %v371_v25 = vadd.f32 %v370_v52, %v246_v54  ;;  %v329_v52 = vadd.f32 %v5944_v33, %v204_v40  ;;  %v405_v54 = vmax.f32 %v332_v44, 0.0  ;;  %v425_v33 = vld [vmem:[%s10347_s1 + $0x8] sm:$0xff]  ;;  %v452_v40 = vld [vmem:[%s10347_s1 + $0xe0] sm:$0xff] }
 0x193   :  { %v418_v61 = vmax.f32 %v371_v25, 0.0 }
 0x196   :  { %v248_v20 = vpop.f32.mrf.mxu0 }
 0x197   :  { %v373_v29 = vpop.f32.mrf.mxu1  ;;  %v249_v56 = vadd.f32 %v5881_v32, %v248_v20 }
 0x199   :  { %v374_v12 = vadd.f32 %v373_v29, %v249_v56  ;;  %v404_v56 = vmax.f32 %v329_v52, 0.0  ;;  %v453_v52 = vld [vmem:[%s10347_s1 + $0xe8] sm:$0xff] }
 0x19b   :  { %v419_v8 = vmax.f32 %v374_v12, 0.0  ;;  %v455_v12 = vld [vmem:[%s10347_s1 + $0xf8] sm:$0xff] }
 0x19d   :  { %2170 = vmatpush.msra.mxu1 %v419_v8  ;;  %5189 = vmatpush.msra.mxu3 %v419_v8  ;;  %v466_v8 = vld [vmem:[%s10347_s1 + $0x150] sm:$0xff] }
 0x19e   :  { %v6064_v4 = vpop.f32.mrf.mxu0  ;;  %1635 = vmatmul.f32.gmra.mxu2 %v466_v8 }
 0x19f   :  { %2171 = vmatpush.msra.mxu1 %v418_v61  ;;  %5190 = vmatpush.msra.mxu3 %v418_v61  ;;  %v6067_v9 = vpop.f32.mrf.mxu1  ;;  %v252_v20 = vadd.f32 %v5881_v32, %v6064_v4  ;;  %v458_v61 = vld [vmem:[%s10347_s1 + $0x110] sm:$0xff] }
 0x1a0   :  { %v426_v4 = vld [vmem:[%s10347_s1 + $0x10] sm:$0xff] }
 0x1a1   :  { %2172 = vmatpush.msra.mxu1 %v417_v63  ;;  %5191 = vmatpush.msra.mxu3 %v417_v63  ;;  %v377_v21 = vadd.f32 %v6067_v9, %v252_v20  ;;  %v461_v63 = vld [vmem:[%s10347_s1 + $0x128] sm:$0xff]  ;;  %v456_v20 = vld [vmem:[%s10347_s1 + $0x100] sm:$0xff] }
 0x1a2   :  { %v429_v9 = vld [vmem:[%s10347_s1 + $0x28] sm:$0xff] }
 0x1a3   :  { %2173 = vmatpush.msra.mxu1 %v416_v1  ;;  %5192 = vmatpush.msra.mxu3 %v416_v1  ;;  %v420_v59 = vmax.f32 %v377_v21, 0.0  ;;  %v464_v1 = vld [vmem:[%s10347_s1 + $0x140] sm:$0xff]  ;;  %v873_v21 = vld [vmem:[%s10347_s1 + $0xe08] sm:$0xff] }
 0x1a5   :  { %2174 = vmatpush.msra.mxu1 %v415_v26  ;;  %5193 = vmatpush.msra.mxu3 %v415_v26 }
 0x1a6   :  { %v254_v41 = vpop.f32.mrf.mxu0  ;;  %1638 = vmatmul.f32.gmra.mxu2 %v469_v13 }
 0x1a7   :  { %2175 = vmatpush.msra.mxu1 %v414_v37  ;;  %5194 = vmatpush.msra.mxu3 %v414_v37  ;;  %v379_v43 = vpop.f32.mrf.mxu1  ;;  %v255_v38 = vadd.f32 %v5881_v32, %v254_v41  ;;  %v478_v37 = vld [vmem:[%s10347_s1 + $0x1b0] sm:$0xff] }
 0x1a9   :  { %2176 = vmatpush.msra.mxu1 %v413_v42  ;;  %5195 = vmatpush.msra.mxu3 %v413_v42  ;;  %v380_v16 = vadd.f32 %v379_v43, %v255_v38  ;;  %v438_v42 = vld [vmem:[%s10347_s1 + $0x70] sm:$0xff]  ;;  %v481_v43 = vld [vmem:[%s10347_s1 + $0x1c8] sm:$0xff]  ;;  %v488_v38 = vld [vmem:[%s10347_s1 + $0x200] sm:$0xff] }
 0x1ab   :  { %2177 = vmatpush.msra.mxu1 %v412_v46  ;;  %5196 = vmatpush.msra.mxu3 %v412_v46  ;;  %v421_v17 = vmax.f32 %v380_v16, 0.0 }
 0x1ad   :  { %2178 = vmatpush.msra.mxu1 %v411_v39  ;;  %5197 = vmatpush.msra.mxu3 %v411_v39  ;;  %v476_v39 = vld [vmem:[%s10347_s1 + $0x1a0] sm:$0xff] }
 0x1ae   :  { %v257_v48 = vpop.f32.mrf.mxu0  ;;  %1641 = vmatmul.f32.gmra.mxu2 %v472_v3  ;;  %v468_v3 = vld [vmem:[%s10347_s1 + $0x160] sm:$0xff] }
 0x1af   :  { %2179 = vmatpush.msra.mxu1 %v410_v47  ;;  %5198 = vmatpush.msra.mxu3 %v410_v47  ;;  %v382_v11 = vpop.f32.mrf.mxu1  ;;  %v258_v0 = vadd.f32 %v5881_v32, %v257_v48  ;;  %v487_v47 = vld [vmem:[%s10347_s1 + $0x1f8] sm:$0xff]  ;;  %v449_v48 = vld [vmem:[%s10347_s1 + $0xc8] sm:$0xff] }
 0x1b1   :  { %2180 = vmatpush.msra.mxu1 %v409_v28  ;;  %5199 = vmatpush.msra.mxu3 %v409_v28  ;;  %v383_v29 = vadd.f32 %v382_v11, %v258_v0  ;;  %v490_v28 = vld [vmem:[%s10347_s1 + $0x210] sm:$0xff]  ;;  %v864_v0 = vld [vmem:[%s10347_s1 + $0xdc0] sm:$0xff] }
 0x1b3   :  { %2181 = vmatpush.msra.mxu1 %v408_v51  ;;  %5200 = vmatpush.msra.mxu3 %v408_v51  ;;  %v422_v58 = vmax.f32 %v383_v29, 0.0  ;;  %v450_v51 = vld [vmem:[%s10347_s1 + $0xd0] sm:$0xff]  ;;  %v499_v29 = vld [vmem:[%s10347_s1 + $0x258] sm:$0xff] }
 0x1b5   :  { %2182 = vmatpush.msra.mxu1 %v407_v24  ;;  %5201 = vmatpush.msra.mxu3 %v407_v24  ;;  %v485_v24 = vld [vmem:[%s10347_s1 + $0x1e8] sm:$0xff] }
 0x1b6   :  { %v260_v53 = vpop.f32.mrf.mxu0  ;;  %1644 = vmatmul.f32.gmra.mxu2 %v475_v19  ;;  %v503_v19 = vld [vmem:[%s10347_s1 + $0x278] sm:$0xff] }
 0x1b7   :  { %v261_v49 = vadd.f32 %v5881_v32, %v260_v53  ;;  %2183 = vmatpush.msra.mxu1 %v406_v31  ;;  %5202 = vmatpush.msra.mxu3 %v406_v31  ;;  %v385_v55 = vpop.f32.mrf.mxu1  ;;  %v496_v31 = vld [vmem:[%s10347_s1 + $0x240] sm:$0xff]  ;;  %v867_v53 = vld [vmem:[%s10347_s1 + $0xdd8] sm:$0xff] }
 0x1b9   :  { %v386_v25 = vadd.f32 %v385_v55, %v261_v49  ;;  %2184 = vmatpush.msra.mxu1 %v405_v54  ;;  %5203 = vmatpush.msra.mxu3 %v405_v54  ;;  %v491_v49 = vld [vmem:[%s10347_s1 + $0x218] sm:$0xff]  ;;  %v870_v55 = vld [vmem:[%s10347_s1 + $0xdf0] sm:$0xff] }
 0x1bb   :  { %2185 = vmatpush.msra.mxu1 %v404_v56  ;;  %5204 = vmatpush.msra.mxu3 %v404_v56  ;;  %v423_v32 = vmax.f32 %v386_v25, 0.0  ;;  %v459_v56 = vld [vmem:[%s10347_s1 + $0x118] sm:$0xff]  ;;  %v502_v25 = vld [vmem:[%s10347_s1 + $0x270] sm:$0xff] }
 0x1bc   :  { %2186 = vmatmul.f32.vlgmr.msra.gmra.mxu1 %v425_v33  ;;  %2216 = vmatmul.f32.vlgmr.msra.gmra.mxu3 %v455_v12  ;;  %v494_v12 = vld [vmem:[%s10347_s1 + $0x230] sm:$0xff] }
 0x1bd   :  { %2775 = vmatpush.msrb.mxu0 %v423_v32  ;;  %5205 = vmatpush.msrb.mxu1 %v423_v32  ;;  %v462_v32 = vld [vmem:[%s10347_s1 + $0x130] sm:$0xff] }
 0x1be   :  { %1647 = vmatmul.f32.gmra.mxu2 %v478_v37 }
 0x1bf   :  { %2776 = vmatpush.msrb.mxu0 %v422_v58  ;;  %5206 = vmatpush.msrb.mxu1 %v422_v58  ;;  %v6157_v26 = vpop.f32.mrf.mxu1  ;;  %v505_v58 = vld [vmem:[%s10347_s1 + $0x288] sm:$0xff] }
 0x1c0   :  { %v1624_v33 = vpop.f32.mrf.mxu2 }
 0x1c1   :  { %2777 = vmatpush.msrb.mxu0 %v421_v17  ;;  %5207 = vmatpush.msrb.mxu1 %v421_v17 }
 0x1c3   :  { %2778 = vmatpush.msrb.mxu0 %v420_v59  ;;  %5208 = vmatpush.msrb.mxu1 %v420_v59  ;;  %v497_v59 = vld [vmem:[%s10347_s1 + $0x248] sm:$0xff] }
 0x1c4   :  { %2189 = vmatmul.f32.gmra.mxu1 %v428_v60  ;;  %2219 = vmatmul.f32.gmra.mxu3 %v458_v61  ;;  %v876_v60 = vld [vmem:[%s10347_s1 + $0xe20] sm:$0xff]  ;;  %v465_v61 = vld [vmem:[%s10347_s1 + $0x148] sm:$0xff] }
 0x1c5   :  { %4980 = vmatmul.msk.f32.vlgmr.msrb.gmra.mxu0 %vm1000_vm0, %v426_v4  ;;  %v508_v4 = vld [vmem:[%s10347_s1 + $0x2a0] sm:$0xff] }
 0x1c6   :  { %1650 = vmatmul.f32.gmra.mxu2 %v481_v43  ;;  %v885_v43 = vld [vmem:[%s10347_s1 + $0xe68] sm:$0xff] }
 0x1c7   :  { %v6172_v41 = vpop.f32.mrf.mxu1 }
 0x1cc   :  { %2192 = vmatmul.f32.gmra.mxu1 %v431_v62  ;;  %2222 = vmatmul.f32.gmra.mxu3 %v461_v63  ;;  %v500_v63 = vld [vmem:[%s10347_s1 + $0x260] sm:$0xff] }
 0x1cd   :  { %4981 = vmatmul.msk.f32.gmra.mxu0 %vm1000_vm0, %v429_v9  ;;  %v879_v9 = vld [vmem:[%s10347_s1 + $0xe38] sm:$0xff] }
 0x1ce   :  { %1653 = vmatmul.f32.gmra.mxu2 %v484_v10  ;;  %v517_v10 = vld [vmem:[%s10347_s1 + $0x2e8] sm:$0xff] }
 0x1cf   :  { %v6193_v46 = vpop.f32.mrf.mxu1 }
 0x1d4   :  { %2195 = vmatmul.f32.gmra.mxu1 %v434_v5  ;;  %2225 = vmatmul.f32.gmra.mxu3 %v464_v1  ;;  %v511_v5 = vld [vmem:[%s10347_s1 + $0x2b8] sm:$0xff] }
 0x1d5   :  { %4982 = vmatmul.msk.f32.gmra.mxu0 %vm1000_vm0, %v432_v14 }
 0x1d6   :  { %1656 = vmatmul.f32.gmra.mxu2 %v487_v47  ;;  %v509_v47 = vld [vmem:[%s10347_s1 + $0x2a8] sm:$0xff] }
 0x1d7   :  { %v6211_v18 = vpop.f32.mrf.mxu1 }
 0x1dc   :  { %2198 = vmatmul.f32.gmra.mxu1 %v437_v34  ;;  %2228 = vmatmul.f32.gmra.mxu3 %v467_v35  ;;  %v882_v34 = vld [vmem:[%s10347_s1 + $0xe50] sm:$0xff]  ;;  %v471_v35 = vld [vmem:[%s10347_s1 + $0x178] sm:$0xff] }
 0x1dd   :  { %4983 = vmatmul.msk.f32.gmra.mxu0 %vm1000_vm0, %v435_v27  ;;  %v514_v27 = vld [vmem:[%s10347_s1 + $0x2d0] sm:$0xff] }
 0x1de   :  { %1659 = vmatmul.f32.gmra.mxu2 %v490_v28  ;;  %v1627_v17 = vpop.f32.mrf.mxu2  ;;  %v477_v28 = vld [vmem:[%s10347_s1 + $0x1a8] sm:$0xff] }
 0x1df   :  { %v6230_v11 = vpop.f32.mrf.mxu1 }
 0x1e4   :  { %2201 = vmatmul.f32.gmra.mxu1 %v440_v22  ;;  %2231 = vmatmul.f32.gmra.mxu3 %v470_v36 }
 0x1e5   :  { %4984 = vmatmul.msk.f32.gmra.mxu0 %vm1000_vm0, %v438_v42  ;;  %v506_v42 = vld [vmem:[%s10347_s1 + $0x290] sm:$0xff] }
 0x1e6   :  { %1662 = vmatmul.f32.gmra.mxu2 %v493_v7  ;;  %v1630_v62 = vpop.f32.mrf.mxu2 }
 0x1e7   :  { %v6245_v44 = vpop.f32.mrf.mxu1 }
 0x1ec   :  { %2204 = vmatmul.f32.gmra.mxu1 %v443_v45  ;;  %2234 = vmatmul.f32.gmra.mxu3 %v473_v15 }
 0x1ed   :  { %4985 = vmatmul.msk.f32.gmra.mxu0 %vm1000_vm0, %v441_v30  ;;  %v474_v30 = vld [vmem:[%s10347_s1 + $0x190] sm:$0xff] }
 0x1ee   :  { %1665 = vmatmul.f32.gmra.mxu2 %v496_v31 }
 0x1ef   :  { %v6267_v54 = vpop.f32.mrf.mxu1 }
 0x1f4   :  { %2207 = vmatmul.f32.gmra.mxu1 %v446_v23  ;;  %2237 = vmatmul.f32.gmra.mxu3 %v476_v39 }
 0x1f5   :  { %4986 = vmatmul.msk.f32.gmra.mxu0 %vm1000_vm0, %v444_v6 }
 0x1f6   :  { %1668 = vmatmul.f32.gmra.mxu2 %v499_v29 }
 0x1f7   :  { %v6286_v16 = vpop.f32.mrf.mxu1 }
 0x1fc   :  { %2210 = vmatmul.f32.gmra.mxu1 %v449_v48  ;;  %2240 = vmatmul.f32.gmra.mxu3 %v479_v50  ;;  %v888_v48 = vld [vmem:[%s10347_s1 + $0xe80] sm:$0xff] }
 0x1fd   :  { %4987 = vmatmul.msk.f32.gmra.mxu0 %vm1000_vm0, %v447_v2  ;;  %v1633_v1 = vpop.f32.mrf.mxu2 }
 0x1fe   :  { %1671 = vmatmul.f32.gmra.mxu2 %v502_v25 }
 0x1ff   :  { %v6307_v8 = vpop.f32.mrf.mxu1 }
 0x204   :  { %2213 = vmatmul.f32.gmra.mxu1 %v452_v40  ;;  %2243 = vmatmul.f32.gmra.mxu3 %v482_v57  ;;  %v520_v40 = vld [vmem:[%s10347_s1 + $0x300] sm:$0xff] }
 0x205   :  { %4988 = vmatmul.msk.f32.gmra.mxu0 %vm1000_vm0, %v450_v51 }
 0x206   :  { %1674 = vmatmul.f32.gmra.mxu2 %v505_v58 }
 0x207   :  { %v6323_v13 = vpop.f32.mrf.mxu1 }
 0x20c   :  { %2246 = vmatmul.f32.gmra.mxu3 %v485_v24  ;;  %5126 = vmatmul.msk.f32.vlgmr.msrb.gmra.mxu1 %vm1000_vm0, %v864_v0  ;;  %v512_v24 = vld [vmem:[%s10347_s1 + $0x2c0] sm:$0xff]  ;;  %v891_v0 = vld [vmem:[%s10347_s1 + $0xe98] sm:$0xff] }
 0x20d   :  { %4989 = vmatmul.msk.f32.gmra.mxu0 %vm1000_vm0, %v453_v52 }
 0x20e   :  { %1677 = vmatmul.f32.gmra.mxu2 %v508_v4 }
 0x214   :  { %2249 = vmatmul.f32.gmra.mxu3 %v488_v38  ;;  %5127 = vmatmul.msk.f32.gmra.mxu1 %vm1000_vm0, %v867_v53  ;;  %v480_v38 = vld [vmem:[%s10347_s1 + $0x1c0] sm:$0xff]  ;;  %v523_v53 = vld [vmem:[%s10347_s1 + $0x318] sm:$0xff] }
 0x215   :  { %4990 = vmatmul.msk.f32.gmra.mxu0 %vm1000_vm0, %v456_v20 }
 0x216   :  { %1680 = vmatmul.f32.gmra.mxu2 %v511_v5 }
 0x21c   :  { %2252 = vmatmul.f32.gmra.mxu3 %v491_v49  ;;  %5128 = vmatmul.msk.f32.gmra.mxu1 %vm1000_vm0, %v870_v55  ;;  %v515_v55 = vld [vmem:[%s10347_s1 + $0x2d8] sm:$0xff] }
 0x21d   :  { %4991 = vmatmul.msk.f32.gmra.mxu0 %vm1000_vm0, %v459_v56  ;;  %v894_v56 = vld [vmem:[%s10347_s1 + $0xeb0] sm:$0xff] }
 0x21e   :  { %1683 = vmatmul.f32.gmra.mxu2 %v514_v27 }
 0x221   :  { %v1636_v45 = vpop.f32.mrf.mxu2 }
 0x224   :  { %2255 = vmatmul.f32.gmra.mxu3 %v494_v12  ;;  %5129 = vmatmul.msk.f32.gmra.mxu1 %vm1000_vm0, %v873_v21  ;;  %v483_v12 = vld [vmem:[%s10347_s1 + $0x1d8] sm:$0xff]  ;;  %v526_v21 = vld [vmem:[%s10347_s1 + $0x330] sm:$0xff] }
 0x225   :  { %4992 = vmatmul.msk.f32.gmra.mxu0 %vm1000_vm0, %v462_v32 }
 0x226   :  { %1686 = vmatmul.f32.gmra.mxu2 %v517_v10 }
 0x229   :  { %v1639_v50 = vpop.f32.mrf.mxu2 }
 0x22c   :  { %2258 = vmatmul.f32.gmra.mxu3 %v497_v59  ;;  %5130 = vmatmul.msk.f32.gmra.mxu1 %vm1000_vm0, %v876_v60  ;;  %v897_v59 = vld [vmem:[%s10347_s1 + $0xec8] sm:$0xff] }
 0x22d   :  { %4993 = vmatmul.msk.f32.gmra.mxu0 %vm1000_vm0, %v465_v61 }
 0x22e   :  { %1689 = vmatmul.f32.gmra.mxu2 %v520_v40  ;;  %v535_v40 = vld [vmem:[%s10347_s1 + $0x378] sm:$0xff] }
 0x231   :  { %v1642_v52 = vpop.f32.mrf.mxu2 }
 0x234   :  { %2261 = vmatmul.f32.gmra.mxu3 %v500_v63  ;;  %5131 = vmatmul.msk.f32.gmra.mxu1 %vm1000_vm0, %v879_v9 }
 0x235   :  { %4994 = vmatmul.msk.f32.gmra.mxu0 %vm1000_vm0, %v468_v3  ;;  %v529_v3 = vld [vmem:[%s10347_s1 + $0x348] sm:$0xff] }
 0x236   :  { %1692 = vmatmul.f32.gmra.mxu2 %v523_v53  ;;  %v527_v53 = vld [vmem:[%s10347_s1 + $0x338] sm:$0xff] }
 0x239   :  { %v6339_v14 = vpop.f32.mrf.mxu1  ;;  %v1645_v25 = vpop.f32.mrf.mxu2 }
 0x23c   :  { %2264 = vmatmul.f32.gmra.mxu3 %v503_v19  ;;  %5132 = vmatmul.msk.f32.gmra.mxu1 %vm1000_vm0, %v882_v34 }
 0x23d   :  { %4995 = vmatmul.msk.f32.gmra.mxu0 %vm1000_vm0, %v471_v35 }
 0x23e   :  { %1695 = vmatmul.f32.gmra.mxu2 %v526_v21 }
 0x23f   :  { %v2217_v37 = vpop.f32.mrf.mxu3 }
 0x240   :  { %v6355_v22 = vadd.f32 %v2217_v37, %v1624_v33  ;;  %v489_v37 = vld [vmem:[%s10347_s1 + $0x208] sm:$0xff] }
 0x241   :  { %v6357_v36 = vpop.f32.mrf.mxu1  ;;  %v1648_v60 = vpop.f32.mrf.mxu2 }
 0x242   :  { %v6365_v15 = vpop.f32.mrf.mxu0 }
 0x244   :  { %2267 = vmatmul.f32.gmra.mxu3 %v506_v42  ;;  %5133 = vmatmul.msk.f32.gmra.mxu1 %vm1000_vm0, %v885_v43  ;;  %v532_v42 = vld [vmem:[%s10347_s1 + $0x360] sm:$0xff] }
 0x245   :  { %4996 = vmatmul.msk.f32.gmra.mxu0 %vm1000_vm0, %v474_v30 }
 0x246   :  { %1698 = vmatmul.f32.gmra.mxu2 %v529_v3  ;;  %v533_v3 = vld [vmem:[%s10347_s1 + $0x368] sm:$0xff] }
 0x247   :  { %v2220_v23 = vpop.f32.mrf.mxu3 }
 0x248   :  { %v6375_v39 = vadd.f32 %v2220_v23, %v1627_v17  ;;  %v518_v17 = vld [vmem:[%s10347_s1 + $0x2f0] sm:$0xff]  ;;  %v524_v23 = vld [vmem:[%s10347_s1 + $0x320] sm:$0xff] }
 0x249   :  { %v6377_v6 = vpop.f32.mrf.mxu1  ;;  %v1651_v35 = vpop.f32.mrf.mxu2 }
 0x24a   :  { %v6385_v2 = vpop.f32.mrf.mxu0 }
 0x24c   :  { %2270 = vmatmul.f32.gmra.mxu3 %v509_v47  ;;  %5134 = vmatmul.msk.f32.gmra.mxu1 %vm1000_vm0, %v888_v48  ;;  %v903_v47 = vld [vmem:[%s10347_s1 + $0xef8] sm:$0xff] }
 0x24d   :  { %4997 = vmatmul.msk.f32.gmra.mxu0 %vm1000_vm0, %v477_v28  ;;  %v492_v28 = vld [vmem:[%s10347_s1 + $0x220] sm:$0xff] }
 0x24e   :  { %1701 = vmatmul.f32.gmra.mxu2 %v532_v42 }
 0x24f   :  { %v2223_v57 = vpop.f32.mrf.mxu3 }
 0x250   :  { %v6395_v51 = vadd.f32 %v2223_v57, %v1630_v62  ;;  %v486_v62 = vld [vmem:[%s10347_s1 + $0x1f0] sm:$0xff] }
 0x251   :  { %v2196_v7 = vpop.f32.mrf.mxu1  ;;  %v1654_v48 = vpop.f32.mrf.mxu2 }
 0x252   :  { %v6403_v31 = vpop.f32.mrf.mxu0  ;;  %v2197_v63 = vadd.f32 %v2196_v7, %v6211_v18  ;;  %v521_v18 = vld [vmem:[%s10347_s1 + $0x308] sm:$0xff] }
 0x254   :  { %2273 = vmatmul.f32.gmra.mxu3 %v512_v24  ;;  %5135 = vmatmul.msk.f32.gmra.mxu1 %vm1000_vm0, %v891_v0 }
 0x255   :  { %4998 = vmatmul.msk.f32.gmra.mxu0 %vm1000_vm0, %v480_v38 }
 0x256   :  { %1704 = vmatmul.f32.gmra.mxu2 %v535_v40 }
 0x257   :  { %v2226_v20 = vpop.f32.mrf.mxu3 }
 0x258   :  { %v6413_v29 = vadd.f32 %v2226_v20, %v1633_v1  ;;  %v906_v20 = vld [vmem:[%s10347_s1 + $0xf10] sm:$0xff] }
 0x259   :  { %v2199_v49 = vpop.f32.mrf.mxu1 }
 0x25a   :  { %v2789_v33 = vpop.f32.mrf.mxu0  ;;  %v2200_v9 = vadd.f32 %v2199_v49, %v6230_v11  ;;  %v900_v11 = vld [vmem:[%s10347_s1 + $0xee0] sm:$0xff]  ;;  %v1657_v49 = vpop.f32.mrf.mxu2 }
 0x25b   :  { %v2790_v5 = vadd.f32 %v2789_v33, %v2197_v63 }
 0x25c   :  { %2276 = vmatmul.f32.gmra.mxu3 %v515_v55  ;;  %5136 = vmatmul.msk.f32.gmra.mxu1 %vm1000_vm0, %v894_v56  ;;  %v495_v55 = vld [vmem:[%s10347_s1 + $0x238] sm:$0xff] }
 0x25d   :  { %4999 = vmatmul.msk.f32.gmra.mxu0 %vm1000_vm0, %v483_v12 }
 0x25f   :  { %v2229_v32 = vpop.f32.mrf.mxu3 }
 0x260   :  { %v6429_v58 = vadd.f32 %v2229_v32, %v1636_v45  ;;  %v530_v32 = vld [vmem:[%s10347_s1 + $0x350] sm:$0xff] }
 0x261   :  { %v6437_v61 = vpop.f32.mrf.mxu1 }
 0x262   :  { %v2792_v4 = vpop.f32.mrf.mxu0 }
 0x263   :  { %v2793_v1 = vadd.f32 %v2792_v4, %v2200_v9 }
 0x264   :  { %2279 = vmatmul.f32.gmra.mxu3 %v518_v17  ;;  %5137 = vmatmul.msk.f32.gmra.mxu1 %vm1000_vm0, %v897_v59  ;;  %v909_v17 = vld [vmem:[%s10347_s1 + $0xf28] sm:$0xff]  ;;  %v1660_v59 = vpop.f32.mrf.mxu2 }
 0x265   :  { %5000 = vmatmul.msk.f32.gmra.mxu0 %vm1000_vm0, %v486_v62  ;;  %v5213_v43 = vpack.i.bf16 %v2793_v1, %v2790_v5  ;;  %v498_v62 = vld [vmem:[%s10347_s1 + $0x250] sm:$0xff]  ;;  %v912_v5 = vld [vmem:[%s10347_s1 + $0xf40] sm:$0xff] }
 0x267   :  { %v2232_v19 = vpop.f32.mrf.mxu3  ;;  %5214 = vrot.lane.b32.xlu0 %v5213_v43, %s5557_s16 }
 0x268   :  { %v6449_v34 = vadd.f32 %v2232_v19, %v1639_v50 }
 0x269   :  { %v2205_v45 = vpop.f32.mrf.mxu1 }
 0x26a   :  { %v6457_v27 = vpop.f32.mrf.mxu0  ;;  %v2206_v57 = vadd.f32 %v2205_v45, %v6267_v54 }
 0x26c   :  { %2282 = vmatmul.f32.gmra.mxu3 %v521_v18  ;;  %5138 = vmatmul.msk.f32.gmra.mxu1 %vm1000_vm0, %v900_v11  ;;  %v1663_v1 = vpop.f32.mrf.mxu2  ;;  %v501_v18 = vld [vmem:[%s10347_s1 + $0x268] sm:$0xff] }
 0x26d   :  { %5001 = vmatmul.msk.f32.gmra.mxu0 %vm1000_vm0, %v489_v37 }
 0x26f   :  { %v2235_v30 = vpop.f32.mrf.mxu3 }
 0x270   :  { %v6468_v10 = vadd.f32 %v2235_v30, %v1642_v52  ;;  %v536_v30 = vld [vmem:[%s10347_s1 + $0x380] sm:$0xff] }
 0x271   :  { %v2208_v7 = vpop.f32.mrf.mxu1 }
 0x272   :  { %v2798_v50 = vpop.f32.mrf.mxu0  ;;  %v2209_v24 = vadd.f32 %v2208_v7, %v6286_v16  ;;  %v538_v16 = vld [vmem:[%s10347_s1 + $0x390] sm:$0xff] }
 0x273   :  { %v2799_v38 = vadd.f32 %v2798_v50, %v2206_v57  ;;  %1707 = vmatmul.f32.gmra.mxu2 %v538_v16  ;;  %v542_v16 = vld [vmem:[%s10347_s1 + $0x3b0] sm:$0xff] }
 0x274   :  { %2285 = vmatmul.f32.gmra.mxu3 %v524_v23  ;;  %5139 = vmatmul.msk.f32.gmra.mxu1 %vm1000_vm0, %v903_v47  ;;  %v915_v23 = vld [vmem:[%s10347_s1 + $0xf58] sm:$0xff]  ;;  %v1666_v47 = vpop.f32.mrf.mxu2 }
 0x275   :  { %5002 = vmatmul.msk.f32.gmra.mxu0 %vm1000_vm0, %v492_v28 }
 0x277   :  { %v2238_v0 = vpop.f32.mrf.mxu3 }
 0x278   :  { %v6486_v52 = vadd.f32 %v2238_v0, %v1645_v25  ;;  %v918_v0 = vld [vmem:[%s10347_s1 + $0xf70] sm:$0xff] }
 0x279   :  { %v6505_v21 = vpop.f32.mrf.mxu1 }
 0x27a   :  { %v2801_v54 = vpop.f32.mrf.mxu0 }
 0x27b   :  { %v2802_v56 = vadd.f32 %v2801_v54, %v2209_v24 }
 0x27c   :  { %2288 = vmatmul.f32.gmra.mxu3 %v527_v53  ;;  %5140 = vmatmul.msk.f32.gmra.mxu1 %vm1000_vm0, %v906_v20  ;;  %v507_v20 = vld [vmem:[%s10347_s1 + $0x298] sm:$0xff] }
 0x27d   :  { %v5218_v25 = vpack.i.bf16 %v2802_v56, %v2799_v38  ;;  %5003 = vmatmul.msk.f32.gmra.mxu0 %vm1000_vm0, %v495_v55  ;;  %v1669_v38 = vpop.f32.mrf.mxu2 }
 0x27f   :  { %v2241_v33 = vpop.f32.mrf.mxu3  ;;  %5219 = vrot.lane.b32.xlu0 %v5218_v25, %s5558_s0  ;;  %v921_v25 = vld [vmem:[%s10347_s1 + $0xf88] sm:$0xff] }
 0x280   :  { %v6503_v12 = vadd.f32 %v2241_v33, %v1648_v60  ;;  %v541_v60 = vld [vmem:[%s10347_s1 + $0x3a8] sm:$0xff] }
 0x281   :  { %1710 = vmatmul.f32.gmra.mxu2 %v541_v60  ;;  %v2214_v11 = vpop.f32.mrf.mxu1 }
 0x282   :  { %v6513_v4 = vpop.f32.mrf.mxu0  ;;  %v2215_v37 = vadd.f32 %v2214_v11, %v6323_v13  ;;  %v504_v13 = vld [vmem:[%s10347_s1 + $0x280] sm:$0xff]  ;;  %v513_v11 = vld [vmem:[%s10347_s1 + $0x2c8] sm:$0xff] }
 0x284   :  { %2291 = vmatmul.f32.gmra.mxu3 %v530_v32  ;;  %5141 = vmatmul.msk.f32.gmra.mxu1 %vm1000_vm0, %v909_v17  ;;  %v510_v17 = vld [vmem:[%s10347_s1 + $0x2b0] sm:$0xff] }
 0x285   :  { %5004 = vmatmul.msk.f32.gmra.mxu0 %vm1000_vm0, %v498_v62  ;;  %v1672_v33 = vpop.f32.mrf.mxu2 }
 0x287   :  { %v2244_v63 = vpop.f32.mrf.mxu3 }
 0x288   :  { %v6523_v9 = vadd.f32 %v2244_v63, %v1651_v35  ;;  %v544_v35 = vld [vmem:[%s10347_s1 + $0x3c0] sm:$0xff] }
 0x289   :  { %1713 = vmatmul.f32.gmra.mxu2 %v544_v35  ;;  %v6556_v40 = vpop.f32.mrf.mxu1 }
 0x28a   :  { %v2807_v19 = vpop.f32.mrf.mxu0  ;;  %10355 = vst [vmem:[#allocation5_spill] sm:$0xff] %v6556_v40 }
 0x28b   :  { %v2808_v45 = vadd.f32 %v2807_v19, %v2215_v37 }
 0x28c   :  { %2294 = vmatmul.f32.gmra.mxu3 %v533_v3  ;;  %5142 = vmatmul.msk.f32.gmra.mxu1 %vm1000_vm0, %v912_v5  ;;  %v545_v3 = vld [vmem:[%s10347_s1 + $0x3c8] sm:$0xff]  ;;  %v924_v5 = vld [vmem:[%s10347_s1 + $0xfa0] sm:$0xff] }
 0x28d   :  { %5005 = vmatmul.msk.f32.gmra.mxu0 %vm1000_vm0, %v501_v18  ;;  %v1675_v19 = vpop.f32.mrf.mxu2 }
 0x28f   :  { %v2247_v42 = vpop.f32.mrf.mxu3 }
 0x290   :  { %v6540_v43 = vadd.f32 %v2247_v42, %v1654_v48  ;;  %v547_v48 = vld [vmem:[%s10347_s1 + $0x3d8] sm:$0xff]  ;;  %v548_v42 = vld [vmem:[%s10347_s1 + $0x3e0] sm:$0xff] }
 0x291   :  { %1716 = vmatmul.f32.gmra.mxu2 %v547_v48  ;;  %v6578_v54 = vpop.f32.mrf.mxu1 }
 0x292   :  { %v2810_v50 = vpop.f32.mrf.mxu0 }
 0x293   :  { %v2811_v28 = vadd.f32 %v2810_v50, %v6355_v22  ;;  %v539_v22 = vld [vmem:[%s10347_s1 + $0x398] sm:$0xff]  ;;  %v516_v50 = vld [vmem:[%s10347_s1 + $0x2e0] sm:$0xff] }
 0x294   :  { %2297 = vmatmul.f32.gmra.mxu3 %v536_v30  ;;  %5143 = vmatmul.msk.f32.gmra.mxu1 %vm1000_vm0, %v915_v23 }
 0x295   :  { %5006 = vmatmul.msk.f32.gmra.mxu0 %vm1000_vm0, %v504_v13  ;;  %v5223_v57 = vpack.i.bf16 %v2811_v28, %v2808_v45  ;;  %v927_v45 = vld [vmem:[%s10347_s1 + $0xfb8] sm:$0xff]  ;;  %v1678_v30 = vpop.f32.mrf.mxu2  ;;  %v2203_v28 = vadd.f32 %v6437_v61, %v6245_v44 }
 0x296   :  { %v519_v44 = vld [vmem:[%s10347_s1 + $0x2f8] sm:$0xff] }
 0x297   :  { %5224 = vrot.lane.b32.xlu1 %v5223_v57, %s5559_s11  ;;  %v2250_v7 = vpop.f32.mrf.mxu3 }
 0x298   :  { %v6560_v24 = vadd.f32 %v2250_v7, %v1657_v49  ;;  %v550_v49 = vld [vmem:[%s10347_s1 + $0x3f0] sm:$0xff]  ;;  %v2796_v7 = vadd.f32 %v6457_v27, %v2203_v28 }
 0x299   :  { %1719 = vmatmul.f32.gmra.mxu2 %v550_v49  ;;  %v6600_v63 = vpop.f32.mrf.mxu1  ;;  %v562_v27 = vld [vmem:[%s10347_s1 + $0x450] sm:$0xff] }
 0x29a   :  { %v6568_v53 = vpop.f32.mrf.mxu0 }
 0x29c   :  { %2300 = vmatmul.f32.gmra.mxu3 %v539_v22  ;;  %5144 = vmatmul.msk.f32.gmra.mxu1 %vm1000_vm0, %v918_v0  ;;  %v551_v22 = vld [vmem:[%s10347_s1 + $0x3f8] sm:$0xff]  ;;  %v930_v0 = vld [vmem:[%s10347_s1 + $0xfd0] sm:$0xff] }
 0x29d   :  { %5007 = vmatmul.msk.f32.gmra.mxu0 %vm1000_vm0, %v507_v20  ;;  %v1681_v20 = vpop.f32.mrf.mxu2 }
 0x29f   :  { %v2253_v55 = vpop.f32.mrf.mxu3 }
 0x2a0   :  { %v6580_v56 = vadd.f32 %v2253_v55, %v1660_v59  ;;  %v553_v59 = vld [vmem:[%s10347_s1 + $0x408] sm:$0xff] }
 0x2a1   :  { %1722 = vmatmul.f32.gmra.mxu2 %v553_v59  ;;  %v6631_v13 = vpop.f32.mrf.mxu1 }
 0x2a2   :  { %v6588_v32 = vpop.f32.mrf.mxu0  ;;  %10356 = vst [vmem:[#allocation6_spill] sm:$0xff] %v6631_v13 }
 0x2a4   :  { %2303 = vmatmul.f32.gmra.mxu3 %v542_v16  ;;  %5145 = vmatmul.msk.f32.gmra.mxu1 %vm1000_vm0, %v921_v25 }
 0x2a5   :  { %5008 = vmatmul.msk.f32.gmra.mxu0 %vm1000_vm0, %v510_v17  ;;  %v933_v17 = vld [vmem:[%s10347_s1 + $0xfe8] sm:$0xff]  ;;  %v1684_v59 = vpop.f32.mrf.mxu2 }
 0x2a7   :  { %v2256_v62 = vpop.f32.mrf.mxu3 }
 0x2a8   :  { %v6598_v60 = vadd.f32 %v2256_v62, %v1663_v1  ;;  %v556_v1 = vld [vmem:[%s10347_s1 + $0x420] sm:$0xff] }
 0x2a9   :  { %1725 = vmatmul.f32.gmra.mxu2 %v556_v1 }
 0x2aa   :  { %v6608_v18 = vpop.f32.mrf.mxu0 }
 0x2ac   :  { %2306 = vmatmul.f32.gmra.mxu3 %v545_v3  ;;  %5146 = vmatmul.msk.f32.gmra.mxu1 %vm1000_vm0, %v924_v5  ;;  %v522_v3 = vld [vmem:[%s10347_s1 + $0x310] sm:$0xff] }
 0x2ad   :  { %5009 = vmatmul.msk.f32.gmra.mxu0 %vm1000_vm0, %v513_v11 }
 0x2af   :  { %v2259_v35 = vpop.f32.mrf.mxu3 }
 0x2b0   :  { %v6618_v37 = vadd.f32 %v2259_v35, %v1666_v47  ;;  %v559_v47 = vld [vmem:[%s10347_s1 + $0x438] sm:$0xff]  ;;  %v557_v35 = vld [vmem:[%s10347_s1 + $0x428] sm:$0xff] }
 0x2b1   :  { %1728 = vmatmul.f32.gmra.mxu2 %v559_v47  ;;  %v525_v47 = vld [vmem:[%s10347_s1 + $0x328] sm:$0xff] }
 0x2b2   :  { %v6626_v23 = vpop.f32.mrf.mxu0 }
 0x2b4   :  { %2309 = vmatmul.f32.gmra.mxu3 %v548_v42  ;;  %5147 = vmatmul.msk.f32.gmra.mxu1 %vm1000_vm0, %v927_v45  ;;  %v936_v42 = vld [vmem:[%s10347_s1 + $0x1000] sm:$0xff]  ;;  %v1687_v45 = vpop.f32.mrf.mxu2 }
 0x2b5   :  { %5010 = vmatmul.msk.f32.gmra.mxu0 %vm1000_vm0, %v516_v50 }
 0x2b7   :  { %v2262_v48 = vpop.f32.mrf.mxu3 }
 0x2b8   :  { %v6640_v57 = vadd.f32 %v2262_v48, %v1669_v38  ;;  %v6657_v38 = vpop.f32.mrf.mxu1 }
 0x2b9   :  { %1731 = vmatmul.f32.gmra.mxu2 %v562_v27  ;;  %v528_v27 = vld [vmem:[%s10347_s1 + $0x340] sm:$0xff] }
 0x2ba   :  { %v2825_v49 = vpop.f32.mrf.mxu0 }
 0x2bb   :  { %v2826_v61 = vadd.f32 %v2825_v49, %v6449_v34  ;;  %v554_v34 = vld [vmem:[%s10347_s1 + $0x410] sm:$0xff] }
 0x2bc   :  { %2312 = vmatmul.f32.gmra.mxu3 %v551_v22  ;;  %5148 = vmatmul.msk.f32.gmra.mxu1 %vm1000_vm0, %v930_v0 }
 0x2bd   :  { %v5228_v55 = vpack.i.bf16 %v2826_v61, %v2796_v7  ;;  %5011 = vmatmul.msk.f32.gmra.mxu0 %vm1000_vm0, %v519_v44  ;;  %v2212_v7 = vadd.f32 %v6505_v21, %v6307_v8  ;;  %v560_v44 = vld [vmem:[%s10347_s1 + $0x440] sm:$0xff]  ;;  %v939_v8 = vld [vmem:[%s10347_s1 + $0x1018] sm:$0xff]  ;;  %v1690_v21 = vpop.f32.mrf.mxu2 }
 0x2bf   :  { %5229 = vrot.lane.b32.xlu1 %v5228_v55, %s5557_s16  ;;  %v2265_v16 = vpop.f32.mrf.mxu3 }
 0x2c0   :  { %v6661_v25 = vadd.f32 %v2265_v16, %v1672_v33  ;;  %v565_v33 = vld [vmem:[%s10347_s1 + $0x468] sm:$0xff]  ;;  %v6677_v5 = vpop.f32.mrf.mxu1 }
 0x2c1   :  { %1734 = vmatmul.f32.gmra.mxu2 %v565_v33  ;;  %10357 = vst [vmem:[#allocation7_spill] sm:$0xff] %v6677_v5  ;;  %v531_v33 = vld [vmem:[%s10347_s1 + $0x358] sm:$0xff] }
 0x2c2   :  { %v2828_v62 = vpop.f32.mrf.mxu0 }
 0x2c3   :  { %v2829_v28 = vadd.f32 %v2828_v62, %v6468_v10 }
 0x2c4   :  { %2315 = vmatmul.f32.gmra.mxu3 %v554_v34  ;;  %5149 = vmatmul.msk.f32.gmra.mxu1 %vm1000_vm0, %v933_v17  ;;  %v942_v17 = vld [vmem:[%s10347_s1 + $0x1030] sm:$0xff] }
 0x2c5   :  { %5012 = vmatmul.msk.f32.gmra.mxu0 %vm1000_vm0, %v522_v3  ;;  %v1693_v62 = vpop.f32.mrf.mxu2 }
 0x2c7   :  { %v2268_v11 = vpop.f32.mrf.mxu3 }
 0x2c8   :  { %v6679_v1 = vadd.f32 %v2268_v11, %v1675_v19  ;;  %v568_v19 = vld [vmem:[%s10347_s1 + $0x480] sm:$0xff]  ;;  %v6703_v49 = vpop.f32.mrf.mxu1 }
 0x2c9   :  { %1737 = vmatmul.f32.gmra.mxu2 %v568_v19  ;;  %10358 = vst [vmem:[#allocation8_spill] sm:$0xff] %v6703_v49  ;;  %v534_v19 = vld [vmem:[%s10347_s1 + $0x370] sm:$0xff] }
 0x2ca   :  { %v2831_v50 = vpop.f32.mrf.mxu0 }
 0x2cb   :  { %v2832_v48 = vadd.f32 %v2831_v50, %v6486_v52  ;;  %v2805_v52 = vadd.f32 %v6513_v4, %v2212_v7  ;;  %v571_v4 = vld [vmem:[%s10347_s1 + $0x498] sm:$0xff]  ;;  %v566_v50 = vld [vmem:[%s10347_s1 + $0x470] sm:$0xff] }
 0x2cc   :  { %2318 = vmatmul.f32.gmra.mxu3 %v557_v35  ;;  %5150 = vmatmul.msk.f32.gmra.mxu1 %vm1000_vm0, %v936_v42 }
 0x2cd   :  { %v5243_v22 = vpack.i.bf16 %v2832_v48, %v2829_v28  ;;  %5013 = vmatmul.msk.f32.gmra.mxu0 %vm1000_vm0, %v525_v47  ;;  %v945_v47 = vld [vmem:[%s10347_s1 + $0x1048] sm:$0xff]  ;;  %v1696_v28 = vpop.f32.mrf.mxu2 }
 0x2cf   :  { %5244 = vrot.lane.b32.xlu0 %v5243_v22, %s5557_s16  ;;  %v2271_v0 = vpop.f32.mrf.mxu3 }
 0x2d0   :  { %v6700_v10 = vadd.f32 %v2271_v0, %v1678_v30  ;;  %v6732_v11 = vpop.f32.mrf.mxu1 }
 0x2d1   :  { %1740 = vmatmul.f32.gmra.mxu2 %v571_v4  ;;  %10359 = vst [vmem:[#allocation9_spill] sm:$0xff] %v6732_v11  ;;  %v2814_v4 = vadd.f32 %v6568_v53, %v6375_v39  ;;  %v572_v39 = vld [vmem:[%s10347_s1 + $0x4a0] sm:$0xff] }
 0x2d2   :  { %v2834_v61 = vpop.f32.mrf.mxu0 }
 0x2d3   :  { %v2835_v30 = vadd.f32 %v2834_v61, %v6503_v12  ;;  %v563_v12 = vld [vmem:[%s10347_s1 + $0x458] sm:$0xff] }
 0x2d4   :  { %2321 = vmatmul.f32.gmra.mxu3 %v560_v44  ;;  %5151 = vmatmul.msk.f32.gmra.mxu1 %vm1000_vm0, %v939_v8 }
 0x2d5   :  { %5014 = vmatmul.msk.f32.gmra.mxu0 %vm1000_vm0, %v528_v27  ;;  %v5233_v55 = vpack.i.bf16 %v2835_v30, %v2805_v52  ;;  %v1699_v61 = vpop.f32.mrf.mxu2  ;;  %v537_v30 = vld [vmem:[%s10347_s1 + $0x388] sm:$0xff] }
 0x2d7   :  { %5234 = vrot.lane.b32.xlu2 %v5233_v55, %s5558_s0  ;;  %v2274_v16 = vpop.f32.mrf.mxu3  ;;  %v580_v55 = vld [vmem:[%s10347_s1 + $0x4e0] sm:$0xff] }
 0x2d8   :  { %v6721_v34 = vadd.f32 %v2274_v16, %v1681_v20  ;;  %v574_v20 = vld [vmem:[%s10347_s1 + $0x4b0] sm:$0xff]  ;;  %v6756_v0 = vpop.f32.mrf.mxu1 }
 0x2d9   :  { %1743 = vmatmul.f32.gmra.mxu2 %v574_v20  ;;  %10360 = vst [vmem:[#allocation10_spill] sm:$0xff] %v6756_v0 }
 0x2da   :  { %v2837_v3 = vpop.f32.mrf.mxu0 }
 0x2db   :  { %v2838_v7 = vadd.f32 %v2837_v3, %v6523_v9  ;;  %v569_v9 = vld [vmem:[%s10347_s1 + $0x488] sm:$0xff] }
 0x2dc   :  { %2324 = vmatmul.f32.gmra.mxu3 %v563_v12  ;;  %5152 = vmatmul.msk.f32.gmra.mxu1 %vm1000_vm0, %v942_v17 }
 0x2dd   :  { %5015 = vmatmul.msk.f32.gmra.mxu0 %vm1000_vm0, %v531_v33  ;;  %v540_v33 = vld [vmem:[%s10347_s1 + $0x3a0] sm:$0xff]  ;;  %v1702_v20 = vpop.f32.mrf.mxu2 }
 0x2df   :  { %v2277_v35 = vpop.f32.mrf.mxu3 }
 0x2e0   :  { %v6739_v42 = vadd.f32 %v2277_v35, %v1684_v59  ;;  %v577_v59 = vld [vmem:[%s10347_s1 + $0x4c8] sm:$0xff]  ;;  %v6779_v12 = vpop.f32.mrf.mxu1  ;;  %v583_v35 = vld [vmem:[%s10347_s1 + $0x4f8] sm:$0xff] }
 0x2e1   :  { %1746 = vmatmul.f32.gmra.mxu2 %v577_v59  ;;  %10361 = vst [vmem:[#allocation11_spill] sm:$0xff] %v6779_v12 }
 0x2e2   :  { %v2840_v48 = vpop.f32.mrf.mxu0 }
 0x2e3   :  { %v2841_v22 = vadd.f32 %v2840_v48, %v6540_v43  ;;  %v948_v43 = vld [vmem:[%s10347_s1 + $0x1060] sm:$0xff]  ;;  %v575_v48 = vld [vmem:[%s10347_s1 + $0x4b8] sm:$0xff] }
 0x2e4   :  { %2327 = vmatmul.f32.gmra.mxu3 %v566_v50  ;;  %5153 = vmatmul.msk.f32.gmra.mxu1 %vm1000_vm0, %v945_v47 }
 0x2e5   :  { %v5248_v52 = vpack.i.bf16 %v2841_v22, %v2838_v7  ;;  %5016 = vmatmul.msk.f32.gmra.mxu0 %vm1000_vm0, %v534_v19  ;;  %v954_v19 = vld [vmem:[%s10347_s1 + $0x1090] sm:$0xff]  ;;  %v543_v22 = vld [vmem:[%s10347_s1 + $0x3b8] sm:$0xff]  ;;  %v1705_v59 = vpop.f32.mrf.mxu2 }
 0x2e7   :  { %5249 = vrot.lane.b32.xlu1 %v5248_v52, %s5558_s0  ;;  %v2280_v44 = vpop.f32.mrf.mxu3 }
 0x2e8   :  { %v6760_v8 = vadd.f32 %v2280_v44, %v1687_v45  ;;  %v6800_v47 = vpop.f32.mrf.mxu1  ;;  %v586_v44 = vld [vmem:[%s10347_s1 + $0x510] sm:$0xff] }
 0x2e9   :  { %1749 = vmatmul.f32.gmra.mxu2 %v580_v55  ;;  %10362 = vst [vmem:[#allocation12_spill] sm:$0xff] %v6800_v47 }
 0x2ea   :  { %v2843_v27 = vpop.f32.mrf.mxu0 }
 0x2eb   :  { %v2844_v45 = vadd.f32 %v2843_v27, %v6560_v24  ;;  %v951_v24 = vld [vmem:[%s10347_s1 + $0x1078] sm:$0xff] }
 0x2ec   :  { %2330 = vmatmul.f32.gmra.mxu3 %v569_v9  ;;  %5154 = vmatmul.msk.f32.gmra.mxu1 %vm1000_vm0, %v948_v43 }
 0x2ed   :  { %v5238_v16 = vpack.i.bf16 %v2844_v45, %v2814_v4  ;;  %5017 = vmatmul.msk.f32.gmra.mxu0 %vm1000_vm0, %v537_v30  ;;  %v546_v4 = vld [vmem:[%s10347_s1 + $0x3d0] sm:$0xff] }
 0x2ef   :  { %5239 = vrot.lane.b32.xlu2 %v5238_v16, %s5559_s11  ;;  %v2283_v17 = vpop.f32.mrf.mxu3 }
 0x2f0   :  { %v6782_v3 = vadd.f32 %v2283_v17, %v1690_v21  ;;  %v6832_v55 = vpop.f32.mrf.mxu1 }
 0x2f1   :  { %1752 = vmatmul.f32.gmra.mxu2 %v583_v35  ;;  %10363 = vst [vmem:[#allocation13_spill] sm:$0xff] %v6832_v55  ;;  %v4090_v55 = vld [vmem:[%s10350_s4 + $0x60] sm:$0xff] }
 0x2f2   :  { %v2846_v53 = vpop.f32.mrf.mxu0 }
 0x2f3   :  { %v2847_v52 = vadd.f32 %v2846_v53, %v6580_v56  ;;  %v578_v56 = vld [vmem:[%s10347_s1 + $0x4d0] sm:$0xff] }
 0x2f4   :  { %2333 = vmatmul.f32.gmra.mxu3 %v572_v39  ;;  %5155 = vmatmul.msk.f32.gmra.mxu1 %vm1000_vm0, %v951_v24  ;;  %v581_v39 = vld [vmem:[%s10347_s1 + $0x4e8] sm:$0xff]  ;;  %v960_v24 = vld [vmem:[%s10347_s1 + $0x10c0] sm:$0xff] }
 0x2f5   :  { %5018 = vmatmul.msk.f32.gmra.mxu0 %vm1000_vm0, %v540_v33  ;;  %v549_v33 = vld [vmem:[%s10347_s1 + $0x3e8] sm:$0xff] }
 0x2f6   :  { %v1708_v45 = vpop.f32.mrf.mxu2 }
 0x2f7   :  { %v2286_v21 = vpop.f32.mrf.mxu3 }
 0x2f8   :  { %v6798_v50 = vadd.f32 %v2286_v21, %v1693_v62  ;;  %v6856_v21 = vpop.f32.mrf.mxu1 }
 0x2f9   :  { %1755 = vmatmul.f32.gmra.mxu2 %v586_v44  ;;  %10364 = vst [vmem:[#allocation14_spill] sm:$0xff] %v6856_v21 }
 0x2fa   :  { %v2849_v7 = vpop.f32.mrf.mxu0 }
 0x2fb   :  { %v2850_v62 = vadd.f32 %v2849_v7, %v6598_v60  ;;  %v957_v60 = vld [vmem:[%s10347_s1 + $0x10a8] sm:$0xff]  ;;  %v584_v7 = vld [vmem:[%s10347_s1 + $0x500] sm:$0xff] }
 0x2fc   :  { %2336 = vmatmul.f32.gmra.mxu3 %v575_v48  ;;  %5156 = vmatmul.msk.f32.gmra.mxu1 %vm1000_vm0, %v954_v19 }
 0x2fd   :  { %v5253_v9 = vpack.i.bf16 %v2850_v62, %v2847_v52  ;;  %5019 = vmatmul.msk.f32.gmra.mxu0 %vm1000_vm0, %v543_v22  ;;  %v963_v22 = vld [vmem:[%s10347_s1 + $0x10d8] sm:$0xff]  ;;  %v552_v62 = vld [vmem:[%s10347_s1 + $0x400] sm:$0xff] }
 0x2ff   :  { %5254 = vrot.lane.b32.xlu2 %v5253_v9, %s5559_s11  ;;  %v2289_v43 = vpop.f32.mrf.mxu3 }
 0x300   :  { %v6819_v27 = vadd.f32 %v2289_v43, %v1696_v28  ;;  %v589_v28 = vld [vmem:[%s10347_s1 + $0x528] sm:$0xff]  ;;  %v6877_v9 = vpop.f32.mrf.mxu1 }
 0x301   :  { %1758 = vmatmul.f32.gmra.mxu2 %v589_v28  ;;  %10365 = vst [vmem:[#allocation15_spill] sm:$0xff] %v6877_v9  ;;  %v2191_v9 = vadd.f32 %v6357_v36, %v6172_v41  ;;  %v623_v41 = vld [vmem:[%s10347_s1 + $0x638] sm:$0xff] }
 0x302   :  { %v6827_v30 = vpop.f32.mrf.mxu0 }
 0x303   :  { %v2784_v11 = vadd.f32 %v6385_v2, %v2191_v9 }
 0x304   :  { %2339 = vmatmul.f32.gmra.mxu3 %v578_v56  ;;  %5157 = vmatmul.msk.f32.gmra.mxu1 %vm1000_vm0, %v957_v60  ;;  %v1711_v35 = vpop.f32.mrf.mxu2  ;;  %v587_v60 = vld [vmem:[%s10347_s1 + $0x518] sm:$0xff] }
 0x305   :  { %5020 = vmatmul.msk.f32.gmra.mxu0 %vm1000_vm0, %v546_v4  ;;  %v966_v4 = vld [vmem:[%s10347_s1 + $0x10f0] sm:$0xff] }
 0x307   :  { %v2292_v16 = vpop.f32.mrf.mxu3 }
 0x308   :  { %v6839_v17 = vadd.f32 %v2292_v16, %v1699_v61  ;;  %v592_v61 = vld [vmem:[%s10347_s1 + $0x540] sm:$0xff]  ;;  %v555_v16 = vld [vmem:[%s10347_s1 + $0x418] sm:$0xff] }
 0x309   :  { %1761 = vmatmul.f32.gmra.mxu2 %v592_v61  ;;  %v6897_v61 = vpop.f32.mrf.mxu1 }
 0x30a   :  { %v6847_v53 = vpop.f32.mrf.mxu0  ;;  %10366 = vst [vmem:[#allocation16_spill] sm:$0xff] %v6897_v61  ;;  %v5225_v61 = vpop.permute.xlu1 %5224 }
 0x30c   :  { %2342 = vmatmul.f32.gmra.mxu3 %v581_v39  ;;  %5158 = vmatmul.msk.f32.gmra.mxu1 %vm1000_vm0, %v960_v24  ;;  %v1714_v44 = vpop.f32.mrf.mxu2 }
 0x30d   :  { %5021 = vmatmul.msk.f32.gmra.mxu0 %vm1000_vm0, %v549_v33 }
 0x30f   :  { %v2295_v48 = vpop.f32.mrf.mxu3 }
 0x310   :  { %v6859_v19 = vadd.f32 %v2295_v48, %v1702_v20  ;;  %v595_v20 = vld [vmem:[%s10347_s1 + $0x558] sm:$0xff]  ;;  %v590_v48 = vld [vmem:[%s10347_s1 + $0x530] sm:$0xff] }
 0x311   :  { %1764 = vmatmul.f32.gmra.mxu2 %v595_v20 }
 0x312   :  { %v6867_v52 = vpop.f32.mrf.mxu0 }
 0x314   :  { %2345 = vmatmul.f32.gmra.mxu3 %v584_v7  ;;  %5159 = vmatmul.msk.f32.gmra.mxu1 %vm1000_vm0, %v963_v22  ;;  %v1717_v39 = vpop.f32.mrf.mxu2  ;;  %v969_v7 = vld [vmem:[%s10347_s1 + $0x1108] sm:$0xff] }
 0x315   :  { %5022 = vmatmul.msk.f32.gmra.mxu0 %vm1000_vm0, %v552_v62  ;;  %v558_v62 = vld [vmem:[%s10347_s1 + $0x430] sm:$0xff] }
 0x317   :  { %v2298_v43 = vpop.f32.mrf.mxu3 }
 0x318   :  { %v6879_v56 = vadd.f32 %v2298_v43, %v1705_v59  ;;  %v598_v59 = vld [vmem:[%s10347_s1 + $0x570] sm:$0xff] }
 0x319   :  { %1767 = vmatmul.f32.gmra.mxu2 %v598_v59 }
 0x31a   :  { %v2861_v28 = vpop.f32.mrf.mxu0 }
 0x31c   :  { %2348 = vmatmul.f32.gmra.mxu3 %v587_v60  ;;  %5160 = vmatmul.msk.f32.gmra.mxu1 %vm1000_vm0, %v966_v4  ;;  %v6908_v20 = vpop.f32.mrf.mxu2  ;;  %v601_v60 = vld [vmem:[%s10347_s1 + $0x588] sm:$0xff] }
 0x31d   :  { %5023 = vmatmul.msk.f32.gmra.mxu0 %vm1000_vm0, %v555_v16 }
 0x31f   :  { %v2301_v24 = vpop.f32.mrf.mxu3 }
 0x320   :  { %v6895_v33 = vadd.f32 %v2301_v24, %v1708_v45  ;;  %v2862_v45 = vadd.f32 %v2861_v28, %v6679_v1  ;;  %v593_v1 = vld [vmem:[%s10347_s1 + $0x548] sm:$0xff] }
 0x321   :  { %1770 = vmatmul.f32.gmra.mxu2 %v601_v60  ;;  %v561_v24 = vld [vmem:[%s10347_s1 + $0x448] sm:$0xff] }
 0x322   :  { %v2864_v22 = vpop.f32.mrf.mxu0 }
 0x323   :  { %v2865_v43 = vadd.f32 %v2864_v22, %v6700_v10  ;;  %v972_v10 = vld [vmem:[%s10347_s1 + $0x1120] sm:$0xff] }
 0x324   :  { %2351 = vmatmul.f32.gmra.mxu3 %v590_v48  ;;  %5161 = vmatmul.msk.f32.gmra.mxu1 %vm1000_vm0, %v969_v7  ;;  %v6931_v48 = vpop.f32.mrf.mxu2  ;;  %v6936_v7 = vpop.f32.mrf.mxu1 }
 0x325   :  { %v5258_v4 = vpack.i.bf16 %v2865_v43, %v2862_v45  ;;  %5024 = vmatmul.msk.f32.gmra.mxu0 %vm1000_vm0, %v558_v62  ;;  %10367 = vst [vmem:[#allocation17_spill] sm:$0xff] %v6936_v7  ;;  %v596_v45 = vld [vmem:[%s10347_s1 + $0x560] sm:$0xff]  ;;  %v975_v43 = vld [vmem:[%s10347_s1 + $0x1138] sm:$0xff] }
 0x327   :  { %5259 = vrot.lane.b32.xlu0 %v5258_v4, %s5557_s16  ;;  %v2304_v16 = vpop.f32.mrf.mxu3  ;;  %v564_v4 = vld [vmem:[%s10347_s1 + $0x460] sm:$0xff] }
 0x328   :  { %v6918_v59 = vadd.f32 %v2304_v16, %v1711_v35  ;;  %v604_v35 = vld [vmem:[%s10347_s1 + $0x5a0] sm:$0xff] }
 0x329   :  { %1773 = vmatmul.f32.gmra.mxu2 %v604_v35 }
 0x32a   :  { %v6926_v28 = vpop.f32.mrf.mxu0 }
 0x32c   :  { %2354 = vmatmul.f32.gmra.mxu3 %v593_v1  ;;  %5162 = vmatmul.msk.f32.gmra.mxu1 %vm1000_vm0, %v972_v10  ;;  %v6951_v16 = vpop.f32.mrf.mxu2  ;;  %v4093_v1 = vld [vmem:[%s10350_s4 + $0x78] sm:$0xff]  ;;  %v6961_v10 = vpop.f32.mrf.mxu1 }
 0x32d   :  { %5025 = vmatmul.msk.f32.gmra.mxu0 %vm1000_vm0, %v561_v24  ;;  %10368 = vst [vmem:[#allocation18_spill] sm:$0xff] %v6961_v10  ;;  %4338 = vmatpush.msra.mxu1 %v4093_v1 }
 0x32f   :  { %v2307_v22 = vpop.f32.mrf.mxu3 }
 0x330   :  { %v6940_v62 = vadd.f32 %v2307_v22, %v1714_v44  ;;  %v607_v44 = vld [vmem:[%s10347_s1 + $0x5b8] sm:$0xff]  ;;  %v4092_v22 = vld [vmem:[%s10350_s4 + $0x70] sm:$0xff] }
 0x331   :  { %1776 = vmatmul.f32.gmra.mxu2 %v607_v44  ;;  %4339 = vmatpush.msra.mxu1 %v4092_v22  ;;  %v567_v44 = vld [vmem:[%s10347_s1 + $0x478] sm:$0xff]  ;;  %v610_v22 = vld [vmem:[%s10347_s1 + $0x5d0] sm:$0xff] }
 0x332   :  { %v2870_v60 = vpop.f32.mrf.mxu0 }
 0x333   :  { %v2871_v1 = vadd.f32 %v2870_v60, %v6739_v42  ;;  %v4089_v42 = vld [vmem:[%s10350_s4 + $0x58] sm:$0xff] }
 0x334   :  { %2357 = vmatmul.f32.gmra.mxu3 %v596_v45  ;;  %5163 = vmatmul.msk.f32.gmra.mxu1 %vm1000_vm0, %v975_v43  ;;  %v599_v45 = vld [vmem:[%s10347_s1 + $0x578] sm:$0xff]  ;;  %v978_v43 = vld [vmem:[%s10347_s1 + $0x1150] sm:$0xff]  ;;  %v6982_v21 = vpop.f32.mrf.mxu2  ;;  %v6996_v60 = vpop.f32.mrf.mxu1 }
 0x335   :  { %5026 = vmatmul.msk.f32.gmra.mxu0 %vm1000_vm0, %v564_v4  ;;  %10369 = vst [vmem:[#allocation19_spill] sm:$0xff] %v6996_v60  ;;  %v4078_v60 = vld [vmem:[%s10350_s4] sm:$0xff] }
 0x337   :  { %v2310_v24 = vpop.f32.mrf.mxu3 }
 0x338   :  { %v6963_v35 = vadd.f32 %v2310_v24, %v1717_v39  ;;  %v4091_v39 = vld [vmem:[%s10350_s4 + $0x68] sm:$0xff] }
 0x339   :  { %4340 = vmatpush.msra.mxu1 %v4091_v39  ;;  %1779 = vmatmul.f32.gmra.mxu2 %v610_v22  ;;  %v4085_v22 = vld [vmem:[%s10350_s4 + $0x38] sm:$0xff] }
 0x33a   :  { %v2873_v4 = vpop.f32.mrf.mxu0 }
 0x33b   :  { %v2874_v24 = vadd.f32 %v2873_v4, %v6760_v8  ;;  %4341 = vmatpush.msra.mxu1 %v4090_v55  ;;  %v602_v55 = vld [vmem:[%s10347_s1 + $0x590] sm:$0xff]  ;;  %v981_v4 = vld [vmem:[%s10347_s1 + $0x1168] sm:$0xff] }
 0x33c   :  { %2360 = vmatmul.f32.gmra.mxu3 %v599_v45  ;;  %5164 = vmatmul.msk.f32.gmra.mxu1 %vm1000_vm0, %v978_v43  ;;  %v4088_v43 = vld [vmem:[%s10350_s4 + $0x50] sm:$0xff]  ;;  %v7018_v39 = vpop.f32.mrf.mxu2 }
 0x33d   :  { %v5263_v47 = vpack.i.bf16 %v2874_v24, %v2871_v1  ;;  %5027 = vmatmul.msk.f32.gmra.mxu0 %vm1000_vm0, %v567_v44  ;;  %4342 = vmatpush.msra.mxu1 %v4089_v42  ;;  %v4087_v44 = vld [vmem:[%s10350_s4 + $0x48] sm:$0xff]  ;;  %v4086_v24 = vld [vmem:[%s10350_s4 + $0x40] sm:$0xff] }
 0x33e   :  { %v613_v1 = vld [vmem:[%s10347_s1 + $0x5e8] sm:$0xff] }
 0x33f   :  { %5264 = vrot.lane.b32.xlu1 %v5263_v47, %s5558_s0  ;;  %v2313_v8 = vpop.f32.mrf.mxu3  ;;  %4343 = vmatpush.msra.mxu1 %v4088_v43  ;;  %v4084_v43 = vld [vmem:[%s10350_s4 + $0x30] sm:$0xff] }
 0x340   :  { %v6999_v45 = vadd.f32 %v2313_v8, %v6908_v20  ;;  %v570_v20 = vld [vmem:[%s10347_s1 + $0x490] sm:$0xff] }
 0x341   :  { %4344 = vmatpush.msra.mxu1 %v4087_v44  ;;  %1782 = vmatmul.f32.gmra.mxu2 %v613_v1  ;;  %v4083_v1 = vld [vmem:[%s10350_s4 + $0x28] sm:$0xff] }
 0x342   :  { %v7010_v47 = vpop.f32.mrf.mxu0 }
 0x343   :  { %4345 = vmatpush.msra.mxu1 %v4086_v24 }
 0x344   :  { %2363 = vmatmul.f32.gmra.mxu3 %v602_v55  ;;  %5165 = vmatmul.msk.f32.gmra.mxu1 %vm1000_vm0, %v981_v4  ;;  %v605_v55 = vld [vmem:[%s10347_s1 + $0x5a8] sm:$0xff]  ;;  %v984_v4 = vld [vmem:[%s10347_s1 + $0x1180] sm:$0xff]  ;;  %v7051_v24 = vpop.f32.mrf.mxu2 }
 0x345   :  { %5028 = vmatmul.msk.f32.gmra.mxu0 %vm1000_vm0, %v570_v20  ;;  %4346 = vmatpush.msra.mxu1 %v4085_v22  ;;  %v7043_v20 = vpop.f32.mrf.mxu1  ;;  %v616_v22 = vld [vmem:[%s10347_s1 + $0x600] sm:$0xff] }
 0x346   :  { %10370 = vst [vmem:[#allocation20_spill] sm:$0xff] %v7043_v20 }
 0x347   :  { %v2316_v42 = vpop.f32.mrf.mxu3  ;;  %4347 = vmatpush.msra.mxu1 %v4084_v43  ;;  %v4081_v43 = vld [vmem:[%s10350_s4 + $0x18] sm:$0xff] }
 0x348   :  { %v7032_v8 = vadd.f32 %v2316_v42, %v6931_v48  ;;  %v573_v48 = vld [vmem:[%s10347_s1 + $0x4a8] sm:$0xff]  ;;  %v4082_v42 = vld [vmem:[%s10350_s4 + $0x20] sm:$0xff] }
 0x349   :  { %4348 = vmatpush.msra.mxu1 %v4083_v1  ;;  %1785 = vmatmul.f32.gmra.mxu2 %v616_v22  ;;  %v576_v22 = vld [vmem:[%s10347_s1 + $0x4c0] sm:$0xff] }
 0x34a   :  { %v2879_v44 = vpop.f32.mrf.mxu0 }
 0x34b   :  { %4349 = vmatpush.msra.mxu1 %v4082_v42 }
 0x34c   :  { %2366 = vmatmul.f32.gmra.mxu3 %v605_v55  ;;  %5166 = vmatmul.msk.f32.gmra.mxu1 %vm1000_vm0, %v984_v4  ;;  %v4080_v55 = vld [vmem:[%s10350_s4 + $0x10] sm:$0xff]  ;;  %v608_v4 = vld [vmem:[%s10347_s1 + $0x5c0] sm:$0xff]  ;;  %v7084_v12 = vpop.f32.mrf.mxu2 }
 0x34d   :  { %5029 = vmatmul.msk.f32.gmra.mxu0 %vm1000_vm0, %v573_v48  ;;  %4350 = vmatpush.msra.mxu1 %v4081_v43  ;;  %v987_v48 = vld [vmem:[%s10347_s1 + $0x1198] sm:$0xff]  ;;  %v2880_v43 = vadd.f32 %v2879_v44, %v6798_v50  ;;  %v7089_v20 = vpop.f32.mrf.mxu1  ;;  %v4108_v44 = vld [vmem:[%s10350_s4 + $0xf0] sm:$0xff] }
 0x34e   :  { %10371 = vst [vmem:[#allocation21_spill] sm:$0xff] %v7089_v20  ;;  %v4109_v50 = vld [vmem:[%s10350_s4 + $0xf8] sm:$0xff] }
 0x34f   :  { %v2319_v1 = vpop.f32.mrf.mxu3  ;;  %4351 = vmatpush.msra.mxu1 %v4080_v55  ;;  %v619_v55 = vld [vmem:[%s10347_s1 + $0x618] sm:$0xff] }
 0x350   :  { %v7065_v40 = vadd.f32 %v2319_v1, %v6951_v16  ;;  %v4079_v16 = vld [vmem:[%s10350_s4 + $0x8] sm:$0xff] }
 0x351   :  { %4352 = vmatpush.msra.mxu1 %v4079_v16  ;;  %1788 = vmatmul.f32.gmra.mxu2 %v619_v55  ;;  %v4106_v16 = vld [vmem:[%s10350_s4 + $0xe0] sm:$0xff] }
 0x352   :  { %v2882_v42 = vpop.f32.mrf.mxu0 }
 0x353   :  { %v2883_v1 = vadd.f32 %v2882_v42, %v6819_v27  ;;  %4353 = vmatpush.msra.mxu1 %v4078_v60  ;;  %v611_v60 = vld [vmem:[%s10347_s1 + $0x5d8] sm:$0xff] }
 0x354   :  { %2369 = vmatmul.f32.gmra.mxu3 %v608_v4  ;;  %5167 = vmatmul.msk.f32.gmra.mxu1 %vm1000_vm0, %v987_v48  ;;  %v990_v48 = vld [vmem:[%s10347_s1 + $0x11b0] sm:$0xff] }
 0x355   :  { %v5268_v10 = vpack.i.bf16 %v2883_v1, %v2880_v43  ;;  %5030 = vmatmul.msk.f32.gmra.mxu0 %vm1000_vm0, %v576_v22  ;;  %4364 = vmatpush.msrb.mxu1 %v4109_v50  ;;  %v7120_v22 = vpop.f32.mrf.mxu2  ;;  %v622_v43 = vld [vmem:[%s10347_s1 + $0x630] sm:$0xff]  ;;  %v4105_v1 = vld [vmem:[%s10350_s4 + $0xd8] sm:$0xff]  ;;  %v7133_v55 = vpop.f32.mrf.mxu1 }
 0x356   :  { %10372 = vst [vmem:[#allocation22_spill] sm:$0xff] %v7133_v55  ;;  %v4100_v55 = vld [vmem:[%s10350_s4 + $0xb0] sm:$0xff] }
 0x357   :  { %5269 = vrot.lane.b32.xlu2 %v5268_v10, %s5559_s11  ;;  %v2322_v27 = vpop.f32.mrf.mxu3  ;;  %4365 = vmatpush.msrb.mxu1 %v4108_v44  ;;  %v4107_v10 = vld [vmem:[%s10350_s4 + $0xe8] sm:$0xff] }
 0x358   :  { %v7104_v4 = vadd.f32 %v2322_v27, %v6982_v21  ;;  %v579_v21 = vld [vmem:[%s10347_s1 + $0x4d8] sm:$0xff]  ;;  %v4104_v27 = vld [vmem:[%s10350_s4 + $0xd0] sm:$0xff] }
 0x359   :  { %4366 = vmatpush.msrb.mxu1 %v4107_v10  ;;  %1791 = vmatmul.f32.gmra.mxu2 %v622_v43  ;;  %v4103_v10 = vld [vmem:[%s10350_s4 + $0xc8] sm:$0xff]  ;;  %v4102_v43 = vld [vmem:[%s10350_s4 + $0xc0] sm:$0xff] }
 0x35a   :  { %v7115_v42 = vpop.f32.mrf.mxu0 }
 0x35b   :  { %4367 = vmatpush.msrb.mxu1 %v4106_v16 }
 0x35c   :  { %2372 = vmatmul.f32.gmra.mxu3 %v611_v60  ;;  %5168 = vmatmul.msk.f32.gmra.mxu1 %vm1000_vm0, %v990_v48  ;;  %v614_v60 = vld [vmem:[%s10347_s1 + $0x5f0] sm:$0xff]  ;;  %v993_v48 = vld [vmem:[%s10347_s1 + $0x11c8] sm:$0xff] }
 0x35d   :  { %5031 = vmatmul.msk.f32.gmra.mxu0 %vm1000_vm0, %v579_v21  ;;  %4368 = vmatpush.msrb.mxu1 %v4105_v1  ;;  %v7155_v16 = vpop.f32.mrf.mxu2  ;;  %v625_v1 = vld [vmem:[%s10347_s1 + $0x648] sm:$0xff]  ;;  %v7173_v20 = vpop.f32.mrf.mxu1 }
 0x35e   :  { %10373 = vst [vmem:[#allocation23_spill] sm:$0xff] %v7173_v20  ;;  %v2188_v20 = vadd.f32 %v6339_v14, %v6157_v26 }
 0x35f   :  { %v2325_v50 = vpop.f32.mrf.mxu3  ;;  %4369 = vmatpush.msrb.mxu1 %v4104_v27  ;;  %v7168_v27 = vpop.permute.xlu0 %5214 }
 0x360   :  { %v7139_v44 = vadd.f32 %v2325_v50, %v7018_v39  ;;  %v582_v39 = vld [vmem:[%s10347_s1 + $0x4f0] sm:$0xff]  ;;  %v4101_v50 = vld [vmem:[%s10350_s4 + $0xb8] sm:$0xff]  ;;  %v2781_v7 = vadd.f32 %v6365_v15, %v2188_v20  ;;  %v5216_v26 = vunpack.i.l.bf16 %v7168_v27  ;;  %v588_v15 = vld [vmem:[%s10347_s1 + $0x520] sm:$0xff]  ;;  %v5217_v5 = vunpack.i.h.bf16 %v7168_v27 }
 0x361   :  { %4370 = vmatpush.msrb.mxu1 %v4103_v10  ;;  %1794 = vmatmul.f32.gmra.mxu2 %v625_v1 }
 0x362   :  { %v7150_v21 = vpop.f32.mrf.mxu0  ;;  %v3500_v13 = vsel %vm1000_vm0, %v2781_v7, %v5216_v26  ;;  %v591_v7 = vld [vmem:[%s10347_s1 + $0x538] sm:$0xff]  ;;  %v7265_v26 = vpop.permute.xlu2 %5234 }
 0x363   :  { %4371 = vmatpush.msrb.mxu1 %v4102_v43  ;;  %v4099_v43 = vld [vmem:[%s10350_s4 + $0xa8] sm:$0xff] }
 0x364   :  { %2375 = vmatmul.f32.gmra.mxu3 %v614_v60  ;;  %5169 = vmatmul.msk.f32.gmra.mxu1 %vm1000_vm0, %v993_v48  ;;  %v617_v48 = vld [vmem:[%s10347_s1 + $0x608] sm:$0xff] }
 0x365   :  { %5032 = vmatmul.msk.f32.gmra.mxu0 %vm1000_vm0, %v582_v39  ;;  %4372 = vmatpush.msrb.mxu1 %v4101_v50  ;;  %v996_v39 = vld [vmem:[%s10347_s1 + $0x11e0] sm:$0xff]  ;;  %v7192_v50 = vpop.f32.mrf.mxu2 }
 0x367   :  { %v2328_v10 = vpop.f32.mrf.mxu3  ;;  %4373 = vmatpush.msrb.mxu1 %v4100_v55  ;;  %v628_v55 = vld [vmem:[%s10347_s1 + $0x660] sm:$0xff]  ;;  %v5220_v14 = vpop.permute.xlu0 %5219 }
 0x368   :  { %v7176_v60 = vadd.f32 %v2328_v10, %v7051_v24  ;;  %v585_v24 = vld [vmem:[%s10347_s1 + $0x508] sm:$0xff]  ;;  %v4098_v10 = vld [vmem:[%s10350_s4 + $0xa0] sm:$0xff]  ;;  %v5222_v27 = vunpack.i.h.bf16 %v5220_v14 }
 0x369   :  { %4374 = vmatpush.msrb.mxu1 %v4099_v43  ;;  %v4097_v43 = vld [vmem:[%s10350_s4 + $0x98] sm:$0xff]  ;;  %1797 = vmatmul.f32.gmra.mxu2 %v628_v55  ;;  %v4095_v55 = vld [vmem:[%s10350_s4 + $0x88] sm:$0xff] }
 0x36a   :  { %v7187_v1 = vpop.f32.mrf.mxu0 }
 0x36b   :  { %4375 = vmatpush.msrb.mxu1 %v4098_v10  ;;  %v999_v10 = vld [vmem:[%s10347_s1 + $0x11f8] sm:$0xff] }
 0x36c   :  { %2378 = vmatmul.f32.gmra.mxu3 %v617_v48  ;;  %5170 = vmatmul.msk.f32.gmra.mxu1 %vm1000_vm0, %v996_v39  ;;  %v4096_v48 = vld [vmem:[%s10350_s4 + $0x90] sm:$0xff] }
 0x36d   :  { %5033 = vmatmul.msk.f32.gmra.mxu0 %vm1000_vm0, %v585_v24  ;;  %4376 = vmatpush.msrb.mxu1 %v4097_v43  ;;  %v620_v24 = vld [vmem:[%s10347_s1 + $0x620] sm:$0xff]  ;;  %v7231_v20 = vpop.f32.mrf.mxu2 }
 0x36e   :  { %v4094_v43 = vld [vmem:[%s10350_s4 + $0x80] sm:$0xff] }
 0x36f   :  { %v2331_v49 = vpop.f32.mrf.mxu3  ;;  %4377 = vmatpush.msrb.mxu1 %v4096_v48  ;;  %v5221_v48 = vunpack.i.l.bf16 %v5220_v14  ;;  %v4123_v14 = vld [vmem:[%s10350_s4 + $0x168] sm:$0xff] }
 0x370   :  { %v7211_v39 = vadd.f32 %v2331_v49, %v7084_v12  ;;  %v7224_v49 = vpop.f32.mrf.mxu1 }
 0x371   :  { %10374 = vst [vmem:[#allocation24_spill] sm:$0xff] %v7224_v49  ;;  %4378 = vmatpush.msrb.mxu1 %v4095_v55  ;;  %v631_v49 = vld [vmem:[%s10347_s1 + $0x678] sm:$0xff]  ;;  %v5226_v55 = vunpack.i.l.bf16 %v5225_v61 }
 0x372   :  { %v7226_v12 = vpop.f32.mrf.mxu0  ;;  %1800 = vmatmul.f32.gmra.mxu2 %v631_v49 }
 0x373   :  { %4379 = vmatpush.msrb.mxu1 %v4094_v43  ;;  %v5227_v43 = vunpack.i.h.bf16 %v5225_v61  ;;  %v626_v61 = vld [vmem:[%s10347_s1 + $0x650] sm:$0xff] }
 0x374   :  { %2381 = vmatmul.f32.gmra.mxu3 %v620_v24  ;;  %5171 = vmatmul.msk.f32.gmra.mxu1 %vm1000_vm0, %v999_v10  ;;  %v3504_v24 = vsel %vm3503_vm1, %v3500_v13, %v5221_v48  ;;  %v4125_v13 = vld [vmem:[%s10350_s4 + $0x178] sm:$0xff] }
 0x375   :  { %5034 = vmatmul.msk.f32.gmra.mxu0 %vm1000_vm0, %v588_v15  ;;  %v3508_v9 = vsel %vm3507_vm2, %v3504_v24, %v5226_v55  ;;  %v4124_v15 = vld [vmem:[%s10350_s4 + $0x170] sm:$0xff]  ;;  %v5230_v55 = vpop.permute.xlu1 %5229 }
 0x377   :  { %v2334_v0 = vpop.f32.mrf.mxu3 }
 0x378   :  { %v7246_v10 = vadd.f32 %v2334_v0, %v7120_v22  ;;  %v2868_v0 = vadd.f32 %v6926_v28, %v6721_v34  ;;  %v7263_v22 = vpop.f32.mrf.mxu2  ;;  %v7267_v49 = vpop.f32.mrf.mxu1  ;;  %v634_v34 = vld [vmem:[%s10347_s1 + $0x690] sm:$0xff]  ;;  %v3501_v28 = vsel %vm1000_vm0, %v2784_v11, %v5217_v5  ;;  %v4122_v5 = vld [vmem:[%s10350_s4 + $0x160] sm:$0xff]  ;;  %v2194_v11 = vadd.f32 %v6377_v6, %v6193_v46 }
 0x379   :  { %10375 = vst [vmem:[#allocation25_spill] sm:$0xff] %v7267_v49  ;;  %v5240_v46 = vpop.permute.xlu2 %5239  ;;  %v4120_v6 = vld [vmem:[%s10350_s4 + $0x150] sm:$0xff] }
 0x37a   :  { %v2897_v36 = vpop.f32.mrf.mxu0  ;;  %1803 = vmatmul.f32.gmra.mxu2 %v634_v34 }
 0x37b   :  { %v2898_v2 = vadd.f32 %v2897_v36, %v6918_v59 }
 0x37c   :  { %2384 = vmatmul.f32.gmra.mxu3 %v623_v41  ;;  %4354 = vmatmul.f32.vlgmr.msra.gmra.mxu1 %v3508_v9  ;;  %v3505_v41 = vsel %vm3503_vm1, %v3501_v28, %v5222_v27  ;;  %v637_v9 = vld [vmem:[%s10347_s1 + $0x6a8] sm:$0xff]  ;;  %v2787_v27 = vadd.f32 %v6403_v31, %v2194_v11  ;;  %v5241_v28 = vunpack.i.l.bf16 %v5240_v46  ;;  %v4118_v31 = vld [vmem:[%s10350_s4 + $0x140] sm:$0xff] }
 0x37d   :  { %v5273_v59 = vpack.i.bf16 %v2898_v2, %v2868_v0  ;;  %5035 = vmatmul.msk.f32.gmra.mxu0 %vm1000_vm0, %v591_v7  ;;  %4390 = vmatpush.msra.mxu1 %v4125_v13  ;;  %v4121_v7 = vld [vmem:[%s10350_s4 + $0x158] sm:$0xff]  ;;  %v5231_v13 = vunpack.i.l.bf16 %v5230_v55  ;;  %v3509_v0 = vsel %vm3507_vm2, %v3505_v41, %v5227_v43  ;;  %v629_v41 = vld [vmem:[%s10347_s1 + $0x668] sm:$0xff] }
 0x37e   :  { %v597_v11 = vld [vmem:[%s10347_s1 + $0x568] sm:$0xff] }
 0x37f   :  { %5274 = vrot.lane.b32.xlu0 %v5273_v59, %s5557_s16  ;;  %v2337_v48 = vpop.f32.mrf.mxu3  ;;  %4391 = vmatpush.msra.mxu1 %v4124_v15  ;;  %v5236_v15 = vunpack.i.l.bf16 %v7265_v26  ;;  %v4119_v59 = vld [vmem:[%s10350_s4 + $0x148] sm:$0xff]  ;;  %v3502_v43 = vsel %vm1000_vm0, %v2787_v27, %v5231_v13  ;;  %v640_v27 = vld [vmem:[%s10347_s1 + $0x6c0] sm:$0xff] }
 0x380   :  { %v7282_v24 = vadd.f32 %v2337_v48, %v7155_v16  ;;  %v594_v16 = vld [vmem:[%s10347_s1 + $0x550] sm:$0xff]  ;;  %v7300_v2 = vpop.f32.mrf.mxu2  ;;  %v7311_v34 = vpop.f32.mrf.mxu1 }
 0x381   :  { %4392 = vmatpush.msra.mxu1 %v4123_v14  ;;  %10376 = vst [vmem:[#allocation26_spill] sm:$0xff] %v7311_v34 }
 0x382   :  { %v2900_v36 = vpop.f32.mrf.mxu0  ;;  %1806 = vmatmul.f32.gmra.mxu2 %v637_v9  ;;  %v4116_v9 = vld [vmem:[%s10350_s4 + $0x130] sm:$0xff] }
 0x383   :  { %4393 = vmatpush.msra.mxu1 %v4122_v5 }
 0x384   :  { %2387 = vmatmul.f32.gmra.mxu3 %v626_v61  ;;  %4357 = vmatmul.f32.gmra.mxu1 %v3509_v0  ;;  %v3506_v61 = vsel %vm3503_vm1, %v3502_v43, %v5236_v15  ;;  %v5250_v43 = vpop.permute.xlu1 %5249 }
 0x385   :  { %5036 = vmatmul.msk.f32.gmra.mxu0 %vm1000_vm0, %v594_v16  ;;  %4394 = vmatpush.msra.mxu1 %v4121_v7  ;;  %v5232_v16 = vunpack.i.h.bf16 %v5230_v55  ;;  %v2901_v7 = vadd.f32 %v2900_v36, %v6940_v62  ;;  %v3510_v0 = vsel %vm3507_vm2, %v3506_v61, %v5241_v28  ;;  %v2817_v62 = vadd.f32 %v6588_v32, %v6395_v51  ;;  %v4115_v36 = vld [vmem:[%s10350_s4 + $0x128] sm:$0xff] }
 0x386   :  { %v2877_v61 = vadd.f32 %v7010_v47, %v6782_v3  ;;  %v2820_v3 = vadd.f32 %v6608_v18, %v6413_v29  ;;  %v4111_v47 = vld [vmem:[%s10350_s4 + $0x108] sm:$0xff]  ;;  %v4110_v18 = vld [vmem:[%s10350_s4 + $0x100] sm:$0xff] }
 0x387   :  { %v2340_v14 = vpop.f32.mrf.mxu3  ;;  %4395 = vmatpush.msra.mxu1 %v4120_v6  ;;  %v3511_v15 = vsel %vm1000_vm0, %v2817_v62, %v5232_v16 }
 0x388   :  { %v7318_v48 = vadd.f32 %v2340_v14, %v7192_v50  ;;  %v4117_v50 = vld [vmem:[%s10350_s4 + $0x138] sm:$0xff]  ;;  %v7336_v6 = vpop.f32.mrf.mxu2  ;;  %v5245_v14 = vpop.permute.xlu0 %5244 }
 0x389   :  { %4396 = vmatpush.msra.mxu1 %v4119_v59  ;;  %v5242_v59 = vunpack.i.h.bf16 %v5240_v46  ;;  %v7353_v51 = vpop.f32.mrf.mxu1 }
 0x38a   :  { %v2903_v5 = vpop.f32.mrf.mxu0  ;;  %1809 = vmatmul.f32.gmra.mxu2 %v640_v27  ;;  %v643_v27 = vld [vmem:[%s10347_s1 + $0x6d8] sm:$0xff] }
 0x38b   :  { %v2904_v13 = vadd.f32 %v2903_v5, %v6963_v35  ;;  %4397 = vmatpush.msra.mxu1 %v4118_v31  ;;  %v5237_v35 = vunpack.i.h.bf16 %v7265_v26  ;;  %v4114_v26 = vld [vmem:[%s10350_s4 + $0x120] sm:$0xff] }
 0x38c   :  { %2390 = vmatmul.f32.gmra.mxu3 %v629_v41  ;;  %4360 = vmatmul.f32.gmra.mxu1 %v3510_v0  ;;  %v632_v31 = vld [vmem:[%s10347_s1 + $0x680] sm:$0xff]  ;;  %v5251_v0 = vunpack.i.l.bf16 %v5250_v43 }
 0x38d   :  { %v5288_v55 = vpack.i.bf16 %v2904_v13, %v2901_v7  ;;  %5037 = vmatmul.msk.f32.gmra.mxu0 %vm1000_vm0, %v597_v11  ;;  %4398 = vmatpush.msra.mxu1 %v4117_v50  ;;  %v600_v41 = vld [vmem:[%s10347_s1 + $0x580] sm:$0xff]  ;;  %v3514_v5 = vsel %vm3503_vm1, %v3511_v15, %v5237_v35  ;;  %v5246_v11 = vunpack.i.l.bf16 %v5245_v14  ;;  %v5255_v13 = vpop.permute.xlu2 %5254  ;;  %v635_v15 = vld [vmem:[%s10347_s1 + $0x698] sm:$0xff] }
 0x38e   :  { %v3517_v16 = vsel %vm3507_vm2, %v3514_v5, %v5242_v59  ;;  %v5256_v62 = vunpack.i.l.bf16 %v5255_v13  ;;  %v646_v5 = vld [vmem:[%s10347_s1 + $0x6f0] sm:$0xff] }
 0x38f   :  { %5289 = vrot.lane.b32.xlu0 %v5288_v55, %s5557_s16  ;;  %v2343_v28 = vpop.f32.mrf.mxu3  ;;  %4399 = vmatpush.msra.mxu1 %v4116_v9  ;;  %v4112_v9 = vld [vmem:[%s10350_s4 + $0x110] sm:$0xff]  ;;  %v3512_v35 = vsel %vm1000_vm0, %v2820_v3, %v5246_v11  ;;  %v5257_v11 = vunpack.i.h.bf16 %v5255_v13 }
 0x390   :  { %v7356_v32 = vadd.f32 %v2343_v28, %v7231_v20  ;;  %v4113_v20 = vld [vmem:[%s10350_s4 + $0x118] sm:$0xff]  ;;  %v7375_v7 = vpop.f32.mrf.mxu2  ;;  %v3515_v29 = vsel %vm3503_vm1, %v3512_v35, %v5251_v0  ;;  %v2886_v35 = vadd.f32 %v7115_v42, %v6839_v17 }
 0x391   :  { %4400 = vmatpush.msra.mxu1 %v4115_v36  ;;  %v7401_v59 = vpop.f32.mrf.mxu1 }
 0x392   :  { %v2906_v46 = vpop.f32.mrf.mxu0  ;;  %1812 = vmatmul.f32.gmra.mxu2 %v643_v27 }
 0x393   :  { %v2907_v50 = vadd.f32 %v2906_v46, %v6999_v45  ;;  %4401 = vmatpush.msra.mxu1 %v4114_v26  ;;  %v603_v26 = vld [vmem:[%s10347_s1 + $0x598] sm:$0xff] }
 0x394   :  { %2393 = vmatmul.f32.gmra.mxu3 %v632_v31  ;;  %4380 = vmatmul.f32.vlgmr.msrb.gmra.mxu1 %v3517_v16  ;;  %v3518_v31 = vsel %vm3507_vm2, %v3515_v29, %v5256_v62  ;;  %v638_v16 = vld [vmem:[%s10347_s1 + $0x6b0] sm:$0xff] }
 0x395   :  { %v5278_v45 = vpack.i.bf16 %v2907_v50, %v2877_v61  ;;  %5038 = vmatmul.msk.f32.gmra.mxu0 %vm1000_vm0, %v600_v41  ;;  %4402 = vmatpush.msra.mxu1 %v4113_v20  ;;  %v5252_v41 = vunpack.i.h.bf16 %v5250_v43  ;;  %v2823_v20 = vadd.f32 %v6626_v23, %v6429_v58  ;;  %v606_v58 = vld [vmem:[%s10347_s1 + $0x5b0] sm:$0xff] }
 0x397   :  { %5279 = vrot.lane.b32.xlu1 %v5278_v45, %s5558_s0  ;;  %v2346_v55 = vpop.f32.mrf.mxu3  ;;  %4403 = vmatpush.msra.mxu1 %v4112_v9 }
 0x398   :  { %v7392_v36 = vadd.f32 %v2346_v55, %v7263_v22  ;;  %v5247_v22 = vunpack.i.h.bf16 %v5245_v14  ;;  %v7407_v46 = vpop.f32.mrf.mxu2  ;;  %v609_v55 = vld [vmem:[%s10347_s1 + $0x5c8] sm:$0xff] }
 0x399   :  { %4404 = vmatpush.msra.mxu1 %v4111_v47  ;;  %v7434_v3 = vpop.f32.mrf.mxu1  ;;  %v641_v47 = vld [vmem:[%s10347_s1 + $0x6c8] sm:$0xff] }
 0x39a   :  { %v2909_v28 = vpop.f32.mrf.mxu0  ;;  %1815 = vmatmul.f32.gmra.mxu2 %v646_v5  ;;  %v3513_v61 = vsel %vm1000_vm0, %v2823_v20, %v5247_v22 }
 0x39b   :  { %4405 = vmatpush.msra.mxu1 %v4110_v18  ;;  %v3516_v43 = vsel %vm3503_vm1, %v3513_v61, %v5252_v41  ;;  %v2910_v23 = vadd.f32 %v2909_v28, %v7032_v8  ;;  %v644_v41 = vld [vmem:[%s10347_s1 + $0x6e0] sm:$0xff] }
 0x39c   :  { %2396 = vmatmul.f32.gmra.mxu3 %v635_v15  ;;  %4383 = vmatmul.f32.gmra.mxu1 %v3518_v31  ;;  %v3519_v9 = vsel %vm3507_vm2, %v3516_v43, %v5257_v11  ;;  %v5260_v15 = vpop.permute.xlu0 %5259 }
 0x39d   :  { %5039 = vmatmul.msk.f32.gmra.mxu0 %vm1000_vm0, %v603_v26  ;;  %v5261_v26 = vunpack.i.l.bf16 %v5260_v15 }
 0x39f   :  { %v2349_v14 = vpop.f32.mrf.mxu3 }
 0x3a0   :  { %v7417_v50 = vadd.f32 %v2349_v14, %v7300_v2  ;;  %v7429_v27 = vpop.f32.mrf.mxu2  ;;  %v649_v2 = vld [vmem:[%s10347_s1 + $0x708] sm:$0xff]  ;;  %v612_v14 = vld [vmem:[%s10347_s1 + $0x5e0] sm:$0xff] }
 0x3a2   :  { %v2912_v0 = vpop.f32.mrf.mxu0  ;;  %1818 = vmatmul.f32.gmra.mxu2 %v649_v2 }
 0x3a3   :  { %v2913_v13 = vadd.f32 %v2912_v0, %v7065_v40 }
 0x3a4   :  { %2399 = vmatmul.f32.gmra.mxu3 %v638_v16  ;;  %4386 = vmatmul.f32.gmra.mxu1 %v3519_v9  ;;  %v5262_v16 = vunpack.i.h.bf16 %v5260_v15 }
 0x3a5   :  { %v5293_v45 = vpack.i.bf16 %v2913_v13, %v2910_v23  ;;  %5040 = vmatmul.msk.f32.gmra.mxu0 %vm1000_vm0, %v606_v58  ;;  %v2856_v23 = vadd.f32 %v6847_v53, %v6640_v57 }
 0x3a7   :  { %5294 = vrot.lane.b32.xlu1 %v5293_v45, %s5558_s0  ;;  %v2352_v8 = vpop.f32.mrf.mxu3  ;;  %v647_v45 = vld [vmem:[%s10347_s1 + $0x6f8] sm:$0xff] }
 0x3a8   :  { %v7439_v40 = vadd.f32 %v2352_v8, %v7336_v6  ;;  %v7450_v18 = vpop.f32.mrf.mxu2  ;;  %v652_v6 = vld [vmem:[%s10347_s1 + $0x720] sm:$0xff]  ;;  %v3521_v8 = vsel %vm1000_vm0, %v2856_v23, %v5262_v16 }
 0x3a9   :  { %v624_v16 = vld [vmem:[%s10347_s1 + $0x640] sm:$0xff] }
 0x3aa   :  { %v2915_v62 = vpop.f32.mrf.mxu0  ;;  %1821 = vmatmul.f32.gmra.mxu2 %v652_v6 }
 0x3ab   :  { %v2916_v29 = vadd.f32 %v2915_v62, %v7104_v4  ;;  %v2853_v4 = vadd.f32 %v6827_v30, %v6618_v37  ;;  %v655_v37 = vld [vmem:[%s10347_s1 + $0x738] sm:$0xff]  ;;  %v7472_v30 = vpop.f32.mrf.mxu1 }
 0x3ac   :  { %2402 = vmatmul.f32.gmra.mxu3 %v641_v47  ;;  %v615_v62 = vld [vmem:[%s10347_s1 + $0x5f8] sm:$0xff] }
 0x3ad   :  { %v5283_v28 = vpack.i.bf16 %v2916_v29, %v2886_v35  ;;  %5041 = vmatmul.msk.f32.gmra.mxu0 %vm1000_vm0, %v609_v55  ;;  %v3520_v61 = vsel %vm1000_vm0, %v2853_v4, %v5261_v26  ;;  %v658_v35 = vld [vmem:[%s10347_s1 + $0x750] sm:$0xff] }
 0x3af   :  { %5284 = vrot.lane.b32.xlu2 %v5283_v28, %s5559_s11  ;;  %v2355_v22 = vpop.f32.mrf.mxu3  ;;  %v650_v28 = vld [vmem:[%s10347_s1 + $0x710] sm:$0xff] }
 0x3b0   :  { %v7458_v17 = vadd.f32 %v2355_v22, %v7375_v7  ;;  %v1774_v7 = vpop.f32.mrf.mxu2  ;;  %v618_v22 = vld [vmem:[%s10347_s1 + $0x610] sm:$0xff] }
 0x3b1   :  { %v5270_v42 = vpop.permute.xlu2 %5269  ;;  %v5265_v31 = vpop.permute.xlu1 %5264 }
 0x3b2   :  { %v5271_v5 = vunpack.i.l.bf16 %v5270_v42  ;;  %v5266_v20 = vunpack.i.l.bf16 %v5265_v31  ;;  %v2918_v11 = vpop.f32.mrf.mxu0  ;;  %v5267_v58 = vunpack.i.h.bf16 %v5265_v31  ;;  %1824 = vmatmul.f32.gmra.mxu2 %v655_v37  ;;  %v5272_v2 = vunpack.i.h.bf16 %v5270_v42  ;;  %v661_v42 = vld [vmem:[%s10347_s1 + $0x768] sm:$0xff]  ;;  %v656_v37 = vld [vmem:[%s10347_s1 + $0x740] sm:$0xff] }
 0x3b3   :  { %v2919_v57 = vadd.f32 %v2918_v11, %v7139_v44  ;;  %v7497_v15 = vpop.f32.mrf.mxu1 }
 0x3b4   :  { %v3523_v43 = vsel %vm3503_vm1, %v3520_v61, %v5266_v20  ;;  %2405 = vmatmul.f32.gmra.mxu3 %v644_v41  ;;  %v3524_v55 = vsel %vm3503_vm1, %v3521_v8, %v5267_v58  ;;  %v653_v41 = vld [vmem:[%s10347_s1 + $0x728] sm:$0xff]  ;;  %v667_v58 = vld [vmem:[%s10347_s1 + $0x798] sm:$0xff] }
 0x3b5   :  { %5042 = vmatmul.msk.f32.gmra.mxu0 %vm1000_vm0, %v612_v14  ;;  %v3526_v0 = vsel %vm3507_vm2, %v3523_v43, %v5271_v5  ;;  %v3527_v6 = vsel %vm3507_vm2, %v3524_v55, %v5272_v2  ;;  %v621_v20 = vld [vmem:[%s10347_s1 + $0x628] sm:$0xff]  ;;  %v664_v14 = vld [vmem:[%s10347_s1 + $0x780] sm:$0xff]  ;;  %v4140_v2 = vld [vmem:[%s10350_s4 + $0x1f0] sm:$0xff] }
 0x3b6   :  { %4406 = vmatmul.f32.vlgmr.msra.gmra.mxu1 %v3526_v0 }
 0x3b7   :  { %v2358_v13 = vpop.f32.mrf.mxu3 }
 0x3b8   :  { %v7480_v9 = vadd.f32 %v2358_v13, %v7407_v46  ;;  %v1777_v46 = vpop.f32.mrf.mxu2 }
 0x3ba   :  { %v2921_v47 = vpop.f32.mrf.mxu0  ;;  %1827 = vmatmul.f32.gmra.mxu2 %v658_v35 }
 0x3bb   :  { %v2922_v53 = vadd.f32 %v2921_v47, %v7176_v60  ;;  %v627_v47 = vld [vmem:[%s10347_s1 + $0x658] sm:$0xff] }
 0x3bc   :  { %2408 = vmatmul.f32.gmra.mxu3 %v647_v45  ;;  %v659_v45 = vld [vmem:[%s10347_s1 + $0x758] sm:$0xff] }
 0x3bd   :  { %v5298_v29 = vpack.i.bf16 %v2922_v53, %v2919_v57  ;;  %5043 = vmatmul.msk.f32.gmra.mxu0 %vm1000_vm0, %v615_v62  ;;  %v4139_v62 = vld [vmem:[%s10350_s4 + $0x1e8] sm:$0xff]  ;;  %v670_v57 = vld [vmem:[%s10347_s1 + $0x7b0] sm:$0xff]  ;;  %v4138_v53 = vld [vmem:[%s10350_s4 + $0x1e0] sm:$0xff] }
 0x3be   :  { %4409 = vmatmul.f32.gmra.mxu1 %v3527_v6  ;;  %v4136_v6 = vld [vmem:[%s10350_s4 + $0x1d0] sm:$0xff] }
 0x3bf   :  { %5299 = vrot.lane.b32.xlu2 %v5298_v29, %s5559_s11  ;;  %v2361_v44 = vpop.f32.mrf.mxu3 }
 0x3c0   :  { %v7501_v60 = vadd.f32 %v2361_v44, %v7429_v27  ;;  %v1780_v4 = vpop.f32.mrf.mxu2  ;;  %v662_v44 = vld [vmem:[%s10347_s1 + $0x770] sm:$0xff] }
 0x3c2   :  { %v7506_v26 = vpop.f32.mrf.mxu0  ;;  %1830 = vmatmul.f32.gmra.mxu2 %v661_v42 }
 0x3c4   :  { %2411 = vmatmul.f32.gmra.mxu3 %v650_v28 }
 0x3c5   :  { %5044 = vmatmul.msk.f32.gmra.mxu0 %vm1000_vm0, %v618_v22  ;;  %v630_v22 = vld [vmem:[%s10347_s1 + $0x670] sm:$0xff] }
 0x3c7   :  { %v2364_v27 = vpop.f32.mrf.mxu3 }
 0x3c8   :  { %v7516_v31 = vadd.f32 %v2364_v27, %v7450_v18  ;;  %v1783_v11 = vpop.f32.mrf.mxu2 }
 0x3ca   :  { %v7521_v5 = vpop.f32.mrf.mxu0  ;;  %1833 = vmatmul.f32.gmra.mxu2 %v664_v14  ;;  %v4134_v14 = vld [vmem:[%s10350_s4 + $0x1c0] sm:$0xff] }
 0x3cc   :  { %2414 = vmatmul.f32.gmra.mxu3 %v653_v41 }
 0x3cd   :  { %5045 = vmatmul.msk.f32.gmra.mxu0 %vm1000_vm0, %v621_v20  ;;  %v673_v20 = vld [vmem:[%s10347_s1 + $0x7c8] sm:$0xff] }
 0x3cf   :  { %v2367_v18 = vpop.f32.mrf.mxu3 }
 0x3d0   :  { %v7530_v61 = vadd.f32 %v2367_v18, %v1774_v7  ;;  %v7540_v0 = vpop.f32.mrf.mxu2  ;;  %v4141_v7 = vld [vmem:[%s10350_s4 + $0x1f8] sm:$0xff] }
 0x3d1   :  { %4416 = vmatpush.msrb.mxu1 %v4141_v7 }
 0x3d2   :  { %v7535_v43 = vpop.f32.mrf.mxu0  ;;  %1836 = vmatmul.f32.gmra.mxu2 %v667_v58  ;;  %v665_v58 = vld [vmem:[%s10347_s1 + $0x788] sm:$0xff] }
 0x3d3   :  { %4417 = vmatpush.msrb.mxu1 %v4140_v2 }
 0x3d4   :  { %2417 = vmatmul.f32.gmra.mxu3 %v656_v37 }
 0x3d5   :  { %5046 = vmatmul.msk.f32.gmra.mxu0 %vm1000_vm0, %v624_v16  ;;  %4418 = vmatpush.msrb.mxu1 %v4139_v62  ;;  %v4132_v16 = vld [vmem:[%s10350_s4 + $0x1b0] sm:$0xff] }
 0x3d7   :  { %v2370_v23 = vpop.f32.mrf.mxu3  ;;  %4419 = vmatpush.msrb.mxu1 %v4138_v53  ;;  %v4128_v53 = vld [vmem:[%s10350_s4 + $0x190] sm:$0xff] }
 0x3d8   :  { %v7549_v13 = vadd.f32 %v2370_v23, %v1777_v46  ;;  %v7563_v55 = vpop.f32.mrf.mxu2  ;;  %v4137_v46 = vld [vmem:[%s10350_s4 + $0x1d8] sm:$0xff]  ;;  %v633_v23 = vld [vmem:[%s10347_s1 + $0x688] sm:$0xff] }
 0x3d9   :  { %4420 = vmatpush.msrb.mxu1 %v4137_v46  ;;  %v668_v46 = vld [vmem:[%s10347_s1 + $0x7a0] sm:$0xff] }
 0x3da   :  { %v2933_v8 = vpop.f32.mrf.mxu0  ;;  %1839 = vmatmul.f32.gmra.mxu2 %v670_v57 }
 0x3db   :  { %4421 = vmatpush.msrb.mxu1 %v4136_v6  ;;  %v2934_v42 = vadd.f32 %v2933_v8, %v7318_v48  ;;  %v4133_v48 = vld [vmem:[%s10350_s4 + $0x1b8] sm:$0xff]  ;;  %v4130_v8 = vld [vmem:[%s10350_s4 + $0x1a0] sm:$0xff] }
 0x3dc   :  { %2420 = vmatmul.f32.gmra.mxu3 %v659_v45  ;;  %v676_v45 = vld [vmem:[%s10347_s1 + $0x7e0] sm:$0xff] }
 0x3dd   :  { %5047 = vmatmul.msk.f32.gmra.mxu0 %vm1000_vm0, %v627_v47  ;;  %v4129_v47 = vld [vmem:[%s10350_s4 + $0x198] sm:$0xff]  ;;  %v636_v6 = vld [vmem:[%s10347_s1 + $0x6a0] sm:$0xff] }
 0x3df   :  { %v2373_v35 = vpop.f32.mrf.mxu3 }
 0x3e0   :  { %v7575_v29 = vadd.f32 %v2373_v35, %v1780_v4  ;;  %v4135_v4 = vld [vmem:[%s10350_s4 + $0x1c8] sm:$0xff]  ;;  %v1792_v41 = vpop.f32.mrf.mxu2 }
 0x3e1   :  { %4422 = vmatpush.msrb.mxu1 %v4135_v4 }
 0x3e2   :  { %v2936_v28 = vpop.f32.mrf.mxu0  ;;  %1842 = vmatmul.f32.gmra.mxu2 %v673_v20 }
 0x3e3   :  { %v2937_v27 = vadd.f32 %v2936_v28, %v7356_v32  ;;  %4423 = vmatpush.msrb.mxu1 %v4134_v14  ;;  %v679_v28 = vld [vmem:[%s10347_s1 + $0x7f8] sm:$0xff] }
 0x3e4   :  { %2423 = vmatmul.f32.gmra.mxu3 %v662_v44  ;;  %v639_v14 = vld [vmem:[%s10347_s1 + $0x6b8] sm:$0xff] }
 0x3e5   :  { %v5303_v18 = vpack.i.bf16 %v2937_v27, %v2934_v42  ;;  %5048 = vmatmul.msk.f32.gmra.mxu0 %vm1000_vm0, %v630_v22  ;;  %4424 = vmatpush.msrb.mxu1 %v4133_v48  ;;  %v4126_v22 = vld [vmem:[%s10350_s4 + $0x180] sm:$0xff]  ;;  %v671_v27 = vld [vmem:[%s10347_s1 + $0x7b8] sm:$0xff] }
 0x3e7   :  { %5304 = vrot.lane.b32.xlu0 %v5303_v18, %s5557_s16  ;;  %v2376_v32 = vpop.f32.mrf.mxu3  ;;  %4425 = vmatpush.msrb.mxu1 %v4132_v16 }
 0x3e8   :  { %v7602_v37 = vadd.f32 %v2376_v32, %v1783_v11  ;;  %v4131_v11 = vld [vmem:[%s10350_s4 + $0x1a8] sm:$0xff]  ;;  %v1795_v2 = vpop.f32.mrf.mxu2 }
 0x3e9   :  { %4426 = vmatpush.msrb.mxu1 %v4131_v11  ;;  %v642_v11 = vld [vmem:[%s10347_s1 + $0x6d0] sm:$0xff] }
 0x3ea   :  { %v7610_v7 = vpop.f32.mrf.mxu0  ;;  %1845 = vmatmul.f32.gmra.mxu2 %v676_v45 }
 0x3eb   :  { %4427 = vmatpush.msrb.mxu1 %v4130_v8  ;;  %v685_v8 = vld [vmem:[%s10347_s1 + $0x828] sm:$0xff] }
 0x3ec   :  { %2426 = vmatmul.f32.gmra.mxu3 %v665_v58 }
 0x3ed   :  { %5049 = vmatmul.msk.f32.gmra.mxu0 %vm1000_vm0, %v633_v23  ;;  %4428 = vmatpush.msrb.mxu1 %v4129_v47 }
 0x3ef   :  { %v2379_v62 = vpop.f32.mrf.mxu3  ;;  %4429 = vmatpush.msrb.mxu1 %v4128_v53  ;;  %v7684_v53 = vpop.f32.mrf.mxu1 }
 0x3f0   :  { %v7629_v57 = vadd.f32 %v2379_v62, %v7540_v0  ;;  %v4127_v0 = vld [vmem:[%s10350_s4 + $0x188] sm:$0xff]  ;;  %v1798_v44 = vpop.f32.mrf.mxu2 }
 0x3f1   :  { %4430 = vmatpush.msrb.mxu1 %v4127_v0  ;;  %v5275_v47 = vpop.permute.xlu0 %5274 }
 0x3f2   :  { %v2942_v35 = vpop.f32.mrf.mxu0  ;;  %1848 = vmatmul.f32.gmra.mxu2 %v679_v28  ;;  %v677_v28 = vld [vmem:[%s10347_s1 + $0x7e8] sm:$0xff] }
 0x3f3   :  { %4431 = vmatpush.msrb.mxu1 %v4126_v22  ;;  %v2943_v18 = vadd.f32 %v2942_v35, %v7417_v50  ;;  %v674_v50 = vld [vmem:[%s10347_s1 + $0x7d0] sm:$0xff]  ;;  %v2859_v35 = vadd.f32 %v6867_v52, %v6661_v25  ;;  %v688_v25 = vld [vmem:[%s10347_s1 + $0x840] sm:$0xff] }
 0x3f4   :  { %2429 = vmatmul.f32.gmra.mxu3 %v668_v46 }
 0x3f5   :  { %5050 = vmatmul.msk.f32.gmra.mxu0 %vm1000_vm0, %v636_v6 }
 0x3f7   :  { %v2382_v4 = vpop.f32.mrf.mxu3 }
 0x3f8   :  { %v7651_v42 = vadd.f32 %v2382_v4, %v7563_v55  ;;  %v7661_v32 = vpop.f32.mrf.mxu2  ;;  %v682_v55 = vld [vmem:[%s10347_s1 + $0x810] sm:$0xff] }
 0x3fa   :  { %v2945_v20 = vpop.f32.mrf.mxu0  ;;  %1851 = vmatmul.f32.gmra.mxu2 %v682_v55 }
 0x3fb   :  { %v2946_v48 = vadd.f32 %v2945_v20, %v7439_v40  ;;  %v645_v20 = vld [vmem:[%s10347_s1 + $0x6e8] sm:$0xff] }
 0x3fc   :  { %2432 = vmatmul.f32.gmra.mxu3 %v671_v27 }
 0x3fd   :  { %v5308_v16 = vpack.i.bf16 %v2946_v48, %v2943_v18  ;;  %5051 = vmatmul.msk.f32.gmra.mxu0 %vm1000_vm0, %v639_v14  ;;  %v5277_v18 = vunpack.i.h.bf16 %v5275_v47 }
 0x3ff   :  { %5309 = vrot.lane.b32.xlu1 %v5308_v16, %s5558_s0  ;;  %v2385_v58 = vpop.f32.mrf.mxu3  ;;  %v2889_v16 = vadd.f32 %v7150_v21, %v6859_v19 }
 0x400   :  { %v7668_v23 = vadd.f32 %v2385_v58, %v1792_v41  ;;  %v7678_v45 = vpop.f32.mrf.mxu2  ;;  %v5276_v41 = vunpack.i.l.bf16 %v5275_v47  ;;  %v680_v47 = vld [vmem:[%s10347_s1 + $0x800] sm:$0xff] }
 0x402   :  { %v7673_v40 = vpop.f32.mrf.mxu0  ;;  %1854 = vmatmul.f32.gmra.mxu2 %v685_v8  ;;  %v3522_v14 = vsel %vm1000_vm0, %v2859_v35, %v5276_v41  ;;  %v7713_v41 = vpop.f32.mrf.mxu1 }
 0x404   :  { %2435 = vmatmul.f32.gmra.mxu3 %v674_v50 }
 0x405   :  { %5052 = vmatmul.msk.f32.gmra.mxu0 %vm1000_vm0, %v642_v11  ;;  %v3529_v11 = vsel %vm1000_vm0, %v2889_v16, %v5277_v18  ;;  %v651_v16 = vld [vmem:[%s10347_s1 + $0x718] sm:$0xff] }
 0x407   :  { %v2388_v62 = vpop.f32.mrf.mxu3 }
 0x408   :  { %v7686_v46 = vadd.f32 %v2388_v62, %v1795_v2  ;;  %v7697_v2 = vpop.f32.mrf.mxu2 }
 0x409   :  { %v5285_v6 = vpop.permute.xlu2 %5284  ;;  %v5280_v0 = vpop.permute.xlu1 %5279 }
 0x40a   :  { %v5286_v22 = vunpack.i.l.bf16 %v5285_v6  ;;  %v5281_v4 = vunpack.i.l.bf16 %v5280_v0  ;;  %v2951_v27 = vpop.f32.mrf.mxu0  ;;  %v5282_v55 = vunpack.i.h.bf16 %v5280_v0  ;;  %1857 = vmatmul.f32.gmra.mxu2 %v688_v25  ;;  %v5287_v8 = vunpack.i.h.bf16 %v5285_v6  ;;  %v648_v0 = vld [vmem:[%s10347_s1 + $0x700] sm:$0xff]  ;;  %v691_v6 = vld [vmem:[%s10347_s1 + $0x858] sm:$0xff] }
 0x40b   :  { %v2952_v19 = vadd.f32 %v2951_v27, %v7480_v9  ;;  %v2892_v27 = vadd.f32 %v7187_v1, %v6879_v56  ;;  %v694_v1 = vld [vmem:[%s10347_s1 + $0x870] sm:$0xff] }
 0x40c   :  { %2438 = vmatmul.f32.gmra.mxu3 %v677_v28  ;;  %v3525_v52 = vsel %vm3503_vm1, %v3522_v14, %v5281_v4  ;;  %v3532_v62 = vsel %vm3503_vm1, %v3529_v11, %v5282_v55  ;;  %v5290_v28 = vpop.permute.xlu0 %5289  ;;  %v7741_v11 = vpop.f32.mrf.mxu1 }
 0x40d   :  { %5053 = vmatmul.msk.f32.gmra.mxu0 %vm1000_vm0, %v645_v20  ;;  %v3528_v48 = vsel %vm3507_vm2, %v3525_v52, %v5286_v22  ;;  %v3535_v4 = vsel %vm3507_vm2, %v3532_v62, %v5287_v8  ;;  %v5291_v20 = vunpack.i.l.bf16 %v5290_v28  ;;  %v683_v52 = vld [vmem:[%s10347_s1 + $0x818] sm:$0xff]  ;;  %v5292_v8 = vunpack.i.h.bf16 %v5290_v28 }
 0x40e   :  { %4412 = vmatmul.f32.gmra.mxu1 %v3528_v48 }
 0x40f   :  { %v2391_v58 = vpop.f32.mrf.mxu3 }
 0x410   :  { %v7707_v50 = vadd.f32 %v2391_v58, %v1798_v44  ;;  %v1810_v44 = vpop.f32.mrf.mxu2 }
 0x412   :  { %v2954_v35 = vpop.f32.mrf.mxu0  ;;  %1860 = vmatmul.f32.gmra.mxu2 %v691_v6  ;;  %v686_v6 = vld [vmem:[%s10347_s1 + $0x830] sm:$0xff] }
 0x413   :  { %v2955_v21 = vadd.f32 %v2954_v35, %v7501_v60  ;;  %v2895_v35 = vadd.f32 %v7226_v12, %v6895_v33  ;;  %v697_v12 = vld [vmem:[%s10347_s1 + $0x888] sm:$0xff] }
 0x414   :  { %2441 = vmatmul.f32.gmra.mxu3 %v680_v47 }
 0x415   :  { %v5313_v22 = vpack.i.bf16 %v2955_v21, %v2952_v19  ;;  %5054 = vmatmul.msk.f32.gmra.mxu0 %vm1000_vm0, %v648_v0  ;;  %v3531_v28 = vsel %vm1000_vm0, %v2895_v35, %v5292_v8  ;;  %v660_v8 = vld [vmem:[%s10347_s1 + $0x760] sm:$0xff] }
 0x416   :  { %4432 = vmatmul.f32.vlgmr.msrb.gmra.mxu1 %v3535_v4  ;;  %v654_v4 = vld [vmem:[%s10347_s1 + $0x730] sm:$0xff] }
 0x417   :  { %5314 = vrot.lane.b32.xlu2 %v5313_v22, %s5559_s11  ;;  %v2394_v9 = vpop.f32.mrf.mxu3 }
 0x418   :  { %v7728_v60 = vadd.f32 %v2394_v9, %v7661_v32  ;;  %v3530_v32 = vsel %vm1000_vm0, %v2892_v27, %v5291_v20  ;;  %v1813_v58 = vpop.f32.mrf.mxu2  ;;  %v7769_v9 = vpop.f32.mrf.mxu1 }
 0x419   :  { %v5300_v14 = vpop.permute.xlu2 %5299  ;;  %v5295_v25 = vpop.permute.xlu1 %5294 }
 0x41a   :  { %v5301_v18 = vunpack.i.l.bf16 %v5300_v14  ;;  %v5296_v48 = vunpack.i.l.bf16 %v5295_v25  ;;  %v7735_v55 = vpop.f32.mrf.mxu0  ;;  %v5297_v62 = vunpack.i.h.bf16 %v5295_v25  ;;  %1863 = vmatmul.f32.gmra.mxu2 %v694_v1  ;;  %v5302_v21 = vunpack.i.h.bf16 %v5300_v14  ;;  %v689_v25 = vld [vmem:[%s10347_s1 + $0x848] sm:$0xff] }
 0x41c   :  { %2444 = vmatmul.f32.gmra.mxu3 %v683_v52  ;;  %v3533_v56 = vsel %vm3503_vm1, %v3530_v32, %v5296_v48  ;;  %v3534_v20 = vsel %vm3503_vm1, %v3531_v28, %v5297_v62  ;;  %v703_v62 = vld [vmem:[%s10347_s1 + $0x8b8] sm:$0xff] }
 0x41d   :  { %5055 = vmatmul.msk.f32.gmra.mxu0 %vm1000_vm0, %v651_v16  ;;  %v3536_v47 = vsel %vm3507_vm2, %v3533_v56, %v5301_v18  ;;  %v657_v18 = vld [vmem:[%s10347_s1 + $0x748] sm:$0xff]  ;;  %v700_v16 = vld [vmem:[%s10347_s1 + $0x8a0] sm:$0xff] }
 0x41e   :  { %4435 = vmatmul.f32.gmra.mxu1 %v3536_v47  ;;  %v692_v56 = vld [vmem:[%s10347_s1 + $0x860] sm:$0xff] }
 0x41f   :  { %v2397_v0 = vpop.f32.mrf.mxu3 }
 0x420   :  { %v7752_v19 = vadd.f32 %v2397_v0, %v7678_v45  ;;  %v1816_v33 = vpop.f32.mrf.mxu2  ;;  %v3537_v45 = vsel %vm3507_vm2, %v3534_v20, %v5302_v21  ;;  %v4156_v21 = vld [vmem:[%s10350_s4 + $0x270] sm:$0xff]  ;;  %v4155_v20 = vld [vmem:[%s10350_s4 + $0x268] sm:$0xff] }
 0x422   :  { %v7758_v22 = vpop.f32.mrf.mxu0  ;;  %1866 = vmatmul.f32.gmra.mxu2 %v697_v12 }
 0x424   :  { %2447 = vmatmul.f32.gmra.mxu3 %v686_v6  ;;  %v695_v6 = vld [vmem:[%s10347_s1 + $0x878] sm:$0xff] }
 0x425   :  { %5056 = vmatmul.msk.f32.gmra.mxu0 %vm1000_vm0, %v654_v4  ;;  %v663_v4 = vld [vmem:[%s10347_s1 + $0x778] sm:$0xff] }
 0x426   :  { %4438 = vmatmul.f32.gmra.mxu1 %v3537_v45 }
 0x427   :  { %v2400_v27 = vpop.f32.mrf.mxu3 }
 0x428   :  { %v7772_v14 = vadd.f32 %v2400_v27, %v7697_v2  ;;  %v1819_v48 = vpop.f32.mrf.mxu2  ;;  %v706_v27 = vld [vmem:[%s10347_s1 + $0x8d0] sm:$0xff] }
 0x42a   :  { %v7777_v52 = vpop.f32.mrf.mxu0  ;;  %1869 = vmatmul.f32.gmra.mxu2 %v700_v16  ;;  %v4152_v16 = vld [vmem:[%s10350_s4 + $0x250] sm:$0xff] }
 0x42c   :  { %2450 = vmatmul.f32.gmra.mxu3 %v689_v25 }
 0x42d   :  { %5057 = vmatmul.msk.f32.gmra.mxu0 %vm1000_vm0, %v657_v18  ;;  %v4154_v18 = vld [vmem:[%s10350_s4 + $0x260] sm:$0xff] }
 0x42f   :  { %v2403_v2 = vpop.f32.mrf.mxu3 }
 0x430   :  { %v7786_v32 = vadd.f32 %v2403_v2, %v1810_v44  ;;  %v7796_v47 = vpop.f32.mrf.mxu2  ;;  %v4157_v44 = vld [vmem:[%s10350_s4 + $0x278] sm:$0xff]  ;;  %v698_v2 = vld [vmem:[%s10347_s1 + $0x890] sm:$0xff] }
 0x431   :  { %4442 = vmatpush.msra.mxu1 %v4157_v44  ;;  %v709_v44 = vld [vmem:[%s10347_s1 + $0x8e8] sm:$0xff] }
 0x432   :  { %v7791_v1 = vpop.f32.mrf.mxu0  ;;  %1872 = vmatmul.f32.gmra.mxu2 %v703_v62 }
 0x433   :  { %4443 = vmatpush.msra.mxu1 %v4156_v21  ;;  %v4149_v21 = vld [vmem:[%s10350_s4 + $0x238] sm:$0xff] }
 0x434   :  { %2453 = vmatmul.f32.gmra.mxu3 %v692_v56 }
 0x435   :  { %5058 = vmatmul.msk.f32.gmra.mxu0 %vm1000_vm0, %v660_v8  ;;  %4444 = vmatpush.msra.mxu1 %v4155_v20  ;;  %v666_v8 = vld [vmem:[%s10347_s1 + $0x790] sm:$0xff]  ;;  %v701_v20 = vld [vmem:[%s10347_s1 + $0x8a8] sm:$0xff] }
 0x437   :  { %v2406_v35 = vpop.f32.mrf.mxu3  ;;  %4445 = vmatpush.msra.mxu1 %v4154_v18 }
 0x438   :  { %v7805_v0 = vadd.f32 %v2406_v35, %v1813_v58  ;;  %v2940_v58 = vadd.f32 %v7610_v7, %v7392_v36  ;;  %v7822_v45 = vpop.f32.mrf.mxu2  ;;  %v4153_v36 = vld [vmem:[%s10350_s4 + $0x258] sm:$0xff]  ;;  %v4150_v35 = vld [vmem:[%s10350_s4 + $0x240] sm:$0xff] }
 0x439   :  { %4446 = vmatpush.msra.mxu1 %v4153_v36  ;;  %v712_v36 = vld [vmem:[%s10347_s1 + $0x900] sm:$0xff] }
 0x43a   :  { %v2969_v28 = vpop.f32.mrf.mxu0  ;;  %1875 = vmatmul.f32.gmra.mxu2 %v706_v27 }
 0x43b   :  { %v2970_v12 = vadd.f32 %v2969_v28, %v7602_v37  ;;  %4447 = vmatpush.msra.mxu1 %v4152_v16  ;;  %v4146_v16 = vld [vmem:[%s10350_s4 + $0x220] sm:$0xff] }
 0x43c   :  { %2456 = vmatmul.f32.gmra.mxu3 %v695_v6 }
 0x43d   :  { %v5318_v25 = vpack.i.bf16 %v2970_v12, %v2940_v58  ;;  %5059 = vmatmul.msk.f32.gmra.mxu0 %vm1000_vm0, %v663_v4  ;;  %v4148_v4 = vld [vmem:[%s10350_s4 + $0x230] sm:$0xff]  ;;  %v669_v12 = vld [vmem:[%s10347_s1 + $0x7a8] sm:$0xff] }
 0x43f   :  { %5319 = vrot.lane.b32.xlu0 %v5318_v25, %s5557_s16  ;;  %v2409_v37 = vpop.f32.mrf.mxu3 }
 0x440   :  { %v7835_v7 = vadd.f32 %v2409_v37, %v1816_v33  ;;  %v4151_v33 = vld [vmem:[%s10350_s4 + $0x248] sm:$0xff]  ;;  %v7849_v62 = vpop.f32.mrf.mxu2 }
 0x441   :  { %4448 = vmatpush.msra.mxu1 %v4151_v33 }
 0x442   :  { %v2972_v56 = vpop.f32.mrf.mxu0  ;;  %1878 = vmatmul.f32.gmra.mxu2 %v709_v44  ;;  %v672_v44 = vld [vmem:[%s10347_s1 + $0x7c0] sm:$0xff] }
 0x443   :  { %4449 = vmatpush.msra.mxu1 %v4150_v35  ;;  %v2973_v27 = vadd.f32 %v2972_v56, %v7629_v57  ;;  %v4145_v57 = vld [vmem:[%s10350_s4 + $0x218] sm:$0xff]  ;;  %v4144_v56 = vld [vmem:[%s10350_s4 + $0x210] sm:$0xff]  ;;  %v2949_v35 = vadd.f32 %v7673_v40, %v7458_v17 }
 0x444   :  { %2459 = vmatmul.f32.gmra.mxu3 %v698_v2  ;;  %v707_v40 = vld [vmem:[%s10347_s1 + $0x8d8] sm:$0xff] }
 0x445   :  { %5060 = vmatmul.msk.f32.gmra.mxu0 %vm1000_vm0, %v666_v8  ;;  %4450 = vmatpush.msra.mxu1 %v4149_v21  ;;  %v704_v8 = vld [vmem:[%s10347_s1 + $0x8c0] sm:$0xff] }
 0x447   :  { %v2412_v6 = vpop.f32.mrf.mxu3  ;;  %4451 = vmatpush.msra.mxu1 %v4148_v4  ;;  %v715_v4 = vld [vmem:[%s10347_s1 + $0x918] sm:$0xff] }
 0x448   :  { %v7861_v28 = vadd.f32 %v2412_v6, %v1819_v48  ;;  %v4147_v48 = vld [vmem:[%s10350_s4 + $0x228] sm:$0xff]  ;;  %v1831_v18 = vpop.f32.mrf.mxu2 }
 0x449   :  { %4452 = vmatpush.msra.mxu1 %v4147_v48  ;;  %v675_v48 = vld [vmem:[%s10347_s1 + $0x7d8] sm:$0xff] }
 0x44a   :  { %v2975_v58 = vpop.f32.mrf.mxu0  ;;  %1881 = vmatmul.f32.gmra.mxu2 %v712_v36 }
 0x44b   :  { %v2976_v25 = vadd.f32 %v2975_v58, %v7651_v42  ;;  %4453 = vmatpush.msra.mxu1 %v4146_v16  ;;  %v4142_v58 = vld [vmem:[%s10350_s4 + $0x200] sm:$0xff] }
 0x44c   :  { %2462 = vmatmul.f32.gmra.mxu3 %v701_v20 }
 0x44d   :  { %v5333_v37 = vpack.i.bf16 %v2976_v25, %v2973_v27  ;;  %5061 = vmatmul.msk.f32.gmra.mxu0 %vm1000_vm0, %v669_v12  ;;  %4454 = vmatpush.msra.mxu1 %v4145_v57  ;;  %v718_v25 = vld [vmem:[%s10347_s1 + $0x930] sm:$0xff] }
 0x44e   :  { %v678_v57 = vld [vmem:[%s10347_s1 + $0x7f0] sm:$0xff] }
 0x44f   :  { %5334 = vrot.lane.b32.xlu0 %v5333_v37, %s5557_s16  ;;  %v2415_v42 = vpop.f32.mrf.mxu3  ;;  %4455 = vmatpush.msra.mxu1 %v4144_v56  ;;  %v710_v37 = vld [vmem:[%s10347_s1 + $0x8f0] sm:$0xff] }
 0x450   :  { %v7889_v2 = vadd.f32 %v2415_v42, %v7796_v47  ;;  %v4143_v47 = vld [vmem:[%s10350_s4 + $0x208] sm:$0xff]  ;;  %v1834_v6 = vpop.f32.mrf.mxu2 }
 0x451   :  { %4456 = vmatpush.msra.mxu1 %v4143_v47 }
 0x452   :  { %v2978_v33 = vpop.f32.mrf.mxu0  ;;  %1884 = vmatmul.f32.gmra.mxu2 %v715_v4 }
 0x453   :  { %v2979_v21 = vadd.f32 %v2978_v33, %v7668_v23  ;;  %4457 = vmatpush.msra.mxu1 %v4142_v58 }
 0x454   :  { %2465 = vmatmul.f32.gmra.mxu3 %v704_v8 }
 0x455   :  { %v5323_v20 = vpack.i.bf16 %v2979_v21, %v2949_v35  ;;  %5062 = vmatmul.msk.f32.gmra.mxu0 %vm1000_vm0, %v672_v44  ;;  %v681_v35 = vld [vmem:[%s10347_s1 + $0x808] sm:$0xff]  ;;  %v2958_v21 = vadd.f32 %v7735_v55, %v7516_v31  ;;  %v2925_v31 = vadd.f32 %v7506_v26, %v7211_v39  ;;  %v727_v26 = vld [vmem:[%s10347_s1 + $0x978] sm:$0xff] }
 0x457   :  { %5324 = vrot.lane.b32.xlu1 %v5323_v20, %s5558_s0  ;;  %v2418_v17 = vpop.f32.mrf.mxu3 }
 0x458   :  { %v7915_v23 = vadd.f32 %v2418_v17, %v7822_v45  ;;  %v1837_v27 = vpop.f32.mrf.mxu2 }
 0x459   :  { %v5305_v58 = vpop.permute.xlu0 %5304 }
 0x45a   :  { %v2981_v12 = vpop.f32.mrf.mxu0  ;;  %1887 = vmatmul.f32.gmra.mxu2 %v718_v25  ;;  %v716_v25 = vld [vmem:[%s10347_s1 + $0x920] sm:$0xff] }
 0x45b   :  { %v2982_v42 = vadd.f32 %v2981_v12, %v7686_v46  ;;  %v713_v46 = vld [vmem:[%s10347_s1 + $0x908] sm:$0xff] }
 0x45c   :  { %2468 = vmatmul.f32.gmra.mxu3 %v707_v40  ;;  %v5306_v40 = vunpack.i.l.bf16 %v5305_v58 }
 0x45d   :  { %5063 = vmatmul.msk.f32.gmra.mxu0 %vm1000_vm0, %v675_v48 }
 0x45f   :  { %v2421_v45 = vpop.f32.mrf.mxu3 }
 0x460   :  { %v7928_v36 = vadd.f32 %v2421_v45, %v7849_v62  ;;  %v7938_v8 = vpop.f32.mrf.mxu2  ;;  %v721_v62 = vld [vmem:[%s10347_s1 + $0x948] sm:$0xff] }
 0x462   :  { %v2984_v16 = vpop.f32.mrf.mxu0  ;;  %1890 = vmatmul.f32.gmra.mxu2 %v721_v62  ;;  %v5307_v62 = vunpack.i.h.bf16 %v5305_v58 }
 0x463   :  { %v2985_v56 = vadd.f32 %v2984_v16, %v7707_v50 }
 0x464   :  { %2471 = vmatmul.f32.gmra.mxu3 %v710_v37 }
 0x465   :  { %v5338_v33 = vpack.i.bf16 %v2985_v56, %v2982_v42  ;;  %5064 = vmatmul.msk.f32.gmra.mxu0 %vm1000_vm0, %v678_v57  ;;  %v684_v57 = vld [vmem:[%s10347_s1 + $0x820] sm:$0xff]  ;;  %v3682_v42 = vsel %vm1000_vm0, %v2925_v31, %v5306_v40  ;;  %v7974_v56 = vpop.f32.mrf.mxu1 }
 0x466   :  { %10377 = vst [vmem:[#allocation27_spill] sm:$0xff] %v7974_v56 }
 0x467   :  { %5339 = vrot.lane.b32.xlu1 %v5338_v33, %s5558_s0  ;;  %v2424_v44 = vpop.f32.mrf.mxu3 }
 0x468   :  { %v7945_v47 = vadd.f32 %v2424_v44, %v1831_v18  ;;  %v7956_v20 = vpop.f32.mrf.mxu2  ;;  %v724_v18 = vld [vmem:[%s10347_s1 + $0x960] sm:$0xff] }
 0x46a   :  { %v2987_v50 = vpop.f32.mrf.mxu0  ;;  %1893 = vmatmul.f32.gmra.mxu2 %v724_v18 }
 0x46b   :  { %v2988_v4 = vadd.f32 %v2987_v50, %v7728_v60 }
 0x46c   :  { %2474 = vmatmul.f32.gmra.mxu3 %v713_v46  ;;  %v2928_v46 = vadd.f32 %v7521_v5, %v7246_v10 }
 0x46d   :  { %v5328_v17 = vpack.i.bf16 %v2988_v4, %v2958_v21  ;;  %5065 = vmatmul.msk.f32.gmra.mxu0 %vm1000_vm0, %v681_v35  ;;  %v719_v4 = vld [vmem:[%s10347_s1 + $0x938] sm:$0xff] }
 0x46e   :  { %v3683_v58 = vsel %vm1000_vm0, %v2928_v46, %v5307_v62  ;;  %v693_v62 = vld [vmem:[%s10347_s1 + $0x868] sm:$0xff] }
 0x46f   :  { %5329 = vrot.lane.b32.xlu2 %v5328_v17, %s5559_s11  ;;  %v2427_v12 = vpop.f32.mrf.mxu3  ;;  %v687_v17 = vld [vmem:[%s10347_s1 + $0x838] sm:$0xff] }
 0x470   :  { %v7963_v48 = vadd.f32 %v2427_v12, %v1834_v6  ;;  %v1846_v6 = vpop.f32.mrf.mxu2 }
 0x471   :  { %v5315_v60 = vpop.permute.xlu2 %5314  ;;  %v5310_v55 = vpop.permute.xlu1 %5309 }
 0x472   :  { %v5316_v45 = vunpack.i.l.bf16 %v5315_v60  ;;  %v5311_v37 = vunpack.i.l.bf16 %v5310_v55  ;;  %v2990_v16 = vpop.f32.mrf.mxu0  ;;  %v5312_v44 = vunpack.i.h.bf16 %v5310_v55  ;;  %1896 = vmatmul.f32.gmra.mxu2 %v727_v26  ;;  %v5317_v21 = vunpack.i.h.bf16 %v5315_v60  ;;  %v8001_v55 = vpop.f32.mrf.mxu1 }
 0x473   :  { %v2991_v12 = vadd.f32 %v2990_v16, %v7752_v19  ;;  %10378 = vst [vmem:[#allocation28_spill] sm:$0xff] %v8001_v55 }
 0x474   :  { %v3685_v39 = vsel %vm3503_vm1, %v3682_v42, %v5311_v37  ;;  %2477 = vmatmul.f32.gmra.mxu3 %v716_v25  ;;  %v3686_v40 = vsel %vm3503_vm1, %v3683_v58, %v5312_v44  ;;  %v722_v25 = vld [vmem:[%s10347_s1 + $0x950] sm:$0xff]  ;;  %v736_v44 = vld [vmem:[%s10347_s1 + $0x9c0] sm:$0xff] }
 0x475   :  { %5066 = vmatmul.msk.f32.gmra.mxu0 %vm1000_vm0, %v684_v57  ;;  %v3688_v33 = vsel %vm3507_vm2, %v3685_v39, %v5316_v45  ;;  %v3689_v60 = vsel %vm3507_vm2, %v3686_v40, %v5317_v21  ;;  %v690_v37 = vld [vmem:[%s10347_s1 + $0x850] sm:$0xff]  ;;  %v733_v57 = vld [vmem:[%s10347_s1 + $0x9a8] sm:$0xff] }
 0x476   :  { %4458 = vmatmul.f32.vlgmr.msra.gmra.mxu1 %v3688_v33  ;;  %v725_v39 = vld [vmem:[%s10347_s1 + $0x968] sm:$0xff] }
 0x477   :  { %v2430_v50 = vpop.f32.mrf.mxu3 }
 0x478   :  { %v7984_v35 = vadd.f32 %v2430_v50, %v1837_v27  ;;  %v1849_v5 = vpop.f32.mrf.mxu2  ;;  %v730_v27 = vld [vmem:[%s10347_s1 + $0x990] sm:$0xff]  ;;  %v728_v50 = vld [vmem:[%s10347_s1 + $0x980] sm:$0xff] }
 0x47a   :  { %v2993_v18 = vpop.f32.mrf.mxu0  ;;  %1899 = vmatmul.f32.gmra.mxu2 %v730_v27 }
 0x47b   :  { %v2994_v10 = vadd.f32 %v2993_v18, %v7772_v14  ;;  %v739_v18 = vld [vmem:[%s10347_s1 + $0x9d8] sm:$0xff] }
 0x47c   :  { %2480 = vmatmul.f32.gmra.mxu3 %v719_v4  ;;  %v696_v4 = vld [vmem:[%s10347_s1 + $0x880] sm:$0xff] }
 0x47d   :  { %v5343_v31 = vpack.i.bf16 %v2994_v10, %v2991_v12  ;;  %5067 = vmatmul.msk.f32.gmra.mxu0 %vm1000_vm0, %v687_v17  ;;  %v4172_v12 = vld [vmem:[%s10350_s4 + $0x2f0] sm:$0xff]  ;;  %v731_v10 = vld [vmem:[%s10347_s1 + $0x998] sm:$0xff] }
 0x47e   :  { %4461 = vmatmul.f32.gmra.mxu1 %v3689_v60  ;;  %v4171_v60 = vld [vmem:[%s10350_s4 + $0x2e8] sm:$0xff] }
 0x47f   :  { %5344 = vrot.lane.b32.xlu2 %v5343_v31, %s5559_s11  ;;  %v2433_v19 = vpop.f32.mrf.mxu3  ;;  %v699_v31 = vld [vmem:[%s10347_s1 + $0x898] sm:$0xff] }
 0x480   :  { %v8005_v14 = vadd.f32 %v2433_v19, %v7938_v8  ;;  %v1852_v16 = vpop.f32.mrf.mxu2  ;;  %v742_v19 = vld [vmem:[%s10347_s1 + $0x9f0] sm:$0xff] }
 0x482   :  { %v8010_v45 = vpop.f32.mrf.mxu0  ;;  %1902 = vmatmul.f32.gmra.mxu2 %v733_v57 }
 0x484   :  { %2483 = vmatmul.f32.gmra.mxu3 %v722_v25  ;;  %v4170_v25 = vld [vmem:[%s10350_s4 + $0x2e0] sm:$0xff] }
 0x485   :  { %5068 = vmatmul.msk.f32.gmra.mxu0 %vm1000_vm0, %v690_v37  ;;  %v4169_v37 = vld [vmem:[%s10350_s4 + $0x2d8] sm:$0xff] }
 0x487   :  { %v2436_v8 = vpop.f32.mrf.mxu3 }
 0x488   :  { %v8020_v42 = vadd.f32 %v2436_v8, %v7956_v20  ;;  %v1855_v33 = vpop.f32.mrf.mxu2 }
 0x48a   :  { %v8025_v26 = vpop.f32.mrf.mxu0  ;;  %1905 = vmatmul.f32.gmra.mxu2 %v736_v44 }
 0x48c   :  { %2486 = vmatmul.f32.gmra.mxu3 %v725_v39  ;;  %v4168_v39 = vld [vmem:[%s10350_s4 + $0x2d0] sm:$0xff] }
 0x48d   :  { %5069 = vmatmul.msk.f32.gmra.mxu0 %vm1000_vm0, %v693_v62  ;;  %v734_v62 = vld [vmem:[%s10347_s1 + $0x9b0] sm:$0xff] }
 0x48f   :  { %v2439_v20 = vpop.f32.mrf.mxu3 }
 0x490   :  { %v8034_v46 = vadd.f32 %v2439_v20, %v1846_v6  ;;  %v8044_v58 = vpop.f32.mrf.mxu2  ;;  %v4173_v6 = vld [vmem:[%s10350_s4 + $0x2f8] sm:$0xff]  ;;  %v702_v20 = vld [vmem:[%s10347_s1 + $0x8b0] sm:$0xff] }
 0x491   :  { %4468 = vmatpush.msrb.mxu1 %v4173_v6  ;;  %v745_v6 = vld [vmem:[%s10347_s1 + $0xa08] sm:$0xff] }
 0x492   :  { %v8039_v21 = vpop.f32.mrf.mxu0  ;;  %1908 = vmatmul.f32.gmra.mxu2 %v739_v18 }
 0x493   :  { %4469 = vmatpush.msrb.mxu1 %v4172_v12 }
 0x494   :  { %2489 = vmatmul.f32.gmra.mxu3 %v728_v50 }
 0x495   :  { %5070 = vmatmul.msk.f32.gmra.mxu0 %vm1000_vm0, %v696_v4  ;;  %4470 = vmatpush.msrb.mxu1 %v4171_v60 }
 0x497   :  { %v2442_v17 = vpop.f32.mrf.mxu3  ;;  %4471 = vmatpush.msrb.mxu1 %v4170_v25 }
 0x498   :  { %v8053_v40 = vadd.f32 %v2442_v17, %v1849_v5  ;;  %v8067_v5 = vpop.f32.mrf.mxu2  ;;  %v4166_v17 = vld [vmem:[%s10350_s4 + $0x2c0] sm:$0xff] }
 0x499   :  { %4472 = vmatpush.msrb.mxu1 %v4169_v37  ;;  %v748_v37 = vld [vmem:[%s10347_s1 + $0xa20] sm:$0xff] }
 0x49a   :  { %v3005_v27 = vpop.f32.mrf.mxu0  ;;  %1911 = vmatmul.f32.gmra.mxu2 %v742_v19  ;;  %v705_v19 = vld [vmem:[%s10347_s1 + $0x8c8] sm:$0xff] }
 0x49b   :  { %4473 = vmatpush.msrb.mxu1 %v4168_v39  ;;  %v3006_v50 = vadd.f32 %v3005_v27, %v7861_v28  ;;  %v4165_v28 = vld [vmem:[%s10350_s4 + $0x2b8] sm:$0xff]  ;;  %v4164_v27 = vld [vmem:[%s10350_s4 + $0x2b0] sm:$0xff] }
 0x49c   :  { %2492 = vmatmul.f32.gmra.mxu3 %v731_v10  ;;  %v4161_v39 = vld [vmem:[%s10350_s4 + $0x298] sm:$0xff] }
 0x49d   :  { %5071 = vmatmul.msk.f32.gmra.mxu0 %vm1000_vm0, %v699_v31  ;;  %v737_v31 = vld [vmem:[%s10347_s1 + $0x9c8] sm:$0xff] }
 0x49f   :  { %v2445_v57 = vpop.f32.mrf.mxu3 }
 0x4a0   :  { %v8079_v8 = vadd.f32 %v2445_v57, %v1852_v16  ;;  %v4167_v16 = vld [vmem:[%s10350_s4 + $0x2c8] sm:$0xff]  ;;  %v1864_v18 = vpop.f32.mrf.mxu2  ;;  %v4162_v57 = vld [vmem:[%s10350_s4 + $0x2a0] sm:$0xff] }
 0x4a1   :  { %4474 = vmatpush.msrb.mxu1 %v4167_v16  ;;  %v740_v16 = vld [vmem:[%s10347_s1 + $0x9e0] sm:$0xff] }
 0x4a2   :  { %v3008_v44 = vpop.f32.mrf.mxu0  ;;  %1914 = vmatmul.f32.gmra.mxu2 %v745_v6 }
 0x4a3   :  { %v3009_v4 = vadd.f32 %v3008_v44, %v7889_v2  ;;  %4475 = vmatpush.msrb.mxu1 %v4166_v17  ;;  %v751_v17 = vld [vmem:[%s10347_s1 + $0xa38] sm:$0xff] }
 0x4a4   :  { %2495 = vmatmul.f32.gmra.mxu3 %v734_v62 }
 0x4a5   :  { %v5348_v12 = vpack.i.bf16 %v3009_v4, %v3006_v50  ;;  %5072 = vmatmul.msk.f32.gmra.mxu0 %vm1000_vm0, %v702_v20  ;;  %4476 = vmatpush.msrb.mxu1 %v4165_v28  ;;  %v4160_v20 = vld [vmem:[%s10350_s4 + $0x290] sm:$0xff]  ;;  %v708_v4 = vld [vmem:[%s10347_s1 + $0x8e0] sm:$0xff] }
 0x4a7   :  { %5349 = vrot.lane.b32.xlu0 %v5348_v12, %s5557_s16  ;;  %v2448_v2 = vpop.f32.mrf.mxu3  ;;  %4477 = vmatpush.msrb.mxu1 %v4164_v27  ;;  %v4158_v12 = vld [vmem:[%s10350_s4 + $0x280] sm:$0xff]  ;;  %v743_v27 = vld [vmem:[%s10347_s1 + $0x9f8] sm:$0xff] }
 0x4a8   :  { %v8106_v10 = vadd.f32 %v2448_v2, %v1855_v33  ;;  %v4163_v33 = vld [vmem:[%s10350_s4 + $0x2a8] sm:$0xff]  ;;  %v1867_v25 = vpop.f32.mrf.mxu2 }
 0x4a9   :  { %4478 = vmatpush.msrb.mxu1 %v4163_v33 }
 0x4aa   :  { %v8114_v60 = vpop.f32.mrf.mxu0  ;;  %1917 = vmatmul.f32.gmra.mxu2 %v748_v37 }
 0x4ab   :  { %4479 = vmatpush.msrb.mxu1 %v4162_v57 }
 0x4ac   :  { %2498 = vmatmul.f32.gmra.mxu3 %v737_v31 }
 0x4ad   :  { %5073 = vmatmul.msk.f32.gmra.mxu0 %vm1000_vm0, %v705_v19  ;;  %4480 = vmatpush.msrb.mxu1 %v4161_v39  ;;  %v711_v19 = vld [vmem:[%s10347_s1 + $0x8f8] sm:$0xff] }
 0x4af   :  { %v2451_v62 = vpop.f32.mrf.mxu3  ;;  %4481 = vmatpush.msrb.mxu1 %v4160_v20 }
 0x4b0   :  { %v8133_v44 = vadd.f32 %v2451_v62, %v8044_v58  ;;  %v4159_v58 = vld [vmem:[%s10350_s4 + $0x288] sm:$0xff]  ;;  %v1870_v6 = vpop.f32.mrf.mxu2 }
 0x4b1   :  { %4482 = vmatpush.msrb.mxu1 %v4159_v58  ;;  %v5320_v58 = vpop.permute.xlu0 %5319 }
 0x4b2   :  { %v3014_v50 = vpop.f32.mrf.mxu0  ;;  %1920 = vmatmul.f32.gmra.mxu2 %v751_v17 }
 0x4b3   :  { %4483 = vmatpush.msrb.mxu1 %v4158_v12  ;;  %v3015_v33 = vadd.f32 %v3014_v50, %v7928_v36  ;;  %v746_v36 = vld [vmem:[%s10347_s1 + $0xa10] sm:$0xff]  ;;  %v8188_v12 = vpop.f32.mrf.mxu1 }
 0x4b4   :  { %2501 = vmatmul.f32.gmra.mxu3 %v740_v16  ;;  %v714_v16 = vld [vmem:[%s10347_s1 + $0x910] sm:$0xff]  ;;  %10379 = vst [vmem:[#allocation29_spill] sm:$0xff] %v8188_v12 }
 0x4b5   :  { %5074 = vmatmul.msk.f32.gmra.mxu0 %vm1000_vm0, %v708_v4  ;;  %v757_v4 = vld [vmem:[%s10347_s1 + $0xa68] sm:$0xff] }
 0x4b7   :  { %v2454_v28 = vpop.f32.mrf.mxu3 }
 0x4b8   :  { %v8155_v2 = vadd.f32 %v2454_v28, %v8067_v5  ;;  %v8165_v57 = vpop.f32.mrf.mxu2  ;;  %v754_v5 = vld [vmem:[%s10347_s1 + $0xa50] sm:$0xff] }
 0x4ba   :  { %v3017_v31 = vpop.f32.mrf.mxu0  ;;  %1923 = vmatmul.f32.gmra.mxu2 %v754_v5 }
 0x4bb   :  { %v3018_v37 = vadd.f32 %v3017_v31, %v7945_v47 }
 0x4bc   :  { %2504 = vmatmul.f32.gmra.mxu3 %v743_v27  ;;  %v2931_v27 = vadd.f32 %v7535_v43, %v7282_v24  ;;  %v760_v24 = vld [vmem:[%s10347_s1 + $0xa80] sm:$0xff] }
 0x4bd   :  { %v5353_v39 = vpack.i.bf16 %v3018_v37, %v3015_v33  ;;  %5075 = vmatmul.msk.f32.gmra.mxu0 %vm1000_vm0, %v711_v19  ;;  %v749_v33 = vld [vmem:[%s10347_s1 + $0xa28] sm:$0xff] }
 0x4bf   :  { %5354 = vrot.lane.b32.xlu1 %v5353_v39, %s5558_s0  ;;  %v2457_v62 = vpop.f32.mrf.mxu3 }
 0x4c0   :  { %v8172_v20 = vadd.f32 %v2457_v62, %v1864_v18  ;;  %v8182_v50 = vpop.f32.mrf.mxu2  ;;  %v5321_v18 = vunpack.i.l.bf16 %v5320_v58  ;;  %v717_v62 = vld [vmem:[%s10347_s1 + $0x928] sm:$0xff] }
 0x4c2   :  { %v8177_v47 = vpop.f32.mrf.mxu0  ;;  %1926 = vmatmul.f32.gmra.mxu2 %v757_v4 }
 0x4c4   :  { %2507 = vmatmul.f32.gmra.mxu3 %v746_v36  ;;  %v3684_v36 = vsel %vm1000_vm0, %v2931_v27, %v5321_v18  ;;  %v2961_v18 = vadd.f32 %v7758_v22, %v7530_v61 }
 0x4c5   :  { %5076 = vmatmul.msk.f32.gmra.mxu0 %vm1000_vm0, %v714_v16  ;;  %v5322_v16 = vunpack.i.h.bf16 %v5320_v58  ;;  %v752_v58 = vld [vmem:[%s10347_s1 + $0xa40] sm:$0xff] }
 0x4c7   :  { %v2460_v17 = vpop.f32.mrf.mxu3  ;;  %v3691_v55 = vsel %vm1000_vm0, %v2961_v18, %v5322_v16 }
 0x4c8   :  { %v8190_v28 = vadd.f32 %v2460_v17, %v1867_v25  ;;  %v8201_v25 = vpop.f32.mrf.mxu2 }
 0x4c9   :  { %v5330_v31 = vpop.permute.xlu2 %5329  ;;  %v5325_v19 = vpop.permute.xlu1 %5324 }
 0x4ca   :  { %v5331_v37 = vunpack.i.l.bf16 %v5330_v31  ;;  %v5326_v5 = vunpack.i.l.bf16 %v5325_v19  ;;  %v3023_v39 = vpop.f32.mrf.mxu0  ;;  %v5327_v17 = vunpack.i.h.bf16 %v5325_v19  ;;  %1929 = vmatmul.f32.gmra.mxu2 %v760_v24  ;;  %v5332_v56 = vunpack.i.h.bf16 %v5330_v31  ;;  %v763_v31 = vld [vmem:[%s10347_s1 + $0xa98] sm:$0xff] }
 0x4cb   :  { %v3024_v61 = vadd.f32 %v3023_v39, %v7984_v35  ;;  %v2964_v39 = vadd.f32 %v7777_v52, %v7549_v13  ;;  %v766_v52 = vld [vmem:[%s10347_s1 + $0xab0] sm:$0xff] }
 0x4cc   :  { %2510 = vmatmul.f32.gmra.mxu3 %v749_v33  ;;  %v3687_v43 = vsel %vm3503_vm1, %v3684_v36, %v5326_v5  ;;  %v8217_v33 = vpop.f32.mrf.mxu1  ;;  %v720_v5 = vld [vmem:[%s10347_s1 + $0x940] sm:$0xff] }
 0x4cd   :  { %5077 = vmatmul.msk.f32.gmra.mxu0 %vm1000_vm0, %v717_v62  ;;  %v3690_v4 = vsel %vm3507_vm2, %v3687_v43, %v5331_v37  ;;  %v3694_v37 = vsel %vm3503_vm1, %v3691_v55, %v5327_v17  ;;  %v5335_v62 = vpop.permute.xlu0 %5334 }
 0x4ce   :  { %4464 = vmatmul.f32.gmra.mxu1 %v3690_v4  ;;  %v3697_v55 = vsel %vm3507_vm2, %v3694_v37, %v5332_v56  ;;  %v5336_v24 = vunpack.i.l.bf16 %v5335_v62  ;;  %v755_v4 = vld [vmem:[%s10347_s1 + $0xa58] sm:$0xff] }
 0x4cf   :  { %v2463_v27 = vpop.f32.mrf.mxu3 }
 0x4d0   :  { %v8211_v12 = vadd.f32 %v2463_v27, %v1870_v6  ;;  %v1882_v6 = vpop.f32.mrf.mxu2  ;;  %v723_v27 = vld [vmem:[%s10347_s1 + $0x958] sm:$0xff] }
 0x4d2   :  { %v3026_v19 = vpop.f32.mrf.mxu0  ;;  %1932 = vmatmul.f32.gmra.mxu2 %v763_v31 }
 0x4d3   :  { %v3027_v22 = vadd.f32 %v3026_v19, %v8005_v14  ;;  %v5337_v19 = vunpack.i.h.bf16 %v5335_v62 }
 0x4d4   :  { %2513 = vmatmul.f32.gmra.mxu3 %v752_v58  ;;  %v8245_v37 = vpop.f32.mrf.mxu1 }
 0x4d5   :  { %v5358_v36 = vpack.i.bf16 %v3027_v22, %v3024_v61  ;;  %5078 = vmatmul.msk.f32.gmra.mxu0 %vm1000_vm0, %v720_v5  ;;  %v2967_v22 = vadd.f32 %v7791_v1, %v7575_v29  ;;  %v769_v1 = vld [vmem:[%s10347_s1 + $0xac8] sm:$0xff] }
 0x4d6   :  { %4484 = vmatmul.f32.vlgmr.msrb.gmra.mxu1 %v3697_v55 }
 0x4d7   :  { %5359 = vrot.lane.b32.xlu2 %v5358_v36, %s5559_s11  ;;  %v2466_v35 = vpop.f32.mrf.mxu3  ;;  %v3693_v62 = vsel %vm1000_vm0, %v2967_v22, %v5337_v19  ;;  %v732_v22 = vld [vmem:[%s10347_s1 + $0x9a0] sm:$0xff] }
 0x4d8   :  { %v8232_v14 = vadd.f32 %v2466_v35, %v8165_v57  ;;  %v3692_v57 = vsel %vm1000_vm0, %v2964_v39, %v5336_v24  ;;  %v1885_v58 = vpop.f32.mrf.mxu2  ;;  %v758_v24 = vld [vmem:[%s10347_s1 + $0xa70] sm:$0xff] }
 0x4d9   :  { %v5345_v43 = vpop.permute.xlu2 %5344  ;;  %v5340_v16 = vpop.permute.xlu1 %5339  ;;  %v726_v39 = vld [vmem:[%s10347_s1 + $0x970] sm:$0xff] }
 0x4da   :  { %v5346_v17 = vunpack.i.l.bf16 %v5345_v43  ;;  %v5341_v56 = vunpack.i.l.bf16 %v5340_v16  ;;  %v8239_v18 = vpop.f32.mrf.mxu0  ;;  %v5342_v61 = vunpack.i.h.bf16 %v5340_v16  ;;  %1935 = vmatmul.f32.gmra.mxu2 %v766_v52  ;;  %v5347_v55 = vunpack.i.h.bf16 %v5345_v43  ;;  %v772_v52 = vld [vmem:[%s10347_s1 + $0xae0] sm:$0xff] }
 0x4dc   :  { %2516 = vmatmul.f32.gmra.mxu3 %v755_v4  ;;  %v3695_v13 = vsel %vm3503_vm1, %v3692_v57, %v5341_v56  ;;  %v3696_v16 = vsel %vm3503_vm1, %v3693_v62, %v5342_v61  ;;  %v8273_v43 = vpop.f32.mrf.mxu1  ;;  %v761_v56 = vld [vmem:[%s10347_s1 + $0xa88] sm:$0xff] }
 0x4dd   :  { %5079 = vmatmul.msk.f32.gmra.mxu0 %vm1000_vm0, %v723_v27  ;;  %v3698_v5 = vsel %vm3507_vm2, %v3695_v13, %v5346_v17  ;;  %10380 = vst [vmem:[#allocation30_spill] sm:$0xff] %v8273_v43  ;;  %v729_v57 = vld [vmem:[%s10347_s1 + $0x988] sm:$0xff] }
 0x4de   :  { %4487 = vmatmul.f32.gmra.mxu1 %v3698_v5  ;;  %v764_v5 = vld [vmem:[%s10347_s1 + $0xaa0] sm:$0xff] }
 0x4df   :  { %v2469_v31 = vpop.f32.mrf.mxu3 }
 0x4e0   :  { %v8256_v36 = vadd.f32 %v2469_v31, %v8182_v50  ;;  %v1888_v29 = vpop.f32.mrf.mxu2  ;;  %v3699_v50 = vsel %vm3507_vm2, %v3696_v16, %v5347_v55  ;;  %v775_v55 = vld [vmem:[%s10347_s1 + $0xaf8] sm:$0xff] }
 0x4e1   :  { %v767_v16 = vld [vmem:[%s10347_s1 + $0xab8] sm:$0xff] }
 0x4e2   :  { %v8262_v35 = vpop.f32.mrf.mxu0  ;;  %1938 = vmatmul.f32.gmra.mxu2 %v769_v1 }
 0x4e4   :  { %2519 = vmatmul.f32.gmra.mxu3 %v758_v24 }
 0x4e5   :  { %5080 = vmatmul.msk.f32.gmra.mxu0 %vm1000_vm0, %v726_v39  ;;  %v4188_v39 = vld [vmem:[%s10350_s4 + $0x370] sm:$0xff] }
 0x4e6   :  { %4490 = vmatmul.f32.gmra.mxu1 %v3699_v50  ;;  %v735_v50 = vld [vmem:[%s10347_s1 + $0x9b8] sm:$0xff] }
 0x4e7   :  { %v2472_v4 = vpop.f32.mrf.mxu3 }
 0x4e8   :  { %v8276_v17 = vadd.f32 %v2472_v4, %v8201_v25  ;;  %v1891_v13 = vpop.f32.mrf.mxu2  ;;  %v4187_v4 = vld [vmem:[%s10350_s4 + $0x368] sm:$0xff] }
 0x4ea   :  { %v8281_v27 = vpop.f32.mrf.mxu0  ;;  %1941 = vmatmul.f32.gmra.mxu2 %v772_v52  ;;  %v778_v52 = vld [vmem:[%s10347_s1 + $0xb10] sm:$0xff] }
 0x4ec   :  { %2522 = vmatmul.f32.gmra.mxu3 %v761_v56 }
 0x4ed   :  { %5081 = vmatmul.msk.f32.gmra.mxu0 %vm1000_vm0, %v729_v57 }
 0x4ef   :  { %v2475_v25 = vpop.f32.mrf.mxu3 }
 0x4f0   :  { %v8290_v19 = vadd.f32 %v2475_v25, %v1882_v6  ;;  %v8300_v31 = vpop.f32.mrf.mxu2  ;;  %v4189_v6 = vld [vmem:[%s10350_s4 + $0x378] sm:$0xff] }
 0x4f1   :  { %4494 = vmatpush.msra.mxu1 %v4189_v6 }
 0x4f2   :  { %v8295_v61 = vpop.f32.mrf.mxu0  ;;  %1944 = vmatmul.f32.gmra.mxu2 %v775_v55  ;;  %v770_v55 = vld [vmem:[%s10347_s1 + $0xad0] sm:$0xff] }
 0x4f3   :  { %4495 = vmatpush.msra.mxu1 %v4188_v39 }
 0x4f4   :  { %2525 = vmatmul.f32.gmra.mxu3 %v764_v5  ;;  %v4186_v5 = vld [vmem:[%s10350_s4 + $0x360] sm:$0xff] }
 0x4f5   :  { %5082 = vmatmul.msk.f32.gmra.mxu0 %vm1000_vm0, %v732_v22  ;;  %4496 = vmatpush.msra.mxu1 %v4187_v4  ;;  %v4184_v22 = vld [vmem:[%s10350_s4 + $0x350] sm:$0xff] }
 0x4f7   :  { %v2478_v24 = vpop.f32.mrf.mxu3  ;;  %4497 = vmatpush.msra.mxu1 %v4186_v5  ;;  %v741_v5 = vld [vmem:[%s10347_s1 + $0x9e8] sm:$0xff] }
 0x4f8   :  { %v8309_v62 = vadd.f32 %v2478_v24, %v1885_v58  ;;  %v3012_v58 = vadd.f32 %v8114_v60, %v7915_v23  ;;  %v8326_v57 = vpop.f32.mrf.mxu2  ;;  %v4185_v23 = vld [vmem:[%s10350_s4 + $0x358] sm:$0xff]  ;;  %v738_v24 = vld [vmem:[%s10347_s1 + $0x9d0] sm:$0xff] }
 0x4f9   :  { %4498 = vmatpush.msra.mxu1 %v4185_v23 }
 0x4fa   :  { %v3041_v1 = vpop.f32.mrf.mxu0  ;;  %1947 = vmatmul.f32.gmra.mxu2 %v778_v52  ;;  %v773_v52 = vld [vmem:[%s10347_s1 + $0xae8] sm:$0xff] }
 0x4fb   :  { %v3042_v56 = vadd.f32 %v3041_v1, %v8106_v10  ;;  %4499 = vmatpush.msra.mxu1 %v4184_v22  ;;  %v4182_v1 = vld [vmem:[%s10350_s4 + $0x340] sm:$0xff] }
 0x4fc   :  { %2528 = vmatmul.f32.gmra.mxu3 %v767_v16  ;;  %v781_v16 = vld [vmem:[%s10347_s1 + $0xb28] sm:$0xff] }
 0x4fd   :  { %v5363_v25 = vpack.i.bf16 %v3042_v56, %v3012_v58  ;;  %5083 = vmatmul.msk.f32.gmra.mxu0 %vm1000_vm0, %v735_v50  ;;  %v4181_v50 = vld [vmem:[%s10350_s4 + $0x338] sm:$0xff]  ;;  %v4180_v56 = vld [vmem:[%s10350_s4 + $0x330] sm:$0xff] }
 0x4ff   :  { %5364 = vrot.lane.b32.xlu0 %v5363_v25, %s5557_s16  ;;  %v2481_v10 = vpop.f32.mrf.mxu3 }
 0x500   :  { %v8339_v60 = vadd.f32 %v2481_v10, %v1888_v29  ;;  %v4183_v29 = vld [vmem:[%s10350_s4 + $0x348] sm:$0xff]  ;;  %v8353_v39 = vpop.f32.mrf.mxu2 }
 0x501   :  { %4500 = vmatpush.msra.mxu1 %v4183_v29  ;;  %v4178_v29 = vld [vmem:[%s10350_s4 + $0x320] sm:$0xff] }
 0x502   :  { %v3044_v6 = vpop.f32.mrf.mxu0  ;;  %1950 = vmatmul.f32.gmra.mxu2 %v781_v16  ;;  %v4176_v16 = vld [vmem:[%s10350_s4 + $0x310] sm:$0xff] }
 0x503   :  { %4501 = vmatpush.msra.mxu1 %v4182_v1  ;;  %v3045_v23 = vadd.f32 %v3044_v6, %v8133_v44  ;;  %v4177_v44 = vld [vmem:[%s10350_s4 + $0x318] sm:$0xff]  ;;  %v776_v1 = vld [vmem:[%s10347_s1 + $0xb00] sm:$0xff] }
 0x504   :  { %2531 = vmatmul.f32.gmra.mxu3 %v770_v55  ;;  %v784_v55 = vld [vmem:[%s10347_s1 + $0xb40] sm:$0xff] }
 0x505   :  { %5084 = vmatmul.msk.f32.gmra.mxu0 %vm1000_vm0, %v738_v24  ;;  %4502 = vmatpush.msra.mxu1 %v4181_v50 }
 0x507   :  { %v2484_v4 = vpop.f32.mrf.mxu3  ;;  %4503 = vmatpush.msra.mxu1 %v4180_v56  ;;  %v3021_v56 = vadd.f32 %v8177_v47, %v7963_v48  ;;  %v779_v47 = vld [vmem:[%s10347_s1 + $0xb18] sm:$0xff] }
 0x508   :  { %v8365_v58 = vadd.f32 %v2484_v4, %v1891_v13  ;;  %v4179_v13 = vld [vmem:[%s10350_s4 + $0x328] sm:$0xff]  ;;  %v1903_v22 = vpop.f32.mrf.mxu2  ;;  %v744_v4 = vld [vmem:[%s10347_s1 + $0xa00] sm:$0xff] }
 0x509   :  { %4504 = vmatpush.msra.mxu1 %v4179_v13 }
 0x50a   :  { %v3047_v25 = vpop.f32.mrf.mxu0  ;;  %1953 = vmatmul.f32.gmra.mxu2 %v784_v55  ;;  %v747_v55 = vld [vmem:[%s10347_s1 + $0xa18] sm:$0xff] }
 0x50b   :  { %v3048_v10 = vadd.f32 %v3047_v25, %v8155_v2  ;;  %4505 = vmatpush.msra.mxu1 %v4178_v29  ;;  %v790_v29 = vld [vmem:[%s10347_s1 + $0xb70] sm:$0xff] }
 0x50c   :  { %2534 = vmatmul.f32.gmra.mxu3 %v773_v52 }
 0x50d   :  { %v5378_v24 = vpack.i.bf16 %v3048_v10, %v3045_v23  ;;  %5085 = vmatmul.msk.f32.gmra.mxu0 %vm1000_vm0, %v741_v5  ;;  %4506 = vmatpush.msra.mxu1 %v4177_v44  ;;  %v787_v5 = vld [vmem:[%s10347_s1 + $0xb58] sm:$0xff]  ;;  %v4174_v23 = vld [vmem:[%s10350_s4 + $0x300] sm:$0xff] }
 0x50f   :  { %5379 = vrot.lane.b32.xlu0 %v5378_v24, %s5557_s16  ;;  %v2487_v2 = vpop.f32.mrf.mxu3  ;;  %4507 = vmatpush.msra.mxu1 %v4176_v16 }
 0x510   :  { %v8393_v6 = vadd.f32 %v2487_v2, %v8300_v31  ;;  %v4175_v31 = vld [vmem:[%s10350_s4 + $0x308] sm:$0xff]  ;;  %v1906_v25 = vpop.f32.mrf.mxu2  ;;  %v782_v2 = vld [vmem:[%s10347_s1 + $0xb30] sm:$0xff] }
 0x511   :  { %4508 = vmatpush.msra.mxu1 %v4175_v31 }
 0x512   :  { %v3050_v50 = vpop.f32.mrf.mxu0  ;;  %1956 = vmatmul.f32.gmra.mxu2 %v787_v5 }
 0x513   :  { %v3051_v52 = vadd.f32 %v3050_v50, %v8172_v20  ;;  %4509 = vmatpush.msra.mxu1 %v4174_v23  ;;  %v3030_v23 = vadd.f32 %v8239_v18, %v8020_v42  ;;  %v2997_v42 = vadd.f32 %v8010_v45, %v7786_v32  ;;  %v799_v45 = vld [vmem:[%s10347_s1 + $0xbb8] sm:$0xff] }
 0x514   :  { %2537 = vmatmul.f32.gmra.mxu3 %v776_v1  ;;  %v750_v1 = vld [vmem:[%s10347_s1 + $0xa30] sm:$0xff] }
 0x515   :  { %v5368_v13 = vpack.i.bf16 %v3051_v52, %v3021_v56  ;;  %5086 = vmatmul.msk.f32.gmra.mxu0 %vm1000_vm0, %v744_v4 }
 0x517   :  { %5369 = vrot.lane.b32.xlu1 %v5368_v13, %s5558_s0  ;;  %v2490_v48 = vpop.f32.mrf.mxu3  ;;  %v753_v13 = vld [vmem:[%s10347_s1 + $0xa48] sm:$0xff] }
 0x518   :  { %v8419_v20 = vadd.f32 %v2490_v48, %v8326_v57  ;;  %v1909_v24 = vpop.f32.mrf.mxu2 }
 0x51a   :  { %v3053_v10 = vpop.f32.mrf.mxu0  ;;  %1959 = vmatmul.f32.gmra.mxu2 %v790_v29 }
 0x51b   :  { %v3054_v50 = vadd.f32 %v3053_v10, %v8190_v28  ;;  %v5350_v10 = vpop.permute.xlu0 %5349 }
 0x51c   :  { %2540 = vmatmul.f32.gmra.mxu3 %v779_v47  ;;  %v5351_v29 = vunpack.i.l.bf16 %v5350_v10 }
 0x51d   :  { %5087 = vmatmul.msk.f32.gmra.mxu0 %vm1000_vm0, %v747_v55 }
 0x51f   :  { %v2493_v57 = vpop.f32.mrf.mxu3 }
 0x520   :  { %v8432_v44 = vadd.f32 %v2493_v57, %v8353_v39  ;;  %v8442_v31 = vpop.f32.mrf.mxu2  ;;  %v793_v39 = vld [vmem:[%s10347_s1 + $0xb88] sm:$0xff] }
 0x522   :  { %v3056_v16 = vpop.f32.mrf.mxu0  ;;  %1962 = vmatmul.f32.gmra.mxu2 %v793_v39  ;;  %v756_v39 = vld [vmem:[%s10347_s1 + $0xa60] sm:$0xff] }
 0x523   :  { %v3057_v4 = vadd.f32 %v3056_v16, %v8211_v12  ;;  %v785_v12 = vld [vmem:[%s10347_s1 + $0xb48] sm:$0xff]  ;;  %v788_v16 = vld [vmem:[%s10347_s1 + $0xb60] sm:$0xff] }
 0x524   :  { %2543 = vmatmul.f32.gmra.mxu3 %v782_v2 }
 0x525   :  { %v5383_v56 = vpack.i.bf16 %v3057_v4, %v3054_v50  ;;  %5088 = vmatmul.msk.f32.gmra.mxu0 %vm1000_vm0, %v750_v1 }
 0x527   :  { %5384 = vrot.lane.b32.xlu1 %v5383_v56, %s5558_s0  ;;  %v2496_v52 = vpop.f32.mrf.mxu3  ;;  %v3700_v56 = vsel %vm1000_vm0, %v2997_v42, %v5351_v29  ;;  %v791_v29 = vld [vmem:[%s10347_s1 + $0xb78] sm:$0xff] }
 0x528   :  { %v8449_v5 = vadd.f32 %v2496_v52, %v1903_v22  ;;  %v8460_v47 = vpop.f32.mrf.mxu2  ;;  %v796_v22 = vld [vmem:[%s10347_s1 + $0xba0] sm:$0xff]  ;;  %v8478_v52 = vpop.f32.mrf.mxu1  ;;  %v759_v42 = vld [vmem:[%s10347_s1 + $0xa78] sm:$0xff] }
 0x529   :  { %10381 = vst [vmem:[#allocation31_spill] sm:$0xff] %v8478_v52 }
 0x52a   :  { %v3059_v28 = vpop.f32.mrf.mxu0  ;;  %1965 = vmatmul.f32.gmra.mxu2 %v796_v22 }
 0x52b   :  { %v3060_v48 = vadd.f32 %v3059_v28, %v8232_v14 }
 0x52c   :  { %2546 = vmatmul.f32.gmra.mxu3 %v785_v12  ;;  %v5352_v12 = vunpack.i.h.bf16 %v5350_v10 }
 0x52d   :  { %v5373_v55 = vpack.i.bf16 %v3060_v48, %v3030_v23  ;;  %5089 = vmatmul.msk.f32.gmra.mxu0 %vm1000_vm0, %v753_v13  ;;  %v3000_v23 = vadd.f32 %v8025_v26, %v7805_v0 }
 0x52f   :  { %5374 = vrot.lane.b32.xlu2 %v5373_v55, %s5559_s11  ;;  %v2499_v57 = vpop.f32.mrf.mxu3  ;;  %v3701_v10 = vsel %vm1000_vm0, %v3000_v23, %v5352_v12  ;;  %v765_v23 = vld [vmem:[%s10347_s1 + $0xaa8] sm:$0xff] }
 0x530   :  { %v8467_v2 = vadd.f32 %v2499_v57, %v1906_v25  ;;  %v1918_v25 = vpop.f32.mrf.mxu2 }
 0x531   :  { %v5360_v14 = vpop.permute.xlu2 %5359  ;;  %v5355_v18 = vpop.permute.xlu1 %5354 }
 0x532   :  { %v5361_v1 = vunpack.i.l.bf16 %v5360_v14  ;;  %v5356_v50 = vunpack.i.l.bf16 %v5355_v18  ;;  %v3062_v4 = vpop.f32.mrf.mxu0  ;;  %v5357_v13 = vunpack.i.h.bf16 %v5355_v18  ;;  %1968 = vmatmul.f32.gmra.mxu2 %v799_v45  ;;  %v5362_v55 = vunpack.i.h.bf16 %v5360_v14  ;;  %v805_v45 = vld [vmem:[%s10347_s1 + $0xbe8] sm:$0xff] }
 0x534   :  { %v3703_v32 = vsel %vm3503_vm1, %v3700_v56, %v5356_v50  ;;  %2549 = vmatmul.f32.gmra.mxu3 %v788_v16  ;;  %v3704_v18 = vsel %vm3503_vm1, %v3701_v10, %v5357_v13  ;;  %v3063_v16 = vadd.f32 %v3062_v4, %v8256_v36  ;;  %v8505_v50 = vpop.f32.mrf.mxu1  ;;  %v794_v4 = vld [vmem:[%s10347_s1 + $0xb90] sm:$0xff]  ;;  %v800_v10 = vld [vmem:[%s10347_s1 + $0xbc0] sm:$0xff] }
 0x535   :  { %5090 = vmatmul.msk.f32.gmra.mxu0 %vm1000_vm0, %v756_v39  ;;  %v3706_v28 = vsel %vm3507_vm2, %v3703_v32, %v5361_v1  ;;  %v3707_v1 = vsel %vm3507_vm2, %v3704_v18, %v5362_v55  ;;  %10382 = vst [vmem:[#allocation32_spill] sm:$0xff] %v8505_v50  ;;  %v762_v56 = vld [vmem:[%s10347_s1 + $0xa90] sm:$0xff]  ;;  %v808_v55 = vld [vmem:[%s10347_s1 + $0xc00] sm:$0xff] }
 0x536   :  { %4510 = vmatmul.f32.vlgmr.msra.gmra.mxu1 %v3706_v28  ;;  %v797_v28 = vld [vmem:[%s10347_s1 + $0xba8] sm:$0xff] }
 0x537   :  { %v2502_v48 = vpop.f32.mrf.mxu3 }
 0x538   :  { %v8488_v22 = vadd.f32 %v2502_v48, %v1909_v24  ;;  %v1921_v26 = vpop.f32.mrf.mxu2  ;;  %v802_v24 = vld [vmem:[%s10347_s1 + $0xbd0] sm:$0xff] }
 0x53a   :  { %v3065_v57 = vpop.f32.mrf.mxu0  ;;  %1971 = vmatmul.f32.gmra.mxu2 %v802_v24 }
 0x53b   :  { %v3066_v0 = vadd.f32 %v3065_v57, %v8276_v17 }
 0x53c   :  { %2552 = vmatmul.f32.gmra.mxu3 %v791_v29 }
 0x53d   :  { %v5388_v14 = vpack.i.bf16 %v3066_v0, %v3063_v16  ;;  %5091 = vmatmul.msk.f32.gmra.mxu0 %vm1000_vm0, %v759_v42  ;;  %v768_v42 = vld [vmem:[%s10347_s1 + $0xac0] sm:$0xff]  ;;  %v811_v16 = vld [vmem:[%s10347_s1 + $0xc18] sm:$0xff] }
 0x53e   :  { %4513 = vmatmul.f32.gmra.mxu1 %v3707_v1  ;;  %v803_v1 = vld [vmem:[%s10347_s1 + $0xbd8] sm:$0xff] }
 0x53f   :  { %5389 = vrot.lane.b32.xlu2 %v5388_v14, %s5559_s11  ;;  %v2505_v36 = vpop.f32.mrf.mxu3  ;;  %v4204_v14 = vld [vmem:[%s10350_s4 + $0x3f0] sm:$0xff] }
 0x540   :  { %v8509_v17 = vadd.f32 %v2505_v36, %v8442_v31  ;;  %v1924_v32 = vpop.f32.mrf.mxu2 }
 0x542   :  { %v8514_v39 = vpop.f32.mrf.mxu0  ;;  %1974 = vmatmul.f32.gmra.mxu2 %v805_v45  ;;  %v814_v45 = vld [vmem:[%s10347_s1 + $0xc30] sm:$0xff] }
 0x544   :  { %2555 = vmatmul.f32.gmra.mxu3 %v794_v4  ;;  %v771_v4 = vld [vmem:[%s10347_s1 + $0xad8] sm:$0xff] }
 0x545   :  { %5092 = vmatmul.msk.f32.gmra.mxu0 %vm1000_vm0, %v762_v56  ;;  %v4203_v56 = vld [vmem:[%s10350_s4 + $0x3e8] sm:$0xff] }
 0x547   :  { %v2508_v31 = vpop.f32.mrf.mxu3 }
 0x548   :  { %v8524_v12 = vadd.f32 %v2508_v31, %v8460_v47  ;;  %v1927_v48 = vpop.f32.mrf.mxu2  ;;  %v4202_v31 = vld [vmem:[%s10350_s4 + $0x3e0] sm:$0xff] }
 0x54a   :  { %v8529_v13 = vpop.f32.mrf.mxu0  ;;  %1977 = vmatmul.f32.gmra.mxu2 %v808_v55 }
 0x54c   :  { %2558 = vmatmul.f32.gmra.mxu3 %v797_v28  ;;  %v4201_v28 = vld [vmem:[%s10350_s4 + $0x3d8] sm:$0xff] }
 0x54d   :  { %5093 = vmatmul.msk.f32.gmra.mxu0 %vm1000_vm0, %v765_v23 }
 0x54f   :  { %v2511_v47 = vpop.f32.mrf.mxu3 }
 0x550   :  { %v8538_v29 = vadd.f32 %v2511_v47, %v1918_v25  ;;  %v8548_v18 = vpop.f32.mrf.mxu2  ;;  %v4205_v25 = vld [vmem:[%s10350_s4 + $0x3f8] sm:$0xff]  ;;  %v4200_v47 = vld [vmem:[%s10350_s4 + $0x3d0] sm:$0xff] }
 0x551   :  { %4520 = vmatpush.msrb.mxu1 %v4205_v25 }
 0x552   :  { %v8543_v57 = vpop.f32.mrf.mxu0  ;;  %1980 = vmatmul.f32.gmra.mxu2 %v811_v16  ;;  %v774_v16 = vld [vmem:[%s10347_s1 + $0xaf0] sm:$0xff] }
 0x553   :  { %4521 = vmatpush.msrb.mxu1 %v4204_v14 }
 0x554   :  { %2561 = vmatmul.f32.gmra.mxu3 %v800_v10  ;;  %v806_v10 = vld [vmem:[%s10347_s1 + $0xbf0] sm:$0xff] }
 0x555   :  { %5094 = vmatmul.msk.f32.gmra.mxu0 %vm1000_vm0, %v768_v42  ;;  %4522 = vmatpush.msrb.mxu1 %v4203_v56 }
 0x557   :  { %v2514_v0 = vpop.f32.mrf.mxu3  ;;  %4523 = vmatpush.msrb.mxu1 %v4202_v31  ;;  %v809_v31 = vld [vmem:[%s10347_s1 + $0xc08] sm:$0xff] }
 0x558   :  { %v8557_v24 = vadd.f32 %v2514_v0, %v1921_v26  ;;  %v8571_v26 = vpop.f32.mrf.mxu2 }
 0x559   :  { %4524 = vmatpush.msrb.mxu1 %v4201_v28 }
 0x55a   :  { %v3077_v36 = vpop.f32.mrf.mxu0  ;;  %1983 = vmatmul.f32.gmra.mxu2 %v814_v45  ;;  %v4196_v45 = vld [vmem:[%s10350_s4 + $0x3b0] sm:$0xff] }
 0x55b   :  { %4525 = vmatpush.msrb.mxu1 %v4200_v47  ;;  %v3078_v25 = vadd.f32 %v3077_v36, %v8365_v58  ;;  %v4197_v58 = vld [vmem:[%s10350_s4 + $0x3b8] sm:$0xff] }
 0x55c   :  { %2564 = vmatmul.f32.gmra.mxu3 %v803_v1  ;;  %v817_v1 = vld [vmem:[%s10347_s1 + $0xc48] sm:$0xff] }
 0x55d   :  { %5095 = vmatmul.msk.f32.gmra.mxu0 %vm1000_vm0, %v771_v4  ;;  %v4198_v4 = vld [vmem:[%s10350_s4 + $0x3c0] sm:$0xff] }
 0x55f   :  { %v2517_v23 = vpop.f32.mrf.mxu3 }
 0x560   :  { %v8583_v55 = vadd.f32 %v2517_v23, %v1924_v32  ;;  %v4199_v32 = vld [vmem:[%s10350_s4 + $0x3c8] sm:$0xff]  ;;  %v1936_v14 = vpop.f32.mrf.mxu2 }
 0x561   :  { %4526 = vmatpush.msrb.mxu1 %v4199_v32  ;;  %v777_v23 = vld [vmem:[%s10347_s1 + $0xb08] sm:$0xff] }
 0x562   :  { %v3080_v42 = vpop.f32.mrf.mxu0  ;;  %1986 = vmatmul.f32.gmra.mxu2 %v817_v1  ;;  %v812_v1 = vld [vmem:[%s10347_s1 + $0xc20] sm:$0xff] }
 0x563   :  { %v3081_v0 = vadd.f32 %v3080_v42, %v8393_v6  ;;  %4527 = vmatpush.msrb.mxu1 %v4198_v4  ;;  %v4194_v42 = vld [vmem:[%s10350_s4 + $0x3a0] sm:$0xff] }
 0x564   :  { %2567 = vmatmul.f32.gmra.mxu3 %v806_v10  ;;  %v820_v10 = vld [vmem:[%s10347_s1 + $0xc60] sm:$0xff] }
 0x565   :  { %v5393_v56 = vpack.i.bf16 %v3081_v0, %v3078_v25  ;;  %5096 = vmatmul.msk.f32.gmra.mxu0 %vm1000_vm0, %v774_v16  ;;  %4528 = vmatpush.msrb.mxu1 %v4197_v58  ;;  %v4193_v16 = vld [vmem:[%s10350_s4 + $0x398] sm:$0xff]  ;;  %v4192_v0 = vld [vmem:[%s10350_s4 + $0x390] sm:$0xff] }
 0x567   :  { %5394 = vrot.lane.b32.xlu0 %v5393_v56, %s5557_s16  ;;  %v2520_v6 = vpop.f32.mrf.mxu3  ;;  %4529 = vmatpush.msrb.mxu1 %v4196_v45  ;;  %v780_v56 = vld [vmem:[%s10347_s1 + $0xb20] sm:$0xff] }
 0x568   :  { %v8610_v36 = vadd.f32 %v2520_v6, %v1927_v48  ;;  %v4195_v48 = vld [vmem:[%s10350_s4 + $0x3a8] sm:$0xff]  ;;  %v1939_v47 = vpop.f32.mrf.mxu2  ;;  %v823_v6 = vld [vmem:[%s10347_s1 + $0xc78] sm:$0xff]  ;;  %v4190_v45 = vld [vmem:[%s10350_s4 + $0x380] sm:$0xff] }
 0x569   :  { %4530 = vmatpush.msrb.mxu1 %v4195_v48  ;;  %v815_v48 = vld [vmem:[%s10347_s1 + $0xc38] sm:$0xff] }
 0x56a   :  { %v8618_v28 = vpop.f32.mrf.mxu0  ;;  %1989 = vmatmul.f32.gmra.mxu2 %v820_v10 }
 0x56b   :  { %4531 = vmatpush.msrb.mxu1 %v4194_v42  ;;  %v783_v42 = vld [vmem:[%s10347_s1 + $0xb38] sm:$0xff] }
 0x56c   :  { %2570 = vmatmul.f32.gmra.mxu3 %v809_v31 }
 0x56d   :  { %5097 = vmatmul.msk.f32.gmra.mxu0 %vm1000_vm0, %v777_v23  ;;  %4532 = vmatpush.msrb.mxu1 %v4193_v16 }
 0x56f   :  { %v2523_v32 = vpop.f32.mrf.mxu3  ;;  %4533 = vmatpush.msrb.mxu1 %v4192_v0 }
 0x570   :  { %v8637_v25 = vadd.f32 %v2523_v32, %v8548_v18  ;;  %v4191_v18 = vld [vmem:[%s10350_s4 + $0x388] sm:$0xff]  ;;  %v1942_v58 = vpop.f32.mrf.mxu2 }
 0x571   :  { %4534 = vmatpush.msrb.mxu1 %v4191_v18 }
 0x572   :  { %v3086_v4 = vpop.f32.mrf.mxu0  ;;  %1992 = vmatmul.f32.gmra.mxu2 %v823_v6 }
 0x573   :  { %4535 = vmatpush.msrb.mxu1 %v4190_v45  ;;  %v3087_v16 = vadd.f32 %v3086_v4, %v8432_v44  ;;  %v818_v44 = vld [vmem:[%s10347_s1 + $0xc50] sm:$0xff]  ;;  %v829_v45 = vld [vmem:[%s10347_s1 + $0xca8] sm:$0xff] }
 0x574   :  { %2573 = vmatmul.f32.gmra.mxu3 %v812_v1  ;;  %v786_v4 = vld [vmem:[%s10347_s1 + $0xb50] sm:$0xff] }
 0x575   :  { %5098 = vmatmul.msk.f32.gmra.mxu0 %vm1000_vm0, %v780_v56 }
 0x577   :  { %v2526_v31 = vpop.f32.mrf.mxu3 }
 0x578   :  { %v8659_v23 = vadd.f32 %v2526_v31, %v8571_v26  ;;  %v8669_v0 = vpop.f32.mrf.mxu2  ;;  %v826_v26 = vld [vmem:[%s10347_s1 + $0xc90] sm:$0xff]  ;;  %v5365_v31 = vpop.permute.xlu0 %5364 }
 0x57a   :  { %v3089_v10 = vpop.f32.mrf.mxu0  ;;  %1995 = vmatmul.f32.gmra.mxu2 %v826_v26 }
 0x57b   :  { %v3090_v32 = vadd.f32 %v3089_v10, %v8449_v5  ;;  %v8692_v10 = vpop.f32.mrf.mxu1 }
 0x57c   :  { %2576 = vmatmul.f32.gmra.mxu3 %v815_v48  ;;  %10383 = vst [vmem:[#allocation33_spill] sm:$0xff] %v8692_v10 }
 0x57d   :  { %v5398_v1 = vpack.i.bf16 %v3090_v32, %v3087_v16  ;;  %5099 = vmatmul.msk.f32.gmra.mxu0 %vm1000_vm0, %v783_v42  ;;  %v3003_v16 = vadd.f32 %v8039_v21, %v7835_v7  ;;  %v832_v7 = vld [vmem:[%s10347_s1 + $0xcc0] sm:$0xff] }
 0x57f   :  { %5399 = vrot.lane.b32.xlu1 %v5398_v1, %s5558_s0  ;;  %v2529_v56 = vpop.f32.mrf.mxu3  ;;  %v821_v1 = vld [vmem:[%s10347_s1 + $0xc68] sm:$0xff] }
 0x580   :  { %v8676_v18 = vadd.f32 %v2529_v56, %v1936_v14  ;;  %v8686_v6 = vpop.f32.mrf.mxu2  ;;  %v5366_v14 = vunpack.i.l.bf16 %v5365_v31 }
 0x582   :  { %v8681_v5 = vpop.f32.mrf.mxu0  ;;  %1998 = vmatmul.f32.gmra.mxu2 %v829_v45  ;;  %v3702_v45 = vsel %vm1000_vm0, %v3003_v16, %v5366_v14  ;;  %v3033_v14 = vadd.f32 %v8262_v35, %v8034_v46 }
 0x584   :  { %2579 = vmatmul.f32.gmra.mxu3 %v818_v44 }
 0x585   :  { %5100 = vmatmul.msk.f32.gmra.mxu0 %vm1000_vm0, %v786_v4  ;;  %v789_v4 = vld [vmem:[%s10347_s1 + $0xb68] sm:$0xff] }
 0x587   :  { %v2532_v48 = vpop.f32.mrf.mxu3 }
 0x588   :  { %v8694_v42 = vadd.f32 %v2532_v48, %v1939_v47  ;;  %v8705_v47 = vpop.f32.mrf.mxu2  ;;  %v5367_v48 = vunpack.i.h.bf16 %v5365_v31  ;;  %v824_v31 = vld [vmem:[%s10347_s1 + $0xc80] sm:$0xff] }
 0x589   :  { %v5375_v32 = vpop.permute.xlu2 %5374  ;;  %v5370_v26 = vpop.permute.xlu1 %5369 }
 0x58a   :  { %v5376_v56 = vunpack.i.l.bf16 %v5375_v32  ;;  %v5371_v44 = vunpack.i.l.bf16 %v5370_v26  ;;  %v3095_v34 = vpop.f32.mrf.mxu0  ;;  %v5372_v10 = vunpack.i.h.bf16 %v5370_v26  ;;  %2001 = vmatmul.f32.gmra.mxu2 %v832_v7  ;;  %v3709_v52 = vsel %vm1000_vm0, %v3033_v14, %v5367_v48 }
 0x58b   :  { %v5377_v43 = vunpack.i.h.bf16 %v5375_v32  ;;  %v3096_v46 = vadd.f32 %v3095_v34, %v8488_v22  ;;  %v835_v32 = vld [vmem:[%s10347_s1 + $0xcd8] sm:$0xff] }
 0x58c   :  { %2582 = vmatmul.f32.gmra.mxu3 %v821_v1  ;;  %v3705_v21 = vsel %vm3503_vm1, %v3702_v45, %v5371_v44  ;;  %v8721_v1 = vpop.f32.mrf.mxu1  ;;  %v5380_v44 = vpop.permute.xlu0 %5379 }
 0x58d   :  { %5101 = vmatmul.msk.f32.gmra.mxu0 %vm1000_vm0, %v789_v4  ;;  %v3708_v49 = vsel %vm3507_vm2, %v3705_v21, %v5376_v56  ;;  %10384 = vst [vmem:[#allocation34_spill] sm:$0xff] %v8721_v1  ;;  %v3712_v56 = vsel %vm3503_vm1, %v3709_v52, %v5372_v10  ;;  %v5381_v10 = vunpack.i.l.bf16 %v5380_v44  ;;  %v827_v21 = vld [vmem:[%s10347_s1 + $0xc98] sm:$0xff] }
 0x58e   :  { %4516 = vmatmul.f32.gmra.mxu1 %v3708_v49  ;;  %v792_v49 = vld [vmem:[%s10347_s1 + $0xb80] sm:$0xff]  ;;  %v3715_v52 = vsel %vm3507_vm2, %v3712_v56, %v5377_v43 }
 0x58f   :  { %v2535_v16 = vpop.f32.mrf.mxu3 }
 0x590   :  { %v8715_v50 = vadd.f32 %v2535_v16, %v1942_v58  ;;  %v1954_v58 = vpop.f32.mrf.mxu2  ;;  %v795_v16 = vld [vmem:[%s10347_s1 + $0xb98] sm:$0xff] }
 0x592   :  { %v3098_v26 = vpop.f32.mrf.mxu0  ;;  %2004 = vmatmul.f32.gmra.mxu2 %v835_v32 }
 0x593   :  { %v3099_v35 = vadd.f32 %v3098_v26, %v8509_v17  ;;  %v3036_v17 = vadd.f32 %v8281_v27, %v8053_v40  ;;  %v838_v27 = vld [vmem:[%s10347_s1 + $0xcf0] sm:$0xff]  ;;  %v5382_v26 = vunpack.i.h.bf16 %v5380_v44 }
 0x594   :  { %2585 = vmatmul.f32.gmra.mxu3 %v824_v31  ;;  %v8749_v56 = vpop.f32.mrf.mxu1 }
 0x595   :  { %v5403_v4 = vpack.i.bf16 %v3099_v35, %v3096_v46  ;;  %5102 = vmatmul.msk.f32.gmra.mxu0 %vm1000_vm0, %v792_v49  ;;  %10385 = vst [vmem:[#allocation35_spill] sm:$0xff] %v8749_v56  ;;  %v3039_v35 = vadd.f32 %v8295_v61, %v8079_v8  ;;  %v841_v61 = vld [vmem:[%s10347_s1 + $0xd08] sm:$0xff] }
 0x596   :  { %4536 = vmatmul.f32.vlgmr.msrb.gmra.mxu1 %v3715_v52 }
 0x597   :  { %5404 = vrot.lane.b32.xlu2 %v5403_v4, %s5559_s11  ;;  %v2538_v34 = vpop.f32.mrf.mxu3  ;;  %v3711_v44 = vsel %vm1000_vm0, %v3039_v35, %v5382_v26  ;;  %v804_v35 = vld [vmem:[%s10347_s1 + $0xbe0] sm:$0xff] }
 0x598   :  { %v8736_v22 = vadd.f32 %v2538_v34, %v8669_v0  ;;  %v3710_v0 = vsel %vm1000_vm0, %v3036_v17, %v5381_v10  ;;  %v1957_v31 = vpop.f32.mrf.mxu2  ;;  %v830_v10 = vld [vmem:[%s10347_s1 + $0xcb0] sm:$0xff] }
 0x599   :  { %v5390_v45 = vpop.permute.xlu2 %5389  ;;  %v5385_v7 = vpop.permute.xlu1 %5384  ;;  %v798_v17 = vld [vmem:[%s10347_s1 + $0xbb0] sm:$0xff] }
 0x59a   :  { %v5391_v48 = vunpack.i.l.bf16 %v5390_v45  ;;  %v5386_v43 = vunpack.i.l.bf16 %v5385_v7  ;;  %v8743_v14 = vpop.f32.mrf.mxu0  ;;  %v5387_v46 = vunpack.i.h.bf16 %v5385_v7  ;;  %2007 = vmatmul.f32.gmra.mxu2 %v838_v27  ;;  %v5392_v52 = vunpack.i.h.bf16 %v5390_v45  ;;  %v844_v27 = vld [vmem:[%s10347_s1 + $0xd20] sm:$0xff] }
 0x59c   :  { %2588 = vmatmul.f32.gmra.mxu3 %v827_v21  ;;  %v3713_v40 = vsel %vm3503_vm1, %v3710_v0, %v5386_v43  ;;  %v3714_v7 = vsel %vm3503_vm1, %v3711_v44, %v5387_v46  ;;  %v8777_v45 = vpop.f32.mrf.mxu1  ;;  %v833_v43 = vld [vmem:[%s10347_s1 + $0xcc8] sm:$0xff] }
 0x59d   :  { %5103 = vmatmul.msk.f32.gmra.mxu0 %vm1000_vm0, %v795_v16  ;;  %v3716_v49 = vsel %vm3507_vm2, %v3713_v40, %v5391_v48  ;;  %10386 = vst [vmem:[#allocation36_spill] sm:$0xff] %v8777_v45  ;;  %v801_v0 = vld [vmem:[%s10347_s1 + $0xbc8] sm:$0xff] }
 0x59e   :  { %4539 = vmatmul.f32.gmra.mxu1 %v3716_v49  ;;  %v836_v49 = vld [vmem:[%s10347_s1 + $0xce0] sm:$0xff] }
 0x59f   :  { %v2541_v32 = vpop.f32.mrf.mxu3 }
 0x5a0   :  { %v8760_v4 = vadd.f32 %v2541_v32, %v8686_v6  ;;  %v1960_v8 = vpop.f32.mrf.mxu2  ;;  %v3717_v6 = vsel %vm3507_vm2, %v3714_v7, %v5392_v52  ;;  %v847_v52 = vld [vmem:[%s10347_s1 + $0xd38] sm:$0xff] }
 0x5a1   :  { %v839_v7 = vld [vmem:[%s10347_s1 + $0xcf8] sm:$0xff] }
 0x5a2   :  { %v8766_v34 = vpop.f32.mrf.mxu0  ;;  %2010 = vmatmul.f32.gmra.mxu2 %v841_v61 }
 0x5a4   :  { %2591 = vmatmul.f32.gmra.mxu3 %v830_v10 }
 0x5a5   :  { %5104 = vmatmul.msk.f32.gmra.mxu0 %vm1000_vm0, %v798_v17  ;;  %v4220_v17 = vld [vmem:[%s10350_s4 + $0x470] sm:$0xff] }
 0x5a6   :  { %4542 = vmatmul.f32.gmra.mxu1 %v3717_v6  ;;  %v807_v6 = vld [vmem:[%s10347_s1 + $0xbf8] sm:$0xff] }
 0x5a7   :  { %v2544_v21 = vpop.f32.mrf.mxu3 }
 0x5a8   :  { %v8780_v48 = vadd.f32 %v2544_v21, %v8705_v47  ;;  %v1963_v40 = vpop.f32.mrf.mxu2  ;;  %v4219_v21 = vld [vmem:[%s10350_s4 + $0x468] sm:$0xff] }
 0x5aa   :  { %v8785_v16 = vpop.f32.mrf.mxu0  ;;  %2013 = vmatmul.f32.gmra.mxu2 %v844_v27  ;;  %v850_v27 = vld [vmem:[%s10347_s1 + $0xd50] sm:$0xff] }
 0x5ac   :  { %2594 = vmatmul.f32.gmra.mxu3 %v833_v43 }
 0x5ad   :  { %5105 = vmatmul.msk.f32.gmra.mxu0 %vm1000_vm0, %v801_v0 }
 0x5af   :  { %v2547_v47 = vpop.f32.mrf.mxu3 }
 0x5b0   :  { %v8794_v26 = vadd.f32 %v2547_v47, %v1954_v58  ;;  %v8804_v32 = vpop.f32.mrf.mxu2  ;;  %v4221_v58 = vld [vmem:[%s10350_s4 + $0x478] sm:$0xff] }
 0x5b1   :  { %4546 = vmatpush.msra.mxu1 %v4221_v58 }
 0x5b2   :  { %v8799_v46 = vpop.f32.mrf.mxu0  ;;  %2016 = vmatmul.f32.gmra.mxu2 %v847_v52  ;;  %v842_v52 = vld [vmem:[%s10347_s1 + $0xd10] sm:$0xff] }
 0x5b3   :  { %4547 = vmatpush.msra.mxu1 %v4220_v17 }
 0x5b4   :  { %2597 = vmatmul.f32.gmra.mxu3 %v836_v49  ;;  %v4218_v49 = vld [vmem:[%s10350_s4 + $0x460] sm:$0xff] }
 0x5b5   :  { %5106 = vmatmul.msk.f32.gmra.mxu0 %vm1000_vm0, %v804_v35  ;;  %4548 = vmatpush.msra.mxu1 %v4219_v21  ;;  %v4216_v35 = vld [vmem:[%s10350_s4 + $0x450] sm:$0xff] }
 0x5b7   :  { %v2550_v10 = vpop.f32.mrf.mxu3  ;;  %4549 = vmatpush.msra.mxu1 %v4218_v49  ;;  %v813_v49 = vld [vmem:[%s10347_s1 + $0xc28] sm:$0xff] }
 0x5b8   :  { %v8813_v44 = vadd.f32 %v2550_v10, %v1957_v31  ;;  %v3084_v31 = vadd.f32 %v8618_v28, %v8419_v20  ;;  %v8830_v0 = vpop.f32.mrf.mxu2  ;;  %v4217_v20 = vld [vmem:[%s10350_s4 + $0x458] sm:$0xff]  ;;  %v810_v10 = vld [vmem:[%s10347_s1 + $0xc10] sm:$0xff] }
 0x5b9   :  { %4550 = vmatpush.msra.mxu1 %v4217_v20 }
 0x5ba   :  { %v3113_v61 = vpop.f32.mrf.mxu0  ;;  %2019 = vmatmul.f32.gmra.mxu2 %v850_v27  ;;  %v845_v27 = vld [vmem:[%s10347_s1 + $0xd28] sm:$0xff] }
 0x5bb   :  { %v3114_v43 = vadd.f32 %v3113_v61, %v8610_v36  ;;  %4551 = vmatpush.msra.mxu1 %v4216_v35  ;;  %v4214_v61 = vld [vmem:[%s10350_s4 + $0x440] sm:$0xff] }
 0x5bc   :  { %2600 = vmatmul.f32.gmra.mxu3 %v839_v7  ;;  %v853_v7 = vld [vmem:[%s10347_s1 + $0xd68] sm:$0xff] }
 0x5bd   :  { %v5408_v47 = vpack.i.bf16 %v3114_v43, %v3084_v31  ;;  %5107 = vmatmul.msk.f32.gmra.mxu0 %vm1000_vm0, %v807_v6  ;;  %v4213_v6 = vld [vmem:[%s10350_s4 + $0x438] sm:$0xff]  ;;  %v4212_v43 = vld [vmem:[%s10350_s4 + $0x430] sm:$0xff] }
 0x5bf   :  { %5409 = vrot.lane.b32.xlu0 %v5408_v47, %s5557_s16  ;;  %v2553_v36 = vpop.f32.mrf.mxu3 }
 0x5c0   :  { %v8843_v28 = vadd.f32 %v2553_v36, %v1960_v8  ;;  %v4215_v8 = vld [vmem:[%s10350_s4 + $0x448] sm:$0xff]  ;;  %v8857_v17 = vpop.f32.mrf.mxu2 }
 0x5c1   :  { %4552 = vmatpush.msra.mxu1 %v4215_v8  ;;  %v4210_v8 = vld [vmem:[%s10350_s4 + $0x420] sm:$0xff] }
 0x5c2   :  { %v3116_v58 = vpop.f32.mrf.mxu0  ;;  %2022 = vmatmul.f32.gmra.mxu2 %v853_v7  ;;  %v4208_v7 = vld [vmem:[%s10350_s4 + $0x410] sm:$0xff] }
 0x5c3   :  { %4553 = vmatpush.msra.mxu1 %v4214_v61  ;;  %v3117_v20 = vadd.f32 %v3116_v58, %v8637_v25  ;;  %v4209_v25 = vld [vmem:[%s10350_s4 + $0x418] sm:$0xff]  ;;  %v848_v61 = vld [vmem:[%s10347_s1 + $0xd40] sm:$0xff] }
 0x5c4   :  { %2603 = vmatmul.f32.gmra.mxu3 %v842_v52  ;;  %v856_v52 = vld [vmem:[%s10347_s1 + $0xd80] sm:$0xff] }
 0x5c5   :  { %5108 = vmatmul.msk.f32.gmra.mxu0 %vm1000_vm0, %v810_v10  ;;  %4554 = vmatpush.msra.mxu1 %v4213_v6 }
 0x5c7   :  { %v2556_v21 = vpop.f32.mrf.mxu3  ;;  %4555 = vmatpush.msra.mxu1 %v4212_v43  ;;  %v3093_v43 = vadd.f32 %v8681_v5, %v8467_v2  ;;  %v851_v5 = vld [vmem:[%s10347_s1 + $0xd58] sm:$0xff] }
 0x5c8   :  { %v8869_v31 = vadd.f32 %v2556_v21, %v1963_v40  ;;  %v4211_v40 = vld [vmem:[%s10350_s4 + $0x428] sm:$0xff]  ;;  %v1975_v35 = vpop.f32.mrf.mxu2  ;;  %v816_v21 = vld [vmem:[%s10347_s1 + $0xc40] sm:$0xff] }
 0x5c9   :  { %4556 = vmatpush.msra.mxu1 %v4211_v40 }
 0x5ca   :  { %v3119_v47 = vpop.f32.mrf.mxu0  ;;  %2025 = vmatmul.f32.gmra.mxu2 %v856_v52  ;;  %v819_v52 = vld [vmem:[%s10347_s1 + $0xc58] sm:$0xff] }
 0x5cb   :  { %v3120_v36 = vadd.f32 %v3119_v47, %v8659_v23  ;;  %4557 = vmatpush.msra.mxu1 %v4210_v8  ;;  %v862_v8 = vld [vmem:[%s10347_s1 + $0xdb0] sm:$0xff] }
 0x5cc   :  { %2606 = vmatmul.f32.gmra.mxu3 %v845_v27 }
 0x5cd   :  { %v5423_v10 = vpack.i.bf16 %v3120_v36, %v3117_v20  ;;  %5109 = vmatmul.msk.f32.gmra.mxu0 %vm1000_vm0, %v813_v49  ;;  %4558 = vmatpush.msra.mxu1 %v4209_v25  ;;  %v859_v49 = vld [vmem:[%s10347_s1 + $0xd98] sm:$0xff]  ;;  %v4206_v20 = vld [vmem:[%s10350_s4 + $0x400] sm:$0xff] }
 0x5cf   :  { %5424 = vrot.lane.b32.xlu0 %v5423_v10, %s5557_s16  ;;  %v2559_v23 = vpop.f32.mrf.mxu3  ;;  %4559 = vmatpush.msra.mxu1 %v4208_v7 }
 0x5d0   :  { %v8897_v58 = vadd.f32 %v2559_v23, %v8804_v32  ;;  %v4207_v32 = vld [vmem:[%s10350_s4 + $0x408] sm:$0xff]  ;;  %v1978_v47 = vpop.f32.mrf.mxu2  ;;  %v854_v23 = vld [vmem:[%s10347_s1 + $0xd70] sm:$0xff] }
 0x5d1   :  { %4560 = vmatpush.msra.mxu1 %v4207_v32 }
 0x5d2   :  { %v3122_v6 = vpop.f32.mrf.mxu0  ;;  %2028 = vmatmul.f32.gmra.mxu2 %v859_v49 }
 0x5d3   :  { %v3123_v27 = vadd.f32 %v3122_v6, %v8676_v18  ;;  %4561 = vmatpush.msra.mxu1 %v4206_v20  ;;  %v3102_v20 = vadd.f32 %v8743_v14, %v8524_v12  ;;  %v3069_v12 = vadd.f32 %v8514_v39, %v8290_v19  ;;  %v871_v39 = vld [vmem:[%s10347_s1 + $0xdf8] sm:$0xff] }
 0x5d4   :  { %2609 = vmatmul.f32.gmra.mxu3 %v848_v61  ;;  %v822_v61 = vld [vmem:[%s10347_s1 + $0xc70] sm:$0xff] }
 0x5d5   :  { %v5413_v40 = vpack.i.bf16 %v3123_v27, %v3093_v43  ;;  %5110 = vmatmul.msk.f32.gmra.mxu0 %vm1000_vm0, %v816_v21 }
 0x5d7   :  { %5414 = vrot.lane.b32.xlu1 %v5413_v40, %s5558_s0  ;;  %v2562_v2 = vpop.f32.mrf.mxu3  ;;  %v825_v40 = vld [vmem:[%s10347_s1 + $0xc88] sm:$0xff] }
 0x5d8   :  { %v8923_v18 = vadd.f32 %v2562_v2, %v8830_v0  ;;  %v1981_v10 = vpop.f32.mrf.mxu2 }
 0x5da   :  { %v3125_v36 = vpop.f32.mrf.mxu0  ;;  %2031 = vmatmul.f32.gmra.mxu2 %v862_v8 }
 0x5db   :  { %v3126_v6 = vadd.f32 %v3125_v36, %v8694_v42  ;;  %v5395_v36 = vpop.permute.xlu0 %5394 }
 0x5dc   :  { %2612 = vmatmul.f32.gmra.mxu3 %v851_v5  ;;  %v5396_v8 = vunpack.i.l.bf16 %v5395_v36 }
 0x5dd   :  { %5111 = vmatmul.msk.f32.gmra.mxu0 %vm1000_vm0, %v819_v52 }
 0x5df   :  { %v2565_v0 = vpop.f32.mrf.mxu3 }
 0x5e0   :  { %v8936_v25 = vadd.f32 %v2565_v0, %v8857_v17  ;;  %v8946_v32 = vpop.f32.mrf.mxu2  ;;  %v865_v17 = vld [vmem:[%s10347_s1 + $0xdc8] sm:$0xff] }
 0x5e2   :  { %v3128_v7 = vpop.f32.mrf.mxu0  ;;  %2034 = vmatmul.f32.gmra.mxu2 %v865_v17  ;;  %v828_v17 = vld [vmem:[%s10347_s1 + $0xca0] sm:$0xff] }
 0x5e3   :  { %v3129_v21 = vadd.f32 %v3128_v7, %v8715_v50  ;;  %v857_v50 = vld [vmem:[%s10347_s1 + $0xd88] sm:$0xff]  ;;  %v860_v7 = vld [vmem:[%s10347_s1 + $0xda0] sm:$0xff] }
 0x5e4   :  { %2615 = vmatmul.f32.gmra.mxu3 %v854_v23 }
 0x5e5   :  { %v5428_v43 = vpack.i.bf16 %v3129_v21, %v3126_v6  ;;  %5112 = vmatmul.msk.f32.gmra.mxu0 %vm1000_vm0, %v822_v61 }
 0x5e7   :  { %5429 = vrot.lane.b32.xlu1 %v5428_v43, %s5558_s0  ;;  %v2568_v27 = vpop.f32.mrf.mxu3  ;;  %v3862_v43 = vsel %vm1000_vm0, %v3069_v12, %v5396_v8  ;;  %v863_v8 = vld [vmem:[%s10347_s1 + $0xdb8] sm:$0xff] }
 0x5e8   :  { %v8953_v49 = vadd.f32 %v2568_v27, %v1975_v35  ;;  %v8964_v5 = vpop.f32.mrf.mxu2  ;;  %v868_v35 = vld [vmem:[%s10347_s1 + $0xde0] sm:$0xff]  ;;  %v8982_v27 = vpop.f32.mrf.mxu1  ;;  %v831_v12 = vld [vmem:[%s10347_s1 + $0xcb8] sm:$0xff] }
 0x5ea   :  { %v3131_v42 = vpop.f32.mrf.mxu0  ;;  %2037 = vmatmul.f32.gmra.mxu2 %v868_v35 }
 0x5eb   :  { %v3132_v2 = vadd.f32 %v3131_v42, %v8736_v22 }
 0x5ec   :  { %2618 = vmatmul.f32.gmra.mxu3 %v857_v50  ;;  %v5397_v50 = vunpack.i.h.bf16 %v5395_v36 }
 0x5ed   :  { %v5418_v52 = vpack.i.bf16 %v3132_v2, %v3102_v20  ;;  %5113 = vmatmul.msk.f32.gmra.mxu0 %vm1000_vm0, %v825_v40  ;;  %v3072_v20 = vadd.f32 %v8529_v13, %v8309_v62 }
 0x5ef   :  { %5419 = vrot.lane.b32.xlu2 %v5418_v52, %s5559_s11  ;;  %v2571_v0 = vpop.f32.mrf.mxu3  ;;  %v3863_v36 = vsel %vm1000_vm0, %v3072_v20, %v5397_v50  ;;  %v837_v20 = vld [vmem:[%s10347_s1 + $0xce8] sm:$0xff] }
 0x5f0   :  { %v8971_v23 = vadd.f32 %v2571_v0, %v1978_v47  ;;  %v1990_v47 = vpop.f32.mrf.mxu2 }
 0x5f1   :  { %v5405_v22 = vpop.permute.xlu2 %5404  ;;  %v5400_v14 = vpop.permute.xlu1 %5399 }
 0x5f2   :  { %v5406_v61 = vunpack.i.l.bf16 %v5405_v22  ;;  %v5401_v6 = vunpack.i.l.bf16 %v5400_v14  ;;  %v3134_v21 = vpop.f32.mrf.mxu0  ;;  %v5402_v40 = vunpack.i.h.bf16 %v5400_v14  ;;  %2040 = vmatmul.f32.gmra.mxu2 %v871_v39  ;;  %v5407_v52 = vunpack.i.h.bf16 %v5405_v22  ;;  %v877_v39 = vld [vmem:[%s10347_s1 + $0xe28] sm:$0xff] }
 0x5f4   :  { %v3865_v19 = vsel %vm3503_vm1, %v3862_v43, %v5401_v6  ;;  %2621 = vmatmul.f32.gmra.mxu3 %v860_v7  ;;  %v3866_v14 = vsel %vm3503_vm1, %v3863_v36, %v5402_v40  ;;  %v3135_v7 = vadd.f32 %v3134_v21, %v8760_v4  ;;  %v9009_v6 = vpop.f32.mrf.mxu1  ;;  %v866_v21 = vld [vmem:[%s10347_s1 + $0xdd0] sm:$0xff]  ;;  %v872_v36 = vld [vmem:[%s10347_s1 + $0xe00] sm:$0xff] }
 0x5f5   :  { %5114 = vmatmul.msk.f32.gmra.mxu0 %vm1000_vm0, %v828_v17  ;;  %v3868_v42 = vsel %vm3507_vm2, %v3865_v19, %v5406_v61  ;;  %v3869_v61 = vsel %vm3507_vm2, %v3866_v14, %v5407_v52  ;;  %v834_v43 = vld [vmem:[%s10347_s1 + $0xcd0] sm:$0xff]  ;;  %v880_v52 = vld [vmem:[%s10347_s1 + $0xe40] sm:$0xff] }
 0x5f6   :  { %4562 = vmatmul.f32.vlgmr.msra.gmra.mxu1 %v3868_v42  ;;  %v869_v42 = vld [vmem:[%s10347_s1 + $0xde8] sm:$0xff] }
 0x5f7   :  { %v2574_v2 = vpop.f32.mrf.mxu3 }
 0x5f8   :  { %v8992_v35 = vadd.f32 %v2574_v2, %v1981_v10  ;;  %v1993_v13 = vpop.f32.mrf.mxu2  ;;  %v874_v10 = vld [vmem:[%s10347_s1 + $0xe10] sm:$0xff] }
 0x5fa   :  { %v3137_v0 = vpop.f32.mrf.mxu0  ;;  %2043 = vmatmul.f32.gmra.mxu2 %v874_v10 }
 0x5fb   :  { %v3138_v62 = vadd.f32 %v3137_v0, %v8780_v48 }
 0x5fc   :  { %2624 = vmatmul.f32.gmra.mxu3 %v863_v8 }
 0x5fd   :  { %v5433_v22 = vpack.i.bf16 %v3138_v62, %v3135_v7  ;;  %5115 = vmatmul.msk.f32.gmra.mxu0 %vm1000_vm0, %v831_v12  ;;  %v840_v12 = vld [vmem:[%s10347_s1 + $0xd00] sm:$0xff]  ;;  %v4237_v62 = vld [vmem:[%s10350_s4 + $0x4f8] sm:$0xff] }
 0x5fe   :  { %4565 = vmatmul.f32.gmra.mxu1 %v3869_v61  ;;  %v875_v61 = vld [vmem:[%s10347_s1 + $0xe18] sm:$0xff] }
 0x5ff   :  { %5434 = vrot.lane.b32.xlu2 %v5433_v22, %s5559_s11  ;;  %v2577_v4 = vpop.f32.mrf.mxu3  ;;  %4572 = vmatpush.msrb.mxu1 %v4237_v62 }
 0x600   :  { %v9013_v48 = vadd.f32 %v2577_v4, %v8946_v32  ;;  %v1996_v19 = vpop.f32.mrf.mxu2 }
 0x602   :  { %v9018_v17 = vpop.f32.mrf.mxu0  ;;  %2046 = vmatmul.f32.gmra.mxu2 %v877_v39  ;;  %v886_v39 = vld [vmem:[%s10347_s1 + $0xe70] sm:$0xff] }
 0x604   :  { %2627 = vmatmul.f32.gmra.mxu3 %v866_v21  ;;  %v843_v21 = vld [vmem:[%s10347_s1 + $0xd18] sm:$0xff] }
 0x605   :  { %5116 = vmatmul.msk.f32.gmra.mxu0 %vm1000_vm0, %v834_v43  ;;  %v4235_v43 = vld [vmem:[%s10350_s4 + $0x4e8] sm:$0xff] }
 0x607   :  { %v2580_v32 = vpop.f32.mrf.mxu3 }
 0x608   :  { %v9028_v50 = vadd.f32 %v2580_v32, %v8964_v5  ;;  %v1999_v2 = vpop.f32.mrf.mxu2  ;;  %v4234_v32 = vld [vmem:[%s10350_s4 + $0x4e0] sm:$0xff] }
 0x60a   :  { %v9033_v40 = vpop.f32.mrf.mxu0  ;;  %2049 = vmatmul.f32.gmra.mxu2 %v880_v52 }
 0x60c   :  { %2630 = vmatmul.f32.gmra.mxu3 %v869_v42  ;;  %v4233_v42 = vld [vmem:[%s10350_s4 + $0x4d8] sm:$0xff] }
 0x60d   :  { %5117 = vmatmul.msk.f32.gmra.mxu0 %vm1000_vm0, %v837_v20 }
 0x60f   :  { %v2583_v5 = vpop.f32.mrf.mxu3 }
 0x610   :  { %v9042_v8 = vadd.f32 %v2583_v5, %v1990_v47  ;;  %v9053_v7 = vpop.f32.mrf.mxu2  ;;  %v883_v47 = vld [vmem:[%s10347_s1 + $0xe58] sm:$0xff]  ;;  %v4232_v5 = vld [vmem:[%s10350_s4 + $0x4d0] sm:$0xff] }
 0x612   :  { %v3146_v0 = vpop.f32.mrf.mxu0  ;;  %2052 = vmatmul.f32.gmra.mxu2 %v883_v47 }
 0x613   :  { %v9051_v14 = vadd.f32 %v3146_v0, %v8843_v28  ;;  %v4236_v28 = vld [vmem:[%s10350_s4 + $0x4f0] sm:$0xff] }
 0x614   :  { %2633 = vmatmul.f32.gmra.mxu3 %v872_v36  ;;  %4573 = vmatpush.msrb.mxu1 %v4236_v28  ;;  %v878_v36 = vld [vmem:[%s10347_s1 + $0xe30] sm:$0xff]  ;;  %v889_v28 = vld [vmem:[%s10347_s1 + $0xe88] sm:$0xff] }
 0x615   :  { %5118 = vmatmul.msk.f32.gmra.mxu0 %vm1000_vm0, %v840_v12  ;;  %v846_v12 = vld [vmem:[%s10347_s1 + $0xd30] sm:$0xff] }
 0x616   :  { %4574 = vmatpush.msrb.mxu1 %v4235_v43  ;;  %v4228_v43 = vld [vmem:[%s10350_s4 + $0x4b0] sm:$0xff] }
 0x617   :  { %v2586_v10 = vpop.f32.mrf.mxu3 }
 0x618   :  { %v9062_v22 = vadd.f32 %v2586_v10, %v1993_v13  ;;  %v9076_v13 = vpop.f32.mrf.mxu2  ;;  %4575 = vmatpush.msrb.mxu1 %v4234_v32 }
 0x61a   :  { %v3149_v4 = vpop.f32.mrf.mxu0  ;;  %2055 = vmatmul.f32.gmra.mxu2 %v886_v39  ;;  %4576 = vmatpush.msrb.mxu1 %v4233_v42  ;;  %v881_v39 = vld [vmem:[%s10347_s1 + $0xe48] sm:$0xff] }
 0x61b   :  { %v3150_v47 = vadd.f32 %v3149_v4, %v8869_v31  ;;  %v4229_v31 = vld [vmem:[%s10350_s4 + $0x4b8] sm:$0xff]  ;;  %v849_v42 = vld [vmem:[%s10347_s1 + $0xd48] sm:$0xff] }
 0x61c   :  { %2636 = vmatmul.f32.gmra.mxu3 %v875_v61  ;;  %4577 = vmatpush.msrb.mxu1 %v4232_v5  ;;  %v4230_v61 = vld [vmem:[%s10350_s4 + $0x4c0] sm:$0xff] }
 0x61d   :  { %5119 = vmatmul.msk.f32.gmra.mxu0 %vm1000_vm0, %v843_v21 }
 0x61f   :  { %v2589_v20 = vpop.f32.mrf.mxu3 }
 0x620   :  { %v9088_v52 = vadd.f32 %v2589_v20, %v1996_v19  ;;  %v4231_v19 = vld [vmem:[%s10350_s4 + $0x4c8] sm:$0xff]  ;;  %v2008_v10 = vpop.f32.mrf.mxu2 }
 0x621   :  { %4578 = vmatpush.msrb.mxu1 %v4231_v19 }
 0x622   :  { %v3152_v0 = vpop.f32.mrf.mxu0  ;;  %2058 = vmatmul.f32.gmra.mxu2 %v889_v28 }
 0x623   :  { %v3153_v62 = vadd.f32 %v3152_v0, %v8897_v58  ;;  %4579 = vmatpush.msrb.mxu1 %v4230_v61  ;;  %v4226_v0 = vld [vmem:[%s10350_s4 + $0x4a0] sm:$0xff] }
 0x624   :  { %2639 = vmatmul.f32.gmra.mxu3 %v878_v36  ;;  %v892_v36 = vld [vmem:[%s10347_s1 + $0xea0] sm:$0xff] }
 0x625   :  { %v5438_v21 = vpack.i.bf16 %v3153_v62, %v3150_v47  ;;  %5120 = vmatmul.msk.f32.gmra.mxu0 %vm1000_vm0, %v846_v12  ;;  %4580 = vmatpush.msrb.mxu1 %v4229_v31  ;;  %v4224_v47 = vld [vmem:[%s10350_s4 + $0x490] sm:$0xff]  ;;  %v884_v62 = vld [vmem:[%s10347_s1 + $0xe60] sm:$0xff]  ;;  %v895_v31 = vld [vmem:[%s10347_s1 + $0xeb8] sm:$0xff] }
 0x626   :  { %v852_v61 = vld [vmem:[%s10347_s1 + $0xd60] sm:$0xff] }
 0x627   :  { %5439 = vrot.lane.b32.xlu0 %v5438_v21, %s5557_s16  ;;  %v2592_v58 = vpop.f32.mrf.mxu3  ;;  %4581 = vmatpush.msrb.mxu1 %v4228_v43 }
 0x628   :  { %v9115_v4 = vadd.f32 %v2592_v58, %v1999_v2  ;;  %v4227_v2 = vld [vmem:[%s10350_s4 + $0x4a8] sm:$0xff]  ;;  %v2011_v5 = vpop.f32.mrf.mxu2  ;;  %v4222_v58 = vld [vmem:[%s10350_s4 + $0x480] sm:$0xff] }
 0x629   :  { %4582 = vmatpush.msrb.mxu1 %v4227_v2  ;;  %v855_v2 = vld [vmem:[%s10347_s1 + $0xd78] sm:$0xff] }
 0x62a   :  { %v3155_v32 = vpop.f32.mrf.mxu0  ;;  %2061 = vmatmul.f32.gmra.mxu2 %v892_v36 }
 0x62b   :  { %v9130_v20 = vadd.f32 %v3155_v32, %v8923_v18  ;;  %4583 = vmatpush.msrb.mxu1 %v4226_v0  ;;  %v4225_v18 = vld [vmem:[%s10350_s4 + $0x498] sm:$0xff] }
 0x62c   :  { %2642 = vmatmul.f32.gmra.mxu3 %v881_v39  ;;  %v887_v32 = vld [vmem:[%s10347_s1 + $0xe78] sm:$0xff] }
 0x62d   :  { %5121 = vmatmul.msk.f32.gmra.mxu0 %vm1000_vm0, %v849_v42  ;;  %4584 = vmatpush.msrb.mxu1 %v4225_v18 }
 0x62f   :  { %v2595_v12 = vpop.f32.mrf.mxu3  ;;  %4585 = vmatpush.msrb.mxu1 %v4224_v47 }
 0x630   :  { %v9143_v19 = vadd.f32 %v2595_v12, %v9053_v7  ;;  %v4223_v7 = vld [vmem:[%s10350_s4 + $0x488] sm:$0xff]  ;;  %v2014_v21 = vpop.f32.mrf.mxu2 }
 0x631   :  { %4586 = vmatpush.msrb.mxu1 %v4223_v7 }
 0x632   :  { %v3158_v28 = vpop.f32.mrf.mxu0  ;;  %2064 = vmatmul.f32.gmra.mxu2 %v895_v31  ;;  %v901_v31 = vld [vmem:[%s10347_s1 + $0xee8] sm:$0xff] }
 0x633   :  { %4587 = vmatpush.msrb.mxu1 %v4222_v58  ;;  %v3159_v36 = vadd.f32 %v3158_v28, %v8936_v25  ;;  %v890_v25 = vld [vmem:[%s10347_s1 + $0xe90] sm:$0xff] }
 0x634   :  { %2645 = vmatmul.f32.gmra.mxu3 %v884_v62  ;;  %v858_v28 = vld [vmem:[%s10347_s1 + $0xd90] sm:$0xff] }
 0x635   :  { %5122 = vmatmul.msk.f32.gmra.mxu0 %vm1000_vm0, %v852_v61 }
 0x637   :  { %v2598_v43 = vpop.f32.mrf.mxu3 }
 0x638   :  { %v9165_v39 = vadd.f32 %v2598_v43, %v9076_v13  ;;  %v9175_v18 = vpop.f32.mrf.mxu2  ;;  %v898_v13 = vld [vmem:[%s10347_s1 + $0xed0] sm:$0xff] }
 0x63a   :  { %v3161_v42 = vpop.f32.mrf.mxu0  ;;  %2067 = vmatmul.f32.gmra.mxu2 %v898_v13 }
 0x63b   :  { %v3162_v0 = vadd.f32 %v3161_v42, %v8953_v49 }
 0x63c   :  { %2648 = vmatmul.f32.gmra.mxu3 %v887_v32  ;;  %v9199_v32 = vpop.f32.mrf.mxu1 }
 0x63d   :  { %v5443_v12 = vpack.i.bf16 %v3162_v0, %v3159_v36  ;;  %5123 = vmatmul.msk.f32.gmra.mxu0 %vm1000_vm0, %v855_v2  ;;  %v893_v0 = vld [vmem:[%s10347_s1 + $0xea8] sm:$0xff] }
 0x63f   :  { %5444 = vrot.lane.b32.xlu1 %v5443_v12, %s5558_s0  ;;  %v2601_v47 = vpop.f32.mrf.mxu3 }
 0x640   :  { %v9182_v62 = vadd.f32 %v2601_v47, %v2008_v10  ;;  %v9193_v7 = vpop.f32.mrf.mxu2  ;;  %v5410_v10 = vpop.permute.xlu0 %5409 }
 0x641   :  { %v5411_v58 = vunpack.i.l.bf16 %v5410_v10 }
 0x642   :  { %v3164_v49 = vpop.f32.mrf.mxu0  ;;  %2070 = vmatmul.f32.gmra.mxu2 %v901_v31 }
 0x643   :  { %v9191_v61 = vadd.f32 %v3164_v49, %v8971_v23  ;;  %v3075_v23 = vadd.f32 %v8543_v57, %v8339_v60  ;;  %v904_v60 = vld [vmem:[%s10347_s1 + $0xf00] sm:$0xff] }
 0x644   :  { %2651 = vmatmul.f32.gmra.mxu3 %v890_v25  ;;  %v861_v25 = vld [vmem:[%s10347_s1 + $0xda8] sm:$0xff] }
 0x645   :  { %5124 = vmatmul.msk.f32.gmra.mxu0 %vm1000_vm0, %v858_v28  ;;  %v3864_v49 = vsel %vm1000_vm0, %v3075_v23, %v5411_v58  ;;  %v5412_v28 = vunpack.i.h.bf16 %v5410_v10  ;;  %v3105_v58 = vadd.f32 %v8766_v34, %v8538_v29  ;;  %v896_v10 = vld [vmem:[%s10347_s1 + $0xec0] sm:$0xff] }
 0x647   :  { %v2604_v43 = vpop.f32.mrf.mxu3  ;;  %v3871_v56 = vsel %vm1000_vm0, %v3105_v58, %v5412_v28  ;;  %v899_v28 = vld [vmem:[%s10347_s1 + $0xed8] sm:$0xff] }
 0x648   :  { %v9201_v42 = vadd.f32 %v2604_v43, %v2011_v5  ;;  %v9212_v5 = vpop.f32.mrf.mxu2  ;;  %v5425_v34 = vpop.permute.xlu0 %5424 }
 0x649   :  { %v5420_v2 = vpop.permute.xlu2 %5419  ;;  %v5415_v36 = vpop.permute.xlu1 %5414 }
 0x64a   :  { %v5421_v13 = vunpack.i.l.bf16 %v5420_v2  ;;  %v5416_v12 = vunpack.i.l.bf16 %v5415_v36  ;;  %v3167_v47 = vpop.f32.mrf.mxu0  ;;  %v5417_v43 = vunpack.i.h.bf16 %v5415_v36  ;;  %2073 = vmatmul.f32.gmra.mxu2 %v904_v60  ;;  %v5422_v1 = vunpack.i.h.bf16 %v5420_v2 }
 0x64b   :  { %v5426_v60 = vunpack.i.l.bf16 %v5425_v34 }
 0x64c   :  { %2654 = vmatmul.f32.gmra.mxu3 %v893_v0  ;;  %v3867_v57 = vsel %vm3503_vm1, %v3864_v49, %v5416_v12  ;;  %v9228_v0 = vpop.f32.mrf.mxu1  ;;  %v3168_v12 = vadd.f32 %v3167_v47, %v8992_v35 }
 0x64d   :  { %5125 = vmatmul.msk.f32.gmra.mxu0 %vm1000_vm0, %v861_v25  ;;  %v3870_v31 = vsel %vm3507_vm2, %v3867_v57, %v5421_v13  ;;  %v3874_v13 = vsel %vm3503_vm1, %v3871_v56, %v5417_v43 }
 0x64e   :  { %4568 = vmatmul.f32.gmra.mxu1 %v3870_v31  ;;  %v3877_v49 = vsel %vm3507_vm2, %v3874_v13, %v5422_v1  ;;  %v5427_v13 = vunpack.i.h.bf16 %v5425_v34 }
 0x64f   :  { %v2607_v23 = vpop.f32.mrf.mxu3 }
 0x650   :  { %v9222_v45 = vadd.f32 %v2607_v23, %v2014_v21  ;;  %v2026_v29 = vpop.f32.mrf.mxu2  ;;  %v907_v21 = vld [vmem:[%s10347_s1 + $0xf18] sm:$0xff] }
 0x652   :  { %v3170_v36 = vpop.f32.mrf.mxu0  ;;  %2076 = vmatmul.f32.gmra.mxu2 %v907_v21 }
 0x653   :  { %v3171_v25 = vadd.f32 %v3170_v36, %v9013_v48  ;;  %v3108_v48 = vadd.f32 %v8785_v16, %v8557_v24  ;;  %v910_v16 = vld [vmem:[%s10347_s1 + $0xf30] sm:$0xff] }
 0x654   :  { %2657 = vmatmul.f32.gmra.mxu3 %v896_v10 }
 0x655   :  { %v5448_v2 = vpack.i.bf16 %v3171_v25, %v3168_v12  ;;  %v3872_v23 = vsel %vm1000_vm0, %v3108_v48, %v5426_v60 }
 0x656   :  { %4588 = vmatmul.f32.vlgmr.msrb.gmra.mxu1 %v3877_v49  ;;  %v902_v49 = vld [vmem:[%s10347_s1 + $0xef0] sm:$0xff] }
 0x657   :  { %5449 = vrot.lane.b32.xlu2 %v5448_v2, %s5559_s11  ;;  %v2610_v56 = vpop.f32.mrf.mxu3 }
 0x658   :  { %v9239_v35 = vadd.f32 %v2610_v56, %v9175_v18  ;;  %v2029_v10 = vpop.f32.mrf.mxu2  ;;  %v9250_v18 = vpop.f32.mrf.mxu1 }
 0x659   :  { %v5435_v47 = vpop.permute.xlu2 %5434  ;;  %v5430_v57 = vpop.permute.xlu1 %5429 }
 0x65a   :  { %v5436_v31 = vunpack.i.l.bf16 %v5435_v47  ;;  %v5431_v1 = vunpack.i.l.bf16 %v5430_v57  ;;  %v3173_v43 = vpop.f32.mrf.mxu0  ;;  %v5432_v12 = vunpack.i.h.bf16 %v5430_v57  ;;  %2079 = vmatmul.f32.gmra.mxu2 %v910_v16  ;;  %v5437_v2 = vunpack.i.h.bf16 %v5435_v47 }
 0x65b   :  { %v9247_v58 = vadd.f32 %v3173_v43, %v9028_v50  ;;  %v3111_v50 = vadd.f32 %v8799_v46, %v8583_v55  ;;  %v913_v55 = vld [vmem:[%s10347_s1 + $0xf48] sm:$0xff] }
 0x65c   :  { %2660 = vmatmul.f32.gmra.mxu3 %v899_v28  ;;  %v3875_v24 = vsel %vm3503_vm1, %v3872_v23, %v5431_v1  ;;  %v916_v23 = vld [vmem:[%s10347_s1 + $0xf60] sm:$0xff] }
 0x65d   :  { %v3878_v36 = vsel %vm3507_vm2, %v3875_v24, %v5436_v31  ;;  %v3873_v60 = vsel %vm1000_vm0, %v3111_v50, %v5427_v13 }
 0x65e   :  { %4591 = vmatmul.f32.gmra.mxu1 %v3878_v36  ;;  %v3876_v56 = vsel %vm3503_vm1, %v3873_v60, %v5432_v12  ;;  %v919_v12 = vld [vmem:[%s10347_s1 + $0xf78] sm:$0xff]  ;;  %v4251_v60 = vld [vmem:[%s10350_s4 + $0x568] sm:$0xff] }
 0x65f   :  { %v2613_v25 = vpop.f32.mrf.mxu3  ;;  %v3879_v46 = vsel %vm3507_vm2, %v3876_v56, %v5437_v2  ;;  %v911_v2 = vld [vmem:[%s10347_s1 + $0xf38] sm:$0xff] }
 0x660   :  { %v9260_v21 = vadd.f32 %v2613_v25, %v9193_v7  ;;  %v2032_v57 = vpop.f32.mrf.mxu2  ;;  %v9274_v7 = vpop.f32.mrf.mxu1 }
 0x662   :  { %v3176_v34 = vpop.f32.mrf.mxu0  ;;  %2082 = vmatmul.f32.gmra.mxu2 %v913_v55  ;;  %v4250_v55 = vld [vmem:[%s10350_s4 + $0x560] sm:$0xff] }
 0x663   :  { %v9268_v48 = vadd.f32 %v3176_v34, %v9042_v8  ;;  %v905_v8 = vld [vmem:[%s10347_s1 + $0xf08] sm:$0xff] }
 0x664   :  { %2663 = vmatmul.f32.gmra.mxu3 %v902_v49 }
 0x666   :  { %4594 = vmatmul.f32.gmra.mxu1 %v3879_v46 }
 0x667   :  { %v2616_v47 = vpop.f32.mrf.mxu3 }
 0x668   :  { %v9277_v28 = vadd.f32 %v2616_v47, %v9212_v5  ;;  %v9285_v43 = vpop.f32.mrf.mxu2  ;;  %v908_v5 = vld [vmem:[%s10347_s1 + $0xf20] sm:$0xff]  ;;  %v4249_v47 = vld [vmem:[%s10350_s4 + $0x558] sm:$0xff] }
 0x66a   :  { %v3179_v31 = vpop.f32.mrf.mxu0  ;;  %2085 = vmatmul.f32.gmra.mxu2 %v916_v23 }
 0x66b   :  { %v9283_v1 = vadd.f32 %v3179_v31, %v9062_v22  ;;  %v4248_v31 = vld [vmem:[%s10350_s4 + $0x550] sm:$0xff] }
 0x66c   :  { %2666 = vmatmul.f32.gmra.mxu3 %v905_v8 }
 0x66f   :  { %v2619_v24 = vpop.f32.mrf.mxu3 }
 0x670   :  { %v9290_v16 = vadd.f32 %v2619_v24, %v2026_v29  ;;  %v2038_v22 = vpop.f32.mrf.mxu2  ;;  %v4253_v29 = vld [vmem:[%s10350_s4 + $0x578] sm:$0xff]  ;;  %v4247_v24 = vld [vmem:[%s10350_s4 + $0x548] sm:$0xff] }
 0x671   :  { %4598 = vmatpush.msra.mxu1 %v4253_v29 }
 0x672   :  { %v3182_v13 = vpop.f32.mrf.mxu0  ;;  %2088 = vmatmul.f32.gmra.mxu2 %v919_v12  ;;  %v4245_v12 = vld [vmem:[%s10350_s4 + $0x538] sm:$0xff] }
 0x673   :  { %v9296_v36 = vadd.f32 %v3182_v13, %v9088_v52  ;;  %v4252_v52 = vld [vmem:[%s10350_s4 + $0x570] sm:$0xff]  ;;  %v4246_v13 = vld [vmem:[%s10350_s4 + $0x540] sm:$0xff] }
 0x674   :  { %2669 = vmatmul.f32.gmra.mxu3 %v908_v5  ;;  %4599 = vmatpush.msra.mxu1 %v4252_v52  ;;  %v917_v52 = vld [vmem:[%s10347_s1 + $0xf68] sm:$0xff] }
 0x676   :  { %4600 = vmatpush.msra.mxu1 %v4251_v60 }
 0x677   :  { %v2622_v50 = vpop.f32.mrf.mxu3 }
 0x678   :  { %v9304_v25 = vadd.f32 %v2622_v50, %v2029_v10  ;;  %v9316_v56 = vpop.f32.mrf.mxu2  ;;  %v922_v10 = vld [vmem:[%s10347_s1 + $0xf90] sm:$0xff]  ;;  %4601 = vmatpush.msra.mxu1 %v4250_v55  ;;  %v928_v55 = vld [vmem:[%s10347_s1 + $0xfc0] sm:$0xff] }
 0x679   :  { %v4244_v50 = vld [vmem:[%s10350_s4 + $0x530] sm:$0xff] }
 0x67a   :  { %v3185_v49 = vpop.f32.mrf.mxu0  ;;  %2091 = vmatmul.f32.gmra.mxu2 %v922_v10  ;;  %4602 = vmatpush.msra.mxu1 %v4249_v47 }
 0x67b   :  { %v3186_v34 = vadd.f32 %v3185_v49, %v9115_v4  ;;  %v4243_v49 = vld [vmem:[%s10350_s4 + $0x528] sm:$0xff] }
 0x67c   :  { %2672 = vmatmul.f32.gmra.mxu3 %v911_v2  ;;  %4603 = vmatpush.msra.mxu1 %v4248_v31 }
 0x67d   :  { %v5453_v46 = vpack.i.bf16 %v3186_v34, %v9130_v20  ;;  %v914_v20 = vld [vmem:[%s10347_s1 + $0xf50] sm:$0xff] }
 0x67e   :  { %4604 = vmatpush.msra.mxu1 %v4247_v24 }
 0x67f   :  { %5454 = vrot.lane.b32.xlu0 %v5453_v46, %s5557_s16  ;;  %v2625_v4 = vpop.f32.mrf.mxu3  ;;  %v4242_v46 = vld [vmem:[%s10350_s4 + $0x520] sm:$0xff] }
 0x680   :  { %v9329_v8 = vadd.f32 %v2625_v4, %v2032_v57  ;;  %v9340_v5 = vpop.f32.mrf.mxu2  ;;  %v925_v57 = vld [vmem:[%s10347_s1 + $0xfa8] sm:$0xff]  ;;  %4605 = vmatpush.msra.mxu1 %v4246_v13 }
 0x682   :  { %v3188_v23 = vpop.f32.mrf.mxu0  ;;  %2094 = vmatmul.f32.gmra.mxu2 %v925_v57  ;;  %4606 = vmatpush.msra.mxu1 %v4245_v12 }
 0x683   :  { %v3189_v60 = vadd.f32 %v3188_v23, %v9143_v19  ;;  %v4241_v19 = vld [vmem:[%s10350_s4 + $0x518] sm:$0xff]  ;;  %v4240_v23 = vld [vmem:[%s10350_s4 + $0x510] sm:$0xff] }
 0x684   :  { %2675 = vmatmul.f32.gmra.mxu3 %v914_v20  ;;  %4607 = vmatpush.msra.mxu1 %v4244_v50  ;;  %v920_v20 = vld [vmem:[%s10347_s1 + $0xf80] sm:$0xff] }
 0x686   :  { %4608 = vmatpush.msra.mxu1 %v4243_v49 }
 0x687   :  { %v2628_v29 = vpop.f32.mrf.mxu3 }
 0x688   :  { %v2047_v10 = vpop.f32.mrf.mxu2  ;;  %4609 = vmatpush.msra.mxu1 %v4242_v46  ;;  %v2629_v4 = vadd.f32 %v2628_v29, %v9285_v43 }
 0x68a   :  { %v3191_v2 = vpop.f32.mrf.mxu0  ;;  %2097 = vmatmul.f32.gmra.mxu2 %v928_v55  ;;  %4610 = vmatpush.msra.mxu1 %v4241_v19  ;;  %v3222_v43 = vadd.f32 %v6578_v54, %v2629_v4  ;;  %v931_v54 = vld [vmem:[%s10347_s1 + $0xfd8] sm:$0xff] }
 0x68b   :  { %v3192_v34 = vadd.f32 %v3191_v2, %v9165_v39  ;;  %v9400_v2 = vpop.f32.mrf.mxu1 }
 0x68c   :  { %2678 = vmatmul.f32.gmra.mxu3 %v917_v52  ;;  %4611 = vmatpush.msra.mxu1 %v4240_v23 }
 0x68d   :  { %v5468_v47 = vpack.i.bf16 %v3192_v34, %v3189_v60  ;;  %v934_v34 = vld [vmem:[%s10347_s1 + $0xff0] sm:$0xff] }
 0x68f   :  { %5469 = vrot.lane.b32.xlu0 %v5468_v47, %s5557_s16  ;;  %v2631_v39 = vpop.f32.mrf.mxu3 }
 0x690   :  { %v2632_v31 = vadd.f32 %v2631_v39, %v2038_v22  ;;  %v2050_v12 = vpop.f32.mrf.mxu2  ;;  %v4239_v22 = vld [vmem:[%s10350_s4 + $0x508] sm:$0xff] }
 0x691   :  { %4612 = vmatpush.msra.mxu1 %v4239_v22  ;;  %v937_v39 = vld [vmem:[%s10347_s1 + $0x1008] sm:$0xff] }
 0x692   :  { %v3225_v24 = vadd.f32 %v6600_v63, %v2632_v31  ;;  %v3194_v57 = vpop.f32.mrf.mxu0  ;;  %v4238_v63 = vld [vmem:[%s10350_s4 + $0x500] sm:$0xff]  ;;  %2100 = vmatmul.f32.gmra.mxu2 %v931_v54 }
 0x693   :  { %v3195_v13 = vadd.f32 %v3194_v57, %v9182_v62  ;;  %4613 = vmatpush.msra.mxu1 %v4238_v63  ;;  %v9417_v31 = vpop.f32.mrf.mxu1  ;;  %v10387_v57 = vld [vmem:[#allocation7_spill] sm:$0xff] }
 0x694   :  { %2681 = vmatmul.f32.gmra.mxu3 %v920_v20  ;;  %v5483_v29 = vpack.i.bf16 %v3225_v24, %v3222_v43 }
 0x695   :  { %v5458_v50 = vpack.i.bf16 %v3195_v13, %v9191_v61  ;;  %v923_v61 = vld [vmem:[%s10347_s1 + $0xf98] sm:$0xff] }
 0x697   :  { %5459 = vrot.lane.b32.xlu1 %v5458_v50, %s5558_s0  ;;  %5484 = vrot.lane.b32.xlu0 %v5483_v29, %s5557_s16  ;;  %v2634_v62 = vpop.f32.mrf.mxu3 }
 0x698   :  { %v9395_v52 = vadd.f32 %v2634_v62, %v9316_v56  ;;  %v9402_v60 = vpop.f32.mrf.mxu2  ;;  %v926_v56 = vld [vmem:[%s10347_s1 + $0xfb0] sm:$0xff] }
 0x699   :  { %v5440_v63 = vpop.permute.xlu0 %5439 }
 0x69a   :  { %v3197_v49 = vpop.f32.mrf.mxu0  ;;  %2103 = vmatmul.f32.gmra.mxu2 %v934_v34 }
 0x69b   :  { %v3198_v47 = vadd.f32 %v3197_v49, %v9201_v42  ;;  %v9427_v54 = vpop.f32.mrf.mxu1 }
 0x69c   :  { %2684 = vmatmul.f32.gmra.mxu3 %v923_v61  ;;  %v5441_v61 = vunpack.i.l.bf16 %v5440_v63 }
 0x69f   :  { %v2637_v55 = vpop.f32.mrf.mxu3 }
 0x6a0   :  { %v9412_v19 = vpop.f32.mrf.mxu2  ;;  %v2638_v23 = vadd.f32 %v2637_v55, %v9340_v5  ;;  %v932_v55 = vld [vmem:[%s10347_s1 + $0xfe0] sm:$0xff] }
 0x6a2   :  { %v3200_v46 = vpop.f32.mrf.mxu0  ;;  %2106 = vmatmul.f32.gmra.mxu2 %v937_v39  ;;  %v3231_v42 = vadd.f32 %v6657_v38, %v2638_v23 }
 0x6a3   :  { %v3201_v4 = vadd.f32 %v3200_v46, %v9222_v45  ;;  %v929_v45 = vld [vmem:[%s10347_s1 + $0xfc8] sm:$0xff]  ;;  %v9447_v23 = vpop.f32.mrf.mxu1 }
 0x6a4   :  { %2687 = vmatmul.f32.gmra.mxu3 %v926_v56  ;;  %v3141_v56 = vadd.f32 %v9018_v17, %v8794_v26 }
 0x6a5   :  { %v5473_v20 = vpack.i.bf16 %v3201_v4, %v3198_v47 }
 0x6a6   :  { %v3880_v39 = vsel %vm1000_vm0, %v3141_v56, %v5441_v61  ;;  %v10389_v56 = vld [vmem:[#allocation10_spill] sm:$0xff] }
 0x6a7   :  { %5474 = vrot.lane.b32.xlu1 %v5473_v20, %s5558_s0  ;;  %v2640_v43 = vpop.f32.mrf.mxu3 }
 0x6a8   :  { %v2641_v24 = vadd.f32 %v2640_v43, %v2047_v10  ;;  %v2059_v50 = vpop.f32.mrf.mxu2  ;;  %v940_v10 = vld [vmem:[%s10347_s1 + $0x1020] sm:$0xff]  ;;  %v5442_v43 = vunpack.i.h.bf16 %v5440_v63 }
 0x6aa   :  { %v3234_v13 = vadd.f32 %v10387_v57, %v2641_v24  ;;  %v3203_v22 = vpop.f32.mrf.mxu0  ;;  %2109 = vmatmul.f32.gmra.mxu2 %v940_v10 }
 0x6ab   :  { %v3204_v29 = vadd.f32 %v3203_v22, %v9239_v35  ;;  %v9465_v61 = vpop.f32.mrf.mxu1 }
 0x6ac   :  { %2690 = vmatmul.f32.gmra.mxu3 %v929_v45  ;;  %v5488_v5 = vpack.i.bf16 %v3234_v13, %v3231_v42  ;;  %v3144_v45 = vadd.f32 %v9033_v40, %v8813_v44  ;;  %v935_v42 = vld [vmem:[%s10347_s1 + $0xff8] sm:$0xff]  ;;  %v946_v44 = vld [vmem:[%s10347_s1 + $0x1050] sm:$0xff] }
 0x6ad   :  { %v5463_v62 = vpack.i.bf16 %v3204_v29, %v9247_v58 }
 0x6ae   :  { %v3881_v22 = vsel %vm1000_vm0, %v3144_v45, %v5442_v43  ;;  %v944_v45 = vld [vmem:[%s10347_s1 + $0x1040] sm:$0xff] }
 0x6af   :  { %5464 = vrot.lane.b32.xlu2 %v5463_v62, %s5559_s11  ;;  %5489 = vrot.lane.b32.xlu1 %v5488_v5, %s5558_s0  ;;  %v2643_v38 = vpop.f32.mrf.mxu3 }
 0x6b0   :  { %v9435_v35 = vadd.f32 %v2643_v38, %v2050_v12  ;;  %v2062_v4 = vpop.f32.mrf.mxu2  ;;  %v943_v12 = vld [vmem:[%s10347_s1 + $0x1038] sm:$0xff] }
 0x6b1   :  { %v5450_v49 = vpop.permute.xlu2 %5449  ;;  %v5445_v34 = vpop.permute.xlu1 %5444 }
 0x6b2   :  { %v5451_v46 = vunpack.i.l.bf16 %v5450_v49  ;;  %v3206_v58 = vpop.f32.mrf.mxu0  ;;  %v5446_v47 = vunpack.i.l.bf16 %v5445_v34  ;;  %2112 = vmatmul.f32.gmra.mxu2 %v943_v12  ;;  %v5447_v26 = vunpack.i.h.bf16 %v5445_v34  ;;  %v5452_v57 = vunpack.i.h.bf16 %v5450_v49  ;;  %v938_v49 = vld [vmem:[%s10347_s1 + $0x1010] sm:$0xff]  ;;  %v10388_v34 = vld [vmem:[#allocation9_spill] sm:$0xff] }
 0x6b3   :  { %v3207_v29 = vadd.f32 %v3206_v58, %v9260_v21  ;;  %v941_v12 = vld [vmem:[%s10347_s1 + $0x1028] sm:$0xff] }
 0x6b4   :  { %2693 = vmatmul.f32.gmra.mxu3 %v932_v55  ;;  %v3883_v20 = vsel %vm3503_vm1, %v3880_v39, %v5446_v47  ;;  %v3884_v10 = vsel %vm3503_vm1, %v3881_v22, %v5447_v26  ;;  %v949_v47 = vld [vmem:[%s10347_s1 + $0x1068] sm:$0xff]  ;;  %v955_v22 = vld [vmem:[%s10347_s1 + $0x1098] sm:$0xff] }
 0x6b5   :  { %v3886_v24 = vsel %vm3507_vm2, %v3883_v20, %v5451_v46  ;;  %v3887_v38 = vsel %vm3507_vm2, %v3884_v10, %v5452_v57  ;;  %v9482_v20 = vpop.f32.mrf.mxu1  ;;  %v4268_v57 = vld [vmem:[%s10350_s4 + $0x5f0] sm:$0xff] }
 0x6b6   :  { %4614 = vmatmul.f32.vlgmr.msra.gmra.mxu1 %v3886_v24  ;;  %v952_v24 = vld [vmem:[%s10347_s1 + $0x1080] sm:$0xff] }
 0x6b7   :  { %v2646_v17 = vpop.f32.mrf.mxu3 }
 0x6b8   :  { %v2065_v63 = vpop.f32.mrf.mxu2  ;;  %v2647_v62 = vadd.f32 %v2646_v17, %v9402_v60 }
 0x6ba   :  { %v3209_v13 = vpop.f32.mrf.mxu0  ;;  %2115 = vmatmul.f32.gmra.mxu2 %v946_v44  ;;  %v3240_v55 = vadd.f32 %v10388_v34, %v2647_v62  ;;  %v4265_v44 = vld [vmem:[%s10350_s4 + $0x5d8] sm:$0xff]  ;;  %v4264_v62 = vld [vmem:[%s10350_s4 + $0x5d0] sm:$0xff] }
 0x6bb   :  { %v3210_v5 = vadd.f32 %v3209_v13, %v9277_v28 }
 0x6bc   :  { %2696 = vmatmul.f32.gmra.mxu3 %v935_v42 }
 0x6bd   :  { %v5478_v40 = vpack.i.bf16 %v3210_v5, %v3207_v29  ;;  %v9495_v42 = vpop.f32.mrf.mxu1  ;;  %v4266_v29 = vld [vmem:[%s10350_s4 + $0x5e0] sm:$0xff] }
 0x6be   :  { %4617 = vmatmul.f32.gmra.mxu1 %v3887_v38  ;;  %v4263_v38 = vld [vmem:[%s10350_s4 + $0x5c8] sm:$0xff] }
 0x6bf   :  { %5479 = vrot.lane.b32.xlu2 %v5478_v40, %s5559_s11  ;;  %v2649_v21 = vpop.f32.mrf.mxu3  ;;  %v947_v40 = vld [vmem:[%s10347_s1 + $0x1058] sm:$0xff] }
 0x6c0   :  { %v2650_v28 = vadd.f32 %v2649_v21, %v9412_v19  ;;  %v2068_v60 = vpop.f32.mrf.mxu2 }
 0x6c2   :  { %v3243_v46 = vadd.f32 %v10389_v56, %v2650_v28  ;;  %2118 = vmatmul.f32.gmra.mxu2 %v949_v47  ;;  %v4261_v56 = vld [vmem:[%s10350_s4 + $0x5b8] sm:$0xff]  ;;  %v4259_v47 = vld [vmem:[%s10350_s4 + $0x5a8] sm:$0xff] }
 0x6c4   :  { %2699 = vmatmul.f32.gmra.mxu3 %v938_v49  ;;  %v5493_v58 = vpack.i.bf16 %v3243_v46, %v3240_v55  ;;  %v4262_v49 = vld [vmem:[%s10350_s4 + $0x5c0] sm:$0xff]  ;;  %v950_v46 = vld [vmem:[%s10347_s1 + $0x1070] sm:$0xff] }
 0x6c5   :  { %v9530_v28 = vpop.f32.mrf.mxu1 }
 0x6c7   :  { %5494 = vrot.lane.b32.xlu2 %v5493_v58, %s5559_s11  ;;  %v2652_v39 = vpop.f32.mrf.mxu3  ;;  %v4260_v58 = vld [vmem:[%s10350_s4 + $0x5b0] sm:$0xff] }
 0x6c8   :  { %v9477_v19 = vadd.f32 %v2652_v39, %v2059_v50  ;;  %v2071_v43 = vpop.f32.mrf.mxu2  ;;  %v4269_v50 = vld [vmem:[%s10350_s4 + $0x5f8] sm:$0xff] }
 0x6c9   :  { %4624 = vmatpush.msrb.mxu1 %v4269_v50 }
 0x6ca   :  { %2121 = vmatmul.f32.gmra.mxu2 %v952_v24  ;;  %v4258_v24 = vld [vmem:[%s10350_s4 + $0x5a0] sm:$0xff] }
 0x6cb   :  { %4625 = vmatpush.msrb.mxu1 %v4268_v57  ;;  %v953_v57 = vld [vmem:[%s10347_s1 + $0x1088] sm:$0xff] }
 0x6cc   :  { %2702 = vmatmul.f32.gmra.mxu3 %v941_v12 }
 0x6cd   :  { %v9554_v12 = vpop.f32.mrf.mxu1 }
 0x6cf   :  { %v2655_v26 = vpop.f32.mrf.mxu3 }
 0x6d0   :  { %v9487_v17 = vadd.f32 %v2655_v26, %v2062_v4  ;;  %v9500_v13 = vpop.f32.mrf.mxu2  ;;  %v4267_v4 = vld [vmem:[%s10350_s4 + $0x5e8] sm:$0xff] }
 0x6d1   :  { %4626 = vmatpush.msrb.mxu1 %v4267_v4  ;;  %v10390_v4 = vld [vmem:[#allocation6_spill] sm:$0xff] }
 0x6d2   :  { %2124 = vmatmul.f32.gmra.mxu2 %v955_v22  ;;  %v3228_v22 = vadd.f32 %v10390_v4, %v9395_v52  ;;  %v964_v52 = vld [vmem:[%s10347_s1 + $0x10e0] sm:$0xff] }
 0x6d3   :  { %4627 = vmatpush.msrb.mxu1 %v4266_v29  ;;  %v10391_v29 = vld [vmem:[#allocation15_spill] sm:$0xff] }
 0x6d4   :  { %2705 = vmatmul.f32.gmra.mxu3 %v944_v45  ;;  %v4257_v45 = vld [vmem:[%s10350_s4 + $0x598] sm:$0xff] }
 0x6d5   :  { %4628 = vmatpush.msrb.mxu1 %v4265_v44  ;;  %v4256_v44 = vld [vmem:[%s10350_s4 + $0x590] sm:$0xff] }
 0x6d7   :  { %v2658_v5 = vpop.f32.mrf.mxu3  ;;  %4629 = vmatpush.msrb.mxu1 %v4264_v62  ;;  %v4255_v62 = vld [vmem:[%s10350_s4 + $0x588] sm:$0xff] }
 0x6d8   :  { %v9511_v10 = vadd.f32 %v2658_v5, %v2065_v63  ;;  %v9525_v21 = vpop.f32.mrf.mxu2  ;;  %v958_v63 = vld [vmem:[%s10347_s1 + $0x10b0] sm:$0xff] }
 0x6d9   :  { %4630 = vmatpush.msrb.mxu1 %v4263_v38  ;;  %v9579_v38 = vpop.f32.mrf.mxu1 }
 0x6da   :  { %2127 = vmatmul.f32.gmra.mxu2 %v958_v63  ;;  %v4254_v63 = vld [vmem:[%s10350_s4 + $0x580] sm:$0xff] }
 0x6db   :  { %4631 = vmatpush.msrb.mxu1 %v4262_v49 }
 0x6dc   :  { %2708 = vmatmul.f32.gmra.mxu3 %v947_v40 }
 0x6dd   :  { %4632 = vmatpush.msrb.mxu1 %v4261_v56  ;;  %v956_v56 = vld [vmem:[%s10347_s1 + $0x10a0] sm:$0xff] }
 0x6df   :  { %v2661_v34 = vpop.f32.mrf.mxu3  ;;  %4633 = vmatpush.msrb.mxu1 %v4260_v58  ;;  %v4283_v58 = vld [vmem:[%s10350_s4 + $0x668] sm:$0xff] }
 0x6e0   :  { %v9535_v55 = vadd.f32 %v2661_v34, %v2068_v60  ;;  %v9549_v39 = vpop.f32.mrf.mxu2  ;;  %v961_v60 = vld [vmem:[%s10347_s1 + $0x10c8] sm:$0xff]  ;;  %v4285_v34 = vld [vmem:[%s10350_s4 + $0x678] sm:$0xff] }
 0x6e1   :  { %4634 = vmatpush.msrb.mxu1 %v4259_v47 }
 0x6e2   :  { %2130 = vmatmul.f32.gmra.mxu2 %v961_v60  ;;  %v967_v60 = vld [vmem:[%s10347_s1 + $0x10f8] sm:$0xff] }
 0x6e3   :  { %4635 = vmatpush.msrb.mxu1 %v4258_v24  ;;  %v4282_v24 = vld [vmem:[%s10350_s4 + $0x660] sm:$0xff] }
 0x6e4   :  { %2711 = vmatmul.f32.gmra.mxu3 %v950_v46  ;;  %v4284_v46 = vld [vmem:[%s10350_s4 + $0x670] sm:$0xff] }
 0x6e5   :  { %4636 = vmatpush.msrb.mxu1 %v4257_v45  ;;  %v4281_v45 = vld [vmem:[%s10350_s4 + $0x658] sm:$0xff] }
 0x6e7   :  { %v2664_v26 = vpop.f32.mrf.mxu3  ;;  %4637 = vmatpush.msrb.mxu1 %v4256_v44  ;;  %v10393_v44 = vld [vmem:[#allocation17_spill] sm:$0xff] }
 0x6e8   :  { %v2665_v50 = vadd.f32 %v2664_v26, %v2071_v43  ;;  %v9571_v40 = vpop.f32.mrf.mxu2 }
 0x6e9   :  { %4638 = vmatpush.msrb.mxu1 %v4255_v62 }
 0x6ea   :  { %v3258_v5 = vadd.f32 %v10391_v29, %v2665_v50  ;;  %2133 = vmatmul.f32.gmra.mxu2 %v964_v52  ;;  %v10392_v29 = vld [vmem:[#allocation16_spill] sm:$0xff]  ;;  %v970_v52 = vld [vmem:[%s10347_s1 + $0x1110] sm:$0xff] }
 0x6eb   :  { %4639 = vmatpush.msrb.mxu1 %v4254_v63 }
 0x6ec   :  { %2714 = vmatmul.f32.gmra.mxu3 %v953_v57  ;;  %v5498_v43 = vpack.i.bf16 %v3258_v5, %v3228_v22  ;;  %v9609_v57 = vpop.f32.mrf.mxu1  ;;  %v959_v22 = vld [vmem:[%s10347_s1 + $0x10b8] sm:$0xff] }
 0x6ed   :  { %4650 = vmatpush.msra.mxu1 %v4285_v34 }
 0x6ee   :  { %5499 = vrot.lane.b32.xlu0 %v5498_v43, %s5557_s16 }
 0x6ef   :  { %v2667_v49 = vpop.f32.mrf.mxu3  ;;  %4651 = vmatpush.msra.mxu1 %v4284_v46 }
 0x6f0   :  { %v9597_v47 = vpop.f32.mrf.mxu2  ;;  %v2668_v26 = vadd.f32 %v2667_v49, %v9500_v13  ;;  %v4280_v13 = vld [vmem:[%s10350_s4 + $0x650] sm:$0xff]  ;;  %v4278_v49 = vld [vmem:[%s10350_s4 + $0x640] sm:$0xff] }
 0x6f1   :  { %4652 = vmatpush.msra.mxu1 %v4283_v58  ;;  %v962_v58 = vld [vmem:[%s10347_s1 + $0x10d0] sm:$0xff] }
 0x6f2   :  { %2136 = vmatmul.f32.gmra.mxu2 %v967_v60  ;;  %v3261_v5 = vadd.f32 %v10392_v29, %v2668_v26  ;;  %v4276_v60 = vld [vmem:[%s10350_s4 + $0x630] sm:$0xff]  ;;  %v10394_v26 = vld [vmem:[#allocation8_spill] sm:$0xff]  ;;  %v5455_v29 = vpop.permute.xlu0 %5454 }
 0x6f3   :  { %4653 = vmatpush.msra.mxu1 %v4282_v24 }
 0x6f4   :  { %2717 = vmatmul.f32.gmra.mxu3 %v956_v56  ;;  %v4277_v56 = vld [vmem:[%s10350_s4 + $0x638] sm:$0xff]  ;;  %v9642_v24 = vpop.f32.mrf.mxu1 }
 0x6f5   :  { %4654 = vmatpush.msra.mxu1 %v4281_v45  ;;  %v10395_v45 = vld [vmem:[#allocation18_spill] sm:$0xff] }
 0x6f7   :  { %v2670_v50 = vpop.f32.mrf.mxu3  ;;  %4655 = vmatpush.msra.mxu1 %v4280_v13 }
 0x6f8   :  { %v2671_v4 = vadd.f32 %v2670_v50, %v9525_v21  ;;  %v9620_v62 = vpop.f32.mrf.mxu2  ;;  %v4279_v21 = vld [vmem:[%s10350_s4 + $0x648] sm:$0xff]  ;;  %v3237_v50 = vadd.f32 %v10394_v26, %v9435_v35  ;;  %v4274_v35 = vld [vmem:[%s10350_s4 + $0x620] sm:$0xff] }
 0x6f9   :  { %4656 = vmatpush.msra.mxu1 %v4279_v21  ;;  %v5456_v21 = vunpack.i.l.bf16 %v5455_v29 }
 0x6fa   :  { %v3264_v43 = vadd.f32 %v10393_v44, %v2671_v4  ;;  %2139 = vmatmul.f32.gmra.mxu2 %v970_v52 }
 0x6fb   :  { %4657 = vmatpush.msra.mxu1 %v4278_v49  ;;  %v965_v49 = vld [vmem:[%s10347_s1 + $0x10e8] sm:$0xff] }
 0x6fc   :  { %2720 = vmatmul.f32.gmra.mxu3 %v959_v22  ;;  %v5513_v63 = vpack.i.bf16 %v3264_v43, %v3261_v5  ;;  %v973_v5 = vld [vmem:[%s10347_s1 + $0x1128] sm:$0xff]  ;;  %v4273_v43 = vld [vmem:[%s10350_s4 + $0x618] sm:$0xff] }
 0x6fd   :  { %4658 = vmatpush.msra.mxu1 %v4277_v56  ;;  %v9668_v56 = vpop.f32.mrf.mxu1 }
 0x6fe   :  { %5514 = vrot.lane.b32.xlu0 %v5513_v63, %s5557_s16 }
 0x6ff   :  { %v2673_v34 = vpop.f32.mrf.mxu3  ;;  %4659 = vmatpush.msra.mxu1 %v4276_v60 }
 0x700   :  { %v2674_v46 = vadd.f32 %v2673_v34, %v9549_v39  ;;  %v9647_v22 = vpop.f32.mrf.mxu2  ;;  %v4275_v39 = vld [vmem:[%s10350_s4 + $0x628] sm:$0xff]  ;;  %v4272_v34 = vld [vmem:[%s10350_s4 + $0x610] sm:$0xff] }
 0x701   :  { %4660 = vmatpush.msra.mxu1 %v4275_v39  ;;  %v4270_v39 = vld [vmem:[%s10350_s4 + $0x600] sm:$0xff] }
 0x702   :  { %v3267_v4 = vadd.f32 %v10395_v45, %v2674_v46  ;;  %2142 = vmatmul.f32.gmra.mxu2 %v973_v5  ;;  %v3882_v45 = vsel %vm1000_vm0, %v9051_v14, %v5456_v21  ;;  %v968_v14 = vld [vmem:[%s10347_s1 + $0x1100] sm:$0xff] }
 0x703   :  { %4661 = vmatpush.msra.mxu1 %v4274_v35 }
 0x704   :  { %2723 = vmatmul.f32.gmra.mxu3 %v962_v58  ;;  %v5503_v13 = vpack.i.bf16 %v3267_v4, %v3237_v50  ;;  %v4271_v58 = vld [vmem:[%s10350_s4 + $0x608] sm:$0xff]  ;;  %v976_v50 = vld [vmem:[%s10347_s1 + $0x1140] sm:$0xff] }
 0x705   :  { %4662 = vmatpush.msra.mxu1 %v4273_v43 }
 0x706   :  { %5504 = vrot.lane.b32.xlu1 %v5503_v13, %s5558_s0  ;;  %v5457_v13 = vunpack.i.h.bf16 %v5455_v29 }
 0x707   :  { %v2676_v44 = vpop.f32.mrf.mxu3  ;;  %4663 = vmatpush.msra.mxu1 %v4272_v34 }
 0x708   :  { %v9673_v26 = vpop.f32.mrf.mxu2  ;;  %v2677_v5 = vadd.f32 %v2676_v44, %v9571_v40  ;;  %v3889_v21 = vsel %vm1000_vm0, %v9268_v48, %v5457_v13  ;;  %v10397_v40 = vld [vmem:[#allocation20_spill] sm:$0xff] }
 0x709   :  { %v5465_v52 = vpop.permute.xlu2 %5464  ;;  %v5460_v63 = vpop.permute.xlu1 %5459  ;;  %4664 = vmatpush.msra.mxu1 %v4271_v58  ;;  %v10396_v58 = vld [vmem:[#allocation19_spill] sm:$0xff] }
 0x70a   :  { %v5466_v46 = vunpack.i.l.bf16 %v5465_v52  ;;  %v5461_v60 = vunpack.i.l.bf16 %v5460_v63  ;;  %2145 = vmatmul.f32.gmra.mxu2 %v976_v50  ;;  %v5462_v43 = vunpack.i.h.bf16 %v5460_v63  ;;  %v3270_v29 = vadd.f32 %v10396_v58, %v2677_v5  ;;  %v9697_v50 = vpop.f32.mrf.mxu1 }
 0x70b   :  { %4665 = vmatpush.msra.mxu1 %v4270_v39 }
 0x70c   :  { %2726 = vmatmul.f32.gmra.mxu3 %v965_v49  ;;  %v3885_v4 = vsel %vm3503_vm1, %v3882_v45, %v5461_v60  ;;  %v5467_v60 = vunpack.i.h.bf16 %v5465_v52  ;;  %v5470_v45 = vpop.permute.xlu0 %5469 }
 0x70d   :  { %v3888_v35 = vsel %vm3507_vm2, %v3885_v4, %v5466_v46  ;;  %v3892_v46 = vsel %vm3503_vm1, %v3889_v21, %v5462_v43  ;;  %v979_v4 = vld [vmem:[%s10347_s1 + $0x1158] sm:$0xff]  ;;  %v5471_v39 = vunpack.i.l.bf16 %v5470_v45 }
 0x70e   :  { %4620 = vmatmul.f32.gmra.mxu1 %v3888_v35  ;;  %v3895_v48 = vsel %vm3507_vm2, %v3892_v46, %v5467_v60  ;;  %v971_v43 = vld [vmem:[%s10347_s1 + $0x1118] sm:$0xff] }
 0x70f   :  { %v2679_v34 = vpop.f32.mrf.mxu3 }
 0x710   :  { %v2680_v49 = vadd.f32 %v2679_v34, %v9597_v47  ;;  %v9695_v63 = vpop.f32.mrf.mxu2  ;;  %v10398_v34 = vld [vmem:[#allocation11_spill] sm:$0xff] }
 0x712   :  { %v3273_v44 = vadd.f32 %v10397_v40, %v2680_v49  ;;  %2148 = vmatmul.f32.gmra.mxu2 %v979_v4  ;;  %v3246_v49 = vadd.f32 %v10398_v34, %v9477_v19  ;;  %v9713_v40 = vpop.f32.mrf.mxu1  ;;  %v5472_v19 = vunpack.i.h.bf16 %v5470_v45 }
 0x714   :  { %2729 = vmatmul.f32.gmra.mxu3 %v968_v14  ;;  %v5518_v47 = vpack.i.bf16 %v3273_v44, %v3270_v29  ;;  %v10399_v14 = vld [vmem:[#allocation21_spill] sm:$0xff]  ;;  %v3891_v34 = vsel %vm1000_vm0, %v9296_v36, %v5472_v19  ;;  %v5485_v45 = vpop.permute.xlu0 %5484 }
 0x716   :  { %5519 = vrot.lane.b32.xlu1 %v5518_v47, %s5558_s0  ;;  %4640 = vmatmul.f32.vlgmr.msrb.gmra.mxu1 %v3895_v48  ;;  %v982_v47 = vld [vmem:[%s10347_s1 + $0x1170] sm:$0xff] }
 0x717   :  { %v2682_v52 = vpop.f32.mrf.mxu3 }
 0x718   :  { %v2683_v13 = vadd.f32 %v2682_v52, %v9620_v62  ;;  %v9711_v60 = vpop.f32.mrf.mxu2  ;;  %v3890_v62 = vsel %vm1000_vm0, %v9283_v1, %v5471_v39  ;;  %v974_v1 = vld [vmem:[%s10347_s1 + $0x1130] sm:$0xff]  ;;  %v3212_v39 = vpop.f32.mrf.mxu0 }
 0x719   :  { %v5480_v5 = vpop.permute.xlu2 %5479  ;;  %v5475_v35 = vpop.permute.xlu1 %5474 }
 0x71a   :  { %v3276_v21 = vadd.f32 %v10399_v14, %v2683_v13  ;;  %v5481_v58 = vunpack.i.l.bf16 %v5480_v5  ;;  %v5476_v29 = vunpack.i.l.bf16 %v5475_v35  ;;  %2151 = vmatmul.f32.gmra.mxu2 %v982_v47  ;;  %v5477_v48 = vunpack.i.h.bf16 %v5475_v35  ;;  %v985_v35 = vld [vmem:[%s10347_s1 + $0x1188] sm:$0xff] }
 0x71b   :  { %v3213_v47 = vadd.f32 %v3212_v39, %v9290_v16 }
 0x71c   :  { %2732 = vmatmul.f32.gmra.mxu3 %v971_v43  ;;  %v5508_v44 = vpack.i.bf16 %v3276_v21, %v3246_v49  ;;  %v3893_v46 = vsel %vm3503_vm1, %v3890_v62, %v5476_v29  ;;  %v5482_v43 = vunpack.i.h.bf16 %v5480_v5  ;;  %v3894_v49 = vsel %vm3503_vm1, %v3891_v34, %v5477_v48  ;;  %v10400_v21 = vld [vmem:[#allocation22_spill] sm:$0xff]  ;;  %v9734_v29 = vpop.f32.mrf.mxu1 }
 0x71d   :  { %v3896_v4 = vsel %vm3507_vm2, %v3893_v46, %v5481_v58  ;;  %v5486_v62 = vunpack.i.l.bf16 %v5485_v45 }
 0x71e   :  { %5509 = vrot.lane.b32.xlu2 %v5508_v44, %s5559_s11  ;;  %4643 = vmatmul.f32.gmra.mxu1 %v3896_v4  ;;  %v3897_v5 = vsel %vm3507_vm2, %v3894_v49, %v5482_v43  ;;  %v977_v4 = vld [vmem:[%s10347_s1 + $0x1148] sm:$0xff]  ;;  %v988_v49 = vld [vmem:[%s10347_s1 + $0x11a0] sm:$0xff] }
 0x71f   :  { %v2685_v52 = vpop.f32.mrf.mxu3  ;;  %v4042_v48 = vsel %vm1000_vm0, %v3213_v47, %v5486_v62 }
 0x720   :  { %v2686_v13 = vadd.f32 %v2685_v52, %v9647_v22  ;;  %v2104_v14 = vpop.f32.mrf.mxu2  ;;  %v3215_v16 = vpop.f32.mrf.mxu0 }
 0x721   :  { %v5490_v22 = vpop.permute.xlu1 %5489  ;;  %v5495_v36 = vpop.permute.xlu2 %5494  ;;  %v3216_v62 = vadd.f32 %v3215_v16, %v9304_v25 }
 0x722   :  { %v3279_v58 = vadd.f32 %v10400_v21, %v2686_v13  ;;  %2154 = vmatmul.f32.gmra.mxu2 %v985_v35  ;;  %v5491_v44 = vunpack.i.l.bf16 %v5490_v22  ;;  %v5496_v52 = vunpack.i.l.bf16 %v5495_v36  ;;  %v10401_v13 = vld [vmem:[#allocation23_spill] sm:$0xff]  ;;  %v5492_v35 = vunpack.i.h.bf16 %v5490_v22 }
 0x723   :  { %v991_v22 = vld [vmem:[%s10347_s1 + $0x11b8] sm:$0xff] }
 0x724   :  { %2735 = vmatmul.f32.gmra.mxu3 %v974_v1  ;;  %v4045_v43 = vsel %vm3503_vm1, %v4042_v48, %v5491_v44  ;;  %v980_v44 = vld [vmem:[%s10347_s1 + $0x1160] sm:$0xff] }
 0x725   :  { %v4048_v39 = vsel %vm3507_vm2, %v4045_v43, %v5496_v52 }
 0x726   :  { %3963 = vrot.lane.b32.xlu2 %v3279_v58, %s5559_s11  ;;  %4646 = vmatmul.f32.gmra.mxu1 %v3897_v5  ;;  %v9751_v58 = vpop.f32.mrf.mxu1 }
 0x727   :  { %v2688_v46 = vpop.f32.mrf.mxu3 }
 0x728   :  { %v2689_v19 = vadd.f32 %v2688_v46, %v9673_v26  ;;  %v2107_v34 = vpop.f32.mrf.mxu2  ;;  %v5487_v26 = vunpack.i.h.bf16 %v5485_v45  ;;  %v5497_v46 = vunpack.i.h.bf16 %v5495_v36  ;;  %v983_v36 = vld [vmem:[%s10347_s1 + $0x1178] sm:$0xff] }
 0x72a   :  { %v3282_v1 = vadd.f32 %v10401_v13, %v2689_v19  ;;  %2157 = vmatmul.f32.gmra.mxu2 %v988_v49  ;;  %v4043_v45 = vsel %vm1000_vm0, %v3216_v62, %v5487_v26  ;;  %v994_v13 = vld [vmem:[%s10347_s1 + $0x11d0] sm:$0xff]  ;;  %v997_v26 = vld [vmem:[%s10347_s1 + $0x11e8] sm:$0xff] }
 0x72b   :  { %v4046_v47 = vsel %vm3503_vm1, %v4043_v45, %v5492_v35  ;;  %v989_v35 = vld [vmem:[%s10347_s1 + $0x11a8] sm:$0xff]  ;;  %v4298_v45 = vld [vmem:[%s10350_s4 + $0x6e0] sm:$0xff] }
 0x72c   :  { %2738 = vmatmul.f32.gmra.mxu3 %v977_v4  ;;  %3965 = vrot.lane.b32.xlu0 %v3282_v1, %s5559_s11  ;;  %v4049_v25 = vsel %vm3507_vm2, %v4046_v47, %v5497_v46  ;;  %v4299_v62 = vld [vmem:[%s10350_s4 + $0x6e8] sm:$0xff]  ;;  %v4297_v47 = vld [vmem:[%s10350_s4 + $0x6d8] sm:$0xff] }
 0x72e   :  { %4666 = vmatmul.f32.vlgmr.msra.gmra.mxu1 %v4048_v39  ;;  %v9772_v48 = vpop.f32.mrf.mxu1  ;;  %v4301_v39 = vld [vmem:[%s10350_s4 + $0x6f8] sm:$0xff] }
 0x72f   :  { %v2691_v21 = vpop.f32.mrf.mxu3  ;;  %4676 = vmatpush.msrb.mxu1 %v4301_v39 }
 0x730   :  { %v9755_v5 = vadd.f32 %v2691_v21, %v9695_v63  ;;  %v2110_v19 = vpop.f32.mrf.mxu2  ;;  %v4300_v21 = vld [vmem:[%s10350_s4 + $0x6f0] sm:$0xff] }
 0x731   :  { %4677 = vmatpush.msrb.mxu1 %v4300_v21  ;;  %v4292_v21 = vld [vmem:[%s10350_s4 + $0x6b0] sm:$0xff] }
 0x732   :  { %10402 = vst [vmem:[#allocation7_spill] sm:$0xff] %v9755_v5  ;;  %2160 = vmatmul.f32.gmra.mxu2 %v991_v22 }
 0x733   :  { %4678 = vmatpush.msrb.mxu1 %v4299_v62 }
 0x734   :  { %2741 = vmatmul.f32.gmra.mxu3 %v980_v44 }
 0x735   :  { %4679 = vmatpush.msrb.mxu1 %v4298_v45  ;;  %v4291_v45 = vld [vmem:[%s10350_s4 + $0x6a8] sm:$0xff] }
 0x736   :  { %4669 = vmatmul.f32.gmra.mxu1 %v4049_v25  ;;  %v9784_v49 = vpop.f32.mrf.mxu1 }
 0x737   :  { %v2694_v63 = vpop.f32.mrf.mxu3  ;;  %4680 = vmatpush.msrb.mxu1 %v4297_v47  ;;  %v4290_v47 = vld [vmem:[%s10350_s4 + $0x6a0] sm:$0xff] }
 0x738   :  { %v9767_v4 = vadd.f32 %v2694_v63, %v9711_v60  ;;  %v9774_v52 = vpop.f32.mrf.mxu2  ;;  %v986_v60 = vld [vmem:[%s10347_s1 + $0x1190] sm:$0xff] }
 0x73a   :  { %10403 = vst [vmem:[#allocation9_spill] sm:$0xff] %v9767_v4  ;;  %2163 = vmatmul.f32.gmra.mxu2 %v994_v13  ;;  %v4296_v13 = vld [vmem:[%s10350_s4 + $0x6d0] sm:$0xff] }
 0x73b   :  { %4681 = vmatpush.msrb.mxu1 %v4296_v13  ;;  %v998_v13 = vld [vmem:[%s10347_s1 + $0x11f0] sm:$0xff] }
 0x73c   :  { %2744 = vmatmul.f32.gmra.mxu3 %v983_v36  ;;  %v992_v36 = vld [vmem:[%s10347_s1 + $0x11c0] sm:$0xff] }
 0x73e   :  { %v9801_v46 = vpop.f32.mrf.mxu1 }
 0x73f   :  { %v2697_v1 = vpop.f32.mrf.mxu3 }
 0x740   :  { %v9779_v43 = vadd.f32 %v2697_v1, %v2104_v14  ;;  %v2116_v16 = vpop.f32.mrf.mxu2 }
 0x742   :  { %10404 = vst [vmem:[#allocation10_spill] sm:$0xff] %v9779_v43  ;;  %2166 = vmatmul.f32.gmra.mxu2 %v997_v26 }
 0x744   :  { %2747 = vmatmul.f32.gmra.mxu3 %v986_v60 }
 0x747   :  { %v2700_v14 = vpop.f32.mrf.mxu3 }
 0x748   :  { %v2119_v44 = vpop.f32.mrf.mxu2  ;;  %v2701_v22 = vadd.f32 %v2700_v14, %v2107_v34  ;;  %v4295_v34 = vld [vmem:[%s10350_s4 + $0x6c8] sm:$0xff]  ;;  %v4294_v14 = vld [vmem:[%s10350_s4 + $0x6c0] sm:$0xff] }
 0x749   :  { %4682 = vmatpush.msrb.mxu1 %v4295_v34  ;;  %v4287_v34 = vld [vmem:[%s10350_s4 + $0x688] sm:$0xff] }
 0x74a   :  { %v3294_v1 = vadd.f32 %v7353_v51, %v2701_v22  ;;  %v4293_v51 = vld [vmem:[%s10350_s4 + $0x6b8] sm:$0xff] }
 0x74b   :  { %4683 = vmatpush.msrb.mxu1 %v4294_v14  ;;  %v4289_v22 = vld [vmem:[%s10350_s4 + $0x698] sm:$0xff] }
 0x74c   :  { %2750 = vmatmul.f32.gmra.mxu3 %v989_v35  ;;  %v995_v35 = vld [vmem:[%s10347_s1 + $0x11d8] sm:$0xff] }
 0x74d   :  { %4684 = vmatpush.msrb.mxu1 %v4293_v51 }
 0x74f   :  { %v2703_v25 = vpop.f32.mrf.mxu3  ;;  %4685 = vmatpush.msrb.mxu1 %v4292_v21 }
 0x750   :  { %v2704_v63 = vadd.f32 %v2703_v25, %v2110_v19  ;;  %v2122_v26 = vpop.f32.mrf.mxu2  ;;  %v9820_v19 = vpop.f32.mrf.mxu1 }
 0x751   :  { %4686 = vmatpush.msrb.mxu1 %v4291_v45 }
 0x752   :  { %v3297_v60 = vadd.f32 %v7401_v59, %v2704_v63 }
 0x753   :  { %4687 = vmatpush.msrb.mxu1 %v4290_v47 }
 0x754   :  { %2753 = vmatmul.f32.gmra.mxu3 %v992_v36  ;;  %v5523_v39 = vpack.i.bf16 %v3297_v60, %v3294_v1  ;;  %v4288_v1 = vld [vmem:[%s10350_s4 + $0x690] sm:$0xff] }
 0x755   :  { %4688 = vmatpush.msrb.mxu1 %v4289_v22 }
 0x756   :  { %5524 = vrot.lane.b32.xlu1 %v5523_v39, %s5557_s16 }
 0x757   :  { %v2706_v59 = vpop.f32.mrf.mxu3  ;;  %4689 = vmatpush.msrb.mxu1 %v4288_v1  ;;  %v9871_v1 = vld [vmem:[%s10351_s5] ss:$0 sm:$0xff] }
 0x758   :  { %v2125_v62 = vpop.f32.mrf.mxu2  ;;  %v9844_v25 = vpop.f32.mrf.mxu1 }
 0x759   :  { %4690 = vmatpush.msrb.mxu1 %v4287_v34 }
 0x75c   :  { %2756 = vmatmul.f32.gmra.mxu3 %v995_v35 }
 0x75f   :  { %v2709_v63 = vpop.f32.mrf.mxu3 }
 0x760   :  { %v2710_v36 = vadd.f32 %v2709_v63, %v2116_v16  ;;  %v2128_v39 = vpop.f32.mrf.mxu2  ;;  %v4286_v16 = vld [vmem:[%s10350_s4 + $0x680] sm:$0xff]  ;;  %v9860_v51 = vpop.f32.mrf.mxu1 }
 0x761   :  { %4691 = vmatpush.msrb.mxu1 %v4286_v16 }
 0x762   :  { %v3303_v60 = vadd.f32 %v7472_v30, %v2710_v36  ;;  %v5500_v36 = vpop.permute.xlu0 %5499 }
 0x763   :  { %v5502_v5 = vunpack.i.h.bf16 %v5500_v36 }
 0x764   :  { %2759 = vmatmul.f32.gmra.mxu3 %v998_v13  ;;  %3985 = vrot.lane.b32.xlu2 %v3303_v60, %s5558_s0  ;;  %v5501_v13 = vunpack.i.l.bf16 %v5500_v36  ;;  %v10405_v60 = vld [vmem:[#allocation5_spill] sm:$0xff] }
 0x765   :  { %v3219_v34 = vadd.f32 %v10405_v60, %v9329_v8 }
 0x767   :  { %v2712_v14 = vpop.f32.mrf.mxu3 }
 0x768   :  { %v2713_v35 = vadd.f32 %v2712_v14, %v2119_v44  ;;  %v2131_v21 = vpop.f32.mrf.mxu2  ;;  %v9864_v22 = vpop.f32.mrf.mxu1 }
 0x76a   :  { %v3306_v30 = vadd.f32 %v7497_v15, %v2713_v35 }
 0x76c   :  { %3987 = vrot.lane.b32.xlu1 %v3306_v30, %s5558_s0 }
 0x76f   :  { %v2715_v45 = vpop.f32.mrf.mxu3 }
 0x770   :  { %v2716_v47 = vadd.f32 %v2715_v45, %v2122_v26  ;;  %v9873_v15 = vpop.f32.mrf.mxu2  ;;  %v4615_v45 = vpop.f32.mrf.mxu1 }
 0x772   :  { %v3309_v63 = vadd.f32 %v7684_v53, %v2716_v47  ;;  %v4362_v53 = vadd.f32 %v9871_v1, %v9199_v32  ;;  %v10406_v32 = vld [vmem:[#allocation12_spill] sm:$0xff] }
 0x773   :  { %v3249_v60 = vadd.f32 %v10406_v32, %v9487_v17 }
 0x774   :  { %3989 = vrot.lane.b32.xlu1 %v3309_v63, %s5558_s0  ;;  %v4044_v63 = vsel %vm1000_vm0, %v3219_v34, %v5501_v13  ;;  %v4388_v43 = vadd.f32 %v9274_v7, %v4362_v53  ;;  %v4356_v13 = vadd.f32 %v9871_v1, %v8982_v27 }
 0x775   :  { %v4051_v36 = vsel %vm1000_vm0, %v3249_v60, %v5502_v5 }
 0x777   :  { %v2718_v44 = vpop.f32.mrf.mxu3 }
 0x778   :  { %v2719_v26 = vadd.f32 %v2718_v44, %v2125_v62  ;;  %v5510_v16 = vpop.permute.xlu2 %5509  ;;  %v5505_v14 = vpop.permute.xlu1 %5504  ;;  %v4414_v62 = vadd.f32 %v9427_v54, %v4388_v43 }
 0x779   :  { %v5511_v35 = vunpack.i.l.bf16 %v5510_v16  ;;  %v5506_v30 = vunpack.i.l.bf16 %v5505_v14  ;;  %v5507_v44 = vunpack.i.h.bf16 %v5505_v14  ;;  %v2137_v14 = vpop.f32.mrf.mxu2 }
 0x77a   :  { %v3312_v47 = vadd.f32 %v7713_v41, %v2719_v26  ;;  %v2707_v41 = vadd.f32 %v2706_v59, %v9774_v52  ;;  %v4440_v7 = vadd.f32 %v9482_v20, %v4414_v62  ;;  %v5512_v26 = vunpack.i.h.bf16 %v5510_v16  ;;  %v5515_v59 = vpop.permute.xlu0 %5514 }
 0x77b   :  { %v4047_v4 = vsel %vm3503_vm1, %v4044_v63, %v5506_v30  ;;  %v4054_v43 = vsel %vm3503_vm1, %v4051_v36, %v5507_v44 }
 0x77c   :  { %3997 = vrot.lane.b32.xlu0 %v3312_v47, %s5559_s11  ;;  %v4050_v8 = vsel %vm3507_vm2, %v4047_v4, %v5511_v35  ;;  %v4382_v4 = vadd.f32 %v9228_v0, %v4356_v13  ;;  %v4466_v54 = vadd.f32 %v9554_v12, %v4440_v7  ;;  %v3300_v17 = vadd.f32 %v7434_v3, %v2707_v41  ;;  %v9900_v35 = vpop.f32.mrf.mxu1 }
 0x77d   :  { %4672 = vmatmul.f32.gmra.mxu1 %v4050_v8  ;;  %v4057_v0 = vsel %vm3507_vm2, %v4054_v43, %v5512_v26  ;;  %v5516_v3 = vunpack.i.l.bf16 %v5515_v59 }
 0x77e   :  { %v4408_v27 = vadd.f32 %v9400_v2, %v4382_v4  ;;  %v4492_v20 = vadd.f32 %v9642_v24, %v4466_v54  ;;  %v5517_v4 = vunpack.i.h.bf16 %v5515_v59 }
 0x77f   :  { %v2721_v34 = vpop.f32.mrf.mxu3 }
 0x780   :  { %v2722_v53 = vadd.f32 %v2721_v34, %v2128_v39  ;;  %v4434_v12 = vadd.f32 %v9447_v23, %v4408_v27  ;;  %v4518_v5 = vadd.f32 %v9713_v40, %v4492_v20  ;;  %v10407_v39 = vld [vmem:[#allocation13_spill] sm:$0xff] }
 0x781   :  { %v3252_v16 = vadd.f32 %v10407_v39, %v9511_v10  ;;  %v2140_v60 = vpop.f32.mrf.mxu2 }
 0x782   :  { %v3315_v52 = vadd.f32 %v7741_v11, %v2722_v53  ;;  %v4460_v11 = vadd.f32 %v9495_v42, %v4434_v12  ;;  %v4544_v2 = vadd.f32 %v9772_v48, %v4518_v5  ;;  %v3964_v48 = vpop.permute.xlu2 %3963 }
 0x783   :  { %v4052_v40 = vsel %vm1000_vm0, %v3252_v16, %v5516_v3 }
 0x784   :  { %3999 = vrot.lane.b32.xlu2 %v3315_v52, %s5559_s11  ;;  %3977 = vrot.lane.b32.xlu0 %v3300_v17, %s5557_s16  ;;  %v4486_v63 = vadd.f32 %v9579_v38, %v4460_v11  ;;  %v4570_v8 = vadd.f32 %v9820_v19, %v4544_v2 }
 0x785   :  { %4692 = vmatmul.f32.vlgmr.msrb.gmra.mxu1 %v4057_v0 }
 0x786   :  { %v4512_v44 = vadd.f32 %v9668_v56, %v4486_v63  ;;  %v4596_v42 = vadd.f32 %v9864_v22, %v4570_v8 }
 0x787   :  { %v2724_v24 = vpop.f32.mrf.mxu3 }
 0x788   :  { %v2725_v30 = vadd.f32 %v2724_v24, %v2131_v21  ;;  %v5520_v47 = vpop.permute.xlu1 %5519  ;;  %v4538_v19 = vadd.f32 %v9734_v29, %v4512_v44  ;;  %v10408_v29 = vld [vmem:[#allocation14_spill] sm:$0xff] }
 0x789   :  { %v5521_v62 = vunpack.i.l.bf16 %v5520_v47  ;;  %v2143_v36 = vpop.f32.mrf.mxu2  ;;  %v5522_v54 = vunpack.i.h.bf16 %v5520_v47  ;;  %v3255_v43 = vadd.f32 %v10408_v29, %v9535_v55  ;;  %v4305_v29 = vld [vmem:[%s10350_s4 + $0x718] sm:$0xff] }
 0x78a   :  { %v3318_v23 = vadd.f32 %v7769_v9, %v2725_v30  ;;  %v4564_v9 = vadd.f32 %v9784_v49, %v4538_v19  ;;  %v4359_v49 = vadd.f32 %v9871_v1, %v9009_v6  ;;  %v4310_v19 = vld [vmem:[%s10350_s4 + $0x740] sm:$0xff] }
 0x78b   :  { %v4055_v32 = vsel %vm3503_vm1, %v4052_v40, %v5521_v62  ;;  %v4621_v10 = vpop.f32.mrf.mxu1  ;;  %v10409_v40 = vld [vmem:[#allocation30_spill] sm:$0xff] }
 0x78c   :  { %4001 = vrot.lane.b32.xlu2 %v3318_v23, %s5559_s11  ;;  %v4058_v38 = vsel %vm3507_vm2, %v4055_v32, %v3964_v48  ;;  %v4622_v21 = vadd.f32 %v4621_v10, %v4596_v42  ;;  %v4590_v22 = vadd.f32 %v9844_v25, %v4564_v9  ;;  %v4314_v23 = vld [vmem:[%s10350_s4 + $0x760] sm:$0xff]  ;;  %v4313_v42 = vld [vmem:[%s10350_s4 + $0x758] sm:$0xff]  ;;  %v4312_v48 = vld [vmem:[%s10350_s4 + $0x750] sm:$0xff] }
 0x78d   :  { %4695 = vmatmul.f32.gmra.mxu1 %v4058_v38  ;;  %v4311_v32 = vld [vmem:[%s10350_s4 + $0x748] sm:$0xff] }
 0x78e   :  { %v4616_v13 = vadd.f32 %v4615_v45, %v4590_v22  ;;  %v4385_v45 = vadd.f32 %v9250_v18, %v4359_v49  ;;  %v4308_v22 = vld [vmem:[%s10350_s4 + $0x730] sm:$0xff] }
 0x78f   :  { %v2727_v41 = vpop.f32.mrf.mxu3 }
 0x790   :  { %v9923_v56 = vadd.f32 %v2727_v41, %v9873_v15  ;;  %v4053_v15 = vsel %vm1000_vm0, %v3255_v43, %v5517_v4  ;;  %v4411_v55 = vadd.f32 %v9417_v31, %v4385_v45  ;;  %v4309_v41 = vld [vmem:[%s10350_s4 + $0x738] sm:$0xff]  ;;  %v4304_v43 = vld [vmem:[%s10350_s4 + $0x710] sm:$0xff]  ;;  %v10412_v45 = vld [vmem:[#allocation33_spill] sm:$0xff] }
 0x791   :  { %v4056_v25 = vsel %vm3503_vm1, %v4053_v15, %v5522_v54  ;;  %v2146_v20 = vpop.f32.mrf.mxu2  ;;  %v10411_v4 = vld [vmem:[#allocation32_spill] sm:$0xff] }
 0x792   :  { %v4437_v0 = vadd.f32 %v9465_v61, %v4411_v55  ;;  %v4302_v15 = vld [vmem:[%s10350_s4 + $0x700] sm:$0xff]  ;;  %v10413_v55 = vld [vmem:[#allocation34_spill] sm:$0xff] }
 0x793   :  { %v4641_v7 = vpop.f32.mrf.mxu1 }
 0x794   :  { %v4642_v34 = vadd.f32 %v4641_v7, %v4616_v13  ;;  %v4463_v6 = vadd.f32 %v9530_v28, %v4437_v0  ;;  %v4307_v13 = vld [vmem:[%s10350_s4 + $0x728] sm:$0xff] }
 0x796   :  { %v4489_v5 = vadd.f32 %v9609_v57, %v4463_v6 }
 0x797   :  { %v2730_v26 = vpop.f32.mrf.mxu3 }
 0x798   :  { %v9926_v53 = vadd.f32 %v2730_v26, %v2137_v14  ;;  %v4515_v11 = vadd.f32 %v9697_v50, %v4489_v5  ;;  %v4306_v26 = vld [vmem:[%s10350_s4 + $0x720] sm:$0xff] }
 0x799   :  { %v2149_v2 = vpop.f32.mrf.mxu2 }
 0x79a   :  { %v4541_v39 = vadd.f32 %v9751_v58, %v4515_v11  ;;  %v4316_v58 = vld [vmem:[%s10350_s4 + $0x770] sm:$0xff] }
 0x79b   :  { %v4644_v17 = vpop.f32.mrf.mxu1 }
 0x79c   :  { %v4567_v31 = vadd.f32 %v9801_v46, %v4541_v39 }
 0x79e   :  { %v3966_v52 = vpop.permute.xlu0 %3965  ;;  %v4593_v28 = vadd.f32 %v9860_v51, %v4567_v31  ;;  %v4315_v51 = vld [vmem:[%s10350_s4 + $0x768] sm:$0xff]  ;;  %v10415_v31 = vld [vmem:[#allocation7_spill] sm:$0xff] }
 0x79f   :  { %v2733_v27 = vpop.f32.mrf.mxu3  ;;  %v4059_v14 = vsel %vm3507_vm2, %v4056_v25, %v3966_v52 }
 0x7a0   :  { %v9936_v59 = vadd.f32 %v2733_v27, %v2140_v60  ;;  %4698 = vmatmul.f32.gmra.mxu1 %v4059_v14  ;;  %v4619_v47 = vadd.f32 %v9900_v35, %v4593_v28  ;;  %v10416_v28 = vld [vmem:[#allocation24_spill] sm:$0xff] }
 0x7a1   :  { %v2152_v46 = vpop.f32.mrf.mxu2 }
 0x7a2   :  { %v4645_v63 = vadd.f32 %v4644_v17, %v4619_v47  ;;  %v4303_v17 = vld [vmem:[%s10350_s4 + $0x708] sm:$0xff] }
 0x7a3   :  { %v4647_v12 = vpop.f32.mrf.mxu1 }
 0x7a4   :  { %v9941_v1 = vadd.f32 %v4647_v12, %v4622_v21  ;;  %v10410_v21 = vld [vmem:[#allocation31_spill] sm:$0xff] }
 0x7a7   :  { %v2736_v3 = vpop.f32.mrf.mxu3 }
 0x7a8   :  { %v2737_v18 = vadd.f32 %v2736_v3, %v2143_v36  ;;  %v10414_v3 = vld [vmem:[#allocation35_spill] sm:$0xff] }
 0x7a9   :  { %v2155_v60 = vpop.f32.mrf.mxu2 }
 0x7aa   :  { %v3330_v24 = vadd.f32 %v8217_v33, %v2737_v18  ;;  %v4317_v33 = vld [vmem:[%s10350_s4 + $0x778] sm:$0xff] }
 0x7ab   :  { %v4667_v16 = vpop.f32.mrf.mxu1  ;;  %4702 = vmatpush.msra.mxu1 %v4317_v33  ;;  %v4333_v33 = vld [vmem:[%s10350_s4 + $0x7f8] sm:$0xff] }
 0x7ac   :  { %4009 = vrot.lane.b32.xlu0 %v3330_v24, %s5557_s16  ;;  %v9949_v61 = vadd.f32 %v4667_v16, %v4642_v34 }
 0x7ad   :  { %4703 = vmatpush.msra.mxu1 %v4316_v58  ;;  %v4332_v58 = vld [vmem:[%s10350_s4 + $0x7f0] sm:$0xff] }
 0x7af   :  { %v2739_v30 = vpop.f32.mrf.mxu3  ;;  %4704 = vmatpush.msra.mxu1 %v4315_v51 }
 0x7b0   :  { %v2740_v57 = vadd.f32 %v2739_v30, %v2146_v20  ;;  %v3285_v30 = vadd.f32 %v10416_v28, %v10415_v31 }
 0x7b1   :  { %4705 = vmatpush.msra.mxu1 %v4314_v23  ;;  %v2158_v34 = vpop.f32.mrf.mxu2  ;;  %v10419_v23 = vld [vmem:[#allocation25_spill] sm:$0xff] }
 0x7b2   :  { %v3333_v50 = vadd.f32 %v8245_v37, %v2740_v57  ;;  %v10417_v57 = vld [vmem:[#allocation36_spill] sm:$0xff] }
 0x7b3   :  { %v4670_v8 = vpop.f32.mrf.mxu1  ;;  %4706 = vmatpush.msra.mxu1 %v4313_v42 }
 0x7b4   :  { %4011 = vrot.lane.b32.xlu0 %v3333_v50, %s5557_s16  ;;  %v9964_v35 = vadd.f32 %v4670_v8, %v4645_v63 }
 0x7b5   :  { %4707 = vmatpush.msra.mxu1 %v4312_v48 }
 0x7b7   :  { %v2742_v37 = vpop.f32.mrf.mxu3  ;;  %4708 = vmatpush.msra.mxu1 %v4311_v32 }
 0x7b8   :  { %v2743_v62 = vadd.f32 %v2742_v37, %v2149_v2 }
 0x7b9   :  { %4709 = vmatpush.msra.mxu1 %v4310_v19  ;;  %v2161_v25 = vpop.f32.mrf.mxu2 }
 0x7ba   :  { %v3336_v44 = vadd.f32 %v10409_v40, %v2743_v62  ;;  %v10418_v62 = vld [vmem:[#allocation9_spill] sm:$0xff] }
 0x7bb   :  { %4710 = vmatpush.msra.mxu1 %v4309_v41  ;;  %v3288_v40 = vadd.f32 %v10419_v23, %v10418_v62 }
 0x7bc   :  { %4013 = vrot.lane.b32.xlu0 %v3336_v44, %s5557_s16  ;;  %s5560_s16 = smov [#allocation2]  }
 0x7bd   :  { %4711 = vmatpush.msra.mxu1 %v4308_v22 }
 0x7be   :  { %v3986_v63 = vpop.permute.xlu2 %3985 }
 0x7bf   :  { %v2745_v10 = vpop.f32.mrf.mxu3  ;;  %4712 = vmatpush.msra.mxu1 %v4307_v13 }
 0x7c0   :  { %v2746_v38 = vadd.f32 %v2745_v10, %v2152_v46  ;;  %v10420_v10 = vld [vmem:[#allocation10_spill] sm:$0xff] }
 0x7c1   :  { %4713 = vmatpush.msra.mxu1 %v4306_v26  ;;  %v2164_v12 = vpop.f32.mrf.mxu2  ;;  %v4331_v26 = vld [vmem:[%s10350_s4 + $0x7e8] sm:$0xff] }
 0x7c2   :  { %v3339_v9 = vadd.f32 %v10410_v21, %v2746_v38  ;;  %v10421_v38 = vld [vmem:[#allocation26_spill] sm:$0xff] }
 0x7c3   :  { %4714 = vmatpush.msra.mxu1 %v4305_v29  ;;  %v3291_v19 = vadd.f32 %v10421_v38, %v10420_v10  ;;  %v4327_v29 = vld [vmem:[%s10350_s4 + $0x7c8] sm:$0xff]  ;;  %v4793_v10 = vld [vmem:[%s10352_s6 + $0x50] sm:$0xff] }
 0x7c4   :  { %4021 = vrot.lane.b32.xlu1 %v3339_v9, %s5558_s0 }
 0x7c5   :  { %4715 = vmatpush.msra.mxu1 %v4304_v43  ;;  %v4326_v43 = vld [vmem:[%s10350_s4 + $0x7c0] sm:$0xff] }
 0x7c7   :  { %v2748_v7 = vpop.f32.mrf.mxu3  ;;  %4716 = vmatpush.msra.mxu1 %v4303_v17  ;;  %v4325_v17 = vld [vmem:[%s10350_s4 + $0x7b8] sm:$0xff] }
 0x7c8   :  { %v2749_v36 = vadd.f32 %v2748_v7, %v2155_v60  ;;  %v5525_v11 = vpop.permute.xlu1 %5524 }
 0x7c9   :  { %4717 = vmatpush.msra.mxu1 %v4302_v15  ;;  %v2167_v2 = vpop.f32.mrf.mxu2  ;;  %v5526_v24 = vunpack.i.l.bf16 %v5525_v11  ;;  %v5527_v51 = vunpack.i.h.bf16 %v5525_v11  ;;  %v4323_v15 = vld [vmem:[%s10350_s4 + $0x7a8] sm:$0xff] }
 0x7ca   :  { %v3342_v54 = vadd.f32 %v10411_v4, %v2749_v36  ;;  %v4330_v4 = vld [vmem:[%s10350_s4 + $0x7e0] sm:$0xff] }
 0x7cb   :  { %v4060_v50 = vsel %vm1000_vm0, %v3285_v30, %v5526_v24  ;;  %4728 = vmatpush.msrb.mxu1 %v4333_v33  ;;  %v4061_v42 = vsel %vm1000_vm0, %v3288_v40, %v5527_v51 }
 0x7cc   :  { %4023 = vrot.lane.b32.xlu1 %v3342_v54, %s5558_s0  ;;  %v4063_v46 = vsel %vm3503_vm1, %v4060_v50, %v3986_v63  ;;  %v4329_v54 = vld [vmem:[%s10350_s4 + $0x7d8] sm:$0xff] }
 0x7cd   :  { %4729 = vmatpush.msrb.mxu1 %v4332_v58 }
 0x7cf   :  { %v2751_v49 = vpop.f32.mrf.mxu3  ;;  %4730 = vmatpush.msrb.mxu1 %v4331_v26 }
 0x7d0   :  { %v2752_v52 = vadd.f32 %v2751_v49, %v2158_v34  ;;  %v4324_v49 = vld [vmem:[%s10350_s4 + $0x7b0] sm:$0xff] }
 0x7d1   :  { %4731 = vmatpush.msrb.mxu1 %v4330_v4  ;;  %v4788_v4 = vld [vmem:[%s10352_s6 + $0x28] sm:$0xff] }
 0x7d2   :  { %v3345_v27 = vadd.f32 %v10412_v45, %v2752_v52  ;;  %v4322_v52 = vld [vmem:[%s10350_s4 + $0x7a0] sm:$0xff]  ;;  %v4320_v45 = vld [vmem:[%s10350_s4 + $0x790] sm:$0xff] }
 0x7d3   :  { %4732 = vmatpush.msrb.mxu1 %v4329_v54 }
 0x7d4   :  { %4025 = vrot.lane.b32.xlu1 %v3345_v27, %s5558_s0  ;;  %v4319_v27 = vld [vmem:[%s10350_s4 + $0x788] sm:$0xff] }
 0x7d7   :  { %v2754_v14 = vpop.f32.mrf.mxu3 }
 0x7d8   :  { %v2755_v20 = vadd.f32 %v2754_v14, %v2161_v25  ;;  %v4321_v25 = vld [vmem:[%s10350_s4 + $0x798] sm:$0xff]  ;;  %v4318_v14 = vld [vmem:[%s10350_s4 + $0x780] sm:$0xff] }
 0x7da   :  { %v3348_v0 = vadd.f32 %v10413_v55, %v2755_v20  ;;  %v10422_v55 = vld [vmem:[#allocation27_spill] sm:$0xff] }
 0x7dc   :  { %4033 = vrot.lane.b32.xlu2 %v3348_v0, %s5559_s11  ;;  %v3321_v0 = vadd.f32 %v10422_v55, %v9923_v56  ;;  %v4811_v55 = vld [vmem:[%s10352_s6 + $0xe0] sm:$0xff] }
 0x7de   :  { %v3988_v44 = vpop.permute.xlu1 %3987  ;;  %v4000_v48 = vpop.permute.xlu2 %3999 }
 0x7df   :  { %v2757_v6 = vpop.f32.mrf.mxu3  ;;  %v4064_v32 = vsel %vm3503_vm1, %v4061_v42, %v3988_v44  ;;  %v4797_v42 = vld [vmem:[%s10352_s6 + $0x70] sm:$0xff] }
 0x7e0   :  { %v2758_v5 = vadd.f32 %v2757_v6, %v2164_v12  ;;  %v4067_v21 = vsel %vm3507_vm2, %v4064_v32, %v4000_v48  ;;  %v4796_v48 = vld [vmem:[%s10352_s6 + $0x68] sm:$0xff]  ;;  %v4795_v32 = vld [vmem:[%s10352_s6 + $0x60] sm:$0xff] }
 0x7e2   :  { %v3351_v18 = vadd.f32 %v10414_v3, %v2758_v5 }
 0x7e4   :  { %4035 = vrot.lane.b32.xlu2 %v3351_v18, %s5559_s11 }
 0x7e6   :  { %v3990_v22 = vpop.permute.xlu1 %3989  ;;  %v4002_v34 = vpop.permute.xlu2 %4001 }
 0x7e7   :  { %v2760_v39 = vpop.f32.mrf.mxu3 }
 0x7e8   :  { %v2761_v16 = vadd.f32 %v2760_v39, %v2167_v2  ;;  %v10423_v2 = vld [vmem:[#allocation28_spill] sm:$0xff] }
 0x7e9   :  { %v3324_v24 = vadd.f32 %v10423_v2, %v9926_v53  ;;  %v4803_v2 = vld [vmem:[%s10352_s6 + $0xa0] sm:$0xff] }
 0x7ea   :  { %v3354_v47 = vadd.f32 %v10417_v57, %v2761_v16  ;;  %v10424_v57 = vld [vmem:[#allocation29_spill] sm:$0xff] }
 0x7ec   :  { %4037 = vrot.lane.b32.xlu2 %v3354_v47, %s5559_s11  ;;  %v3327_v47 = vadd.f32 %v10424_v57, %v9936_v59  ;;  %v4798_v59 = vld [vmem:[%s10352_s6 + $0x78] sm:$0xff]  ;;  %v4829_v57 = vld [vmem:[%s10352_s6 + $0x170] sm:$0xff] }
 0x7ee   :  { %v3998_v8 = vpop.permute.xlu0 %3997 }
 0x7ef   :  { %v4066_v37 = vsel %vm3507_vm2, %v4063_v46, %v3998_v8 }
 0x7f0   :  { %4718 = vmatmul.f32.vlgmr.msra.gmra.mxu1 %v4066_v37 }
 0x7f6   :  { %v3978_v60 = vpop.permute.xlu0 %3977 }
 0x7f7   :  { %v4062_v9 = vsel %vm1000_vm0, %v3291_v19, %v3978_v60  ;;  %v4794_v60 = vld [vmem:[%s10352_s6 + $0x58] sm:$0xff]  ;;  %v4792_v19 = vld [vmem:[%s10352_s6 + $0x48] sm:$0xff] }
 0x7f8   :  { %4721 = vmatmul.f32.gmra.mxu1 %v4067_v21  ;;  %v4065_v7 = vsel %vm3503_vm1, %v4062_v9, %v3990_v22  ;;  %v4791_v9 = vld [vmem:[%s10352_s6 + $0x40] sm:$0xff] }
 0x7f9   :  { %v4068_v36 = vsel %vm3507_vm2, %v4065_v7, %v4002_v34 }
 0x7fa   :  { %v4673_v41 = vpop.f32.mrf.mxu1 }
 0x7fb   :  { %v4674_v13 = vadd.f32 %v4673_v41, %v9941_v1  ;;  %v4328_v1 = vld [vmem:[%s10350_s4 + $0x7d0] sm:$0xff] }
 0x7fc   :  { %4733 = vmatpush.msrb.mxu1 %v4328_v1  ;;  %v4787_v1 = vld [vmem:[%s10352_s6 + $0x20] sm:$0xff] }
 0x7fe   :  { %4734 = vmatpush.msrb.mxu1 %v4327_v29 }
 0x800   :  { %4724 = vmatmul.f32.gmra.mxu1 %v4068_v36 }
 0x801   :  { %4735 = vmatpush.msrb.mxu1 %v4326_v43  ;;  %v4786_v43 = vld [vmem:[%s10352_s6 + $0x18] sm:$0xff] }
 0x802   :  { %v4693_v46 = vpop.f32.mrf.mxu1 }
 0x803   :  { %4736 = vmatpush.msrb.mxu1 %v4325_v17  ;;  %v4694_v38 = vadd.f32 %v4693_v46, %v9949_v61  ;;  %v4789_v61 = vld [vmem:[%s10352_s6 + $0x30] sm:$0xff] }
 0x804   :  { %v4825_v46 = vld [vmem:[%s10352_s6 + $0x150] sm:$0xff] }
 0x805   :  { %4737 = vmatpush.msrb.mxu1 %v4324_v49  ;;  %v4785_v49 = vld [vmem:[%s10352_s6 + $0x10] sm:$0xff] }
 0x807   :  { %4738 = vmatpush.msrb.mxu1 %v4323_v15 }
 0x809   :  { %4739 = vmatpush.msrb.mxu1 %v4322_v52 }
 0x80a   :  { %v4696_v8 = vpop.f32.mrf.mxu1 }
 0x80b   :  { %4740 = vmatpush.msrb.mxu1 %v4321_v25  ;;  %v4697_v34 = vadd.f32 %v4696_v8, %v9964_v35  ;;  %v4784_v25 = vld [vmem:[%s10352_s6 + $0x8] sm:$0xff] }
 0x80c   :  { %v4824_v8 = vld [vmem:[%s10352_s6 + $0x148] sm:$0xff] }
 0x80d   :  { %4741 = vmatpush.msrb.mxu1 %v4320_v45  ;;  %v4783_v45 = vld [vmem:[%s10352_s6] sm:$0xff] }
 0x80f   :  { %4742 = vmatpush.msrb.mxu1 %v4319_v27  ;;  %v4814_v27 = vld [vmem:[%s10352_s6 + $0xf8] sm:$0xff] }
 0x811   :  { %4743 = vmatpush.msrb.mxu1 %v4318_v14  ;;  %v4813_v14 = vld [vmem:[%s10352_s6 + $0xf0] sm:$0xff] }
 0x813   :  { %4862 = vmatpush.msra.mxu1 %v4798_v59  ;;  %v4818_v59 = vld [vmem:[%s10352_s6 + $0x118] sm:$0xff] }
 0x815   :  { %4863 = vmatpush.msra.mxu1 %v4797_v42  ;;  %v4817_v42 = vld [vmem:[%s10352_s6 + $0x110] sm:$0xff] }
 0x817   :  { %4864 = vmatpush.msra.mxu1 %v4796_v48  ;;  %v4816_v48 = vld [vmem:[%s10352_s6 + $0x108] sm:$0xff] }
 0x819   :  { %4865 = vmatpush.msra.mxu1 %v4795_v32 }
 0x81b   :  { %4866 = vmatpush.msra.mxu1 %v4794_v60  ;;  %v4815_v60 = vld [vmem:[%s10352_s6 + $0x100] sm:$0xff] }
 0x81d   :  { %v4699_v51 = vpop.f32.mrf.mxu1  ;;  %4867 = vmatpush.msra.mxu1 %v4793_v10  ;;  %v4846_v10 = vld [vmem:[%s10352_s6 + $0x1f8] sm:$0xff] }
 0x81e   :  { %v4010_v20 = vpop.permute.xlu0 %4009  ;;  %v4700_v23 = vadd.f32 %v4699_v51, %v4674_v13  ;;  %v4790_v13 = vld [vmem:[%s10352_s6 + $0x38] sm:$0xff]  ;;  %v4823_v51 = vld [vmem:[%s10352_s6 + $0x140] sm:$0xff] }
 0x81f   :  { %v4069_v12 = vsel %vm1000_vm0, %v3321_v0, %v4010_v20  ;;  %4868 = vmatpush.msra.mxu1 %v4792_v19  ;;  %v4812_v20 = vld [vmem:[%s10352_s6 + $0xe8] sm:$0xff]  ;;  %v4810_v0 = vld [vmem:[%s10352_s6 + $0xd8] sm:$0xff]  ;;  %v4845_v19 = vld [vmem:[%s10352_s6 + $0x1f0] sm:$0xff] }
 0x821   :  { %4869 = vmatpush.msra.mxu1 %v4791_v9  ;;  %v4843_v9 = vld [vmem:[%s10352_s6 + $0x1e0] sm:$0xff] }
 0x823   :  { %4870 = vmatpush.msra.mxu1 %v4790_v13  ;;  %v4840_v13 = vld [vmem:[%s10352_s6 + $0x1c8] sm:$0xff] }
 0x825   :  { %4871 = vmatpush.msra.mxu1 %v4789_v61  ;;  %v4838_v61 = vld [vmem:[%s10352_s6 + $0x1b8] sm:$0xff] }
 0x826   :  { %v4012_v11 = vpop.permute.xlu0 %4011 }
 0x827   :  { %v4070_v39 = vsel %vm1000_vm0, %v3324_v24, %v4012_v11  ;;  %4872 = vmatpush.msra.mxu1 %v4788_v4  ;;  %v4804_v11 = vld [vmem:[%s10352_s6 + $0xa8] sm:$0xff]  ;;  %v4802_v24 = vld [vmem:[%s10352_s6 + $0x98] sm:$0xff] }
 0x828   :  { %v4834_v4 = vld [vmem:[%s10352_s6 + $0x198] sm:$0xff] }
 0x829   :  { %4873 = vmatpush.msra.mxu1 %v4787_v1  ;;  %v4832_v1 = vld [vmem:[%s10352_s6 + $0x188] sm:$0xff] }
 0x82b   :  { %4874 = vmatpush.msra.mxu1 %v4786_v43 }
 0x82d   :  { %4875 = vmatpush.msra.mxu1 %v4785_v49  ;;  %v4854_v49 = vld [vmem:[%s10352_s6 + $0x238] sm:$0xff] }
 0x82e   :  { %v4014_v30 = vpop.permute.xlu0 %4013 }
 0x82f   :  { %v4071_v50 = vsel %vm1000_vm0, %v3327_v47, %v4014_v30  ;;  %4876 = vmatpush.msra.mxu1 %v4784_v25  ;;  %v4828_v47 = vld [vmem:[%s10352_s6 + $0x168] sm:$0xff] }
 0x830   :  { %v4852_v25 = vld [vmem:[%s10352_s6 + $0x228] sm:$0xff] }
 0x831   :  { %4877 = vmatpush.msra.mxu1 %v4783_v45  ;;  %v4850_v45 = vld [vmem:[%s10352_s6 + $0x218] sm:$0xff] }
 0x836   :  { %v4034_v6 = vpop.permute.xlu2 %4033  ;;  %v4022_v5 = vpop.permute.xlu1 %4021 }
 0x837   :  { %v4072_v3 = vsel %vm3503_vm1, %v4069_v12, %v4022_v5  ;;  %v4809_v12 = vld [vmem:[%s10352_s6 + $0xd0] sm:$0xff]  ;;  %v4807_v5 = vld [vmem:[%s10352_s6 + $0xc0] sm:$0xff] }
 0x838   :  { %v4075_v18 = vsel %vm3507_vm2, %v4072_v3, %v4034_v6  ;;  %v4808_v6 = vld [vmem:[%s10352_s6 + $0xc8] sm:$0xff]  ;;  %v4806_v3 = vld [vmem:[%s10352_s6 + $0xb8] sm:$0xff] }
 0x839   :  { %4744 = vmatmul.f32.vlgmr.msrb.gmra.mxu1 %v4075_v18  ;;  %v4805_v18 = vld [vmem:[%s10352_s6 + $0xb0] sm:$0xff] }
 0x83a   :  { %4882 = vmatpush.msrb.mxu1 %v4814_v27 }
 0x83c   :  { %4883 = vmatpush.msrb.mxu1 %v4813_v14  ;;  %v4849_v14 = vld [vmem:[%s10352_s6 + $0x210] sm:$0xff] }
 0x83e   :  { %v4036_v16 = vpop.permute.xlu2 %4035  ;;  %v4024_v31 = vpop.permute.xlu1 %4023  ;;  %4884 = vmatpush.msrb.mxu1 %v4812_v20 }
 0x83f   :  { %v4073_v28 = vsel %vm3503_vm1, %v4070_v39, %v4024_v31  ;;  %v4801_v39 = vld [vmem:[%s10352_s6 + $0x90] sm:$0xff]  ;;  %v4799_v31 = vld [vmem:[%s10352_s6 + $0x80] sm:$0xff] }
 0x840   :  { %v4076_v56 = vsel %vm3507_vm2, %v4073_v28, %v4036_v16  ;;  %4885 = vmatpush.msrb.mxu1 %v4811_v55  ;;  %v4800_v16 = vld [vmem:[%s10352_s6 + $0x88] sm:$0xff] }
 0x841   :  { %4747 = vmatmul.f32.gmra.mxu1 %v4076_v56  ;;  %v4830_v56 = vld [vmem:[%s10352_s6 + $0x178] sm:$0xff]  ;;  %v4848_v55 = vld [vmem:[%s10352_s6 + $0x208] sm:$0xff] }
 0x842   :  { %4886 = vmatpush.msrb.mxu1 %v4810_v0  ;;  %v4847_v0 = vld [vmem:[%s10352_s6 + $0x200] sm:$0xff] }
 0x844   :  { %4887 = vmatpush.msrb.mxu1 %v4809_v12 }
 0x846   :  { %v4038_v33 = vpop.permute.xlu2 %4037  ;;  %v4026_v58 = vpop.permute.xlu1 %4025  ;;  %4888 = vmatpush.msrb.mxu1 %v4808_v6 }
 0x847   :  { %v4074_v63 = vsel %vm3503_vm1, %v4071_v50, %v4026_v58 }
 0x848   :  { %v4077_v53 = vsel %vm3507_vm2, %v4074_v63, %v4038_v33  ;;  %4889 = vmatpush.msrb.mxu1 %v4807_v5  ;;  %v4827_v33 = vld [vmem:[%s10352_s6 + $0x160] sm:$0xff]  ;;  %v4826_v63 = vld [vmem:[%s10352_s6 + $0x158] sm:$0xff] }
 0x849   :  { %4750 = vmatmul.f32.gmra.mxu1 %v4077_v53 }
 0x84a   :  { %4890 = vmatpush.msrb.mxu1 %v4806_v3 }
 0x84c   :  { %4891 = vmatpush.msrb.mxu1 %v4805_v18 }
 0x84e   :  { %4892 = vmatpush.msrb.mxu1 %v4804_v11 }
 0x850   :  { %4893 = vmatpush.msrb.mxu1 %v4803_v2 }
 0x852   :  { %4894 = vmatpush.msrb.mxu1 %v4802_v24 }
 0x854   :  { %4895 = vmatpush.msrb.mxu1 %v4801_v39 }
 0x856   :  { %4896 = vmatpush.msrb.mxu1 %v4800_v16 }
 0x858   :  { %4897 = vmatpush.msrb.mxu1 %v4799_v31 }
 0x86d   :  { %v4719_v37 = vpop.f32.mrf.mxu1 }
 0x86e   :  { %v4720_v21 = vadd.f32 %v4719_v37, %v4694_v38  ;;  %v4822_v37 = vld [vmem:[%s10352_s6 + $0x138] sm:$0xff] }
 0x875   :  { %v4722_v62 = vpop.f32.mrf.mxu1 }
 0x876   :  { %v4723_v54 = vadd.f32 %v4722_v62, %v4697_v34  ;;  %v4821_v62 = vld [vmem:[%s10352_s6 + $0x130] sm:$0xff] }
 0x877   :  { %v4837_v34 = vld [vmem:[%s10352_s6 + $0x1b0] sm:$0xff] }
 0x87d   :  { %v4725_v40 = vpop.f32.mrf.mxu1 }
 0x87e   :  { %v10098_v44 = vadd.f32 %v4725_v40, %v4700_v23  ;;  %v4820_v23 = vld [vmem:[%s10352_s6 + $0x128] sm:$0xff]  ;;  %v4819_v40 = vld [vmem:[%s10352_s6 + $0x120] sm:$0xff] }
 0x8b6   :  { %v4745_v41 = vpop.f32.mrf.mxu1 }
 0x8b7   :  { %v4746_v22 = vadd.f32 %v4745_v41, %v4720_v21  ;;  %v4844_v21 = vld [vmem:[%s10352_s6 + $0x1e8] sm:$0xff]  ;;  %v4842_v41 = vld [vmem:[%s10352_s6 + $0x1d8] sm:$0xff] }
 0x8b9   :  { %v10128_v7 = vmax.f32 %v4746_v22, 0.0  ;;  %v4841_v22 = vld [vmem:[%s10352_s6 + $0x1d0] sm:$0xff] }
 0x8bb   :  { %v4764_v36 = vrot.slane %v10128_v7, 6  ;;  %v4758_v26 = vrot.slane %v10128_v7, 2  ;;  %v4762_v58 = vrot.slane %v10128_v7, 4 }
 0x8bd   :  { %4765 = vrot.lane.b32.xlu1 %v4764_v36, %s5558_s0  ;;  %4759 = vrot.lane.b32.xlu0 %v4758_v26, %s5558_s0  ;;  %v4836_v36 = vld [vmem:[%s10352_s6 + $0x1a8] sm:$0xff]  ;;  %v4835_v26 = vld [vmem:[%s10352_s6 + $0x1a0] sm:$0xff] }
 0x8be   :  { %v4748_v29 = vpop.f32.mrf.mxu1 }
 0x8bf   :  { %v4749_v35 = vadd.f32 %v4748_v29, %v4723_v54  ;;  %v4833_v54 = vld [vmem:[%s10352_s6 + $0x190] sm:$0xff] }
 0x8c1   :  { %v10147_v17 = vmax.f32 %v4749_v35, 0.0  ;;  %v4831_v35 = vld [vmem:[%s10352_s6 + $0x180] sm:$0xff] }
 0x8c3   :  { %v4769_v15 = vrot.slane %v10147_v17, 2  ;;  %v4775_v52 = vrot.slane %v10147_v17, 6  ;;  %v4773_v43 = vrot.slane %v10147_v17, 4 }
 0x8c5   :  { %4770 = vrot.lane.b32.xlu2 %v4769_v15, %s5558_s0  ;;  %4776 = vrot.lane.b32.xlu0 %v4775_v52, %s5558_s0  ;;  %v4853_v52 = vld [vmem:[%s10352_s6 + $0x230] sm:$0xff] }
 0x8c6   :  { %v4751_v27 = vpop.f32.mrf.mxu1 }
 0x8c7   :  { %v4752_v20 = vadd.f32 %v4751_v27, %v10098_v44  ;;  %v5530_v44 = vld [vmem:[%s10353_s7] ss:$0 sm:$0xff] }
 0x8c9   :  { %v4756_v12 = vmax.f32 %v4752_v20, 0.0 }
 0x91f   :  { %v4771_v32 = vpop.permute.xlu2 %4770 }
 0x920   :  { %v4781_v38 = vsel %vm3503_vm1, %v10147_v17, %v4771_v32  ;;  %v4851_v17 = vld [vmem:[%s10352_s6 + $0x220] sm:$0xff] }
 0x92f   :  { %v4760_v28 = vpop.permute.xlu0 %4759  ;;  %v4766_v50 = vpop.permute.xlu1 %4765 }
 0x930   :  { %v4779_v30 = vsel %vm3503_vm1, %v10128_v7, %v4760_v28  ;;  %v4780_v53 = vsel %vm3503_vm1, %v4762_v58, %v4766_v50  ;;  %v4839_v7 = vld [vmem:[%s10352_s6 + $0x1c0] sm:$0xff]  ;;  %s4969_s6 = sshll.u32 %s5560_s16, 4  ;;  %s4970_s6 = int_to_ptr.vmem [resolvable:$true] %s4969_s6 }
 0x931   :  { %4878 = vmatmul.f32.vlgmr.msra.gmra.mxu1 %v4779_v30 }
 0x932   :  { %4902 = vmatpush.msra.mxu1 %v4830_v56 }
 0x934   :  { %4903 = vmatpush.msra.mxu1 %v4829_v57 }
 0x936   :  { %4904 = vmatpush.msra.mxu1 %v4828_v47 }
 0x937   :  { %v4777_v29 = vpop.permute.xlu0 %4776 }
 0x938   :  { %4905 = vmatpush.msra.mxu1 %v4827_v33  ;;  %v4782_v15 = vsel %vm3503_vm1, %v4773_v43, %v4777_v29 }
 0x939   :  { %4898 = vmatmul.f32.vlgmr.msrb.gmra.mxu1 %v4780_v53 }
 0x93a   :  { %4906 = vmatpush.msra.mxu1 %v4826_v63 }
 0x93c   :  { %4907 = vmatpush.msra.mxu1 %v4825_v46 }
 0x93e   :  { %4908 = vmatpush.msra.mxu1 %v4824_v8 }
 0x940   :  { %4909 = vmatpush.msra.mxu1 %v4823_v51 }
 0x942   :  { %4910 = vmatpush.msra.mxu1 %v4822_v37 }
 0x944   :  { %4911 = vmatpush.msra.mxu1 %v4821_v62 }
 0x946   :  { %4912 = vmatpush.msra.mxu1 %v4820_v23 }
 0x948   :  { %4913 = vmatpush.msra.mxu1 %v4819_v40 }
 0x94a   :  { %4914 = vmatpush.msra.mxu1 %v4818_v59 }
 0x94c   :  { %4915 = vmatpush.msra.mxu1 %v4817_v42 }
 0x94e   :  { %4916 = vmatpush.msra.mxu1 %v4816_v48 }
 0x950   :  { %4917 = vmatpush.msra.mxu1 %v4815_v60 }
 0x951   :  { %4918 = vmatmul.f32.vlgmr.msra.gmra.mxu1 %v4781_v38 }
 0x952   :  { %4922 = vmatpush.msrb.mxu1 %v4846_v10 }
 0x954   :  { %4923 = vmatpush.msrb.mxu1 %v4845_v19 }
 0x956   :  { %4924 = vmatpush.msrb.mxu1 %v4844_v21 }
 0x958   :  { %4925 = vmatpush.msrb.mxu1 %v4843_v9 }
 0x95a   :  { %4926 = vmatpush.msrb.mxu1 %v4842_v41 }
 0x95c   :  { %4927 = vmatpush.msrb.mxu1 %v4841_v22 }
 0x95e   :  { %4928 = vmatpush.msrb.mxu1 %v4840_v13 }
 0x960   :  { %4929 = vmatpush.msrb.mxu1 %v4839_v7 }
 0x962   :  { %4930 = vmatpush.msrb.mxu1 %v4838_v61 }
 0x964   :  { %4931 = vmatpush.msrb.mxu1 %v4837_v34 }
 0x966   :  { %4932 = vmatpush.msrb.mxu1 %v4836_v36 }
 0x968   :  { %4933 = vmatpush.msrb.mxu1 %v4835_v26 }
 0x96a   :  { %4934 = vmatpush.msrb.mxu1 %v4834_v4 }
 0x96c   :  { %4935 = vmatpush.msrb.mxu1 %v4833_v54 }
 0x96e   :  { %4936 = vmatpush.msrb.mxu1 %v4832_v1 }
 0x970   :  { %4937 = vmatpush.msrb.mxu1 %v4831_v35 }
 0x971   :  { %4938 = vmatmul.f32.vlgmr.msrb.gmra.mxu1 %v4782_v15 }
 0x972   :  { %4950 = vmatpush.msra.mxu1 %v4854_v49 }
 0x974   :  { %4951 = vmatpush.msra.mxu1 %v4853_v52 }
 0x976   :  { %4952 = vmatpush.msra.mxu1 %v4852_v25 }
 0x978   :  { %4953 = vmatpush.msra.mxu1 %v4851_v17 }
 0x97a   :  { %4954 = vmatpush.msra.mxu1 %v4850_v45 }
 0x97c   :  { %4955 = vmatpush.msra.mxu1 %v4849_v14 }
 0x97e   :  { %4956 = vmatpush.msra.mxu1 %v4848_v55 }
 0x980   :  { %4957 = vmatpush.msra.mxu1 %v4847_v0 }
 0x981   :  { %5172 = vmatmul.msk.f32.vlgmr.msra.gmra.mxu1 %vm3503_vm1, %v4756_v12 }
 0x9ae   :  { %v4879_v6 = vpop.f32.mrf.mxu1 }
 0x9af   :  { %v4880_v11 = vadd.f32 %v5530_v44, %v4879_v6 }
 0x9b6   :  { %v4899_v5 = vpop.f32.mrf.mxu1 }
 0x9b7   :  { %v4900_v2 = vadd.f32 %v4899_v5, %v4880_v11 }
 0x9ce   :  { %v4919_v3 = vpop.f32.mrf.mxu1 }
 0x9cf   :  { %v4920_v24 = vadd.f32 %v4919_v3, %v4900_v2 }
 0x9ee   :  { %v4939_v18 = vpop.f32.mrf.mxu1 }
 0x9ef   :  { %v4940_v39 = vadd.f32 %v4939_v18, %v4920_v24 }
 0x9fe   :  { %v4959_v16 = vpop.f32.mrf.mxu1 }
 0x9ff   :  { %v4960_v31 = vadd.f32 %v4959_v16, %v4940_v39 }
 0xa01   :  { %v4962_v28 = vmax.f32 %v4960_v31, 0.0 }
 0xa03   :  { %4963 = vst [vmem:[#allocation2] sm:$0x3] %v4962_v28 }
 0xa04   :  { %4974 = dma.vmem_to_hbm [thread:$0]  %s4970_s6, 32, %s4972_s18, [#allocation3]  }
 0xa05   :  { %5555 = dma.done.wait [#allocation3], 32  }
 0xa06   :  { %5556 = vsyncadd [#allocation3], 4294967264 }
 0xa07   :  { %4979 = vsyncpa [#allocation3], 1 }

</bundles_post_ra>
